<compile_context>
chip_gen: v7x
topology: tpu7x:2x2x1
jax: 0.10.0
libtpu: 0.0.40
codegen_flags: <defaults>
</compile_context>

<pallas_src>
import functools

import jax
import jax.numpy as jnp
from jax import lax
from jax.experimental import pallas as pl
from jax.experimental.pallas import tpu as pltpu

K = 3                      # kernel_size
DILATIONS = (1, 3, 5)      # convs1 dilations (convs2 always dilation=1)
# Halo = cumulative receptive-field radius of the three residual sub-blocks:
# block i reaches d_i (conv1) + 1 (conv2)  ->  2 + 4 + 6 = 12 samples per side.
HALO = sum(d + 1 for d in DILATIONS)


def _resblock1_kernel(x_ref, w1_ref, b1_ref, a1_ref, w2_ref, b2_ref, a2_ref,
                      o_ref, s_ref, *, C, W, Tt, T_true):
    # x_ref : (C, W)        haloed input tile, W = Tt + 2*HALO
    # w*_ref: (3, C, K*C)   tap-fused weights, w[i][co, k*C+ci]
    # b*_ref: (3, C, 1)     biases
    # a*_ref: (3, C, 1)     Snake alphas
    # o_ref : (C, Tt)       interior of the tile
    # s_ref : (K*C, W)      VMEM scratch: stacked/shifted conv operand
    j = pl.program_id(1)

    # Global column of local column 0 is j*Tt - HALO.  Every conv input must be
    # zero outside the true signal [0, T) — that is exactly PyTorch's 'same'
    # zero padding — so fold a 0/1 column mask into the activation.
    cols = lax.broadcasted_iota(jnp.int32, (1, W), 1) + (j * Tt - HALO)
    mask = jnp.logical_and(cols >= 0, cols < T_true).astype(jnp.float32)  # (1, W)

    def snake(v, alpha):
        # snake(v) = v + sin(a v)^2/(a+eps) = v + (1 - cos(2 a v)) * 0.5/(a+eps)
        inv2a = 0.5 / (alpha + 1e-9)          # (C, 1)
        two_a = alpha + alpha                 # (C, 1)
        return (v + inv2a * (1.0 - jnp.cos(two_a * v))) * mask

    def conv(v, wf, b, d):
        # 'same' dilated K=3 conv as one (C, K*C) x (K*C, W) matmul.
        # Stacked operand rows: [v(t-d); v(t); v(t+d)] (zeros at tile edges).
        zc = jnp.zeros((C, d), jnp.float32)
        s_ref[C:2 * C, :] = v                          # k = 1 tap
        s_ref[0:C, 0:d] = zc                           # k = 0 tap: v shifted right
        s_ref[0:C, d:W] = v[:, 0:W - d]
        s_ref[2 * C:3 * C, 0:W - d] = v[:, d:W]        # k = 2 tap: v shifted left
        s_ref[2 * C:3 * C, W - d:W] = zc
        return jnp.dot(wf, s_ref[...], preferred_element_type=jnp.float32) + b

    x = x_ref[...].astype(jnp.float32)                 # (C, W)
    for i in range(3):
        a1 = a1_ref[i].astype(jnp.float32)
        a2 = a2_ref[i].astype(jnp.float32)
        b1 = b1_ref[i].astype(jnp.float32)
        b2 = b2_ref[i].astype(jnp.float32)
        w1 = w1_ref[i].astype(jnp.float32)
        w2 = w2_ref[i].astype(jnp.float32)

        xt = snake(x, a1)
        xt = conv(xt, w1, b1, DILATIONS[i])
        xt = snake(xt, a2)
        xt = conv(xt, w2, b2, 1)
        x = xt + x

    # Only the interior of the haloed tile is valid (halo columns are
    # contaminated by the per-tile local padding and are discarded).
    o_ref[...] = x[:, HALO:HALO + Tt].astype(o_ref.dtype)


def resblock1_pallas(x, w1, b1, a1, w2, b2, a2, *, tile_t=512):
    """x: (B, C, T) f32.  w*: (3, C, C, K) PyTorch Conv1d weights (post
    remove_weight_norm).  b*: (3, C).  a*: (3, C) Snake alphas."""
    B, C, T = x.shape
    assert w1.shape == (3, C, C, K) and w2.shape == (3, C, C, K)
    assert tile_t % 128 == 0

    Tt = min(tile_t, ((T + 127) // 128) * 128)   # lane-dense time tile
    nT = pl.cdiv(T, Tt)
    Tp = nT * Tt
    W = Tt + 2 * HALO

    # Zero-pad to the haloed, tile-aligned length and pre-extract overlapping
    # windows so every grid step receives a full (C, W) tile through a plain
    # BlockSpec (auto double-buffered) — no in-kernel padding/concat.
    xp = jnp.pad(x, ((0, 0), (0, 0), (HALO, HALO + (Tp - T))))
    idx = jnp.arange(nT)[:, None] * Tt + jnp.arange(W)[None, :]       # (nT, W)
    xw = jnp.transpose(xp[:, :, idx], (0, 2, 1, 3))                   # (B, nT, C, W)

    # Fuse the K taps into the contraction dim: Wf[i][co, k*C+ci] = w[i][co,ci,k]
    w1f = jnp.transpose(w1, (0, 1, 3, 2)).reshape(3, C, K * C)
    w2f = jnp.transpose(w2, (0, 1, 3, 2)).reshape(3, C, K * C)
    b1c, b2c = b1[..., None], b2[..., None]
    a1c, a2c = a1[..., None], a2[..., None]

    kernel = functools.partial(_resblock1_kernel, C=C, W=W, Tt=Tt, T_true=T)
    rep = lambda shape: pl.BlockSpec(shape, lambda b, j: (0,) * len(shape))

    out = pl.pallas_call(
        kernel,
        out_shape=jax.ShapeDtypeStruct((B, C, Tp), x.dtype),
        grid_spec=pltpu.PrefetchScalarGridSpec(
            num_scalar_prefetch=0,
            grid=(B, nT),
            in_specs=[
                pl.BlockSpec((None, None, C, W), lambda b, j: (b, j, 0, 0)),
                rep((3, C, K * C)), rep((3, C, 1)), rep((3, C, 1)),
                rep((3, C, K * C)), rep((3, C, 1)), rep((3, C, 1)),
            ],
            out_specs=pl.BlockSpec((None, C, Tt), lambda b, j: (b, 0, j)),
            scratch_shapes=[pltpu.VMEM((K * C, W), jnp.float32)],
        ),
        compiler_params=pltpu.CompilerParams(
            dimension_semantics=("parallel", "parallel"),
            vmem_limit_bytes=48 * 1024 * 1024,
        ),
    )(xw, w1f, b1c, a1c, w2f, b2c, a2c)
    return out[:, :, :T]


# ---------------- plain-JAX reference (for correctness check) ----------------
def _conv1d_ref(x, w, b, dil):
    pad = (K - 1) * dil // 2
    y = lax.conv_general_dilated(
        x, w, window_strides=(1,), padding=[(pad, pad)],
        rhs_dilation=(dil,), dimension_numbers=("NCH", "OIH", "NCH"))
    return y + b[None, :, None]


def resblock1_ref(x, w1, b1, a1, w2, b2, a2):
    for i in range(3):
        al1 = a1[i][None, :, None]
        al2 = a2[i][None, :, None]
        xt = x + (1.0 / (al1 + 1e-9)) * jnp.sin(al1 * x) ** 2
        xt = _conv1d_ref(xt, w1[i], b1[i], DILATIONS[i])
        xt = xt + (1.0 / (al2 + 1e-9)) * jnp.sin(al2 * xt) ** 2
        xt = _conv1d_ref(xt, w2[i], b2[i], 1)
        x = xt + x
    return x


if __name__ == "__main__":
    B, C, T = 2, 16, 640

    key = jax.random.PRNGKey(0)
    ks = jax.random.split(key, 7)
    x = jax.random.normal(ks[0], (B, C, T), jnp.float32)
    # Conv1d weights init ~ N(0, 0.01) (mirrors init_weights).
    w1 = 0.01 * jax.random.normal(ks[1], (3, C, C, K), jnp.float32)
    w2 = 0.01 * jax.random.normal(ks[2], (3, C, C, K), jnp.float32)
    b1 = 0.01 * jax.random.normal(ks[3], (3, C), jnp.float32)
    b2 = 0.01 * jax.random.normal(ks[4], (3, C), jnp.float32)
    # Snake1d alphas initialized to ones, perturbed slightly.
    a1 = 1.0 + 0.1 * jax.random.normal(ks[5], (3, C), jnp.float32)
    a2 = 1.0 + 0.1 * jax.random.normal(ks[6], (3, C), jnp.float32)

    # Multi-tile path (Tt=256 -> 3 time tiles, T not a multiple of the tile).
    out = jax.block_until_ready(
        resblock1_pallas(x, w1, b1, a1, w2, b2, a2, tile_t=256))
    ref = jax.block_until_ready(resblock1_ref(x, w1, b1, a1, w2, b2, a2))
    assert out.shape == (B, C, T)
    assert jnp.allclose(out, ref, atol=1e-4, rtol=1e-4), \
        f"max err {jnp.max(jnp.abs(out - ref))}"

    # Single-tile / ragged-length path.
    x2 = x[:, :, :100]
    out2 = jax.block_until_ready(resblock1_pallas(x2, w1, b1, a1, w2, b2, a2))
    ref2 = jax.block_until_ready(resblock1_ref(x2, w1, b1, a1, w2, b2, a2))
    assert jnp.allclose(out2, ref2, atol=1e-4, rtol=1e-4), \
        f"max err {jnp.max(jnp.abs(out2 - ref2))}"

    print("KERNEL_OK")
</pallas_src>

<mosaic_0001>
module attributes {stable_mosaic.version = 11 : i64} {
  func.func @_resblock1_kernel(%arg0: i32, %arg1: i32, %arg2: memref<1x1x16x280xf32, #tpu.memory_space<vmem>>, %arg3: memref<3x16x48xf32, #tpu.memory_space<vmem>>, %arg4: memref<3x16x1xf32, #tpu.memory_space<vmem>>, %arg5: memref<3x16x1xf32, #tpu.memory_space<vmem>>, %arg6: memref<3x16x48xf32, #tpu.memory_space<vmem>>, %arg7: memref<3x16x1xf32, #tpu.memory_space<vmem>>, %arg8: memref<3x16x1xf32, #tpu.memory_space<vmem>>, %arg9: memref<1x16x256xf32, #tpu.memory_space<vmem>>, %arg10: memref<48x280xf32, #tpu.memory_space<vmem>>) attributes {dimension_semantics = [#tpu.dimension_semantics<parallel>, #tpu.dimension_semantics<parallel>], iteration_bounds = array<i64: 2, 3>, scalar_prefetch = 0 : i64, scratch_operands = 1 : i64, tpu.core_type = #tpu.core_type<tc>, window_params = [{transform_indices = @transform_0, window_bounds = array<i64: 1, 1, 16, 280>}, {pipeline_mode = #tpu.pipeline_mode<synchronous>, transform_indices = @transform_1, window_bounds = array<i64: 3, 16, 48>}, {pipeline_mode = #tpu.pipeline_mode<synchronous>, transform_indices = @transform_2, window_bounds = array<i64: 3, 16, 1>}, {pipeline_mode = #tpu.pipeline_mode<synchronous>, transform_indices = @transform_3, window_bounds = array<i64: 3, 16, 1>}, {pipeline_mode = #tpu.pipeline_mode<synchronous>, transform_indices = @transform_4, window_bounds = array<i64: 3, 16, 48>}, {pipeline_mode = #tpu.pipeline_mode<synchronous>, transform_indices = @transform_5, window_bounds = array<i64: 3, 16, 1>}, {pipeline_mode = #tpu.pipeline_mode<synchronous>, transform_indices = @transform_6, window_bounds = array<i64: 3, 16, 1>}, {transform_indices = @transform_7, window_bounds = array<i64: 1, 16, 256>}]} {
    %0 = tpu.iota {dimensions = array<i32: 1>} : vector<1x280xi32>
    %c256_i32 = arith.constant 256 : i32
    %1 = arith.muli %arg1, %c256_i32 : i32
    %c12_i32 = arith.constant 12 : i32
    %2 = arith.subi %1, %c12_i32 : i32
    %3 = vector.broadcast %2 : i32 to vector<1x280xi32>
    %4 = arith.addi %0, %3 : vector<1x280xi32>
    %c0_i32 = arith.constant 0 : i32
    %5 = vector.broadcast %c0_i32 : i32 to vector<1x280xi32>
    %6 = arith.cmpi sge, %4, %5 : vector<1x280xi32>
    %c640_i32 = arith.constant 640 : i32
    %7 = vector.broadcast %c640_i32 : i32 to vector<1x280xi32>
    %8 = arith.cmpi slt, %4, %7 : vector<1x280xi32>
    %9 = arith.andi %6, %8 : vector<1x280xi1>
    %10 = arith.extui %9 : vector<1x280xi1> to vector<1x280xi32>
    %11 = arith.sitofp %10 : vector<1x280xi32> to vector<1x280xf32>
    %c0 = arith.constant 0 : index
    %c0_0 = arith.constant 0 : index
    %c0_1 = arith.constant 0 : index
    %c0_2 = arith.constant 0 : index
    %12 = vector.load %arg2[%c0, %c0_0, %c0_1, %c0_2] : memref<1x1x16x280xf32, #tpu.memory_space<vmem>>, vector<1x1x16x280xf32>
    %13 = vector.shape_cast %12 : vector<1x1x16x280xf32> to vector<16x280xf32>
    %c0_3 = arith.constant 0 : index
    %c0_4 = arith.constant 0 : index
    %c0_5 = arith.constant 0 : index
    %14 = vector.load %arg5[%c0_3, %c0_4, %c0_5] : memref<3x16x1xf32, #tpu.memory_space<vmem>>, vector<1x16x1xf32>
    %15 = vector.shape_cast %14 : vector<1x16x1xf32> to vector<16x1xf32>
    %c0_6 = arith.constant 0 : index
    %c0_7 = arith.constant 0 : index
    %c0_8 = arith.constant 0 : index
    %16 = vector.load %arg8[%c0_6, %c0_7, %c0_8] : memref<3x16x1xf32, #tpu.memory_space<vmem>>, vector<1x16x1xf32>
    %17 = vector.shape_cast %16 : vector<1x16x1xf32> to vector<16x1xf32>
    %c0_9 = arith.constant 0 : index
    %c0_10 = arith.constant 0 : index
    %c0_11 = arith.constant 0 : index
    %18 = vector.load %arg4[%c0_9, %c0_10, %c0_11] : memref<3x16x1xf32, #tpu.memory_space<vmem>>, vector<1x16x1xf32>
    %19 = vector.shape_cast %18 : vector<1x16x1xf32> to vector<16x1xf32>
    %c0_12 = arith.constant 0 : index
    %c0_13 = arith.constant 0 : index
    %c0_14 = arith.constant 0 : index
    %20 = vector.load %arg7[%c0_12, %c0_13, %c0_14] : memref<3x16x1xf32, #tpu.memory_space<vmem>>, vector<1x16x1xf32>
    %21 = vector.shape_cast %20 : vector<1x16x1xf32> to vector<16x1xf32>
    %c0_15 = arith.constant 0 : index
    %c0_16 = arith.constant 0 : index
    %c0_17 = arith.constant 0 : index
    %22 = vector.load %arg3[%c0_15, %c0_16, %c0_17] : memref<3x16x48xf32, #tpu.memory_space<vmem>>, vector<1x16x48xf32>
    %23 = vector.shape_cast %22 : vector<1x16x48xf32> to vector<16x48xf32>
    %c0_18 = arith.constant 0 : index
    %c0_19 = arith.constant 0 : index
    %c0_20 = arith.constant 0 : index
    %24 = vector.load %arg6[%c0_18, %c0_19, %c0_20] : memref<3x16x48xf32, #tpu.memory_space<vmem>>, vector<1x16x48xf32>
    %25 = vector.shape_cast %24 : vector<1x16x48xf32> to vector<16x48xf32>
    %cst = arith.constant 9.99999971E-10 : f32
    %26 = vector.broadcast %cst : f32 to vector<16x1xf32>
    %27 = arith.addf %15, %26 : vector<16x1xf32>
    %cst_21 = arith.constant 5.000000e-01 : f32
    %28 = vector.broadcast %cst_21 : f32 to vector<16x1xf32>
    %29 = arith.divf %28, %27 : vector<16x1xf32>
    %30 = arith.addf %15, %15 : vector<16x1xf32>
    %31 = vector.broadcast %30 : vector<16x1xf32> to vector<16x280xf32>
    %32 = arith.mulf %31, %13 : vector<16x280xf32>
    %33 = math.cos %32 : vector<16x280xf32>
    %cst_22 = arith.constant 1.000000e+00 : f32
    %34 = vector.broadcast %cst_22 : f32 to vector<16x280xf32>
    %35 = arith.subf %34, %33 : vector<16x280xf32>
    %36 = vector.broadcast %29 : vector<16x1xf32> to vector<16x280xf32>
    %37 = arith.mulf %36, %35 : vector<16x280xf32>
    %38 = arith.addf %13, %37 : vector<16x280xf32>
    %39 = vector.broadcast %11 : vector<1x280xf32> to vector<16x280xf32>
    %40 = arith.mulf %38, %39 : vector<16x280xf32>
    %cst_23 = arith.constant 0.000000e+00 : f32
    %41 = vector.broadcast %cst_23 : f32 to vector<16x1xf32>
    %c16 = arith.constant 16 : index
    %c0_24 = arith.constant 0 : index
    %42 = vector.load %arg10[%c16, %c0_24] : memref<48x280xf32, #tpu.memory_space<vmem>>, vector<16x280xf32>
    tpu.vector_store %arg10[%c16, %c0_24], %40 {strides = array<i32>} : memref<48x280xf32, #tpu.memory_space<vmem>>, vector<16x280xf32>,
    %c0_25 = arith.constant 0 : index
    %c0_26 = arith.constant 0 : index
    %43 = vector.load %arg10[%c0_25, %c0_26] : memref<48x280xf32, #tpu.memory_space<vmem>>, vector<16x1xf32>
    tpu.vector_store %arg10[%c0_25, %c0_26], %41 {strides = array<i32>} : memref<48x280xf32, #tpu.memory_space<vmem>>, vector<16x1xf32>,
    %44 = vector.extract_strided_slice %40 {offsets = [0, 0], sizes = [16, 279], strides = [1, 1]} : vector<16x280xf32> to vector<16x279xf32>
    %c0_27 = arith.constant 0 : index
    %c1 = arith.constant 1 : index
    %45 = vector.load %arg10[%c0_27, %c1] : memref<48x280xf32, #tpu.memory_space<vmem>>, vector<16x279xf32>
    tpu.vector_store %arg10[%c0_27, %c1], %44 {strides = array<i32>} : memref<48x280xf32, #tpu.memory_space<vmem>>, vector<16x279xf32>,
    %46 = vector.extract_strided_slice %40 {offsets = [0, 1], sizes = [16, 279], strides = [1, 1]} : vector<16x280xf32> to vector<16x279xf32>
    %c32 = arith.constant 32 : index
    %c0_28 = arith.constant 0 : index
    %47 = vector.load %arg10[%c32, %c0_28] : memref<48x280xf32, #tpu.memory_space<vmem>>, vector<16x279xf32>
    tpu.vector_store %arg10[%c32, %c0_28], %46 {strides = array<i32>} : memref<48x280xf32, #tpu.memory_space<vmem>>, vector<16x279xf32>,
    %c32_29 = arith.constant 32 : index
    %c279 = arith.constant 279 : index
    %48 = vector.load %arg10[%c32_29, %c279] : memref<48x280xf32, #tpu.memory_space<vmem>>, vector<16x1xf32>
    tpu.vector_store %arg10[%c32_29, %c279], %41 {strides = array<i32>} : memref<48x280xf32, #tpu.memory_space<vmem>>, vector<16x1xf32>,
    %c0_30 = arith.constant 0 : index
    %c0_31 = arith.constant 0 : index
    %49 = vector.load %arg10[%c0_30, %c0_31] : memref<48x280xf32, #tpu.memory_space<vmem>>, vector<48x280xf32>
    %cst_32 = arith.constant dense<0.000000e+00> : vector<16x280xf32>
    %50 = tpu.matmul %23, %49, %cst_32 {dimension_numbers = #tpu.dot_dimension_numbers<[1], [0], [0], [1], [0, 0, 1, 1], [], []>} : vector<16x48xf32>, vector<48x280xf32>, vector<16x280xf32> -> vector<16x280xf32>
    %51 = vector.broadcast %19 : vector<16x1xf32> to vector<16x280xf32>
    %52 = arith.addf %50, %51 : vector<16x280xf32>
    %cst_33 = arith.constant 9.99999971E-10 : f32
    %53 = vector.broadcast %cst_33 : f32 to vector<16x1xf32>
    %54 = arith.addf %17, %53 : vector<16x1xf32>
    %cst_34 = arith.constant 5.000000e-01 : f32
    %55 = vector.broadcast %cst_34 : f32 to vector<16x1xf32>
    %56 = arith.divf %55, %54 : vector<16x1xf32>
    %57 = arith.addf %17, %17 : vector<16x1xf32>
    %58 = vector.broadcast %57 : vector<16x1xf32> to vector<16x280xf32>
    %59 = arith.mulf %58, %52 : vector<16x280xf32>
    %60 = math.cos %59 : vector<16x280xf32>
    %cst_35 = arith.constant 1.000000e+00 : f32
    %61 = vector.broadcast %cst_35 : f32 to vector<16x280xf32>
    %62 = arith.subf %61, %60 : vector<16x280xf32>
    %63 = vector.broadcast %56 : vector<16x1xf32> to vector<16x280xf32>
    %64 = arith.mulf %63, %62 : vector<16x280xf32>
    %65 = arith.addf %52, %64 : vector<16x280xf32>
    %66 = vector.broadcast %11 : vector<1x280xf32> to vector<16x280xf32>
    %67 = arith.mulf %65, %66 : vector<16x280xf32>
    %cst_36 = arith.constant 0.000000e+00 : f32
    %68 = vector.broadcast %cst_36 : f32 to vector<16x1xf32>
    %c16_37 = arith.constant 16 : index
    %c0_38 = arith.constant 0 : index
    %69 = vector.load %arg10[%c16_37, %c0_38] : memref<48x280xf32, #tpu.memory_space<vmem>>, vector<16x280xf32>
    tpu.vector_store %arg10[%c16_37, %c0_38], %67 {strides = array<i32>} : memref<48x280xf32, #tpu.memory_space<vmem>>, vector<16x280xf32>,
    %c0_39 = arith.constant 0 : index
    %c0_40 = arith.constant 0 : index
    %70 = vector.load %arg10[%c0_39, %c0_40] : memref<48x280xf32, #tpu.memory_space<vmem>>, vector<16x1xf32>
    tpu.vector_store %arg10[%c0_39, %c0_40], %68 {strides = array<i32>} : memref<48x280xf32, #tpu.memory_space<vmem>>, vector<16x1xf32>,
    %71 = vector.extract_strided_slice %67 {offsets = [0, 0], sizes = [16, 279], strides = [1, 1]} : vector<16x280xf32> to vector<16x279xf32>
    %c0_41 = arith.constant 0 : index
    %c1_42 = arith.constant 1 : index
    %72 = vector.load %arg10[%c0_41, %c1_42] : memref<48x280xf32, #tpu.memory_space<vmem>>, vector<16x279xf32>
    tpu.vector_store %arg10[%c0_41, %c1_42], %71 {strides = array<i32>} : memref<48x280xf32, #tpu.memory_space<vmem>>, vector<16x279xf32>,
    %73 = vector.extract_strided_slice %67 {offsets = [0, 1], sizes = [16, 279], strides = [1, 1]} : vector<16x280xf32> to vector<16x279xf32>
    %c32_43 = arith.constant 32 : index
    %c0_44 = arith.constant 0 : index
    %74 = vector.load %arg10[%c32_43, %c0_44] : memref<48x280xf32, #tpu.memory_space<vmem>>, vector<16x279xf32>
    tpu.vector_store %arg10[%c32_43, %c0_44], %73 {strides = array<i32>} : memref<48x280xf32, #tpu.memory_space<vmem>>, vector<16x279xf32>,
    %c32_45 = arith.constant 32 : index
    %c279_46 = arith.constant 279 : index
    %75 = vector.load %arg10[%c32_45, %c279_46] : memref<48x280xf32, #tpu.memory_space<vmem>>, vector<16x1xf32>
    tpu.vector_store %arg10[%c32_45, %c279_46], %68 {strides = array<i32>} : memref<48x280xf32, #tpu.memory_space<vmem>>, vector<16x1xf32>,
    %c0_47 = arith.constant 0 : index
    %c0_48 = arith.constant 0 : index
    %76 = vector.load %arg10[%c0_47, %c0_48] : memref<48x280xf32, #tpu.memory_space<vmem>>, vector<48x280xf32>
    %cst_49 = arith.constant dense<0.000000e+00> : vector<16x280xf32>
    %77 = tpu.matmul %25, %76, %cst_49 {dimension_numbers = #tpu.dot_dimension_numbers<[1], [0], [0], [1], [0, 0, 1, 1], [], []>} : vector<16x48xf32>, vector<48x280xf32>, vector<16x280xf32> -> vector<16x280xf32>
    %78 = vector.broadcast %21 : vector<16x1xf32> to vector<16x280xf32>
    %79 = arith.addf %77, %78 : vector<16x280xf32>
    %80 = arith.addf %79, %13 : vector<16x280xf32>
    %c1_50 = arith.constant 1 : index
    %c0_51 = arith.constant 0 : index
    %c0_52 = arith.constant 0 : index
    %81 = vector.load %arg5[%c1_50, %c0_51, %c0_52] : memref<3x16x1xf32, #tpu.memory_space<vmem>>, vector<1x16x1xf32>
    %82 = vector.shape_cast %81 : vector<1x16x1xf32> to vector<16x1xf32>
    %c1_53 = arith.constant 1 : index
    %c0_54 = arith.constant 0 : index
    %c0_55 = arith.constant 0 : index
    %83 = vector.load %arg8[%c1_53, %c0_54, %c0_55] : memref<3x16x1xf32, #tpu.memory_space<vmem>>, vector<1x16x1xf32>
    %84 = vector.shape_cast %83 : vector<1x16x1xf32> to vector<16x1xf32>
    %c1_56 = arith.constant 1 : index
    %c0_57 = arith.constant 0 : index
    %c0_58 = arith.constant 0 : index
    %85 = vector.load %arg4[%c1_56, %c0_57, %c0_58] : memref<3x16x1xf32, #tpu.memory_space<vmem>>, vector<1x16x1xf32>
    %86 = vector.shape_cast %85 : vector<1x16x1xf32> to vector<16x1xf32>
    %c1_59 = arith.constant 1 : index
    %c0_60 = arith.constant 0 : index
    %c0_61 = arith.constant 0 : index
    %87 = vector.load %arg7[%c1_59, %c0_60, %c0_61] : memref<3x16x1xf32, #tpu.memory_space<vmem>>, vector<1x16x1xf32>
    %88 = vector.shape_cast %87 : vector<1x16x1xf32> to vector<16x1xf32>
    %c1_62 = arith.constant 1 : index
    %c0_63 = arith.constant 0 : index
    %c0_64 = arith.constant 0 : index
    %89 = vector.load %arg3[%c1_62, %c0_63, %c0_64] : memref<3x16x48xf32, #tpu.memory_space<vmem>>, vector<1x16x48xf32>
    %90 = vector.shape_cast %89 : vector<1x16x48xf32> to vector<16x48xf32>
    %c1_65 = arith.constant 1 : index
    %c0_66 = arith.constant 0 : index
    %c0_67 = arith.constant 0 : index
    %91 = vector.load %arg6[%c1_65, %c0_66, %c0_67] : memref<3x16x48xf32, #tpu.memory_space<vmem>>, vector<1x16x48xf32>
    %92 = vector.shape_cast %91 : vector<1x16x48xf32> to vector<16x48xf32>
    %cst_68 = arith.constant 9.99999971E-10 : f32
    %93 = vector.broadcast %cst_68 : f32 to vector<16x1xf32>
    %94 = arith.addf %82, %93 : vector<16x1xf32>
    %cst_69 = arith.constant 5.000000e-01 : f32
    %95 = vector.broadcast %cst_69 : f32 to vector<16x1xf32>
    %96 = arith.divf %95, %94 : vector<16x1xf32>
    %97 = arith.addf %82, %82 : vector<16x1xf32>
    %98 = vector.broadcast %97 : vector<16x1xf32> to vector<16x280xf32>
    %99 = arith.mulf %98, %80 : vector<16x280xf32>
    %100 = math.cos %99 : vector<16x280xf32>
    %cst_70 = arith.constant 1.000000e+00 : f32
    %101 = vector.broadcast %cst_70 : f32 to vector<16x280xf32>
    %102 = arith.subf %101, %100 : vector<16x280xf32>
    %103 = vector.broadcast %96 : vector<16x1xf32> to vector<16x280xf32>
    %104 = arith.mulf %103, %102 : vector<16x280xf32>
    %105 = arith.addf %80, %104 : vector<16x280xf32>
    %106 = vector.broadcast %11 : vector<1x280xf32> to vector<16x280xf32>
    %107 = arith.mulf %105, %106 : vector<16x280xf32>
    %cst_71 = arith.constant 0.000000e+00 : f32
    %108 = vector.broadcast %cst_71 : f32 to vector<16x3xf32>
    %c16_72 = arith.constant 16 : index
    %c0_73 = arith.constant 0 : index
    %109 = vector.load %arg10[%c16_72, %c0_73] : memref<48x280xf32, #tpu.memory_space<vmem>>, vector<16x280xf32>
    tpu.vector_store %arg10[%c16_72, %c0_73], %107 {strides = array<i32>} : memref<48x280xf32, #tpu.memory_space<vmem>>, vector<16x280xf32>,
    %c0_74 = arith.constant 0 : index
    %c0_75 = arith.constant 0 : index
    %110 = vector.load %arg10[%c0_74, %c0_75] : memref<48x280xf32, #tpu.memory_space<vmem>>, vector<16x3xf32>
    tpu.vector_store %arg10[%c0_74, %c0_75], %108 {strides = array<i32>} : memref<48x280xf32, #tpu.memory_space<vmem>>, vector<16x3xf32>,
    %111 = vector.extract_strided_slice %107 {offsets = [0, 0], sizes = [16, 277], strides = [1, 1]} : vector<16x280xf32> to vector<16x277xf32>
    %c0_76 = arith.constant 0 : index
    %c3 = arith.constant 3 : index
    %112 = vector.load %arg10[%c0_76, %c3] : memref<48x280xf32, #tpu.memory_space<vmem>>, vector<16x277xf32>
    tpu.vector_store %arg10[%c0_76, %c3], %111 {strides = array<i32>} : memref<48x280xf32, #tpu.memory_space<vmem>>, vector<16x277xf32>,
    %113 = vector.extract_strided_slice %107 {offsets = [0, 3], sizes = [16, 277], strides = [1, 1]} : vector<16x280xf32> to vector<16x277xf32>
    %c32_77 = arith.constant 32 : index
    %c0_78 = arith.constant 0 : index
    %114 = vector.load %arg10[%c32_77, %c0_78] : memref<48x280xf32, #tpu.memory_space<vmem>>, vector<16x277xf32>
    tpu.vector_store %arg10[%c32_77, %c0_78], %113 {strides = array<i32>} : memref<48x280xf32, #tpu.memory_space<vmem>>, vector<16x277xf32>,
    %c32_79 = arith.constant 32 : index
    %c277 = arith.constant 277 : index
    %115 = vector.load %arg10[%c32_79, %c277] : memref<48x280xf32, #tpu.memory_space<vmem>>, vector<16x3xf32>
    tpu.vector_store %arg10[%c32_79, %c277], %108 {strides = array<i32>} : memref<48x280xf32, #tpu.memory_space<vmem>>, vector<16x3xf32>,
    %c0_80 = arith.constant 0 : index
    %c0_81 = arith.constant 0 : index
    %116 = vector.load %arg10[%c0_80, %c0_81] : memref<48x280xf32, #tpu.memory_space<vmem>>, vector<48x280xf32>
    %cst_82 = arith.constant dense<0.000000e+00> : vector<16x280xf32>
    %117 = tpu.matmul %90, %116, %cst_82 {dimension_numbers = #tpu.dot_dimension_numbers<[1], [0], [0], [1], [0, 0, 1, 1], [], []>} : vector<16x48xf32>, vector<48x280xf32>, vector<16x280xf32> -> vector<16x280xf32>
    %118 = vector.broadcast %86 : vector<16x1xf32> to vector<16x280xf32>
    %119 = arith.addf %117, %118 : vector<16x280xf32>
    %cst_83 = arith.constant 9.99999971E-10 : f32
    %120 = vector.broadcast %cst_83 : f32 to vector<16x1xf32>
    %121 = arith.addf %84, %120 : vector<16x1xf32>
    %cst_84 = arith.constant 5.000000e-01 : f32
    %122 = vector.broadcast %cst_84 : f32 to vector<16x1xf32>
    %123 = arith.divf %122, %121 : vector<16x1xf32>
    %124 = arith.addf %84, %84 : vector<16x1xf32>
    %125 = vector.broadcast %124 : vector<16x1xf32> to vector<16x280xf32>
    %126 = arith.mulf %125, %119 : vector<16x280xf32>
    %127 = math.cos %126 : vector<16x280xf32>
    %cst_85 = arith.constant 1.000000e+00 : f32
    %128 = vector.broadcast %cst_85 : f32 to vector<16x280xf32>
    %129 = arith.subf %128, %127 : vector<16x280xf32>
    %130 = vector.broadcast %123 : vector<16x1xf32> to vector<16x280xf32>
    %131 = arith.mulf %130, %129 : vector<16x280xf32>
    %132 = arith.addf %119, %131 : vector<16x280xf32>
    %133 = vector.broadcast %11 : vector<1x280xf32> to vector<16x280xf32>
    %134 = arith.mulf %132, %133 : vector<16x280xf32>
    %cst_86 = arith.constant 0.000000e+00 : f32
    %135 = vector.broadcast %cst_86 : f32 to vector<16x1xf32>
    %c16_87 = arith.constant 16 : index
    %c0_88 = arith.constant 0 : index
    %136 = vector.load %arg10[%c16_87, %c0_88] : memref<48x280xf32, #tpu.memory_space<vmem>>, vector<16x280xf32>
    tpu.vector_store %arg10[%c16_87, %c0_88], %134 {strides = array<i32>} : memref<48x280xf32, #tpu.memory_space<vmem>>, vector<16x280xf32>,
    %c0_89 = arith.constant 0 : index
    %c0_90 = arith.constant 0 : index
    %137 = vector.load %arg10[%c0_89, %c0_90] : memref<48x280xf32, #tpu.memory_space<vmem>>, vector<16x1xf32>
    tpu.vector_store %arg10[%c0_89, %c0_90], %135 {strides = array<i32>} : memref<48x280xf32, #tpu.memory_space<vmem>>, vector<16x1xf32>,
    %138 = vector.extract_strided_slice %134 {offsets = [0, 0], sizes = [16, 279], strides = [1, 1]} : vector<16x280xf32> to vector<16x279xf32>
    %c0_91 = arith.constant 0 : index
    %c1_92 = arith.constant 1 : index
    %139 = vector.load %arg10[%c0_91, %c1_92] : memref<48x280xf32, #tpu.memory_space<vmem>>, vector<16x279xf32>
    tpu.vector_store %arg10[%c0_91, %c1_92], %138 {strides = array<i32>} : memref<48x280xf32, #tpu.memory_space<vmem>>, vector<16x279xf32>,
    %140 = vector.extract_strided_slice %134 {offsets = [0, 1], sizes = [16, 279], strides = [1, 1]} : vector<16x280xf32> to vector<16x279xf32>
    %c32_93 = arith.constant 32 : index
    %c0_94 = arith.constant 0 : index
    %141 = vector.load %arg10[%c32_93, %c0_94] : memref<48x280xf32, #tpu.memory_space<vmem>>, vector<16x279xf32>
    tpu.vector_store %arg10[%c32_93, %c0_94], %140 {strides = array<i32>} : memref<48x280xf32, #tpu.memory_space<vmem>>, vector<16x279xf32>,
    %c32_95 = arith.constant 32 : index
    %c279_96 = arith.constant 279 : index
    %142 = vector.load %arg10[%c32_95, %c279_96] : memref<48x280xf32, #tpu.memory_space<vmem>>, vector<16x1xf32>
    tpu.vector_store %arg10[%c32_95, %c279_96], %135 {strides = array<i32>} : memref<48x280xf32, #tpu.memory_space<vmem>>, vector<16x1xf32>,
    %c0_97 = arith.constant 0 : index
    %c0_98 = arith.constant 0 : index
    %143 = vector.load %arg10[%c0_97, %c0_98] : memref<48x280xf32, #tpu.memory_space<vmem>>, vector<48x280xf32>
    %cst_99 = arith.constant dense<0.000000e+00> : vector<16x280xf32>
    %144 = tpu.matmul %92, %143, %cst_99 {dimension_numbers = #tpu.dot_dimension_numbers<[1], [0], [0], [1], [0, 0, 1, 1], [], []>} : vector<16x48xf32>, vector<48x280xf32>, vector<16x280xf32> -> vector<16x280xf32>
    %145 = vector.broadcast %88 : vector<16x1xf32> to vector<16x280xf32>
    %146 = arith.addf %144, %145 : vector<16x280xf32>
    %147 = arith.addf %146, %80 : vector<16x280xf32>
    %c2 = arith.constant 2 : index
    %c0_100 = arith.constant 0 : index
    %c0_101 = arith.constant 0 : index
    %148 = vector.load %arg5[%c2, %c0_100, %c0_101] : memref<3x16x1xf32, #tpu.memory_space<vmem>>, vector<1x16x1xf32>
    %149 = vector.shape_cast %148 : vector<1x16x1xf32> to vector<16x1xf32>
    %c2_102 = arith.constant 2 : index
    %c0_103 = arith.constant 0 : index
    %c0_104 = arith.constant 0 : index
    %150 = vector.load %arg8[%c2_102, %c0_103, %c0_104] : memref<3x16x1xf32, #tpu.memory_space<vmem>>, vector<1x16x1xf32>
    %151 = vector.shape_cast %150 : vector<1x16x1xf32> to vector<16x1xf32>
    %c2_105 = arith.constant 2 : index
    %c0_106 = arith.constant 0 : index
    %c0_107 = arith.constant 0 : index
    %152 = vector.load %arg4[%c2_105, %c0_106, %c0_107] : memref<3x16x1xf32, #tpu.memory_space<vmem>>, vector<1x16x1xf32>
    %153 = vector.shape_cast %152 : vector<1x16x1xf32> to vector<16x1xf32>
    %c2_108 = arith.constant 2 : index
    %c0_109 = arith.constant 0 : index
    %c0_110 = arith.constant 0 : index
    %154 = vector.load %arg7[%c2_108, %c0_109, %c0_110] : memref<3x16x1xf32, #tpu.memory_space<vmem>>, vector<1x16x1xf32>
    %155 = vector.shape_cast %154 : vector<1x16x1xf32> to vector<16x1xf32>
    %c2_111 = arith.constant 2 : index
    %c0_112 = arith.constant 0 : index
    %c0_113 = arith.constant 0 : index
    %156 = vector.load %arg3[%c2_111, %c0_112, %c0_113] : memref<3x16x48xf32, #tpu.memory_space<vmem>>, vector<1x16x48xf32>
    %157 = vector.shape_cast %156 : vector<1x16x48xf32> to vector<16x48xf32>
    %c2_114 = arith.constant 2 : index
    %c0_115 = arith.constant 0 : index
    %c0_116 = arith.constant 0 : index
    %158 = vector.load %arg6[%c2_114, %c0_115, %c0_116] : memref<3x16x48xf32, #tpu.memory_space<vmem>>, vector<1x16x48xf32>
    %159 = vector.shape_cast %158 : vector<1x16x48xf32> to vector<16x48xf32>
    %cst_117 = arith.constant 9.99999971E-10 : f32
    %160 = vector.broadcast %cst_117 : f32 to vector<16x1xf32>
    %161 = arith.addf %149, %160 : vector<16x1xf32>
    %cst_118 = arith.constant 5.000000e-01 : f32
    %162 = vector.broadcast %cst_118 : f32 to vector<16x1xf32>
    %163 = arith.divf %162, %161 : vector<16x1xf32>
    %164 = arith.addf %149, %149 : vector<16x1xf32>
    %165 = vector.broadcast %164 : vector<16x1xf32> to vector<16x280xf32>
    %166 = arith.mulf %165, %147 : vector<16x280xf32>
    %167 = math.cos %166 : vector<16x280xf32>
    %cst_119 = arith.constant 1.000000e+00 : f32
    %168 = vector.broadcast %cst_119 : f32 to vector<16x280xf32>
    %169 = arith.subf %168, %167 : vector<16x280xf32>
    %170 = vector.broadcast %163 : vector<16x1xf32> to vector<16x280xf32>
    %171 = arith.mulf %170, %169 : vector<16x280xf32>
    %172 = arith.addf %147, %171 : vector<16x280xf32>
    %173 = vector.broadcast %11 : vector<1x280xf32> to vector<16x280xf32>
    %174 = arith.mulf %172, %173 : vector<16x280xf32>
    %cst_120 = arith.constant 0.000000e+00 : f32
    %175 = vector.broadcast %cst_120 : f32 to vector<16x5xf32>
    %c16_121 = arith.constant 16 : index
    %c0_122 = arith.constant 0 : index
    %176 = vector.load %arg10[%c16_121, %c0_122] : memref<48x280xf32, #tpu.memory_space<vmem>>, vector<16x280xf32>
    tpu.vector_store %arg10[%c16_121, %c0_122], %174 {strides = array<i32>} : memref<48x280xf32, #tpu.memory_space<vmem>>, vector<16x280xf32>,
    %c0_123 = arith.constant 0 : index
    %c0_124 = arith.constant 0 : index
    %177 = vector.load %arg10[%c0_123, %c0_124] : memref<48x280xf32, #tpu.memory_space<vmem>>, vector<16x5xf32>
    tpu.vector_store %arg10[%c0_123, %c0_124], %175 {strides = array<i32>} : memref<48x280xf32, #tpu.memory_space<vmem>>, vector<16x5xf32>,
    %178 = vector.extract_strided_slice %174 {offsets = [0, 0], sizes = [16, 275], strides = [1, 1]} : vector<16x280xf32> to vector<16x275xf32>
    %c0_125 = arith.constant 0 : index
    %c5 = arith.constant 5 : index
    %179 = vector.load %arg10[%c0_125, %c5] : memref<48x280xf32, #tpu.memory_space<vmem>>, vector<16x275xf32>
    tpu.vector_store %arg10[%c0_125, %c5], %178 {strides = array<i32>} : memref<48x280xf32, #tpu.memory_space<vmem>>, vector<16x275xf32>,
    %180 = vector.extract_strided_slice %174 {offsets = [0, 5], sizes = [16, 275], strides = [1, 1]} : vector<16x280xf32> to vector<16x275xf32>
    %c32_126 = arith.constant 32 : index
    %c0_127 = arith.constant 0 : index
    %181 = vector.load %arg10[%c32_126, %c0_127] : memref<48x280xf32, #tpu.memory_space<vmem>>, vector<16x275xf32>
    tpu.vector_store %arg10[%c32_126, %c0_127], %180 {strides = array<i32>} : memref<48x280xf32, #tpu.memory_space<vmem>>, vector<16x275xf32>,
    %c32_128 = arith.constant 32 : index
    %c275 = arith.constant 275 : index
    %182 = vector.load %arg10[%c32_128, %c275] : memref<48x280xf32, #tpu.memory_space<vmem>>, vector<16x5xf32>
    tpu.vector_store %arg10[%c32_128, %c275], %175 {strides = array<i32>} : memref<48x280xf32, #tpu.memory_space<vmem>>, vector<16x5xf32>,
    %c0_129 = arith.constant 0 : index
    %c0_130 = arith.constant 0 : index
    %183 = vector.load %arg10[%c0_129, %c0_130] : memref<48x280xf32, #tpu.memory_space<vmem>>, vector<48x280xf32>
    %cst_131 = arith.constant dense<0.000000e+00> : vector<16x280xf32>
    %184 = tpu.matmul %157, %183, %cst_131 {dimension_numbers = #tpu.dot_dimension_numbers<[1], [0], [0], [1], [0, 0, 1, 1], [], []>} : vector<16x48xf32>, vector<48x280xf32>, vector<16x280xf32> -> vector<16x280xf32>
    %185 = vector.broadcast %153 : vector<16x1xf32> to vector<16x280xf32>
    %186 = arith.addf %184, %185 : vector<16x280xf32>
    %cst_132 = arith.constant 9.99999971E-10 : f32
    %187 = vector.broadcast %cst_132 : f32 to vector<16x1xf32>
    %188 = arith.addf %151, %187 : vector<16x1xf32>
    %cst_133 = arith.constant 5.000000e-01 : f32
    %189 = vector.broadcast %cst_133 : f32 to vector<16x1xf32>
    %190 = arith.divf %189, %188 : vector<16x1xf32>
    %191 = arith.addf %151, %151 : vector<16x1xf32>
    %192 = vector.broadcast %191 : vector<16x1xf32> to vector<16x280xf32>
    %193 = arith.mulf %192, %186 : vector<16x280xf32>
    %194 = math.cos %193 : vector<16x280xf32>
    %cst_134 = arith.constant 1.000000e+00 : f32
    %195 = vector.broadcast %cst_134 : f32 to vector<16x280xf32>
    %196 = arith.subf %195, %194 : vector<16x280xf32>
    %197 = vector.broadcast %190 : vector<16x1xf32> to vector<16x280xf32>
    %198 = arith.mulf %197, %196 : vector<16x280xf32>
    %199 = arith.addf %186, %198 : vector<16x280xf32>
    %200 = vector.broadcast %11 : vector<1x280xf32> to vector<16x280xf32>
    %201 = arith.mulf %199, %200 : vector<16x280xf32>
    %cst_135 = arith.constant 0.000000e+00 : f32
    %202 = vector.broadcast %cst_135 : f32 to vector<16x1xf32>
    %c16_136 = arith.constant 16 : index
    %c0_137 = arith.constant 0 : index
    %203 = vector.load %arg10[%c16_136, %c0_137] : memref<48x280xf32, #tpu.memory_space<vmem>>, vector<16x280xf32>
    tpu.vector_store %arg10[%c16_136, %c0_137], %201 {strides = array<i32>} : memref<48x280xf32, #tpu.memory_space<vmem>>, vector<16x280xf32>,
    %c0_138 = arith.constant 0 : index
    %c0_139 = arith.constant 0 : index
    %204 = vector.load %arg10[%c0_138, %c0_139] : memref<48x280xf32, #tpu.memory_space<vmem>>, vector<16x1xf32>
    tpu.vector_store %arg10[%c0_138, %c0_139], %202 {strides = array<i32>} : memref<48x280xf32, #tpu.memory_space<vmem>>, vector<16x1xf32>,
    %205 = vector.extract_strided_slice %201 {offsets = [0, 0], sizes = [16, 279], strides = [1, 1]} : vector<16x280xf32> to vector<16x279xf32>
    %c0_140 = arith.constant 0 : index
    %c1_141 = arith.constant 1 : index
    %206 = vector.load %arg10[%c0_140, %c1_141] : memref<48x280xf32, #tpu.memory_space<vmem>>, vector<16x279xf32>
    tpu.vector_store %arg10[%c0_140, %c1_141], %205 {strides = array<i32>} : memref<48x280xf32, #tpu.memory_space<vmem>>, vector<16x279xf32>,
    %207 = vector.extract_strided_slice %201 {offsets = [0, 1], sizes = [16, 279], strides = [1, 1]} : vector<16x280xf32> to vector<16x279xf32>
    %c32_142 = arith.constant 32 : index
    %c0_143 = arith.constant 0 : index
    %208 = vector.load %arg10[%c32_142, %c0_143] : memref<48x280xf32, #tpu.memory_space<vmem>>, vector<16x279xf32>
    tpu.vector_store %arg10[%c32_142, %c0_143], %207 {strides = array<i32>} : memref<48x280xf32, #tpu.memory_space<vmem>>, vector<16x279xf32>,
    %c32_144 = arith.constant 32 : index
    %c279_145 = arith.constant 279 : index
    %209 = vector.load %arg10[%c32_144, %c279_145] : memref<48x280xf32, #tpu.memory_space<vmem>>, vector<16x1xf32>
    tpu.vector_store %arg10[%c32_144, %c279_145], %202 {strides = array<i32>} : memref<48x280xf32, #tpu.memory_space<vmem>>, vector<16x1xf32>,
    %c0_146 = arith.constant 0 : index
    %c0_147 = arith.constant 0 : index
    %210 = vector.load %arg10[%c0_146, %c0_147] : memref<48x280xf32, #tpu.memory_space<vmem>>, vector<48x280xf32>
    %cst_148 = arith.constant dense<0.000000e+00> : vector<16x280xf32>
    %211 = tpu.matmul %159, %210, %cst_148 {dimension_numbers = #tpu.dot_dimension_numbers<[1], [0], [0], [1], [0, 0, 1, 1], [], []>} : vector<16x48xf32>, vector<48x280xf32>, vector<16x280xf32> -> vector<16x280xf32>
    %212 = vector.broadcast %155 : vector<16x1xf32> to vector<16x280xf32>
    %213 = arith.addf %211, %212 : vector<16x280xf32>
    %214 = arith.addf %213, %147 : vector<16x280xf32>
    %215 = vector.extract_strided_slice %214 {offsets = [0, 12], sizes = [16, 256], strides = [1, 1]} : vector<16x280xf32> to vector<16x256xf32>
    %c0_149 = arith.constant 0 : index
    %c0_150 = arith.constant 0 : index
    %c0_151 = arith.constant 0 : index
    %216 = vector.load %arg9[%c0_149, %c0_150, %c0_151] : memref<1x16x256xf32, #tpu.memory_space<vmem>>, vector<1x16x256xf32>
    %217 = vector.shape_cast %216 : vector<1x16x256xf32> to vector<16x256xf32>
    %218 = vector.shape_cast %215 : vector<16x256xf32> to vector<1x16x256xf32>
    tpu.vector_store %arg9[%c0_149, %c0_150, %c0_151], %218 {strides = array<i32>} : memref<1x16x256xf32, #tpu.memory_space<vmem>>, vector<1x16x256xf32>,
    return
  }
  func.func @transform_0(%arg0: i32, %arg1: i32) -> (i32, i32, i32, i32) {
    %c0_i32 = arith.constant 0 : i32
    %c0_i32_0 = arith.constant 0 : i32
    %c0_i32_1 = arith.constant 0 : i32
    return %arg0, %arg1, %c0_i32, %c0_i32_0 : i32, i32, i32, i32
  }
  func.func @transform_1(%arg0: i32, %arg1: i32) -> (i32, i32, i32) {
    %c0_i32 = arith.constant 0 : i32
    %c0_i32_0 = arith.constant 0 : i32
    %c0_i32_1 = arith.constant 0 : i32
    %c0_i32_2 = arith.constant 0 : i32
    return %c0_i32, %c0_i32_0, %c0_i32_1 : i32, i32, i32
  }
  func.func @transform_2(%arg0: i32, %arg1: i32) -> (i32, i32, i32) {
    %c0_i32 = arith.constant 0 : i32
    %c0_i32_0 = arith.constant 0 : i32
    %c0_i32_1 = arith.constant 0 : i32
    %c0_i32_2 = arith.constant 0 : i32
    return %c0_i32, %c0_i32_0, %c0_i32_1 : i32, i32, i32
  }
  func.func @transform_3(%arg0: i32, %arg1: i32) -> (i32, i32, i32) {
    %c0_i32 = arith.constant 0 : i32
    %c0_i32_0 = arith.constant 0 : i32
    %c0_i32_1 = arith.constant 0 : i32
    %c0_i32_2 = arith.constant 0 : i32
    return %c0_i32, %c0_i32_0, %c0_i32_1 : i32, i32, i32
  }
  func.func @transform_4(%arg0: i32, %arg1: i32) -> (i32, i32, i32) {
    %c0_i32 = arith.constant 0 : i32
    %c0_i32_0 = arith.constant 0 : i32
    %c0_i32_1 = arith.constant 0 : i32
    %c0_i32_2 = arith.constant 0 : i32
    return %c0_i32, %c0_i32_0, %c0_i32_1 : i32, i32, i32
  }
  func.func @transform_5(%arg0: i32, %arg1: i32) -> (i32, i32, i32) {
    %c0_i32 = arith.constant 0 : i32
    %c0_i32_0 = arith.constant 0 : i32
    %c0_i32_1 = arith.constant 0 : i32
    %c0_i32_2 = arith.constant 0 : i32
    return %c0_i32, %c0_i32_0, %c0_i32_1 : i32, i32, i32
  }
  func.func @transform_6(%arg0: i32, %arg1: i32) -> (i32, i32, i32) {
    %c0_i32 = arith.constant 0 : i32
    %c0_i32_0 = arith.constant 0 : i32
    %c0_i32_1 = arith.constant 0 : i32
    %c0_i32_2 = arith.constant 0 : i32
    return %c0_i32, %c0_i32_0, %c0_i32_1 : i32, i32, i32
  }
  func.func @transform_7(%arg0: i32, %arg1: i32) -> (i32, i32, i32) {
    %c0_i32 = arith.constant 0 : i32
    %c0_i32_0 = arith.constant 0 : i32
    return %arg0, %c0_i32, %arg1 : i32, i32, i32
  }
}

</mosaic_0001>

<bundles_post_ra>
// kernel: tpu_custom_call.1
= control target key start
LH: loop header
LB: loop body
LE: loop exit
PB: predicated region body
PF: predicated region fallthrough
CT: control target
= control target key end

     0   :  { %12 = vsyncpa [#allocation4], 0  ;;  %s11214_s0 = inlined_call_operand.hbm [shape: f32[2,3,16,280], index: 0, kind: input, shape index: {}]   ;;  %s11215_s1 = inlined_call_operand.vmem [shape: f32[3,16,48], index: 1, kind: input, shape index: {}]   ;;  %s11216_s2 = inlined_call_operand.vmem [shape: f32[3,16,1], index: 2, kind: input, shape index: {}]   ;;  %s11217_s3 = inlined_call_operand.vmem [shape: f32[3,16,1], index: 3, kind: input, shape index: {}]   ;;  %s11218_s4 = inlined_call_operand.vmem [shape: f32[3,16,48], index: 4, kind: input, shape index: {}]   ;;  %s11219_s5 = inlined_call_operand.vmem [shape: f32[3,16,1], index: 5, kind: input, shape index: {}]   ;;  %s11220_s6 = inlined_call_operand.vmem [shape: f32[3,16,1], index: 6, kind: input, shape index: {}]   ;;  %s11221_s7 = inlined_call_operand.hbm [shape: f32[2,16,768], index: 7, kind: output, shape index: {}]  }
   0x1   :  { %14 = vsyncpa [#allocation4 + $0x1], 0 }
   0x2   :  { %15 = vsyncpa [#allocation5], 0 }
   0x3   :  { %17 = vsyncpa [#allocation5 + $0x1], 0  ;;  %s7282_s24 = smov 0   ;;  %s7284_s25 = smov 0  }
   0x4   :  { %s7286_s26 = smov 0   ;;  %s7288_s27 = smov 0  }
   0x5   :  { %s7290_s28 = smov 0   ;;  %s7292_s29 = smov 0  }
   0x6   :  { %s7294_s30 = smov 0   ;;  %s7296_s8 = smov 0  }
   0x7 LB: > { %11254 = sst [smem:[#allocation9_spill]] %s7190_s24  ;;  %s6171_s9 = sadd.s32 4294967295, %s7218_s8   ;;  %s7218_s8 = sphi %s7296_s8, %s23_s8   ;;  %s7214_s30 = sphi %s7294_s30, %s11392_s30   ;;  %s7210_s29 = sphi %s7292_s29, %s11386_s29   ;;  %s7206_s28 = sphi %s7290_s28, %s11391_s28   ;;  %s7202_s27 = sphi %s7288_s27, %s11385_s27   ;;  %s7198_s26 = sphi %s7286_s26, %s11390_s26   ;;  %s7194_s25 = sphi %s7284_s25, %s11389_s25   ;;  %s7190_s24 = sphi %s7282_s24, %s11388_s24  }
   0x8   : > { %11255 = sst [smem:[#allocation10_spill]] %s7210_s29  ;;  %s6172_s10 = sadd.s32 4294967294, %s7218_s8  }
   0x9   : > { %s32_s11 = sadd.s32 1, %s7210_s29  ;;  %s35_s12 = sadd.s32 1, %s7214_s30 }
   0xa   : > { %p33_p0 = scmp.ge.s32.totalorder %s32_s11, 3  ;;  %s44_s13 = sadd.s32 1, %s7198_s26 }
   0xb   : > { %p51_p1 = scmp.ne.s32.totalorder %s7198_s26, %s7194_s25  ;;  %p52_p2 = scmp.eq.s32.totalorder %s7218_s8, 0 }
   0xc   : > { %s11394_s11 = smov (%p33_p0, %s32_s11), 0  ;;  %s11396_s12 = smov (!%p33_p0, %s35_s12), %s7214_s30 }
   0xd   : > { %11256 = sst [smem:[#allocation11_spill]] %s11394_s11  ;;  %s40_s14 = ssub.s32 %s7210_s29, %s11394_s11 }
   0xe   : > { %p7335_p3 = por %p52_p2, %p51_p1  ;;  %p37_p4 = scmp.ge.s32.totalorder %s11396_s12, 2 }
   0xf   : > { %p57_p5 = scmp.ne.s32.totalorder %s7194_s25, %s7190_s24  ;;  %p58_p6 = scmp.eq.s32.totalorder %s6171_s9, 0 }
  0x10   : > { %p209_p7 = scmp.eq.s32.totalorder %s6171_s9, 5  ;;  %s11398_s12 = smov (%p37_p4, %s11396_s12), 0 }
  0x11   : > { %11258 = sst [smem:[#allocation12_spill]] %s11398_s12  ;;  %p7343_p8 = por %p58_p6, %p57_p5 }
  0x12   : > { %p7347_p9 = por %p209_p7, %p51_p1  ;;  %s39_s18 = ssub.s32 %s7214_s30, %s11398_s12 }
  0x13   : > { %p215_p10 = scmp.eq.s32.totalorder %s6172_s10, 5  ;;  %s41_s19 = sor.u32 %s40_s14, %s39_s18 }
  0x14   : > { %s11260_s17 = scalar_select %p7347_p9, 1, 0 }
  0x15   : > { %p42_p11 = scmp.eq.s32.totalorder %s41_s19, 0  ;;  %p7353_p12 = por %p215_p10, %p57_p5 }
  0x16   : > { %p6823_p13 = scmp.lt.s32.totalorder %s7218_s8, 6  ;;  %s253_s21 = sand.u32 1, %s7198_s26  }
  0x17   : > { %s11261_s20 = scalar_select %p7353_p12, 1, 0 }
  0x18   : > { %s7360_s22 = scalar_select %p42_p11, %s7198_s26, %s44_s13  }
  0x19   : > { %11262 = sst [smem:[#allocation13_spill]] %s11261_s20  ;;  %s6662_s23 = smul.u32 48, %s253_s21 }
  0x1a   : > { %s6663_s9 = smul.u32 6, %s7210_s29  ;;  %p7365_p0 = pnand %p6823_p13, %p7335_p3 }
  0x1b   : > { %s6664_s10 = smul.u32 18, %s7214_s30  ;;  %s257_s14 = scalar_lea.vmem [#allocation3], %s6662_s23 }
  0x1c   : > { %s266_s18 = sshll.u32 %s257_s14, 4  ;;  %s7377_s15 = scalar_lea.sflag [#allocation4], %s253_s21  ;;  %s7370_s18 = int_to_ptr.vmem [resolvable:$true] %s266_s18 }
  0x1d   : > { %s263_s19 = sadd.s32 %s6664_s10, %s6663_s9  ;;  %p7092_p2 = pneg %p7365_p0 }
  0x1e   : > { %s6175_s12 = sshll.u32 %s263_s19, 7  ;;  %s7095_s24 = scalar_lea.hbm %s11214_s0, 4608 }
  0x1f   : > { %s7375_s13 = scalar_lea.hbm %s11214_s0, %s6175_s12 }
  0x20   : > { %s7090_s29 = scalar_lea.hbm %s7375_s13, 768  ;;  %p7096_p5 = scmp.lt.u32.totalorder %s7375_s13, %s11214_s0 }
  0x21   : > { %p7091_p1 = scmp.ne.s32.totalorder %s7375_s13, %s7090_s29  ;;  %p7097_p6 = scmp.lt.u32.totalorder %s7095_s24, %s7090_s29 }
  0x22   : > { %p7099_p10 = scmp.lt.u32.totalorder %s7090_s29, %s7375_s13 }
  0x23   : > { %p7093_p3 = pnand %p7092_p2, %p7091_p1  ;;  %p7098_p7 = por %p7097_p6, %p7096_p5 }
  0x25   : > { %p7094_p4 = pneg %p7093_p3  ;;  %p7100_p11 = por %p7099_p10, %p7098_p7 }
  0x27   : > { %p7101_p13 = pnand %p7100_p11, %p7094_p4 }
  0x29   : > { %7104 = shalt.err (!%p7101_p13)
}
  0x2a   : > { %s7105_s21 = scalar_lea.vmem %s7370_s18, 768  ;;  %s7220_s10 = smov [#allocation3]  }
  0x2b   : > { %p7106_p1 = scmp.ne.s32.totalorder %s7370_s18, %s7105_s21  ;;  %s7110_s14 = sshll.u32 %s7220_s10, 4  ;;  %s7111_s14 = int_to_ptr.vmem [resolvable:$false] %s7110_s14 }
  0x2c   : > { %s7112_s19 = scalar_lea.vmem %s7111_s14, 1536  ;;  %p7113_p9 = scmp.lt.s32.totalorder %s7370_s18, %s7111_s14 }
  0x2d   : > { %p7108_p3 = pnand %p7106_p1, %p7092_p2  ;;  %p7114_p5 = scmp.lt.s32.totalorder %s7112_s19, %s7105_s21 }
  0x2f   : > { %p7109_p12 = pneg %p7108_p3  ;;  %p7115_p6 = por %p7114_p5, %p7113_p9 }
  0x31   : > { %p7116_p7 = pnand %p7115_p6, %p7109_p12 }
  0x33   : > { %7119 = shalt.err (!%p7116_p7)
}
  0x34   : > { %s7221_s29 = smov 384   ;;  %s7222_s23 = smov 24  }
  0x35   : > { %6818 = dma.hbm_to_vmem [thread:$0]  (!%p7365_p0), %s7375_s13, 768, %s7370_s18, %s7377_s15, %s7221_s29, %s7221_s29, %s7222_s23  }
  0x36   : > { %p6176_p2 = scmp.ge.s32.totalorder %s7218_s8, 1  ;;  %p274_p4 = scmp.lt.s32.totalorder %s7218_s8, 7 }
  0x38   : > { %p275_p10 = pnand %p6176_p2, %p274_p4 }
  0x39   : > { %s7408_s9 = sand.u32 (!%p275_p10), 1, %s7194_s25  }
  0x3a   : > { %278 = sbr.rel (%p275_p10) target bundleno = 3560 (0xde8), region = 48  ;;  %s281_s12 = scalar_lea.sflag (!%p275_p10), [#allocation4], %s7408_s9 }
  0x3b   : > { %s6665_s24 = smul.u32 (!%p275_p10), 48, %s7408_s9 }
  0x3d   : > { %s7412_s20 = scalar_lea.vmem (!%p275_p10), [#allocation3], %s6665_s24 }
  0x41   : > { %7181 = dma.done.wait (%p7343_p8), %s281_s12, 768  }
  0x42   : > { %7183 = vsyncadd (%p7343_p8), %s281_s12, 4294966528  ;;  %v7223_v0 = vmov 0   ;;  %v347_v1 = vld [vmem:[%s11217_s3] sm:$0xff]  ;;  %v348_v2 = vld [vmem:[%s11217_s3 + $0x8] sm:$0xff]  ;;  %v7224_v56 = vmov 683565275  }
  0x43   : > { %6909 = vset.pattern.permute.xlu0 %v7223_v0  ;;  %6910 = vset.pattern.permute.xlu1 %v7223_v0  ;;  %v365_v3 = vadd.f32 %v347_v1, %v347_v1  ;;  %v359_v4 = vadd.f32 1e-09, %v347_v1  ;;  %v360_v5 = vadd.f32 1e-09, %v348_v2  ;;  %v366_v6 = vadd.f32 %v348_v2, %v348_v2  ;;  %v341_v11 = vld [vmem:[%s7412_s20] sm:$0xff]  ;;  %v342_v12 = vld [vmem:[%s7412_s20 + $0x8] sm:$0xff] }
  0x44   : > { %v343_v13 = vld [vmem:[%s7412_s20 + $0x10] sm:$0xff]  ;;  %v344_v21 = vld [vmem:[%s7412_s20 + $0x18] sm:$0xff]  ;;  %v345_v36 = vld [vmem:[%s7412_s20 + $0x20] sm:$0xff]  ;;  %v11251_v58 = vmov 2475754826   ;;  %s6178_s16 = sshll.u32 %s7202_s27, 8 }
  0x45   : > { %369 = vperm.xlu0 %6909, %v365_v3   ;;  %6911 = vrcp.f32 %v359_v4  ;;  %v11238_v61 = vmov 2131351028   ;;  %v11249_v63 = vmov 2102212464   ;;  %v11247_v1 = vmov 920167782  }
  0x46   : > { %6913 = vrcp.f32 %v360_v5  ;;  %s6179_s21 = sadd.s32 4294967284, %s6178_s16  ;;  %s7231_s10 = smov 1  }
  0x47   : > { %s7232_s14 = smov 127   ;;  %s7234_s23 = smov 125  }
  0x48   : > { %s7235_s24 = smov 5   ;;  %s7236_s18 = smov 123  }
  0x49   : > { %374 = vperm.xlu0 %6909, %v366_v6   ;;  %s7237_s19 = smov 116   ;;  %s6177_s29 = sshll.u32 %s7408_s9, 5 }
  0x4a   : > { %p11381_p9 = scmp.ne.s32.totalorder %s11260_s17, 0  ;;  %s7238_s16 = smov [#allocation6]  }
  0x4f   : > { %v6912_v7 = vpop.eup %6911 }
  0x50   : > { %v6914_v8 = vpop.eup %6913  ;;  %v362_v9 = vmul.f32 0.5, %v6912_v7 }
  0x51   : > { %v364_v10 = vmul.f32 0.5, %v6914_v8  ;;  %v11245_v8 = vmov 1326507024  }
  0x52   : > { %1009 = vperm.xlu1 %6910, %v362_v9  }
  0x56   : > { %1014 = vperm.xlu1 %6910, %v364_v10  }
  0xc4   : > { %v370_v14 = vpop.permute.xlu0 %369 }
  0xc5   : > { %v7427_v15 = vmul.f32 %v370_v14, %v341_v11  ;;  %v7429_v16 = vmul.f32 %v370_v14, %v342_v12  ;;  %v7431_v17 = vmul.f32 %v370_v14, %v343_v13 }
  0xc7   : > { %v383_v18 = vand.u32 2147483647, %v7427_v15  ;;  %v386_v19 = vand.u32 2139095040, %v7427_v15  ;;  %v486_v20 = vand.u32 2147483647, %v7429_v16  ;;  %v489_v22 = vand.u32 2139095040, %v7429_v16 }
  0xc8   : > { %v589_v23 = vand.u32 2147483647, %v7431_v17  ;;  %v7439_v24 = vpop.permute.xlu0 %374  ;;  %v592_v27 = vand.u32 2139095040, %v7431_v17 }
  0xc9   : > { %v387_v25 = vshrl.u32 %v386_v19, 23  ;;  %v390_v26 = vand.u32 8388607, %v383_v18  ;;  %v490_v28 = vshrl.u32 %v489_v22, 23  ;;  %v493_v29 = vand.u32 8388607, %v486_v20 }
  0xca   : > { %v7447_v30 = vmul.f32 %v7439_v24, %v344_v21  ;;  %v593_v32 = vshrl.u32 %v592_v27, 23  ;;  %v7451_v33 = vand.u32 8388607, %v589_v23  ;;  %v7457_v44 = vmul.f32 %v7439_v24, %v345_v36 }
  0xcb   : > { %v6183_v31 = vadd.s32 4294967169, %v387_v25  ;;  %v391_v34 = vor.u32 8388608, %v390_v26  ;;  %v6187_v35 = vadd.s32 4294967169, %v490_v28  ;;  %v494_v39 = vor.u32 8388608, %v493_v29 }
  0xcc   : > { %v6191_v38 = vadd.s32 4294967169, %v593_v32  ;;  %v695_v41 = vand.u32 2139095040, %v7447_v30  ;;  %v597_v42 = vor.u32 8388608, %v7451_v33  ;;  %v692_v47 = vand.u32 2147483647, %v7447_v30 }
  0xcd   : > { %v393_v37 = vadd.s32 1, %v6183_v31  ;;  %v496_v40 = vadd.s32 1, %v6187_v35  ;;  %v7459_v46 = vshll.u32 %v391_v34, 8  ;;  %v7464_v53 = vshll.u32 %v494_v39, 8 }
  0xce   : > { %v599_v43 = vadd.s32 1, %v6191_v38  ;;  %v7466_v54 = vshrl.u32 %v695_v41, 23 }
  0xcf   : > { %vm394_vm0 = vcmp.gt.s32.totalorder %v393_v37, 0  ;;  %vm497_vm1 = vcmp.gt.s32.totalorder %v496_v40, 0 }
  0xd0   : > { %v395_v45 = vsel %vm394_vm0, %v393_v37, 0  ;;  %v498_v50 = vsel %vm497_vm1, %v496_v40, 0  ;;  %vm600_vm2 = vcmp.gt.s32.totalorder %v599_v43, 0 }
  0xd1   : > { %v396_v48 = vshrl.u32 %v395_v45, 5  ;;  %v397_v49 = vand.u32 31, %v395_v45  ;;  %v7462_v51 = vshrl.u32 %v498_v50, 5  ;;  %v500_v52 = vand.u32 31, %v498_v50 }
  0xd2   : > { %v7470_v60 = vsel %vm600_vm2, %v599_v43, 0 }
  0xd3   : > { %v398_v55 = vsub.s32 32, %v397_v49  ;;  %v400_v57 = vshll.u32 %v7224_v56, %v397_v49  ;;  %v403_v59 = vshll.u32 %v11251_v58, %v397_v49  ;;  %v406_v62 = vshll.u32 %v11238_v61, %v397_v49 }
  0xd4   : > { %v409_v0 = vshll.u32 %v11249_v63, %v397_v49  ;;  %v412_v2 = vshll.u32 %v11247_v1, %v397_v49  ;;  %vm415_vm3 = vcmp.lt.s32.totalorder %v396_v48, 1  ;;  %vm416_vm4 = vcmp.lt.s32.totalorder %v396_v48, 2 }
  0xd5   : > { %v401_v3 = vshrl.u32 %v11251_v58, %v398_v55  ;;  %v404_v4 = vshrl.u32 %v11238_v61, %v398_v55  ;;  %v407_v5 = vshrl.u32 %v11249_v63, %v398_v55  ;;  %v399_v6 = vshrl.u32 %v7224_v56, %v398_v55 }
  0xd6   : > { %v410_v7 = vshrl.u32 %v11247_v1, %v398_v55  ;;  %v413_v9 = vshrl.u32 %v11245_v8, %v398_v55  ;;  %vm417_vm5 = vcmp.lt.s32.totalorder %v396_v48, 3  ;;  %v501_v13 = vsub.s32 32, %v500_v52 }
  0xd7   : > { %v402_v10 = vor.u32 %v401_v3, %v400_v57  ;;  %v405_v11 = vor.u32 %v404_v4, %v403_v59  ;;  %v408_v12 = vor.u32 %v407_v5, %v406_v62  ;;  %vm418_vm6 = vcmp.lt.s32.totalorder %v396_v48, 4 }
  0xd8   : > { %v411_v14 = vor.u32 %v410_v7, %v409_v0  ;;  %v414_v19 = vor.u32 %v413_v9, %v412_v2  ;;  %v503_v21 = vshll.u32 %v7224_v56, %v500_v52  ;;  %v506_v32 = vshll.u32 %v11251_v58, %v500_v52 }
  0xd9   : > { %v419_v22 = vsel %vm415_vm3, %v399_v6, %v402_v10  ;;  %v420_v25 = vsel %vm418_vm6, %v408_v12, 2102212464  ;;  %v423_v26 = vsel %vm415_vm3, %v402_v10, %v405_v11  ;;  %v427_v27 = vsel %vm415_vm3, %v405_v11, %v408_v12 }
  0xda   : > { %v421_v28 = vsel %vm417_vm5, %v405_v11, %v420_v25  ;;  %v424_v29 = vsel %vm418_vm6, %v411_v14, 920167782  ;;  %v428_v31 = vsel %vm418_vm6, %v414_v19, 1326507024  ;;  %v502_v36 = vshrl.u32 %v7224_v56, %v501_v13 }
  0xdb   : > { %v425_v34 = vsel %vm417_vm5, %v408_v12, %v424_v29  ;;  %v429_v35 = vsel %vm417_vm5, %v411_v14, %v428_v31  ;;  %v504_v37 = vshrl.u32 %v11251_v58, %v501_v13  ;;  %v422_v38 = vsel %vm416_vm4, %v419_v22, %v421_v28 }
  0xdc   : > { %v426_v39 = vsel %vm416_vm4, %v423_v26, %v425_v34  ;;  %v430_v40 = vsel %vm416_vm4, %v427_v27, %v429_v35  ;;  %v507_v41 = vshrl.u32 %v11238_v61, %v501_v13  ;;  %v509_v59 = vshll.u32 %v11238_v61, %v500_v52 }
  0xdd   : > { %v7496_v43 = vmul.u32.u64.low %v7459_v46, %v430_v40  ;;  %v7497_v45 = vmul.u32.u64.high %v7459_v46, %v430_v40, %v7496_v43  ;;  %v7500_v49 = vmul.u32.u64.low %v7459_v46, %v426_v39  ;;  %v7501_v50 = vmul.u32.u64.high %v7459_v46, %v426_v39, %v7500_v49 }
  0xde   : > { %v505_v55 = vor.u32 %v504_v37, %v503_v21  ;;  %v508_v57 = vor.u32 %v507_v41, %v506_v32  ;;  %v510_v62 = vshrl.u32 %v11249_v63, %v501_v13  ;;  %v438_v48 = vmul.u32 %v7459_v46, %v422_v38 }
  0xdf   : > { %v512_v0 = vshll.u32 %v11249_v63, %v500_v52  ;;  %v513_v2 = vshrl.u32 %v11247_v1, %v501_v13  ;;  %v516_v3 = vshrl.u32 %v11245_v8, %v501_v13  ;;  %v515_v5 = vshll.u32 %v11247_v1, %v500_v52 }
  0xe0   : > { %v511_v4 = vor.u32 %v510_v62, %v509_v59  ;;  %vm518_vm7 = vcmp.lt.s32.totalorder %v7462_v51, 1  ;;  %vm519_vm8 = vcmp.lt.s32.totalorder %v7462_v51, 2  ;;  %vm440_vm9 = vc.u32 %v7497_v45, %v7500_v49 }
  0xe1   : > { %v441_v6 = vadd.s32 1, %v7501_v50  ;;  %v514_v7 = vor.u32 %v513_v2, %v512_v0  ;;  %vm520_vm10 = vcmp.lt.s32.totalorder %v7462_v51, 3  ;;  %v517_v46 = vor.u32 %v516_v3, %v515_v5 }
  0xe2   : > { %vm521_vm11 = vcmp.lt.s32.totalorder %v7462_v51, 4  ;;  %v522_v9 = vsel %vm518_vm7, %v502_v36, %v505_v55  ;;  %v526_v10 = vsel %vm518_vm7, %v505_v55, %v508_v57  ;;  %v530_v13 = vsel %vm518_vm7, %v508_v57, %v511_v4 }
  0xe3   : > { %v442_v11 = vsel %vm440_vm9, %v441_v6, %v7501_v50  ;;  %v523_v52 = vsel %vm521_vm11, %v511_v4, 2102212464  ;;  %v527_v12 = vsel %vm521_vm11, %v514_v7, 920167782  ;;  %v531_v22 = vsel %vm521_vm11, %v517_v46, 1326507024 }
  0xe4   : > { %v443_v14 = vadd.s32 %v442_v11, %v438_v48  ;;  %v524_v19 = vsel %vm520_vm10, %v508_v57, %v523_v52  ;;  %v528_v21 = vsel %vm520_vm10, %v511_v4, %v527_v12  ;;  %v532_v27 = vsel %vm520_vm10, %v514_v7, %v531_v22 }
  0xe5   : > { %v525_v25 = vsel %vm519_vm8, %v522_v9, %v524_v19  ;;  %v529_v26 = vsel %vm519_vm8, %v526_v10, %v528_v21  ;;  %v602_v28 = vshrl.u32 %v7470_v60, 5  ;;  %v533_v31 = vsel %vm519_vm8, %v530_v13, %v532_v27 }
  0xe6   : > { %v444_v29 = vadd.s32 536870912, %v443_v14  ;;  %v7527_v32 = vmul.u32.u64.low %v7464_v53, %v529_v26  ;;  %v7528_v34 = vmul.u32.u64.high %v7464_v53, %v529_v26, %v7527_v32  ;;  %v603_v37 = vand.u32 31, %v7470_v60 }
  0xe7   : > { %v7532_v35 = vmul.u32.u64.low %v7464_v53, %v533_v31  ;;  %v7533_v36 = vmul.u32.u64.high %v7464_v53, %v533_v31, %v7532_v35  ;;  %v7538_v38 = vshll.u32 %v597_v42, 8  ;;  %v541_v51 = vmul.u32 %v7464_v53, %v525_v25 }
  0xe8   : > { %v7540_v39 = vshrl.u32 %v444_v29, 30  ;;  %vm621_vm12 = vcmp.lt.s32.totalorder %v602_v28, 1  ;;  %v6195_v40 = vadd.s32 4294967169, %v7466_v54  ;;  %v604_v41 = vsub.s32 32, %v603_v37 }
  0xe9   : > { %v606_v43 = vshll.u32 %v7224_v56, %v603_v37  ;;  %v609_v50 = vshll.u32 %v11251_v58, %v603_v37  ;;  %vm623_vm13 = vcmp.lt.s32.totalorder %v602_v28, 3  ;;  %v544_v60 = vadd.s32 1, %v7528_v34 }
  0xea   : > { %v446_v55 = vshll.u32 %v7540_v39, 30  ;;  %v612_v33 = vshll.u32 %v11238_v61, %v603_v37  ;;  %v615_v42 = vshll.u32 %v11249_v63, %v603_v37  ;;  %vm543_vm14 = vc.u32 %v7533_v36, %v7527_v32 }
  0xeb   : > { %v605_v53 = vshrl.u32 %v7224_v56, %v604_v41  ;;  %v607_v54 = vshrl.u32 %v11251_v58, %v604_v41  ;;  %v618_v57 = vshll.u32 %v11247_v1, %v603_v37  ;;  %v545_v62 = vsel %vm543_vm14, %v544_v60, %v7528_v34 }
  0xec   : > { %v7555_v59 = vsub.s32 %v443_v14, %v446_v55  ;;  %v610_v48 = vshrl.u32 %v11238_v61, %v604_v41  ;;  %v613_v0 = vshrl.u32 %v11249_v63, %v604_v41  ;;  %v546_v2 = vadd.s32 %v545_v62, %v541_v51 }
  0xed   : > { %v608_v3 = vor.u32 %v607_v54, %v606_v43  ;;  %v616_v4 = vshrl.u32 %v11247_v1, %v604_v41  ;;  %v619_v5 = vshrl.u32 %v11245_v8, %v604_v41  ;;  %vm624_vm15 = vcmp.lt.s32.totalorder %v602_v28, 4 }
  0xee   : > { %v449_v6 = vsub.s32 0, %v7555_v59  ;;  %v611_v7 = vor.u32 %v610_v48, %v609_v50  ;;  %v614_v46 = vor.u32 %v613_v0, %v612_v33  ;;  %v547_v9 = vadd.s32 536870912, %v546_v2 }
  0xef   : > { %v617_v10 = vor.u32 %v616_v4, %v615_v42  ;;  %v620_v11 = vor.u32 %v619_v5, %v618_v57  ;;  %v625_v52 = vsel %vm621_vm12, %v605_v53, %v608_v3  ;;  %vm622_vm0 = vcmp.lt.s32.totalorder %v602_v28, 2 }
  0xf0   : > { %v6184_v12 = vmin.u32 %v449_v6, %v7555_v59  ;;  %v626_v13 = vsel %vm624_vm15, %v614_v46, 2102212464  ;;  %v629_v14 = vsel %vm621_vm12, %v608_v3, %v611_v7  ;;  %v633_v19 = vsel %vm621_vm12, %v611_v7, %v614_v46  ;;  %v7592_v3 = vld [vmem:[%s7412_s20 + $0x28] sm:$0xff] }
  0xf1   : > { %v7567_v21 = vshrl.u32 %v547_v9, 30  ;;  %v627_v22 = vsel %vm623_vm13, %v611_v7, %v626_v13  ;;  %v630_v25 = vsel %vm624_vm15, %v617_v10, 920167782  ;;  %v634_v26 = vsel %vm624_vm15, %v620_v11, 1326507024 }
  0xf2   : > { %v451_v27 = vclz %v6184_v12  ;;  %v631_v29 = vsel %vm623_vm13, %v614_v46, %v630_v25  ;;  %v635_v31 = vsel %vm623_vm13, %v617_v10, %v634_v26  ;;  %v699_v51 = vand.u32 8388607, %v692_v47 }
  0xf3   : > { %v549_v34 = vshll.u32 %v7567_v21, 30  ;;  %v632_v35 = vsel %vm622_vm0, %v629_v14, %v631_v29  ;;  %v636_v37 = vsel %vm622_vm0, %v633_v19, %v635_v31  ;;  %v628_v43 = vsel %vm622_vm0, %v625_v52, %v627_v22 }
  0xf4   : > { %v6185_v41 = vadd.s32 4294967294, %v451_v27  ;;  %v7576_v50 = vmul.u32.u64.low %v7538_v38, %v636_v37  ;;  %v7577_v55 = vmul.u32.u64.high %v7538_v38, %v636_v37, %v7576_v50  ;;  %v702_v42 = vadd.s32 1, %v6195_v40 }
  0xf5   : > { %v7579_v60 = vsub.s32 %v546_v2, %v549_v34  ;;  %v7582_v33 = vmul.u32.u64.low %v7538_v38, %v632_v35  ;;  %v7583_v28 = vmul.u32.u64.high %v7538_v38, %v632_v35, %v7582_v33  ;;  %v795_v53 = vand.u32 2147483647, %v7457_v44 }
  0xf6   : > { %vm6186_vm1 = vcmp.lt.s32.totalorder %v6185_v41, 0  ;;  %v439_v54 = vadd.s32 %v7500_v49, %v7497_v45  ;;  %vm703_vm2 = vcmp.gt.s32.totalorder %v702_v42, 0  ;;  %v644_v2 = vmul.u32 %v7538_v38, %v628_v43 }
  0xf7   : > { %v454_v57 = vsel %vm6186_vm1, 0, %v6185_v41  ;;  %v552_v62 = vsub.s32 0, %v7579_v60  ;;  %v700_v4 = vor.u32 8388608, %v699_v51  ;;  %vm646_vm3 = vc.u32 %v7577_v55, %v7582_v33 }
  0xf8   : > { %v455_v48 = vsub.s32 32, %v454_v57  ;;  %v459_v0 = vsub.s32 4294967266, %v454_v57  ;;  %v647_v40 = vadd.s32 1, %v7583_v28  ;;  %v704_v6 = vsel %vm703_vm2, %v702_v42, 0 }
  0xf9   : > { %v6188_v5 = vmin.u32 %v552_v62, %v7579_v60  ;;  %v706_v7 = vand.u32 31, %v704_v6  ;;  %v798_v46 = vand.u32 2139095040, %v7457_v44  ;;  %v456_v9 = vshll.u32 %v7555_v59, %v454_v57 }
  0xfa   : > { %v457_v45 = vshrl.u32 %v439_v54, %v455_v48  ;;  %v460_v49 = vadd.s32 127, %v459_v0  ;;  %v648_v38 = vsel %vm646_vm3, %v647_v40, %v7583_v28  ;;  %v7603_v11 = vmul.f32 %v7439_v24, %v7592_v3 }
  0xfb   : > { %v554_v10 = vclz %v6188_v5  ;;  %v542_v12 = vadd.s32 %v7527_v32, %v7533_v36  ;;  %v649_v13 = vadd.s32 %v648_v38, %v644_v2  ;;  %v707_v14 = vsub.s32 32, %v706_v7 }
  0xfc   : > { %v461_v52 = vshll.u32 %v460_v49, 23  ;;  %v458_v19 = vor.u32 %v457_v45, %v456_v9  ;;  %v7607_v25 = vshll.u32 %v700_v4, 8  ;;  %v7611_v59 = vand.u32 8388607, %v795_v53 }
  0xfd   : > { %v6189_v22 = vadd.s32 4294967294, %v554_v10  ;;  %v650_v27 = vadd.s32 536870912, %v649_v13  ;;  %v7613_v29 = vshrl.u32 %v704_v6, 5  ;;  %v799_v24 = vshrl.u32 %v798_v46, 23 }
  0xfe   : > { %v462_v26 = vor.u32 4788187, %v461_v52  ;;  %v709_v31 = vshll.u32 %v7224_v56, %v706_v7  ;;  %v710_v32 = vshrl.u32 %v11251_v58, %v707_v14  ;;  %v713_v36 = vshrl.u32 %v11238_v61, %v707_v14 }
  0xff   : > { %vm6190_vm4 = vcmp.lt.s32.totalorder %v6189_v22, 0  ;;  %v7618_v35 = vshrl.u32 %v650_v27, 30  ;;  %v712_v37 = vshll.u32 %v11251_v58, %v706_v7  ;;  %v716_v51 = vshrl.u32 %v11249_v63, %v707_v14 }
 0x100   : > { %v557_v34 = vsel %vm6190_vm4, 0, %v6189_v22  ;;  %v465_v41 = vcvt.s32.f32 %v458_v19  ;;  %v715_v28 = vshll.u32 %v11238_v61, %v706_v7  ;;  %v463_v42 = vand.u32 2147483647, %v462_v26 }
 0x101   : > { %v558_v43 = vsub.s32 32, %v557_v34  ;;  %v562_v50 = vsub.s32 4294967266, %v557_v34  ;;  %v652_v54 = vshll.u32 %v7618_v35, 30  ;;  %v711_v57 = vor.u32 %v710_v32, %v709_v31 }
 0x102   : > { %v718_v62 = vshll.u32 %v11249_v63, %v706_v7  ;;  %v714_v2 = vor.u32 %v713_v36, %v712_v37  ;;  %v719_v4 = vshrl.u32 %v11247_v1, %v707_v14  ;;  %v717_v40 = vor.u32 %v716_v51, %v715_v28 }
 0x103   : > { %v560_v48 = vshrl.u32 %v542_v12, %v558_v43  ;;  %v563_v0 = vadd.s32 127, %v562_v50  ;;  %v7626_v5 = vsub.s32 %v649_v13, %v652_v54  ;;  %v721_v6 = vshll.u32 %v11247_v1, %v706_v7 }
 0x104   : > { %v722_v45 = vshrl.u32 %v11245_v8, %v707_v14  ;;  %v559_v49 = vshll.u32 %v7579_v60, %v557_v34  ;;  %v708_v9 = vshrl.u32 %v7224_v56, %v707_v14  ;;  %v720_v10 = vor.u32 %v719_v4, %v718_v62 }
 0x105   : > { %v564_v46 = vshll.u32 %v563_v0, 23  ;;  %v466_v38 = vmul.f32 %v465_v41, %v463_v42  ;;  %v655_v52 = vsub.s32 0, %v7626_v5  ;;  %vm724_vm5 = vcmp.lt.s32.totalorder %v7613_v29, 1 }
 0x106   : > { %v723_v12 = vor.u32 %v722_v45, %v721_v6  ;;  %v561_v19 = vor.u32 %v560_v48, %v559_v49  ;;  %vm726_vm6 = vcmp.lt.s32.totalorder %v7613_v29, 3  ;;  %vm727_vm7 = vcmp.lt.s32.totalorder %v7613_v29, 4 }
 0x107   : > { %v565_v13 = vor.u32 4788187, %v564_v46  ;;  %v6192_v7 = vmin.u32 %v655_v52, %v7626_v5  ;;  %v729_v22 = vsel %vm727_vm7, %v717_v40, 2102212464  ;;  %v732_v60 = vsel %vm724_vm5, %v711_v57, %v714_v2 }
 0x108   : > { %v733_v26 = vsel %vm727_vm7, %v720_v10, 920167782  ;;  %vm725_vm8 = vcmp.lt.s32.totalorder %v7613_v29, 2  ;;  %v728_v14 = vsel %vm724_vm5, %v708_v9, %v711_v57  ;;  %v736_v31 = vsel %vm724_vm5, %v714_v2, %v717_v40 }
 0x109   : > { %v734_v27 = vsel %vm726_vm6, %v717_v40, %v733_v26  ;;  %vm385_vm9 = vcmp.lt.s32.totalorder %v7427_v15, 0  ;;  %v566_v32 = vand.u32 2147483647, %v565_v13  ;;  %v657_v36 = vclz %v6192_v7 }
 0x10a   : > { %v735_v34 = vsel %vm725_vm8, %v732_v60, %v734_v27  ;;  %v737_v37 = vsel %vm727_vm7, %v723_v12, 1326507024  ;;  %v730_v51 = vsel %vm726_vm6, %v714_v2, %v729_v22  ;;  %v6199_v54 = vadd.s32 4294967169, %v799_v24 }
 0x10b   : > { %v738_v41 = vsel %vm726_vm6, %v720_v10, %v737_v37  ;;  %v7648_v43 = vmul.u32.u64.low %v7607_v25, %v735_v34  ;;  %v7649_v50 = vmul.u32.u64.high %v7607_v25, %v735_v34, %v7648_v43  ;;  %v6193_v28 = vadd.s32 4294967294, %v657_v36 }
 0x10c   : > { %v739_v42 = vsel %vm725_vm8, %v736_v31, %v738_v41  ;;  %v898_v57 = vand.u32 2147483647, %v7603_v11  ;;  %v568_v62 = vcvt.s32.f32 %v561_v19  ;;  %v645_v48 = vadd.s32 %v7582_v33, %v7577_v55 }
 0x10d   : > { %v7658_v0 = vmul.u32.u64.low %v7607_v25, %v739_v42  ;;  %v7659_v2 = vmul.u32.u64.high %v7607_v25, %v739_v42, %v7658_v0  ;;  %vm6194_vm10 = vcmp.lt.s32.totalorder %v6193_v28, 0  ;;  %v731_v4 = vsel %vm725_vm8, %v728_v14, %v730_v51 }
 0x10e   : > { %v805_v40 = vadd.s32 1, %v6199_v54  ;;  %v901_v6 = vand.u32 2139095040, %v7603_v11  ;;  %v467_v45 = vxor.u32 2147483648, %v466_v38  ;;  %v7664_v49 = vmul.f32 %v568_v62, %v566_v32 }
 0x10f   : > { %v660_v24 = vsel %vm6194_vm10, 0, %v6193_v28  ;;  %v750_v46 = vadd.s32 1, %v7649_v50  ;;  %v803_v55 = vor.u32 8388608, %v7611_v59  ;;  %v747_v33 = vmul.u32 %v7607_v25, %v731_v4 }
 0x110   : > { %v661_v9 = vsub.s32 32, %v660_v24  ;;  %v665_v10 = vsub.s32 4294967266, %v660_v24  ;;  %vm806_vm11 = vcmp.gt.s32.totalorder %v805_v40, 0  ;;  %vm749_vm12 = vc.u32 %v7659_v2, %v7648_v43 }
 0x111   : > { %v807_v29 = vsel %vm806_vm11, %v805_v40, 0  ;;  %v902_v52 = vshrl.u32 %v901_v6, 23  ;;  %v662_v12 = vshll.u32 %v7626_v5, %v660_v24  ;;  %v751_v7 = vsel %vm749_vm12, %v750_v46, %v7649_v50 }
 0x112   : > { %v663_v19 = vshrl.u32 %v645_v48, %v661_v9  ;;  %v666_v13 = vadd.s32 127, %v665_v10  ;;  %v7675_v22 = vsel %vm385_vm9, %v467_v45, %v466_v38  ;;  %v570_v59 = vxor.u32 2147483648, %v7664_v49 }
 0x113   : > { %v752_v60 = vadd.s32 %v751_v7, %v747_v33  ;;  %v809_v26 = vand.u32 31, %v807_v29  ;;  %v808_v27 = vshrl.u32 %v807_v29, 5  ;;  %v7678_v31 = vshll.u32 %v803_v55, 8 }
 0x114   : > { %v664_v25 = vor.u32 %v663_v19, %v662_v12  ;;  %v667_v14 = vshll.u32 %v666_v13, 23  ;;  %v6203_v34 = vadd.s32 4294967169, %v902_v52  ;;  %vm488_vm13 = vcmp.lt.s32.totalorder %v7429_v16, 0 }
 0x115   : > { %v753_v32 = vadd.s32 536870912, %v752_v60  ;;  %v810_v36 = vsub.s32 32, %v809_v26  ;;  %v812_v5 = vshll.u32 %v7224_v56, %v809_v26  ;;  %v815_v41 = vshll.u32 %v11251_v58, %v809_v26 }
 0x116   : > { %v668_v37 = vor.u32 4788187, %v667_v14  ;;  %v671_v51 = vcvt.s32.f32 %v664_v25  ;;  %v818_v38 = vshll.u32 %v11238_v61, %v809_v26  ;;  %v821_v54 = vshll.u32 %v11249_v63, %v809_v26 }
 0x117   : > { %v7683_v50 = vshrl.u32 %v753_v32, 30  ;;  %v813_v28 = vshrl.u32 %v11251_v58, %v810_v36  ;;  %v816_v42 = vshrl.u32 %v11238_v61, %v810_v36  ;;  %v819_v48 = vshrl.u32 %v11249_v63, %v810_v36 }
 0x118   : > { %v669_v62 = vand.u32 2147483647, %v668_v37  ;;  %v822_v0 = vshrl.u32 %v11247_v1, %v810_v36  ;;  %v824_v4 = vshll.u32 %v11247_v1, %v809_v26  ;;  %v825_v24 = vshrl.u32 %v11245_v8, %v810_v36 }
 0x119   : > { %v755_v40 = vshll.u32 %v7683_v50, 30  ;;  %v814_v6 = vor.u32 %v813_v28, %v812_v5  ;;  %v817_v45 = vor.u32 %v816_v42, %v815_v41  ;;  %v811_v46 = vshrl.u32 %v7224_v56, %v810_v36 }
 0x11a   : > { %v820_v9 = vor.u32 %v819_v48, %v818_v38  ;;  %v823_v10 = vor.u32 %v822_v0, %v821_v54  ;;  %vm827_vm14 = vcmp.lt.s32.totalorder %v808_v27, 1  ;;  %vm591_vm15 = vcmp.lt.s32.totalorder %v7431_v17, 0 }
 0x11b   : > { %v672_v55 = vmul.f32 %v671_v51, %v669_v62  ;;  %v7696_v33 = vsub.s32 %v752_v60, %v755_v40  ;;  %v826_v29 = vor.u32 %v825_v24, %v824_v4  ;;  %vm830_vm0 = vcmp.lt.s32.totalorder %v808_v27, 4 }
 0x11c   : > { %vm829_vm1 = vcmp.lt.s32.totalorder %v808_v27, 3  ;;  %v832_v52 = vsel %vm830_vm0, %v820_v9, 2102212464  ;;  %v835_v12 = vsel %vm827_vm14, %v814_v6, %v817_v45  ;;  %v836_v19 = vsel %vm830_vm0, %v823_v10, 920167782 }
 0x11d   : > { %v758_v13 = vsub.s32 0, %v7696_v33  ;;  %vm828_vm2 = vcmp.lt.s32.totalorder %v808_v27, 2  ;;  %v837_v7 = vsel %vm829_vm1, %v820_v9, %v836_v19  ;;  %v839_v26 = vsel %vm827_vm14, %v817_v45, %v820_v9 }
 0x11e   : > { %v831_v25 = vsel %vm827_vm14, %v811_v46, %v814_v6  ;;  %v833_v14 = vsel %vm829_vm1, %v817_v45, %v832_v52  ;;  %v838_v32 = vsel %vm828_vm2, %v835_v12, %v837_v7  ;;  %v840_v36 = vsel %vm830_vm0, %v826_v29, 1326507024 }
 0x11f   : > { %v6196_v5 = vmin.u32 %v758_v13, %v7696_v33  ;;  %v841_v60 = vsel %vm829_vm1, %v823_v10, %v840_v36  ;;  %v7702_v37 = vmul.u32.u64.low %v7678_v31, %v838_v32  ;;  %v7703_v51 = vmul.u32.u64.high %v7678_v31, %v838_v32, %v7702_v37 }
 0x120   : > { %v673_v41 = vxor.u32 2147483648, %v672_v55  ;;  %v842_v38 = vsel %vm828_vm2, %v839_v26, %v841_v60  ;;  %v7709_v28 = vand.u32 8388607, %v898_v57  ;;  %v908_v42 = vadd.s32 1, %v6203_v34 }
 0x121   : > { %v760_v54 = vclz %v6196_v5  ;;  %v7712_v62 = vmul.u32.u64.low %v7678_v31, %v842_v38  ;;  %v7713_v48 = vmul.u32.u64.high %v7678_v31, %v842_v38, %v7712_v62  ;;  %vm7717_vm3 = vcmp.le.f32.partialorder %v383_v18, 0.7853982 }
 0x122   : > { %v7724_v4 = vsel %vm488_vm13, %v570_v59, %v7664_v49  ;;  %v834_v40 = vsel %vm828_vm2, %v831_v25, %v833_v14  ;;  %vm909_vm4 = vcmp.gt.s32.totalorder %v908_v42, 0  ;;  %v471_v34 = vsel %vm7717_vm3, %v7427_v15, %v7675_v22 }
 0x123   : > { %v6197_v6 = vadd.s32 4294967294, %v760_v54  ;;  %v853_v45 = vadd.s32 1, %v7703_v51  ;;  %v910_v18 = vsel %vm909_vm4, %v908_v42, 0  ;;  %v469_v24 = vsub.s32 4, %v7540_v39 }
 0x124   : > { %v7735_v46 = vsel %vm591_vm15, %v673_v41, %v672_v55  ;;  %v748_v49 = vadd.s32 %v7648_v43, %v7659_v2  ;;  %v906_v59 = vor.u32 8388608, %v7709_v28  ;;  %v912_v27 = vand.u32 31, %v910_v18 }
 0x125   : > { %vm6198_vm5 = vcmp.lt.s32.totalorder %v6197_v6, 0  ;;  %v850_v9 = vmul.u32 %v7678_v31, %v834_v40  ;;  %vm852_vm6 = vc.u32 %v7713_v48, %v7702_v37  ;;  %6915 = vcosq.f32 %v471_v34 }
 0x126   : > { %v763_v22 = vsel %vm6198_vm5, 0, %v6197_v6  ;;  %v854_v10 = vsel %vm852_vm6, %v853_v45, %v7703_v51  ;;  %v911_v29 = vshrl.u32 %v910_v18, 5  ;;  %v913_v52 = vsub.s32 32, %v912_v27 }
 0x127   : > { %v764_v55 = vsub.s32 32, %v763_v22  ;;  %v768_v12 = vsub.s32 4294967266, %v763_v22  ;;  %v855_v19 = vadd.s32 %v854_v10, %v850_v9  ;;  %v470_v43 = vsel %vm385_vm9, %v469_v24, %v7540_v39 }
 0x128   : > { %v915_v2 = vshll.u32 %v7224_v56, %v912_v27  ;;  %v916_v31 = vshrl.u32 %v11251_v58, %v913_v52  ;;  %v919_v13 = vshrl.u32 %v11238_v61, %v913_v52  ;;  %6917 = vsinq.f32 %v471_v34 }
 0x129   : > { %v765_v7 = vshll.u32 %v7696_v33, %v763_v22  ;;  %v769_v26 = vadd.s32 127, %v768_v12  ;;  %v856_v25 = vadd.s32 536870912, %v855_v19  ;;  %v918_v14 = vshll.u32 %v11251_v58, %v912_v27 }
 0x12a   : > { %v766_v32 = vshrl.u32 %v748_v49, %v764_v55  ;;  %v917_v36 = vor.u32 %v916_v31, %v915_v2  ;;  %v921_v5 = vshll.u32 %v11238_v61, %v912_v27  ;;  %v922_v60 = vshrl.u32 %v11249_v63, %v913_v52 }
 0x12b   : > { %v770_v39 = vshll.u32 %v769_v26, 23  ;;  %v7754_v51 = vshrl.u32 %v856_v25, 30  ;;  %v924_v41 = vshll.u32 %v11249_v63, %v912_v27  ;;  %v925_v38 = vshrl.u32 %v11247_v1, %v913_v52 }
 0x12c   : > { %v920_v28 = vor.u32 %v919_v13, %v918_v14  ;;  %v923_v42 = vor.u32 %v922_v60, %v921_v5  ;;  %v927_v33 = vshll.u32 %v11247_v1, %v912_v27  ;;  %v928_v54 = vshrl.u32 %v11245_v8, %v913_v52 }
 0x12d   : > { %v858_v62 = vshll.u32 %v7754_v51, 30  ;;  %v914_v40 = vshrl.u32 %v7224_v56, %v913_v52  ;;  %v926_v34 = vor.u32 %v925_v38, %v924_v41  ;;  %v472_v6 = vsel %vm7717_vm3, 0, %v470_v43 }
 0x12e   : > { %v767_v45 = vor.u32 %v766_v32, %v765_v7  ;;  %v771_v18 = vor.u32 4788187, %v770_v39  ;;  %v929_v24 = vor.u32 %v928_v54, %v927_v33  ;;  %vm933_vm7 = vcmp.lt.s32.totalorder %v911_v29, 4 }
 0x12f   : > { %v6916_v49 = vpop.eup %6915  ;;  %v7764_v9 = vsub.s32 %v855_v19, %v858_v62  ;;  %vm930_vm8 = vcmp.lt.s32.totalorder %v911_v29, 1  ;;  %vm932_vm9 = vcmp.lt.s32.totalorder %v911_v29, 3  ;;  %v935_v27 = vsel %vm933_vm7, %v923_v42, 2102212464 }
 0x130   : > { %v934_v22 = vsel %vm930_vm8, %v914_v40, %v917_v36  ;;  %v936_v10 = vsel %vm932_vm9, %v920_v28, %v935_v27  ;;  %v938_v55 = vsel %vm930_vm8, %v917_v36, %v920_v28  ;;  %v939_v52 = vsel %vm933_vm7, %v926_v34, 920167782 }
 0x131   : > { %v861_v0 = vsub.s32 0, %v7764_v9  ;;  %vm931_vm10 = vcmp.lt.s32.totalorder %v911_v29, 2  ;;  %v940_v12 = vsel %vm932_vm9, %v923_v42, %v939_v52  ;;  %v942_v43 = vsel %vm930_vm8, %v920_v28, %v923_v42 }
 0x132   : > { %v6918_v2 = vpop.eup %6917  ;;  %v772_v31 = vand.u32 2147483647, %v771_v18  ;;  %v941_v19 = vsel %vm931_vm10, %v938_v55, %v940_v12  ;;  %v943_v13 = vsel %vm933_vm7, %v929_v24, 1326507024  ;;  %v946_v7 = vshll.u32 %v906_v59, 8 }
 0x133   : > { %v774_v26 = vcvt.s32.f32 %v767_v45  ;;  %v6200_v25 = vmin.u32 %v861_v0, %v7764_v9  ;;  %v937_v14 = vsel %vm931_vm10, %v934_v22, %v936_v10  ;;  %v944_v32 = vsel %vm932_vm9, %v926_v34, %v943_v13 }
 0x134   : > { %v945_v36 = vsel %vm931_vm10, %v942_v43, %v944_v32  ;;  %v7774_v5 = vmul.u32.u64.low %v946_v7, %v941_v19  ;;  %v7775_v60 = vmul.u32.u64.high %v946_v7, %v941_v19, %v7774_v5  ;;  %v476_v39 = vand.u32 3, %v472_v6 }
 0x135   : > { %v863_v41 = vclz %v6200_v25  ;;  %v7778_v38 = vmul.u32.u64.low %v946_v7, %v945_v36  ;;  %v7779_v28 = vmul.u32.u64.high %v946_v7, %v945_v36, %v7778_v38  ;;  %v479_v42 = vxor.u32 2147483648, %v6918_v2 }
 0x136   : > { %v775_v33 = vmul.f32 %v774_v26, %v772_v31  ;;  %v851_v59 = vadd.s32 %v7702_v37, %v7713_v48  ;;  %v482_v54 = vxor.u32 2147483648, %v6916_v49  ;;  %vm7785_vm11 = vcmp.le.f32.partialorder %v486_v20, 0.7853982 }
 0x137   : > { %v6201_v62 = vadd.s32 4294967294, %v863_v41  ;;  %v953_v40 = vmul.u32 %v946_v7, %v937_v14  ;;  %v572_v34 = vsub.s32 4, %v7567_v21  ;;  %v574_v6 = vsel %vm7785_vm11, %v7429_v16, %v7724_v4 }
 0x138   : > { %v956_v45 = vadd.s32 1, %v7775_v60  ;;  %vm478_vm12 = vcmp.eq.s32.totalorder %v476_v39, 0  ;;  %vm481_vm14 = vcmp.eq.s32.totalorder %v476_v39, 2  ;;  %6919 = vcosq.f32 %v574_v6 }
 0x139   : > { %vm6202_vm0 = vcmp.lt.s32.totalorder %v6201_v62, 0  ;;  %vm955_vm1 = vc.u32 %v7779_v28, %v7774_v5  ;;  %v480_v20 = vsel %vm478_vm12, %v6916_v49, %v479_v42  ;;  %v483_v37 = vsel %vm481_vm14, %v482_v54, %v6918_v2 }
 0x13a   : > { %v776_v48 = vxor.u32 2147483648, %v775_v33  ;;  %v866_v18 = vsel %vm6202_vm0, 0, %v6201_v62  ;;  %v957_v24 = vsel %vm955_vm1, %v956_v45, %v7775_v60  ;;  %vm477_vm2 = vcmp.lt.s32.totalorder %v476_v39, 2 }
 0x13b   : > { %v867_v27 = vsub.s32 32, %v866_v18  ;;  %v871_v22 = vsub.s32 4294967266, %v866_v18  ;;  %v958_v10 = vadd.s32 %v957_v24, %v953_v40  ;;  %v573_v4 = vsel %vm488_vm13, %v572_v34, %v7567_v21 }
 0x13c   : > { %v868_v55 = vshll.u32 %v7764_v9, %v866_v18  ;;  %v484_v52 = vsel %vm477_vm2, %v480_v20, %v483_v37  ;;  %6921 = vsinq.f32 %v574_v6  ;;  %v675_v0 = vsub.s32 4, %v7618_v35 }
 0x13d   : > { %v869_v49 = vshrl.u32 %v851_v59, %v867_v27  ;;  %v872_v12 = vadd.s32 127, %v871_v22  ;;  %v959_v43 = vadd.s32 536870912, %v958_v10  ;;  %vm7805_vm3 = vcmp.le.f32.partialorder %v589_v23, 0.7853982 }
 0x13e   : > { %vm694_vm4 = vcmp.lt.s32.totalorder %v7447_v30, 0  ;;  %vm475_vm5 = vweird.f32 %v7427_v15  ;;  %v575_v21 = vsel %vm7785_vm11, 0, %v573_v4  ;;  %v677_v9 = vsel %vm7805_vm3, %v7431_v17, %v7735_v46 }
 0x13f   : > { %v870_v31 = vor.u32 %v869_v49, %v868_v55  ;;  %v873_v19 = vshll.u32 %v872_v12, 23  ;;  %v7817_v13 = vshrl.u32 %v959_v43, 30  ;;  %v676_v23 = vsel %vm591_vm15, %v675_v0, %v7618_v35 }
 0x140   : > { %v777_v7 = vsel %vm694_vm4, %v776_v48, %v775_v33  ;;  %v485_v15 = vsel %vm475_vm5, nan, %v484_v52  ;;  %6923 = vcosq.f32 %v677_v9  ;;  %v579_v14 = vand.u32 3, %v575_v21  ;;  %v7854_v48 = vpop.permute.xlu1 %1009 }
 0x141   : > { %v874_v26 = vor.u32 4788187, %v873_v19  ;;  %v961_v25 = vshll.u32 %v7817_v13, 30  ;;  %6925 = vsinq.f32 %v677_v9  ;;  %v877_v46 = vcvt.s32.f32 %v870_v31 }
 0x142   : > { %v6920_v32 = vpop.eup %6919  ;;  %v678_v36 = vsel %vm7805_vm3, 0, %v676_v23  ;;  %vm7829_vm13 = vcmp.le.f32.partialorder %v692_v47, 0.7853982  ;;  %v778_v35 = vsub.s32 4, %v7683_v50  ;;  %vm797_vm15 = vcmp.lt.s32.totalorder %v7457_v44, 0 }
 0x143   : > { %v875_v39 = vand.u32 2147483647, %v874_v26  ;;  %v7834_v41 = vsub.s32 %v958_v10, %v961_v25  ;;  %v585_v38 = vxor.u32 2147483648, %v6920_v32  ;;  %v780_v42 = vsel %vm7829_vm13, %v7447_v30, %v777_v7 }
 0x144   : > { %v954_v33 = vadd.s32 %v7774_v5, %v7779_v28  ;;  %vm578_vm6 = vweird.f32 %v7429_v16  ;;  %v779_v54 = vsel %vm694_vm4, %v778_v35, %v7683_v50  ;;  %6927 = vcosq.f32 %v780_v42 }
 0x145   : > { %v878_v47 = vmul.f32 %v877_v46, %v875_v39  ;;  %v964_v59 = vsub.s32 0, %v7834_v41  ;;  %vm584_vm7 = vcmp.eq.s32.totalorder %v579_v14, 2  ;;  %v682_v62 = vand.u32 3, %v678_v36 }
 0x146   : > { %v6922_v29 = vpop.eup %6921  ;;  %v1001_v40 = vsub.f32 1.0, %v485_v15  ;;  %6929 = vsinq.f32 %v780_v42  ;;  %vm580_vm8 = vcmp.lt.s32.totalorder %v579_v14, 2  ;;  %vm581_vm9 = vcmp.eq.s32.totalorder %v579_v14, 0 }
 0x147   : > { %v879_v34 = vxor.u32 2147483648, %v878_v47  ;;  %v6204_v6 = vmin.u32 %v964_v59, %v7834_v41  ;;  %v582_v45 = vxor.u32 2147483648, %v6922_v29  ;;  %v586_v5 = vsel %vm584_vm7, %v585_v38, %v6922_v29 }
 0x148   : > { %vm681_vm10 = vweird.f32 %v7431_v17  ;;  %v781_v28 = vsel %vm7829_vm13, 0, %v779_v54  ;;  %v881_v50 = vsub.s32 4, %v7754_v51  ;;  %vm7858_vm11 = vcmp.le.f32.partialorder %v795_v53, 0.7853982 }
 0x149   : > { %v880_v20 = vsel %vm797_vm15, %v879_v34, %v878_v47  ;;  %v966_v37 = vclz %v6204_v6  ;;  %v583_v18 = vsel %vm581_vm9, %v6920_v32, %v582_v45  ;;  %v7863_v10 = vmul.f32 %v7854_v48, %v1001_v40 }
 0x14a   : > { %v6924_v27 = vpop.eup %6923  ;;  %v587_v22 = vsel %vm580_vm8, %v583_v18, %v586_v5  ;;  %v882_v4 = vsel %vm797_vm15, %v881_v50, %v7754_v51  ;;  %v883_v55 = vsel %vm7858_vm11, %v7457_v44, %v880_v20  ;;  %vm684_vm12 = vcmp.eq.s32.totalorder %v682_v62, 0 }
 0x14b   : > { %v6926_v52 = vpop.eup %6925  ;;  %v6205_v0 = vadd.s32 4294967294, %v966_v37  ;;  %v688_v53 = vxor.u32 2147483648, %v6924_v27  ;;  %v785_v49 = vand.u32 3, %v781_v28  ;;  %v588_v12 = vsel %vm578_vm6, nan, %v587_v22  ;;  %v7892_v37 = vpop.permute.xlu1 %1014 }
 0x14c   : > { %v685_v43 = vxor.u32 2147483648, %v6926_v52  ;;  %vm687_vm14 = vcmp.eq.s32.totalorder %v682_v62, 2  ;;  %6931 = vcosq.f32 %v883_v55  ;;  %v884_v51 = vsel %vm7858_vm11, 0, %v882_v4 }
 0x14d   : > { %vm6206_vm0 = vcmp.lt.s32.totalorder %v6205_v0, 0  ;;  %v689_v2 = vsel %vm687_vm14, %v688_v53, %v6926_v52  ;;  %6933 = vsinq.f32 %v883_v55  ;;  %vm683_vm1 = vcmp.lt.s32.totalorder %v682_v62, 2  ;;  %v7079_v52 = vld [vmem:[%s7412_s20 + $0x8] sm:$0xff] }
 0x14e   : > { %v969_v21 = vsel %vm6206_vm0, 0, %v6205_v0  ;;  %v686_v9 = vsel %vm684_vm12, %v6924_v27, %v685_v43  ;;  %vm784_vm2 = vweird.f32 %v7447_v30  ;;  %v6928_v31 = vpop.eup %6927  ;;  %vm790_vm3 = vcmp.eq.s32.totalorder %v785_v49, 2 }
 0x14f   : > { %v970_v19 = vsub.s32 32, %v969_v21  ;;  %v974_v23 = vsub.s32 4294967266, %v969_v21  ;;  %v690_v16 = vsel %vm683_vm1, %v686_v9, %v689_v2  ;;  %v971_v15 = vshll.u32 %v7834_v41, %v969_v21  ;;  %v7081_v9 = vld [vmem:[%s7412_s20 + $0x18] sm:$0xff] }
 0x150   : > { %v6930_v7 = vpop.eup %6929  ;;  %v1002_v26 = vsub.f32 1.0, %v588_v12  ;;  %v791_v25 = vxor.u32 2147483648, %v6928_v31  ;;  %v888_v14 = vand.u32 3, %v884_v51  ;;  %v691_v36 = vsel %vm681_vm10, nan, %v690_v16  ;;  %v7080_v12 = vld [vmem:[%s7412_s20] sm:$0xff] }
 0x151   : > { %v972_v32 = vshrl.u32 %v954_v33, %v970_v19  ;;  %v975_v46 = vadd.s32 127, %v974_v23  ;;  %v788_v60 = vxor.u32 2147483648, %v6930_v7  ;;  %vm786_vm4 = vcmp.lt.s32.totalorder %v785_v49, 2 }
 0x152   : > { %vm787_vm5 = vcmp.eq.s32.totalorder %v785_v49, 0  ;;  %v792_v35 = vsel %vm790_vm3, %v791_v25, %v6930_v7  ;;  %v316_v39 = vlaneseq  ;;  %vm887_vm13 = vweird.f32 %v7457_v44 }
 0x153   : > { %v973_v38 = vor.u32 %v972_v32, %v971_v15  ;;  %v976_v42 = vshll.u32 %v975_v46, 23  ;;  %v789_v47 = vsel %vm787_vm5, %v6928_v31, %v788_v60  ;;  %v984_v41 = vsub.s32 4, %v7817_v13  ;;  %v7083_v60 = vld [vmem:[%s7412_s20 + $0x20] sm:$0xff] }
 0x154   : > { %vm900_vm15 = vcmp.lt.s32.totalorder %v7603_v11, 0  ;;  %v1003_v33 = vsub.f32 1.0, %v691_v36  ;;  %v1018_v59 = vmul.f32 %v7854_v48, %v1002_v26  ;;  %v793_v17 = vsel %vm786_vm4, %v789_v47, %v792_v35 }
 0x155   : > { %v317_v54 = vand.u32 127, %v316_v39  ;;  %v977_v29 = vor.u32 4788187, %v976_v42  ;;  %v794_v62 = vsel %vm784_vm2, nan, %v793_v17  ;;  %vm889_vm6 = vcmp.lt.s32.totalorder %v888_v14, 2 }
 0x156   : > { %vm7888_vm7 = vcmp.le.f32.partialorder %v898_v57, 0.7853982  ;;  %v322_v34 = vstv %s6179_s21  ;;  %v6932_v6 = vpop.eup %6931  ;;  %vm890_vm8 = vcmp.eq.s32.totalorder %v888_v14, 0  ;;  %v1004_v45 = vsub.f32 1.0, %v794_v62 }
 0x157   : > { %v318_v5 = vadd.s32 128, %v317_v54  ;;  %v6934_v28 = vpop.eup %6933  ;;  %v978_v50 = vand.u32 2147483647, %v977_v29  ;;  %v980_v20 = vcvt.s32.f32 %v973_v38  ;;  %vm893_vm9 = vcmp.eq.s32.totalorder %v888_v14, 2  ;;  %v7082_v14 = vld [vmem:[%s7412_s20 + $0x10] sm:$0xff] }
 0x158   : > { %v894_v30 = vxor.u32 2147483648, %v6932_v6  ;;  %v11232_v18 = vmov 0.0   ;;  %v1019_v57 = vmul.f32 %v7854_v48, %v1003_v33  ;;  %v891_v24 = vxor.u32 2147483648, %v6934_v28 }
 0x159   : > { %1212 = vmatprep.mubr.f32.mxu0 %v11232_v18  ;;  %v1020_v27 = vmul.f32 %v7892_v37, %v1004_v45  ;;  %v324_v22 = vadd.s32 %v322_v34, %v318_v5  ;;  %v981_v4 = vmul.f32 %v980_v20, %v978_v50  ;;  %v1024_v0 = vadd.f32 %v7079_v52, %v1018_v59  ;;  %v349_v59 = vld [vmem:[%s11220_s6] sm:$0xff] }
 0x15a   : > { %v895_v55 = vsel %vm893_vm9, %v894_v30, %v6934_v28  ;;  %v323_v53 = vadd.s32 %v322_v34, %v317_v54  ;;  %v892_v49 = vsel %vm890_vm8, %v6932_v6, %v891_v24  ;;  %v1023_v43 = vadd.f32 %v7080_v12, %v7863_v10  ;;  %v350_v30 = vld [vmem:[%s11220_s6 + $0x8] sm:$0xff] }
 0x15b   : > { %vm327_vm10 = vcmp.ge.s32.totalorder %v324_v22, 0  ;;  %vm330_vm11 = vcmp.lt.s32.totalorder %v324_v22, 640  ;;  %v982_v2 = vxor.u32 2147483648, %v981_v4  ;;  %v896_v48 = vsel %vm889_vm6, %v892_v49, %v895_v55 }
 0x15c   : > { %vm333_vm12 = vmand %vm327_vm10, %vm330_vm11  ;;  %vm326_vm14 = vcmp.ge.s32.totalorder %v323_v53, 0  ;;  %vm329_vm0 = vcmp.lt.s32.totalorder %v323_v53, 640  ;;  %v897_v51 = vsel %vm887_vm13, nan, %v896_v48  ;;  %v1026_v31 = vadd.f32 %v7081_v9, %v1020_v27 }
 0x15d   : > { %v7905_v21 = vsel %vm333_vm12, 1.0, %v11232_v18  ;;  %vm332_vm1 = vmand %vm326_vm14, %vm329_vm0  ;;  %v319_v19 = vadd.s32 256, %v317_v54  ;;  %v983_v10 = vsel %vm900_vm15, %v982_v2, %v981_v4  ;;  %v1005_v23 = vsub.f32 1.0, %v897_v51  ;;  %v352_v4 = vld [vmem:[%s11216_s2 + $0x8] sm:$0xff] }
 0x15e   : > { %v7911_v16 = vmul.f32 %v7905_v21, %v1024_v0  ;;  %v7914_v7 = vsel %vm332_vm1, 1.0, %v11232_v18  ;;  %v986_v44 = vsel %vm7888_vm7, %v7603_v11, %v983_v10  ;;  %v1025_v32 = vadd.f32 %v7082_v14, %v1019_v57  ;;  %v351_v57 = vld [vmem:[%s11216_s2] sm:$0xff] }
 0x15f   : > { %v7920_v15 = vmul.f32 %v7914_v7, %v1023_v43  ;;  %v325_v26 = vadd.s32 %v322_v34, %v319_v19  ;;  %6935 = vcosq.f32 %v986_v44  ;;  %v1021_v25 = vmul.f32 %v7892_v37, %v1005_v23 }
 0x160   : > { %1053 = vrot.lane.b32.xlu1 %v7911_v16, %s7231_s10  ;;  %6937 = vsinq.f32 %v986_v44  ;;  %v7929_v46 = vmul.f32 %v7914_v7, %v1026_v31  ;;  %v985_v36 = vsel %vm900_vm15, %v984_v41, %v7817_v13  ;;  %vm1037_vm5 = vcmask 195584  }
 0x161   : > { %1051 = vrot.lane.b32.xlu0 %v7920_v15, %s7231_s10  ;;  %vm328_vm2 = vcmp.ge.s32.totalorder %v325_v26, 0  ;;  %vm331_vm3 = vcmp.lt.s32.totalorder %v325_v26, 640  ;;  %v1027_v35 = vadd.f32 %v7083_v60, %v1021_v25  ;;  %vm11230_vm13 = vcmask 7168  }
 0x162   : > { %vm334_vm4 = vmand %vm328_vm2, %vm331_vm3  ;;  %1043 = vst.msk [vmem:[#allocation2] sm:$0xff] %vm11230_vm13, %v11232_v18  ;;  %v987_v13 = vsel %vm7888_vm7, 0, %v985_v36  ;;  %v6524_v47 = vpack.c.bf16 %v7929_v46, %v7920_v15  ;;  %v1300_v40 = vadd.f32 1e-09, %v349_v59  ;;  %vm990_vm8 = vweird.f32 %v7603_v11  ;;  %v7979_v11 = vld [vmem:[%s11215_s1] sm:$0xff] }
 0x163   : > { %v7938_v39 = vsel %vm334_vm4, 1.0, %v11232_v18  ;;  %v7941_v38 = vmul.f32 %v7905_v21, %v1027_v35  ;;  %1044 = vst.msk [vmem:[#allocation2 + $0x18] sm:$0xff] %vm11230_vm13, %v11232_v18  ;;  %v991_v33 = vand.u32 3, %v987_v13  ;;  %vm1141_vm9 = vcmask 392192  }
 0x164   : > { %v1031_v42 = vmul.f32 %v7938_v39, %v1025_v32  ;;  %6939 = vrcp.f32 %v1300_v40  ;;  %6440 = vmatprep.mubr.msk.f32.mxu1 %vm1141_vm9, %v7979_v11  ;;  %v1306_v24 = vadd.f32 %v349_v59, %v349_v59  ;;  %v1307_v55 = vadd.f32 %v350_v30, %v350_v30 }
 0x165   : > { %1057 = vrot.lane.b32.xlu0 %v7929_v46, %s7231_s10  ;;  %1059 = vrot.lane.b32.xlu1 %v7941_v38, %s7231_s10  ;;  %v6522_v41 = vpack.c.bf16 %v7941_v38, %v7911_v16  ;;  %vm996_vm15 = vcmp.eq.s32.totalorder %v991_v33, 2  ;;  %vm993_vm6 = vcmp.eq.s32.totalorder %v991_v33, 0  ;;  %vm992_vm7 = vcmp.lt.s32.totalorder %v991_v33, 2 }
 0x166   : > { %1038 = vst.msk [vmem:[#allocation2 + $0x40] sm:$0xff] %vm1037_vm5, %v1031_v42  ;;  %vm1073_vm10 = vcmask 1047560   ;;  %vm1105_vm11 = vcmask 187392   ;;  %vm11229_vm12 = vcmask 195768   ;;  %vm11228_vm14 = vcmask 1039360  }
 0x169   : > { %1082 = vrot.lane.b32.xlu0 %v7911_v16, %s7232_s14  ;;  %v6936_v17 = vpop.eup %6935  ;;  %1084 = vrot.lane.b32.xlu1 %v1031_v42, %s7232_s14 }
 0x16a   : > { %v6938_v54 = vpop.eup %6937  ;;  %v997_v29 = vxor.u32 2147483648, %v6936_v17 }
 0x16b   : > { %v994_v62 = vxor.u32 2147483648, %v6938_v54 }
 0x16c   : > { %v998_v34 = vsel %vm996_vm15, %v997_v29, %v6938_v54 }
 0x16d   : > { %1088 = vrot.lane.b32.xlu0 %v7941_v38, %s7232_s14  ;;  %v995_v6 = vsel %vm993_vm6, %v6936_v17, %v994_v62  ;;  %v1121_v54 = vld [vmem:[#allocation2 + $0x40] sm:$0xff] }
 0x16e   : > { %v999_v45 = vsel %vm992_vm7, %v995_v6, %v998_v34  ;;  %v6940_v27 = vpop.eup %6939 }
 0x16f   : > { %v1000_v5 = vsel %vm990_vm8, nan, %v999_v45  ;;  %v1303_v22 = vmul.f32 0.5, %v6940_v27 }
 0x170   : > { %v1006_v28 = vsub.f32 1.0, %v1000_v5 }
 0x171   : > { %1080 = vrot.lane.b32.xlu0 %v7920_v15, %s7232_s14 }
 0x172   : > { %v1022_v50 = vmul.f32 %v7892_v37, %v1006_v28  ;;  %v1301_v37 = vadd.f32 1e-09, %v350_v30 }
 0x174   : > { %v1028_v20 = vadd.f32 %v1022_v50, %v7592_v3  ;;  %6941 = vrcp.f32 %v1301_v37 }
 0x175   : > { %1055 = vrot.lane.b32.xlu0 %v1031_v42, %s7231_s10 }
 0x176   : > { %v1034_v3 = vmul.f32 %v7938_v39, %v1028_v20 }
 0x178   : > { %1041 = vst.msk [vmem:[#allocation2 + $0x58] sm:$0xff] %vm1037_vm5, %v1034_v3  ;;  %1090 = vrot.lane.b32.xlu1 %v1034_v3, %s7232_s14 }
 0x179   : > { %1133 = vperm.xlu0 %6909, %v351_v57  }
 0x17c   : > { %1086 = vrot.lane.b32.xlu1 %v7929_v46, %s7232_s14 }
 0x17d   : > { %1310 = vperm.xlu0 %6909, %v1306_v24  }
 0x17e   : > { %v6942_v52 = vpop.eup %6941 }
 0x17f   : > { %v1305_v0 = vmul.f32 0.5, %v6942_v52  ;;  %v1124_v59 = vld [vmem:[#allocation2 + $0x58] sm:$0xff] }
 0x180   : > { %1061 = vrot.lane.b32.xlu1 %v1034_v3, %s7231_s10  ;;  %v6534_v40 = vpack.c.bf16 %v1124_v59, %v1121_v54 }
 0x181   : > { %1950 = vperm.xlu0 %6909, %v1303_v22  }
 0x184   : > { %1138 = vperm.xlu1 %6910, %v352_v4  }
 0x188   : > { %1315 = vperm.xlu1 %6910, %v1307_v55  }
 0x18c   : > { %1955 = vperm.xlu1 %6910, %v1305_v0  }
 0x1d2   : > { %v1054_v53 = vpop.permute.xlu1 %1053 }
 0x1d3   : > { %v1052_v49 = vpop.permute.xlu0 %1051 }
 0x1d4   : > { %1074 = vst.msk [vmem:[#allocation2] sm:$0xff] %vm1073_vm10, %v1052_v49  ;;  %v1063_v2 = vsel %vm11230_vm13, %v1052_v49, %v1054_v53 }
 0x1d7   : > { %v1058_v12 = vpop.permute.xlu0 %1057  ;;  %v1060_v43 = vpop.permute.xlu1 %1059 }
 0x1d8   : > { %1077 = vst.msk [vmem:[#allocation2 + $0x18] sm:$0xff] %vm1073_vm10, %v1058_v12  ;;  %v1065_v48 = vsel %vm11230_vm13, %v1058_v12, %v1060_v43 }
 0x1d9   : > { %v6518_v51 = vpack.c.bf16 %v1065_v48, %v1063_v2 }
 0x1db   : > { %v1083_v9 = vpop.permute.xlu0 %1082  ;;  %v1113_v31 = vld [vmem:[#allocation2] sm:$0xff]  ;;  %v1085_v19 = vpop.permute.xlu1 %1084  ;;  %6519 = vmatprep.subr.bf16.mxu0 %v6518_v51 }
 0x1dc   : > { %1982 = vst.msk [vmem:[#allocation2] sm:$0xff] %vm11230_vm13, %v11232_v18  ;;  %v1094_v36 = vsel %vm11228_vm14, %v1083_v9, %v1085_v19 }
 0x1dd   : > { %1106 = vst.msk [vmem:[#allocation2 + $0x70] sm:$0xff] %vm1105_vm11, %v1085_v19 }
 0x1de   : > { %1111 = vst.msk [vmem:[#allocation2 + $0x70] sm:$0xff] %vm11229_vm12, %v11232_v18 }
 0x1df   : > { %v1089_v10 = vpop.permute.xlu0 %1088  ;;  %v1116_v23 = vld [vmem:[#allocation2 + $0x18] sm:$0xff] }
 0x1e0   : > { %v6520_v44 = vpack.c.bf16 %v1116_v23, %v1113_v31  ;;  %1983 = vst.msk [vmem:[#allocation2 + $0x18] sm:$0xff] %vm11230_vm13, %v11232_v18 }
 0x1e2   : > { %6521 = vmatpush1.bf16.msra.mxu0 %v6520_v44 }
 0x1e3   : > { %v1081_v26 = vpop.permute.xlu0 %1080  ;;  %6523 = vmatprep.subr.bf16.mxu0 %v6522_v41 }
 0x1e4   : > { %v1093_v15 = vsel %vm11228_vm14, %v1081_v26, %v1083_v9 }
 0x1e5   : > { %v1127_v29 = vld [vmem:[#allocation2 + $0x70] sm:$0xff] }
 0x1e6   : > { %6525 = vmatpush1.bf16.msra.mxu0 %v6524_v47  ;;  %v356_v47 = vld [vmem:[%s11215_s1 + $0x8] sm:$0xff] }
 0x1e7   : > { %v1056_v25 = vpop.permute.xlu0 %1055 }
 0x1e8   : > { %v1064_v14 = vsel %vm11230_vm13, %v1054_v53, %v1056_v25 }
 0x1e9   : > { %1076 = vst.msk [vmem:[#allocation2 + $0x10] sm:$0xff] %vm1037_vm5, %v1064_v14 }
 0x1ea   : > { %v1091_v32 = vpop.permute.xlu1 %1090 }
 0x1eb   : > { %1109 = vst.msk [vmem:[#allocation2 + $0x88] sm:$0xff] %vm1105_vm11, %v1091_v32  ;;  %v1096_v60 = vsel %vm11228_vm14, %v1089_v10, %v1091_v32 }
 0x1ec   : > { %1112 = vst.msk [vmem:[#allocation2 + $0x88] sm:$0xff] %vm11229_vm12, %v11232_v18  ;;  %v6526_v16 = vpack.c.bf16 %v1096_v60, %v1094_v36 }
 0x1ee   : > { %v1087_v46 = vpop.permute.xlu1 %1086  ;;  %6527 = vmatprep.subr.bf16.mxu0 %v6526_v16 }
 0x1ef   : > { %v1095_v35 = vsel %vm11228_vm14, %v1087_v46, %v1089_v10 }
 0x1f0   : > { %v6528_v38 = vpack.c.bf16 %v1095_v35, %v1093_v15  ;;  %v1115_v41 = vld [vmem:[#allocation2 + $0x10] sm:$0xff] }
 0x1f2   : > { %v1062_v42 = vpop.permute.xlu1 %1061  ;;  %6529 = vmatpush1.bf16.msra.mxu0 %v6528_v38 }
 0x1f3   : > { %v1066_v13 = vsel %vm11230_vm13, %v1060_v43, %v1062_v42  ;;  %v1130_v62 = vld [vmem:[#allocation2 + $0x88] sm:$0xff] }
 0x1f4   : > { %1079 = vst.msk [vmem:[#allocation2 + $0x28] sm:$0xff] %vm1037_vm5, %v1066_v13  ;;  %v6538_v34 = vpack.c.bf16 %v1130_v62, %v1127_v29 }
 0x1f5   : > { %6207 = vmatmul.mubr.msk.f32.vlgmr.msra.gmra.mrb[0].mxu0 %vm1141_vm9, %v7979_v11 }
 0x1f6   : > { %1218 = vmatprep.mubr.f32.mxu0 %v11232_v18 }
 0x1f8   : > { %v8032_v6 = vpop.permute.xlu0 %1133 }
 0x1f9   : > { %6208 = vmatmul.mubr.msk.f32.gmra.mrb[2].mxu0 %vm1141_vm9, %v356_v47 }
 0x1fa   : > { %2146 = vmatprep.mubr.f32.mxu0 %v11232_v18 }
 0x1fb   : > { %v1118_v33 = vld [vmem:[#allocation2 + $0x28] sm:$0xff] }
 0x1fc   : > { %v6530_v17 = vpack.c.bf16 %v1118_v33, %v1115_v41  ;;  %v8039_v20 = vpop.permute.xlu0 %1310 }
 0x1fe   : > { %6531 = vmatprep.subr.bf16.mxu1 %v6530_v17 }
 0x1ff   : > { %6533 = vmatpush3.bf16.msra.mxu1 %v6530_v17 }
 0x200   : > { %6535 = vmatprep.subr.bf16.mxu1 %v6534_v40 }
 0x203   : > { %6537 = vmatpush3.bf16.msra.mxu1 %v6534_v40  ;;  %v8037_v50 = vpop.permute.xlu1 %1138 }
 0x204   : > { %6539 = vmatprep.subr.bf16.mxu1 %v6538_v34 }
 0x207   : > { %6541 = vmatpush3.bf16.msra.mxu1 %v6538_v34  ;;  %v8061_v53 = vpop.permute.xlu1 %1315 }
 0x20a   : > { %6441 = vmatmul.mubr.msk.f32.vlgmr.msra.gmra.mrb[0].mxu1 %vm1141_vm9, %v356_v47 }
 0x2c8   : > { %v1214_v45 = vpop.f32.mrb[0].mxu0 }
 0x2c9   : > { %v8035_v5 = vadd.f32 %v1214_v45, %v8032_v6  ;;  %v1216_v28 = vpop.f32.mrb[1].mxu0 }
 0x2ca   : > { %v8042_v30 = vadd.f32 %v1216_v28, %v8032_v6 }
 0x2cb   : > { %v8046_v11 = vmul.f32 %v8039_v20, %v8035_v5 }
 0x2cc   : > { %v8050_v57 = vmul.f32 %v8039_v20, %v8042_v30  ;;  %v1220_v3 = vpop.f32.mrb[2].mxu0 }
 0x2cd   : > { %v1324_v37 = vand.u32 2147483647, %v8046_v11  ;;  %v1327_v24 = vand.u32 2139095040, %v8046_v11  ;;  %v1222_v27 = vpop.f32.mrb[3].mxu0  ;;  %v8059_v0 = vadd.f32 %v1220_v3, %v8037_v50 }
 0x2ce   : > { %v1427_v22 = vand.u32 2147483647, %v8050_v57  ;;  %v1430_v4 = vand.u32 2139095040, %v8050_v57  ;;  %v8072_v36 = vadd.f32 %v1222_v27, %v8037_v50 }
 0x2cf   : > { %v1328_v55 = vshrl.u32 %v1327_v24, 23  ;;  %v1331_v52 = vand.u32 8388607, %v1324_v37  ;;  %v8067_v2 = vmul.f32 %v8061_v53, %v8059_v0 }
 0x2d0   : > { %v1431_v49 = vshrl.u32 %v1430_v4, 23  ;;  %v1434_v12 = vand.u32 8388607, %v1427_v22 }
 0x2d1   : > { %v6211_v43 = vadd.s32 4294967169, %v1328_v55  ;;  %v1332_v51 = vor.u32 8388608, %v1331_v52  ;;  %v1633_v10 = vand.u32 2147483647, %v8067_v2  ;;  %v1636_v23 = vand.u32 2139095040, %v8067_v2 }
 0x2d2   : > { %v6215_v48 = vadd.s32 4294967169, %v1431_v49  ;;  %v1435_v31 = vor.u32 8388608, %v1434_v12 }
 0x2d3   : > { %v1334_v9 = vadd.s32 1, %v6211_v43  ;;  %v1637_v26 = vshrl.u32 %v1636_v23, 23  ;;  %v8074_v60 = vshll.u32 %v1332_v51, 8  ;;  %v8082_v46 = vand.u32 8388607, %v1633_v10 }
 0x2d4   : > { %v1437_v19 = vadd.s32 1, %v6215_v48  ;;  %v8078_v15 = vshll.u32 %v1435_v31, 8 }
 0x2d5   : > { %vm1335_vm0 = vcmp.gt.s32.totalorder %v1334_v9, 0  ;;  %v8085_v13 = vadd.s32 4294967169, %v1637_v26 }
 0x2d6   : > { %v1336_v44 = vsel %vm1335_vm0, %v1334_v9, 0  ;;  %vm1438_vm1 = vcmp.gt.s32.totalorder %v1437_v19, 0 }
 0x2d7   : > { %v1337_v25 = vshrl.u32 %v1336_v44, 5  ;;  %v1338_v14 = vand.u32 31, %v1336_v44  ;;  %v1439_v32 = vsel %vm1438_vm1, %v1437_v19, 0 }
 0x2d8   : > { %v8076_v16 = vshrl.u32 %v1439_v32, 5  ;;  %v1441_v42 = vand.u32 31, %v1439_v32 }
 0x2d9   : > { %v1339_v35 = vsub.s32 32, %v1338_v14  ;;  %v1341_v38 = vshll.u32 %v7224_v56, %v1338_v14  ;;  %v1344_v47 = vshll.u32 %v11251_v58, %v1338_v14  ;;  %v1347_v41 = vshll.u32 %v11238_v61, %v1338_v14 }
 0x2da   : > { %v1350_v33 = vshll.u32 %v11249_v63, %v1338_v14  ;;  %v1353_v59 = vshll.u32 %v11247_v1, %v1338_v14  ;;  %vm1356_vm2 = vcmp.lt.s32.totalorder %v1337_v25, 1  ;;  %vm1357_vm3 = vcmp.lt.s32.totalorder %v1337_v25, 2 }
 0x2db   : > { %v1342_v17 = vshrl.u32 %v11251_v58, %v1339_v35  ;;  %v1345_v54 = vshrl.u32 %v11238_v61, %v1339_v35  ;;  %v1348_v29 = vshrl.u32 %v11249_v63, %v1339_v35  ;;  %v1340_v62 = vshrl.u32 %v7224_v56, %v1339_v35 }
 0x2dc   : > { %v1351_v40 = vshrl.u32 %v11247_v1, %v1339_v35  ;;  %v1354_v34 = vshrl.u32 %v11245_v8, %v1339_v35  ;;  %v1442_v24 = vsub.s32 32, %v1441_v42  ;;  %vm1358_vm4 = vcmp.lt.s32.totalorder %v1337_v25, 3 }
 0x2dd   : > { %v1343_v45 = vor.u32 %v1342_v17, %v1341_v38  ;;  %v1346_v28 = vor.u32 %v1345_v54, %v1344_v47  ;;  %v1349_v3 = vor.u32 %v1348_v29, %v1347_v41  ;;  %v8097_v27 = vpop.f32.mrb[0].mxu1  ;;  %vm1359_vm15 = vcmp.lt.s32.totalorder %v1337_v25, 4 }
 0x2de   : > { %v1352_v4 = vor.u32 %v1351_v40, %v1350_v33  ;;  %v1355_v55 = vor.u32 %v1354_v34, %v1353_v59  ;;  %v8099_v52 = vpop.f32.mrb[1].mxu1  ;;  %v1444_v19 = vshll.u32 %v7224_v56, %v1441_v42  ;;  %v1445_v26 = vshrl.u32 %v11251_v58, %v1442_v24 }
 0x2df   : > { %v1360_v49 = vsel %vm1356_vm2, %v1340_v62, %v1343_v45  ;;  %v1361_v12 = vsel %vm1359_vm15, %v1349_v3, 2102212464  ;;  %v1364_v43 = vsel %vm1356_vm2, %v1343_v45, %v1346_v28  ;;  %v1368_v48 = vsel %vm1356_vm2, %v1346_v28, %v1349_v3 }
 0x2e0   : > { %v1362_v51 = vsel %vm1358_vm4, %v1346_v28, %v1361_v12  ;;  %v1365_v9 = vsel %vm1359_vm15, %v1352_v4, 920167782  ;;  %v1369_v31 = vsel %vm1359_vm15, %v1355_v55, 1326507024  ;;  %v1447_v14 = vshll.u32 %v11251_v58, %v1441_v42 }
 0x2e1   : > { %v1366_v23 = vsel %vm1358_vm4, %v1349_v3, %v1365_v9  ;;  %v1370_v44 = vsel %vm1358_vm4, %v1352_v4, %v1369_v31  ;;  %v1363_v32 = vsel %vm1357_vm3, %v1360_v49, %v1362_v51  ;;  %v1448_v47 = vshrl.u32 %v11238_v61, %v1442_v24 }
 0x2e2   : > { %v1367_v35 = vsel %vm1357_vm3, %v1364_v43, %v1366_v23  ;;  %v1371_v38 = vsel %vm1357_vm3, %v1368_v48, %v1370_v44  ;;  %v1446_v54 = vor.u32 %v1445_v26, %v1444_v19  ;;  %v1450_v62 = vshll.u32 %v11238_v61, %v1441_v42 }
 0x2e3   : > { %v8112_v41 = vmul.u32.u64.low %v8074_v60, %v1371_v38  ;;  %v8113_v33 = vmul.u32.u64.high %v8074_v60, %v1371_v38, %v8112_v41  ;;  %v8116_v59 = vmul.u32.u64.low %v8074_v60, %v1367_v35  ;;  %v8117_v17 = vmul.u32.u64.high %v8074_v60, %v1367_v35, %v8116_v59 }
 0x2e4   : > { %v1449_v29 = vor.u32 %v1448_v47, %v1447_v14  ;;  %v1451_v40 = vshrl.u32 %v11249_v63, %v1442_v24  ;;  %v1443_v34 = vshrl.u32 %v7224_v56, %v1442_v24  ;;  %v1453_v25 = vshll.u32 %v11249_v63, %v1441_v42 }
 0x2e5   : > { %v1454_v45 = vshrl.u32 %v11247_v1, %v1442_v24  ;;  %v1457_v28 = vshrl.u32 %v11245_v8, %v1442_v24  ;;  %v1379_v3 = vmul.u32 %v8074_v60, %v1363_v32  ;;  %v1456_v55 = vshll.u32 %v11247_v1, %v1441_v42 }
 0x2e6   : > { %v1452_v4 = vor.u32 %v1451_v40, %v1450_v62  ;;  %vm1459_vm6 = vcmp.lt.s32.totalorder %v8076_v16, 1  ;;  %vm1381_vm7 = vc.u32 %v8113_v33, %v8116_v59  ;;  %v1382_v49 = vadd.s32 1, %v8117_v17 }
 0x2e7   : > { %v1455_v12 = vor.u32 %v1454_v45, %v1453_v25  ;;  %vm1460_vm8 = vcmp.lt.s32.totalorder %v8076_v16, 2  ;;  %v1458_v43 = vor.u32 %v1457_v28, %v1456_v55  ;;  %vm1461_vm0 = vcmp.lt.s32.totalorder %v8076_v16, 3 }
 0x2e8   : > { %vm1462_vm1 = vcmp.lt.s32.totalorder %v8076_v16, 4  ;;  %v1467_v24 = vsel %vm1459_vm6, %v1446_v54, %v1449_v29  ;;  %v1383_v60 = vsel %vm1381_vm7, %v1382_v49, %v8117_v17  ;;  %v1471_v42 = vsel %vm1459_vm6, %v1449_v29, %v1452_v4 }
 0x2e9   : > { %v1464_v48 = vsel %vm1462_vm1, %v1452_v4, 2102212464  ;;  %v1468_v51 = vsel %vm1462_vm1, %v1455_v12, 920167782  ;;  %v1384_v9 = vadd.s32 %v1383_v60, %v1379_v3  ;;  %v1463_v31 = vsel %vm1459_vm6, %v1443_v34, %v1446_v54 }
 0x2ea   : > { %v1469_v19 = vsel %vm1461_vm0, %v1452_v4, %v1468_v51  ;;  %v1472_v23 = vsel %vm1462_vm1, %v1458_v43, 1326507024  ;;  %v1465_v44 = vsel %vm1461_vm0, %v1449_v29, %v1464_v48  ;;  %v1643_v32 = vadd.s32 1, %v8085_v13 }
 0x2eb   : > { %v1470_v26 = vsel %vm1460_vm8, %v1467_v24, %v1469_v19  ;;  %v1473_v14 = vsel %vm1461_vm0, %v1455_v12, %v1472_v23  ;;  %v1385_v35 = vadd.s32 536870912, %v1384_v9  ;;  %v1466_v62 = vsel %vm1460_vm8, %v1463_v31, %v1465_v44 }
 0x2ec   : > { %v1474_v38 = vsel %vm1460_vm8, %v1471_v42, %v1473_v14  ;;  %v8140_v47 = vmul.u32.u64.low %v8078_v15, %v1470_v26  ;;  %v8141_v41 = vmul.u32.u64.high %v8078_v15, %v1470_v26, %v8140_v47  ;;  %vm1644_vm2 = vcmp.gt.s32.totalorder %v1643_v32, 0 }
 0x2ed   : > { %v8145_v17 = vmul.u32.u64.low %v8078_v15, %v1474_v38  ;;  %v8146_v54 = vmul.u32.u64.high %v8078_v15, %v1474_v38, %v8145_v17  ;;  %v8148_v29 = vshrl.u32 %v1385_v35, 30  ;;  %v1645_v13 = vsel %vm1644_vm2, %v1643_v32, 0 }
 0x2ee   : > { %v8154_v40 = vmul.f32 %v8061_v53, %v8072_v36  ;;  %v1647_v34 = vand.u32 31, %v1645_v13  ;;  %v1485_v45 = vadd.s32 1, %v8141_v41  ;;  %v1641_v28 = vor.u32 8388608, %v8082_v46 }
 0x2ef   : > { %v1387_v25 = vshll.u32 %v8148_v29, 30  ;;  %v1482_v3 = vmul.u32 %v8078_v15, %v1466_v62  ;;  %vm1484_vm3 = vc.u32 %v8146_v54, %v8140_v47  ;;  %v1380_v43 = vadd.s32 %v8116_v59, %v8113_v33 }
 0x2f0   : > { %v1648_v4 = vsub.s32 32, %v1647_v34  ;;  %v1486_v55 = vsel %vm1484_vm3, %v1485_v45, %v8141_v41  ;;  %v1736_v49 = vand.u32 2147483647, %v8154_v40  ;;  %v8168_v60 = vshll.u32 %v1641_v28, 8 }
 0x2f1   : > { %v8162_v16 = vsub.s32 %v1384_v9, %v1387_v25  ;;  %v1487_v12 = vadd.s32 %v1486_v55, %v1482_v3  ;;  %v8170_v48 = vshrl.u32 %v1645_v13, 5  ;;  %v1739_v51 = vand.u32 2139095040, %v8154_v40 }
 0x2f2   : > { %v1657_v15 = vshrl.u32 %v11249_v63, %v1648_v4  ;;  %v1651_v9 = vshrl.u32 %v11251_v58, %v1648_v4  ;;  %v1654_v31 = vshrl.u32 %v11238_v61, %v1648_v4  ;;  %v8179_v33 = vand.u32 8388607, %v1736_v49 }
 0x2f3   : > { %v1390_v24 = vsub.s32 0, %v8162_v16  ;;  %v1488_v46 = vadd.s32 536870912, %v1487_v12  ;;  %v1410_v59 = vsub.s32 4, %v8148_v29  ;;  %v1656_v23 = vshll.u32 %v11238_v61, %v1647_v34 }
 0x2f4   : > { %v1660_v44 = vshrl.u32 %v11247_v1, %v1648_v4  ;;  %v1650_v14 = vshll.u32 %v7224_v56, %v1647_v34  ;;  %v1653_v32 = vshll.u32 %v11251_v58, %v1647_v34  ;;  %v1659_v35 = vshll.u32 %v11249_v63, %v1647_v34 }
 0x2f5   : > { %v6212_v42 = vmin.u32 %v1390_v24, %v8162_v16  ;;  %v8182_v19 = vshrl.u32 %v1488_v46, 30  ;;  %v1658_v41 = vor.u32 %v1657_v15, %v1656_v23  ;;  %v1663_v17 = vshrl.u32 %v11245_v8, %v1648_v4 }
 0x2f6   : > { %v1740_v62 = vshrl.u32 %v1739_v51, 23  ;;  %v1652_v25 = vor.u32 %v1651_v9, %v1650_v14  ;;  %v1655_v45 = vor.u32 %v1654_v31, %v1653_v32  ;;  %v1661_v28 = vor.u32 %v1660_v44, %v1659_v35 }
 0x2f7   : > { %v1392_v26 = vclz %v6212_v42  ;;  %v1490_v38 = vshll.u32 %v8182_v19, 30  ;;  %v1649_v55 = vshrl.u32 %v7224_v56, %v1648_v4  ;;  %v1662_v24 = vshll.u32 %v11247_v1, %v1647_v34 }
 0x2f8   : > { %vm1665_vm4 = vcmp.lt.s32.totalorder %v8170_v48, 1  ;;  %vm1326_vm15 = vcmp.lt.s32.totalorder %v8046_v11, 0  ;;  %v1513_v46 = vsub.s32 4, %v8182_v19  ;;  %vm1666_vm7 = vcmp.lt.s32.totalorder %v8170_v48, 2 }
 0x2f9   : > { %v6213_v13 = vadd.s32 4294967294, %v1392_v26  ;;  %v8191_v3 = vsub.s32 %v1487_v12, %v1490_v38  ;;  %vm1668_vm8 = vcmp.lt.s32.totalorder %v8170_v48, 4  ;;  %vm1429_vm0 = vcmp.lt.s32.totalorder %v8050_v57, 0 }
 0x2fa   : > { %v1664_v51 = vor.u32 %v1663_v17, %v1662_v24  ;;  %v1670_v34 = vsel %vm1668_vm8, %v1658_v41, 2102212464  ;;  %v1673_v9 = vsel %vm1665_vm4, %v1652_v25, %v1655_v45  ;;  %v1674_v31 = vsel %vm1668_vm8, %v1661_v28, 920167782 }
 0x2fb   : > { %vm6214_vm6 = vcmp.lt.s32.totalorder %v6213_v13, 0  ;;  %v1493_v12 = vsub.s32 0, %v8191_v3  ;;  %vm1667_vm1 = vcmp.lt.s32.totalorder %v8170_v48, 3  ;;  %v1669_v26 = vsel %vm1665_vm4, %v1649_v55, %v1652_v25 }
 0x2fc   : > { %v1395_v15 = vsel %vm6214_vm6, 0, %v6213_v13  ;;  %v1675_v35 = vsel %vm1667_vm1, %v1658_v41, %v1674_v31  ;;  %v1677_v38 = vsel %vm1665_vm4, %v1655_v45, %v1658_v41  ;;  %vm8217_vm2 = vcmp.le.f32.partialorder %v1324_v37, 0.7853982 }
 0x2fd   : > { %v1396_v4 = vsub.s32 32, %v1395_v15  ;;  %v1400_v42 = vsub.s32 4294967266, %v1395_v15  ;;  %v1397_v23 = vshll.u32 %v8162_v16, %v1395_v15  ;;  %v6216_v44 = vmin.u32 %v1493_v12, %v8191_v3 }
 0x2fe   : > { %v1671_v13 = vsel %vm1667_vm1, %v1655_v45, %v1670_v34  ;;  %v1676_v24 = vsel %vm1666_vm7, %v1673_v9, %v1675_v35  ;;  %v1678_v25 = vsel %vm1668_vm8, %v1664_v51, 1326507024  ;;  %vm8227_vm3 = vcmp.le.f32.partialorder %v1427_v22, 0.7853982 }
 0x2ff   : > { %v1398_v14 = vshrl.u32 %v1380_v43, %v1396_v4  ;;  %v1401_v32 = vadd.s32 127, %v1400_v42  ;;  %v1495_v16 = vclz %v6216_v44  ;;  %v1679_v37 = vsel %vm1667_vm1, %v1661_v28, %v1678_v25 }
 0x300   : > { %v6227_v15 = vadd.s32 4294967169, %v1740_v62  ;;  %v1680_v45 = vsel %vm1666_vm7, %v1677_v38, %v1679_v37  ;;  %v8234_v34 = vmul.u32.u64.low %v8168_v60, %v1676_v24  ;;  %v8235_v4 = vmul.u32.u64.high %v8168_v60, %v1676_v24, %v8234_v34 }
 0x301   : > { %v1399_v43 = vor.u32 %v1398_v14, %v1397_v23  ;;  %v1402_v55 = vshll.u32 %v1401_v32, 23  ;;  %v6217_v12 = vadd.s32 4294967294, %v1495_v16  ;;  %v1672_v51 = vsel %vm1666_vm7, %v1669_v26, %v1671_v13 }
 0x302   : > { %v8240_v9 = vmul.u32.u64.low %v8168_v60, %v1680_v45  ;;  %v8241_v22 = vmul.u32.u64.high %v8168_v60, %v1680_v45, %v8240_v9  ;;  %v1411_v62 = vsel %vm1326_vm15, %v1410_v59, %v8148_v29  ;;  %v1483_v28 = vadd.s32 %v8140_v47, %v8146_v54 }
 0x303   : > { %v1403_v42 = vor.u32 4788187, %v1402_v55  ;;  %vm6218_vm4 = vcmp.lt.s32.totalorder %v6217_v12, 0  ;;  %v1746_v31 = vadd.s32 1, %v6227_v15  ;;  %v1406_v44 = vcvt.s32.f32 %v1399_v43 }
 0x304   : > { %v1498_v14 = vsel %vm6218_vm4, 0, %v6217_v12  ;;  %v1514_v48 = vsel %vm1429_vm0, %v1513_v46, %v8182_v19  ;;  %v1688_v35 = vmul.u32 %v8168_v60, %v1672_v51  ;;  %v1691_v38 = vadd.s32 1, %v8235_v4 }
 0x305   : > { %v1404_v23 = vand.u32 2147483647, %v1403_v42  ;;  %v1499_v26 = vsub.s32 32, %v1498_v14  ;;  %v1503_v32 = vsub.s32 4294967266, %v1498_v14  ;;  %v1500_v29 = vshll.u32 %v8191_v3, %v1498_v14 }
 0x306   : > { %vm1690_vm6 = vc.u32 %v8241_v22, %v8234_v34  ;;  %vm1747_vm7 = vcmp.gt.s32.totalorder %v1746_v31, 0  ;;  %v1413_v19 = vsel %vm8217_vm2, 0, %v1411_v62  ;;  %v1516_v55 = vsel %vm8227_vm3, 0, %v1514_v48 }
 0x307   : > { %v1407_v16 = vmul.f32 %v1406_v44, %v1404_v23  ;;  %v1501_v47 = vshrl.u32 %v1483_v28, %v1499_v26  ;;  %v1504_v54 = vadd.s32 127, %v1503_v32  ;;  %v1692_v59 = vsel %vm1690_vm6, %v1691_v38, %v8235_v4 }
 0x308   : > { %v1748_v13 = vsel %vm1747_vm7, %v1746_v31, 0  ;;  %v1693_v46 = vadd.s32 %v1692_v59, %v1688_v35  ;;  %v8265_v45 = vand.u32 3, %v1413_v19  ;;  %v8267_v42 = vand.u32 3, %v1516_v55 }
 0x309   : > { %v1408_v24 = vxor.u32 2147483648, %v1407_v16  ;;  %v1750_v25 = vand.u32 31, %v1748_v13  ;;  %v1502_v60 = vor.u32 %v1501_v47, %v1500_v29  ;;  %v1505_v43 = vshll.u32 %v1504_v54, 23 }
 0x30a   : > { %v1694_v37 = vadd.s32 536870912, %v1693_v46  ;;  %v1744_v9 = vor.u32 8388608, %v8179_v33  ;;  %v8274_v31 = vadd.f32 %v8097_v27, %v8037_v50  ;;  %v8277_v17 = vadd.s32 %v8234_v34, %v8241_v22 }
 0x30b   : > { %v1409_v3 = vsel %vm1326_vm15, %v1408_v24, %v1407_v16  ;;  %v1751_v15 = vsub.s32 32, %v1750_v25  ;;  %v1506_v4 = vor.u32 4788187, %v1505_v43  ;;  %v1509_v28 = vcvt.s32.f32 %v1502_v60 }
 0x30c   : > { %v1412_v12 = vsel %vm8217_vm2, %v8046_v11, %v1409_v3  ;;  %v8269_v51 = vshrl.u32 %v1694_v37, 30  ;;  %v8283_v14 = vadd.f32 %v8099_v52, %v8032_v6  ;;  %vm1422_vm15 = vcmp.eq.s32.totalorder %v8265_v45, 2 }
 0x30d   : > { %6943 = vcosq.f32 %v1412_v12  ;;  %v1507_v62 = vand.u32 2147483647, %v1506_v4  ;;  %v1754_v44 = vshrl.u32 %v11251_v58, %v1751_v15  ;;  %v1757_v33 = vshrl.u32 %v11238_v61, %v1751_v15 }
 0x30e   : > { %6945 = vsinq.f32 %v1412_v12  ;;  %v1696_v23 = vshll.u32 %v8269_v51, 30  ;;  %v1760_v26 = vshrl.u32 %v11249_v63, %v1751_v15  ;;  %v1763_v32 = vshrl.u32 %v11247_v1, %v1751_v15 }
 0x30f   : > { %v1510_v48 = vmul.f32 %v1509_v28, %v1507_v62  ;;  %v8291_v27 = vshrl.u32 %v1748_v13, 5  ;;  %v1753_v34 = vshll.u32 %v7224_v56, %v1750_v25  ;;  %v1756_v22 = vshll.u32 %v11251_v58, %v1750_v25 }
 0x310   : > { %v8289_v50 = vsub.s32 %v1693_v46, %v1696_v23  ;;  %vm1419_vm8 = vcmp.eq.s32.totalorder %v8265_v45, 0  ;;  %v1759_v52 = vshll.u32 %v11238_v61, %v1750_v25  ;;  %v1762_v35 = vshll.u32 %v11249_v63, %v1750_v25 }
 0x311   : > { %v1511_v6 = vxor.u32 2147483648, %v1510_v48  ;;  %v1766_v38 = vshrl.u32 %v11245_v8, %v1751_v15  ;;  %vm1418_vm1 = vcmp.lt.s32.totalorder %v8265_v45, 2  ;;  %v1755_v29 = vor.u32 %v1754_v44, %v1753_v34 }
 0x312   : > { %v1699_v16 = vsub.s32 0, %v8289_v50  ;;  %v1765_v47 = vshll.u32 %v11247_v1, %v1750_v25  ;;  %v8302_v54 = vshll.u32 %v1744_v9, 8  ;;  %vm1416_vm2 = vweird.f32 %v8046_v11 }
 0x313   : > { %v1512_v59 = vsel %vm1429_vm0, %v1511_v6, %v1510_v48  ;;  %v1758_v13 = vor.u32 %v1757_v33, %v1756_v22  ;;  %v1761_v24 = vor.u32 %v1760_v26, %v1759_v52  ;;  %v1764_v19 = vor.u32 %v1763_v32, %v1762_v35 }
 0x314   : > { %v1515_v46 = vsel %vm8227_vm3, %v8050_v57, %v1512_v59  ;;  %v6224_v60 = vmin.u32 %v1699_v16, %v8289_v50  ;;  %v1767_v43 = vor.u32 %v1766_v38, %v1765_v47  ;;  %v8313_v25 = vmul.f32 %v8061_v53, %v8274_v31 }
 0x315   : > { %6947 = vcosq.f32 %v1515_v46  ;;  %v1752_v55 = vshrl.u32 %v7224_v56, %v1751_v15  ;;  %vm1768_vm4 = vcmp.lt.s32.totalorder %v8291_v27, 1  ;;  %vm1769_vm0 = vcmp.lt.s32.totalorder %v8291_v27, 2 }
 0x316   : > { %6949 = vsinq.f32 %v1515_v46  ;;  %v1701_v37 = vclz %v6224_v60  ;;  %vm1770_vm6 = vcmp.lt.s32.totalorder %v8291_v27, 3  ;;  %vm1771_vm3 = vcmp.lt.s32.totalorder %v8291_v27, 4  ;;  %v8357_v60 = vpop.permute.xlu0 %1950 }
 0x317   : > { %v6944_v3 = vpop.eup %6943  ;;  %v1776_v53 = vsel %vm1768_vm4, %v1755_v29, %v1758_v13  ;;  %v1777_v4 = vsel %vm1771_vm3, %v1764_v19, 920167782  ;;  %v1780_v15 = vsel %vm1768_vm4, %v1758_v13, %v1761_v24  ;;  %vm1635_vm7 = vcmp.lt.s32.totalorder %v8067_v2, 0 }
 0x318   : > { %v6946_v41 = vpop.eup %6945  ;;  %v1423_v12 = vxor.u32 2147483648, %v6944_v3  ;;  %v6225_v62 = vadd.s32 4294967294, %v1701_v37  ;;  %v1778_v28 = vsel %vm1770_vm6, %v1761_v24, %v1777_v4  ;;  %v1781_v23 = vsel %vm1771_vm3, %v1767_v43, 1326507024 }
 0x319   : > { %v1420_v9 = vxor.u32 2147483648, %v6946_v41  ;;  %vm1525_vm14 = vcmp.eq.s32.totalorder %v8267_v42, 2  ;;  %v1772_v48 = vsel %vm1768_vm4, %v1752_v55, %v1755_v29  ;;  %v1773_v33 = vsel %vm1771_vm3, %v1761_v24, 2102212464 }
 0x31a   : > { %v1424_v44 = vsel %vm1422_vm15, %v1423_v12, %v6946_v41  ;;  %v1782_v26 = vsel %vm1770_vm6, %v1764_v19, %v1781_v23  ;;  %vm1522_vm12 = vcmp.eq.s32.totalorder %v8267_v42, 0  ;;  %vm6226_vm13 = vcmp.lt.s32.totalorder %v6225_v62, 0 }
 0x31b   : > { %v1421_v32 = vsel %vm1419_vm8, %v6944_v3, %v1420_v9  ;;  %v1779_v34 = vsel %vm1769_vm0, %v1776_v53, %v1778_v28  ;;  %v1783_v22 = vsel %vm1769_vm0, %v1780_v15, %v1782_v26  ;;  %vm1521_vm15 = vcmp.lt.s32.totalorder %v8267_v42, 2 }
 0x31c   : > { %v1425_v6 = vsel %vm1418_vm1, %v1421_v32, %v1424_v44  ;;  %v1704_v52 = vsel %vm6226_vm13, 0, %v6225_v62  ;;  %v8345_v35 = vmul.u32.u64.low %v8302_v54, %v1783_v22  ;;  %v8346_v38 = vmul.u32.u64.high %v8302_v54, %v1783_v22, %v8345_v35 }
 0x31d   : > { %v1426_v16 = vsel %vm1416_vm2, nan, %v1425_v6  ;;  %v1705_v29 = vsub.s32 32, %v1704_v52  ;;  %v1709_v47 = vsub.s32 4294967266, %v1704_v52  ;;  %v1774_v59 = vsel %vm1770_vm6, %v1758_v13, %v1773_v33 }
 0x31e   : > { %v1942_v24 = vsub.f32 1.0, %v1426_v16  ;;  %v1719_v19 = vsub.s32 4, %v8269_v51  ;;  %v8354_v45 = vmul.u32.u64.low %v8302_v54, %v1779_v34  ;;  %v8355_v46 = vmul.u32.u64.high %v8302_v54, %v1779_v34, %v8354_v45 }
 0x31f   : > { %v1706_v43 = vshll.u32 %v8289_v50, %v1704_v52  ;;  %v1707_v55 = vshrl.u32 %v8277_v17, %v1705_v29  ;;  %v1710_v11 = vadd.s32 127, %v1709_v47  ;;  %v1842_v3 = vand.u32 2139095040, %v8313_v25  ;;  %v6948_v37 = vpop.eup %6947 }
 0x320   : > { %v1958_v41 = vmul.f32 %v8357_v60, %v1942_v24  ;;  %v1775_v13 = vsel %vm1769_vm0, %v1772_v48, %v1774_v59  ;;  %vm1793_vm13 = vc.u32 %v8346_v38, %v8354_v45  ;;  %v1839_v12 = vand.u32 2147483647, %v8313_v25  ;;  %v6950_v53 = vpop.eup %6949 }
 0x321   : > { %v1526_v4 = vxor.u32 2147483648, %v6948_v37  ;;  %v1708_v15 = vor.u32 %v1707_v55, %v1706_v43  ;;  %v1711_v9 = vshll.u32 %v1710_v11, 23  ;;  %v1843_v50 = vshrl.u32 %v1842_v3, 23 }
 0x322   : > { %v1964_v17 = vadd.f32 %v1958_v41, %v8035_v5  ;;  %v1523_v62 = vxor.u32 2147483648, %v6950_v53  ;;  %v1720_v28 = vsel %vm1635_vm7, %v1719_v19, %v8269_v51  ;;  %v1794_v23 = vadd.s32 1, %v8355_v46 }
 0x323   : > { %v1527_v27 = vsel %vm1525_vm14, %v1526_v4, %v6950_v53  ;;  %v1712_v44 = vor.u32 4788187, %v1711_v9  ;;  %v1791_v48 = vmul.u32 %v8302_v54, %v1775_v13  ;;  %v6231_v33 = vadd.s32 4294967169, %v1843_v50 }
 0x324   : > { %v1524_v26 = vsel %vm1522_vm12, %v6948_v37, %v1523_v62  ;;  %v1715_v32 = vcvt.s32.f32 %v1708_v15  ;;  %v1795_v5 = vsel %vm1793_vm13, %v1794_v23, %v8355_v46  ;;  %v1846_v51 = vand.u32 8388607, %v1839_v12 }
 0x325   : > { %v1528_v34 = vsel %vm1521_vm15, %v1524_v26, %v1527_v27  ;;  %v1713_v22 = vand.u32 2147483647, %v1712_v44  ;;  %v1796_v6 = vadd.s32 %v1795_v5, %v1791_v48  ;;  %v1849_v52 = vadd.s32 1, %v6231_v33 }
 0x326   : > { %vm1519_vm14 = vweird.f32 %v8050_v57  ;;  %vm8387_vm8 = vcmp.le.f32.partialorder %v1633_v10, 0.7853982  ;;  %v8392_v35 = vmul.f32 %v7914_v7, %v1964_v17  ;;  %v1847_v59 = vor.u32 8388608, %v1846_v51 }
 0x327   : > { %v1529_v16 = vsel %vm1519_vm14, nan, %v1528_v34  ;;  %v1716_v29 = vmul.f32 %v1715_v32, %v1713_v22  ;;  %v1797_v47 = vadd.s32 536870912, %v1796_v6  ;;  %vm1850_vm12 = vcmp.gt.s32.totalorder %v1849_v52, 0 }
 0x328   : > { %v1722_v42 = vsel %vm8387_vm8, 0, %v1720_v28  ;;  %v1851_v24 = vsel %vm1850_vm12, %v1849_v52, 0  ;;  %1990 = vrot.lane.b32.xlu0 %v8392_v35, %s7231_s10  ;;  %v8402_v19 = vmul.f32 %v8039_v20, %v8283_v14  ;;  %v1943_v46 = vsub.f32 1.0, %v1529_v16 }
 0x329   : > { %v1717_v57 = vxor.u32 2147483648, %v1716_v29  ;;  %v8398_v10 = vshrl.u32 %v1797_v47, 30  ;;  %v1853_v43 = vand.u32 31, %v1851_v24  ;;  %v8406_v11 = vand.u32 3, %v1722_v42 }
 0x32a   : > { %v8413_v41 = vadd.s32 %v8354_v45, %v8346_v38  ;;  %v8415_v53 = vshll.u32 %v1847_v59, 8  ;;  %v1530_v4 = vand.u32 2147483647, %v8402_v19  ;;  %v1533_v15 = vand.u32 2139095040, %v8402_v19 }
 0x32b   : > { %v1718_v55 = vsel %vm1635_vm7, %v1717_v57, %v1716_v29  ;;  %v1799_v3 = vshll.u32 %v8398_v10, 30  ;;  %v1854_v13 = vsub.s32 32, %v1853_v43  ;;  %v1959_v9 = vmul.f32 %v8357_v60, %v1943_v46 }
 0x32c   : > { %v1721_v37 = vsel %vm8387_vm8, %v8067_v2, %v1718_v55  ;;  %v1852_v50 = vshrl.u32 %v1851_v24, 5  ;;  %v1856_v38 = vshll.u32 %v7224_v56, %v1853_v43  ;;  %v1859_v23 = vshll.u32 %v11251_v58, %v1853_v43 }
 0x32d   : > { %6951 = vcosq.f32 %v1721_v37  ;;  %v8417_v20 = vsub.s32 %v1796_v6, %v1799_v3  ;;  %v1857_v17 = vshrl.u32 %v11251_v58, %v1854_v13  ;;  %v1860_v45 = vshrl.u32 %v11238_v61, %v1854_v13 }
 0x32e   : > { %6953 = vsinq.f32 %v1721_v37  ;;  %v1863_v28 = vshrl.u32 %v11249_v63, %v1854_v13  ;;  %v1862_v27 = vshll.u32 %v11238_v61, %v1853_v43  ;;  %v1865_v44 = vshll.u32 %v11249_v63, %v1853_v43 }
 0x32f   : > { %v1802_v62 = vsub.s32 0, %v8417_v20  ;;  %v1866_v48 = vshrl.u32 %v11247_v1, %v1854_v13  ;;  %vm1731_vm1 = vcmp.eq.s32.totalorder %v8406_v11, 2  ;;  %v1858_v26 = vor.u32 %v1857_v17, %v1856_v38 }
 0x330   : > { %v1868_v32 = vshll.u32 %v11247_v1, %v1853_v43  ;;  %v1534_v5 = vshrl.u32 %v1533_v15, 23  ;;  %vm1728_vm2 = vcmp.eq.s32.totalorder %v8406_v11, 0  ;;  %v1861_v51 = vor.u32 %v1860_v45, %v1859_v23 }
 0x331   : > { %v6228_v33 = vmin.u32 %v1802_v62, %v8417_v20  ;;  %v1864_v34 = vor.u32 %v1863_v28, %v1862_v27  ;;  %v1867_v22 = vor.u32 %v1866_v48, %v1865_v44  ;;  %v1869_v6 = vshrl.u32 %v11245_v8, %v1854_v13 }
 0x332   : > { %v1965_v52 = vadd.f32 %v1959_v9, %v8042_v30  ;;  %vm1727_vm4 = vcmp.lt.s32.totalorder %v8406_v11, 2  ;;  %v1822_v16 = vsub.s32 4, %v8398_v10  ;;  %v1855_v29 = vshrl.u32 %v7224_v56, %v1854_v13 }
 0x333   : > { %v1804_v54 = vclz %v6228_v33  ;;  %vm1725_vm0 = vweird.f32 %v8067_v2  ;;  %v1870_v47 = vor.u32 %v1869_v6, %v1868_v32  ;;  %vm1871_vm6 = vcmp.lt.s32.totalorder %v1852_v50, 1 }
 0x334   : > { %vm1873_vm3 = vcmp.lt.s32.totalorder %v1852_v50, 3  ;;  %vm1874_vm7 = vcmp.lt.s32.totalorder %v1852_v50, 4  ;;  %v1883_v57 = vsel %vm1871_vm6, %v1861_v51, %v1864_v34  ;;  %vm1872_vm15 = vcmp.lt.s32.totalorder %v1852_v50, 2 }
 0x335   : > { %v6229_v42 = vadd.s32 4294967294, %v1804_v54  ;;  %v1876_v59 = vsel %vm1874_vm7, %v1864_v34, 2102212464  ;;  %v1880_v24 = vsel %vm1874_vm7, %v1867_v22, 920167782  ;;  %v1879_v46 = vsel %vm1871_vm6, %v1858_v26, %v1861_v51 }
 0x336   : > { %v1881_v30 = vsel %vm1873_vm3, %v1864_v34, %v1880_v24  ;;  %v1884_v43 = vsel %vm1874_vm7, %v1870_v47, 1326507024  ;;  %v1875_v3 = vsel %vm1871_vm6, %v1855_v29, %v1858_v26  ;;  %v6219_v13 = vadd.s32 4294967169, %v1534_v5 }
 0x337   : > { %v6952_v55 = vpop.eup %6951  ;;  %vm6230_vm13 = vcmp.lt.s32.totalorder %v6229_v42, 0  ;;  %v1885_v37 = vsel %vm1873_vm3, %v1867_v22, %v1884_v43  ;;  %v1877_v62 = vsel %vm1873_vm3, %v1861_v51, %v1876_v59  ;;  %v1882_v27 = vsel %vm1872_vm15, %v1879_v46, %v1881_v30  ;;  %v8487_v43 = vpop.permute.xlu1 %1955 }
 0x338   : > { %v6954_v15 = vpop.eup %6953  ;;  %v1732_v9 = vxor.u32 2147483648, %v6952_v55  ;;  %v1807_v17 = vsel %vm6230_vm13, 0, %v6229_v42  ;;  %v1886_v38 = vsel %vm1872_vm15, %v1883_v57, %v1885_v37  ;;  %v1540_v34 = vadd.s32 1, %v6219_v13 }
 0x339   : > { %v1729_v45 = vxor.u32 2147483648, %v6954_v15  ;;  %v1808_v28 = vsub.s32 32, %v1807_v17  ;;  %v1812_v23 = vsub.s32 4294967266, %v1807_v17  ;;  %v1809_v48 = vshll.u32 %v8417_v20, %v1807_v17 }
 0x33a   : > { %v1733_v44 = vsel %vm1731_vm1, %v1732_v9, %v6954_v15  ;;  %v8450_v33 = vmul.u32.u64.low %v8415_v53, %v1886_v38  ;;  %v8451_v26 = vmul.u32.u64.high %v8415_v53, %v1886_v38, %v8450_v33  ;;  %v1878_v6 = vsel %vm1872_vm15, %v1875_v3, %v1877_v62 }
 0x33b   : > { %v1730_v32 = vsel %vm1728_vm2, %v6952_v55, %v1729_v45  ;;  %v1810_v5 = vshrl.u32 %v8413_v41, %v1808_v28  ;;  %v1813_v51 = vadd.s32 127, %v1812_v23  ;;  %vm1541_vm14 = vcmp.gt.s32.totalorder %v1540_v34, 0 }
 0x33c   : > { %v1734_v22 = vsel %vm1727_vm4, %v1730_v32, %v1733_v44  ;;  %v8460_v54 = vmul.u32.u64.low %v8415_v53, %v1882_v27  ;;  %v8461_v29 = vmul.u32.u64.high %v8415_v53, %v1882_v27, %v8460_v54  ;;  %vm8468_vm8 = vcmp.le.f32.partialorder %v1736_v49, 0.7853982 }
 0x33d   : > { %v1735_v20 = vsel %vm1725_vm0, nan, %v1734_v22  ;;  %v1811_v47 = vor.u32 %v1810_v5, %v1809_v48  ;;  %v1814_v42 = vshll.u32 %v1813_v51, 23  ;;  %vm1738_vm12 = vcmp.lt.s32.totalorder %v8154_v40, 0 }
 0x33e   : > { %v1945_v59 = vsub.f32 1.0, %v1735_v20  ;;  %v1542_v11 = vsel %vm1541_vm14, %v1540_v34, 0  ;;  %vm1896_vm1 = vc.u32 %v8451_v26, %v8460_v54  ;;  %v1537_v2 = vand.u32 8388607, %v1530_v4 }
 0x33f   : > { %v1815_v50 = vor.u32 4788187, %v1814_v42  ;;  %v1544_v24 = vand.u32 31, %v1542_v11  ;;  %v8480_v57 = vsel %vm1738_vm12, %v1822_v16, %v8398_v10  ;;  %v1894_v49 = vmul.u32 %v8415_v53, %v1878_v6 }
 0x340   : > { %v1897_v46 = vadd.s32 1, %v8461_v29  ;;  %v8485_v30 = vmul.f32 %v7905_v21, %v1965_v52  ;;  %v1818_v3 = vcvt.s32.f32 %v1811_v47  ;;  %v8489_v37 = vshrl.u32 %v1542_v11, 5 }
 0x341   : > { %v1816_v55 = vand.u32 2147483647, %v1815_v50  ;;  %v1545_v13 = vsub.s32 32, %v1544_v24  ;;  %v1961_v15 = vmul.f32 %v8487_v43, %v1945_v59  ;;  %v1547_v10 = vshll.u32 %v7224_v56, %v1544_v24 }
 0x342   : > { %v1898_v9 = vsel %vm1896_vm1, %v1897_v46, %v8461_v29  ;;  %v1550_v53 = vshll.u32 %v11251_v58, %v1544_v24  ;;  %1992 = vrot.lane.b32.xlu1 %v8485_v30, %s7231_s10  ;;  %v1553_v62 = vshll.u32 %v11238_v61, %v1544_v24  ;;  %2020 = vrot.lane.b32.xlu0 %v8485_v30, %s7232_s14  ;;  %v1825_v6 = vsel %vm8468_vm8, 0, %v8480_v57 }
 0x343   : > { %v1819_v52 = vmul.f32 %v1818_v3, %v1816_v55  ;;  %v1899_v16 = vadd.s32 %v1898_v9, %v1894_v49  ;;  %v1548_v17 = vshrl.u32 %v11251_v58, %v1545_v13  ;;  %v1551_v38 = vshrl.u32 %v11238_v61, %v1545_v13 }
 0x344   : > { %v1554_v45 = vshrl.u32 %v11249_v63, %v1545_v13  ;;  %v1556_v28 = vshll.u32 %v11249_v63, %v1544_v24  ;;  %v1557_v23 = vshrl.u32 %v11247_v1, %v1545_v13  ;;  %v1559_v48 = vshll.u32 %v11247_v1, %v1544_v24 }
 0x345   : > { %v1820_v27 = vxor.u32 2147483648, %v1819_v52  ;;  %v1900_v44 = vadd.s32 536870912, %v1899_v16  ;;  %v1560_v33 = vshrl.u32 %v11245_v8, %v1545_v13  ;;  %v1549_v32 = vor.u32 %v1548_v17, %v1547_v10 }
 0x346   : > { %v1552_v5 = vor.u32 %v1551_v38, %v1550_v53  ;;  %v1555_v51 = vor.u32 %v1554_v45, %v1553_v62  ;;  %v1558_v34 = vor.u32 %v1557_v23, %v1556_v28  ;;  %v1538_v20 = vor.u32 8388608, %v1537_v2 }
 0x347   : > { %v1821_v22 = vsel %vm1738_vm12, %v1820_v27, %v1819_v52  ;;  %v8512_v29 = vshrl.u32 %v1900_v44, 30  ;;  %v1967_v47 = vadd.f32 %v1961_v15, %v8059_v0  ;;  %v1561_v59 = vor.u32 %v1560_v33, %v1559_v48 }
 0x348   : > { %v1824_v42 = vsel %vm8468_vm8, %v8154_v40, %v1821_v22  ;;  %vm1562_vm2 = vcmp.lt.s32.totalorder %v8489_v37, 1  ;;  %vm1564_vm4 = vcmp.lt.s32.totalorder %v8489_v37, 3  ;;  %vm1565_vm0 = vcmp.lt.s32.totalorder %v8489_v37, 4 }
 0x349   : > { %6955 = vcosq.f32 %v1824_v42  ;;  %v1902_v11 = vshll.u32 %v8512_v29, 30  ;;  %v1567_v50 = vsel %vm1565_vm0, %v1555_v51, 2102212464  ;;  %v1570_v2 = vsel %vm1562_vm2, %v1549_v32, %v1552_v5 }
 0x34a   : > { %6957 = vsinq.f32 %v1824_v42  ;;  %v1571_v0 = vsel %vm1565_vm0, %v1558_v34, 920167782  ;;  %v1546_v41 = vshrl.u32 %v7224_v56, %v1545_v13  ;;  %vm1563_vm6 = vcmp.lt.s32.totalorder %v8489_v37, 2 }
 0x34b   : > { %v1903_v24 = vsub.s32 %v1899_v16, %v1902_v11  ;;  %v1572_v57 = vsel %vm1564_vm4, %v1555_v51, %v1571_v0  ;;  %v1574_v46 = vsel %vm1562_vm2, %v1552_v5, %v1555_v51  ;;  %v1575_v55 = vsel %vm1565_vm0, %v1561_v59, 1326507024 }
 0x34c   : > { %v1573_v49 = vsel %vm1563_vm6, %v1570_v2, %v1572_v57  ;;  %v1578_v3 = vshll.u32 %v1538_v20, 8  ;;  %v1566_v9 = vsel %vm1562_vm2, %v1546_v41, %v1549_v32  ;;  %v1568_v13 = vsel %vm1564_vm4, %v1552_v5, %v1567_v50 }
 0x34d   : > { %v1905_v15 = vsub.s32 0, %v1903_v24  ;;  %v1576_v10 = vsel %vm1564_vm4, %v1558_v34, %v1575_v55  ;;  %v8545_v17 = vmul.f32 %v7914_v7, %v1967_v47  ;;  %v1829_v38 = vand.u32 3, %v1825_v6 }
 0x34e   : > { %v1577_v53 = vsel %vm1563_vm6, %v1574_v46, %v1576_v10  ;;  %v8540_v52 = vmul.u32.u64.low %v1578_v3, %v1573_v49  ;;  %v8541_v16 = vmul.u32.u64.high %v1578_v3, %v1573_v49, %v8540_v52  ;;  %v1569_v27 = vsel %vm1563_vm6, %v1566_v9, %v1568_v13 }
 0x34f   : > { %v6232_v62 = vmin.u32 %v1905_v15, %v1903_v24  ;;  %v8547_v45 = vmul.u32.u64.low %v1578_v3, %v1577_v53  ;;  %v8548_v28 = vmul.u32.u64.high %v1578_v3, %v1577_v53, %v8547_v45  ;;  %1996 = vrot.lane.b32.xlu0 %v8545_v17, %s7231_s10  ;;  %vm1830_vm3 = vcmp.lt.s32.totalorder %v1829_v38, 2 }
 0x350   : > { %v1588_v44 = vadd.s32 1, %v8541_v16  ;;  %v1585_v51 = vmul.u32 %v1578_v3, %v1569_v27  ;;  %vm1834_vm15 = vcmp.eq.s32.totalorder %v1829_v38, 2  ;;  %vm1831_vm14 = vcmp.eq.s32.totalorder %v1829_v38, 0 }
 0x351   : > { %v1907_v23 = vclz %v6232_v62  ;;  %vm1587_vm7 = vc.u32 %v8548_v28, %v8540_v52  ;;  %v1895_v42 = vadd.s32 %v8460_v54, %v8451_v26  ;;  %vm1828_vm8 = vweird.f32 %v8154_v40 }
 0x352   : > { %v1589_v37 = vsel %vm1587_vm7, %v1588_v44, %v8541_v16  ;;  %vm1841_vm12 = vcmp.lt.s32.totalorder %v8313_v25, 0  ;;  %vm8579_vm1 = vcmp.le.f32.partialorder %v1839_v12, 0.7853982  ;;  %v1586_v12 = vadd.s32 %v8540_v52, %v8548_v28 }
 0x353   : > { %v6956_v48 = vpop.eup %6955  ;;  %v6233_v33 = vadd.s32 4294967294, %v1907_v23  ;;  %2018 = vrot.lane.b32.xlu0 %v8392_v35, %s7232_s14  ;;  %v1590_v20 = vadd.s32 %v1589_v37, %v1585_v51  ;;  %vm1532_vm7 = vcmp.lt.s32.totalorder %v8402_v19, 0 }
 0x354   : > { %v6958_v32 = vpop.eup %6957  ;;  %v1835_v5 = vxor.u32 2147483648, %v6956_v48 }
 0x355   : > { %v1832_v34 = vxor.u32 2147483648, %v6958_v32  ;;  %vm6234_vm13 = vcmp.lt.s32.totalorder %v6233_v33, 0  ;;  %v1591_v2 = vadd.s32 536870912, %v1590_v20 }
 0x356   : > { %v1836_v22 = vsel %vm1834_vm15, %v1835_v5, %v6958_v32  ;;  %v1910_v6 = vsel %vm6234_vm13, 0, %v6233_v33  ;;  %vm1531_vm15 = vcmp.le.f32.partialorder %v1530_v4, 0.7853982 }
 0x357   : > { %v1833_v47 = vsel %vm1831_vm14, %v6956_v48, %v1832_v34  ;;  %v1911_v59 = vsub.s32 32, %v1910_v6  ;;  %v1915_v11 = vsub.s32 4294967266, %v1910_v6  ;;  %v1912_v41 = vshll.u32 %v1903_v24, %v1910_v6 }
 0x358   : > { %v1837_v50 = vsel %vm1830_vm3, %v1833_v47, %v1836_v22  ;;  %v8564_v55 = vshrl.u32 %v1591_v2, 30  ;;  %v1925_v48 = vsub.s32 4, %v8512_v29  ;;  %vm1931_vm3 = vweird.f32 %v8313_v25 }
 0x359   : > { %v1838_v0 = vsel %vm1828_vm8, nan, %v1837_v50  ;;  %v1913_v57 = vshrl.u32 %v1895_v42, %v1911_v59  ;;  %v1916_v49 = vadd.s32 127, %v1915_v11 }
 0x35a   : > { %v1946_v46 = vsub.f32 1.0, %v1838_v0  ;;  %v1593_v26 = vshll.u32 %v8564_v55, 30  ;;  %v1926_v5 = vsel %vm1841_vm12, %v1925_v48, %v8512_v29 }
 0x35b   : > { %v1914_v3 = vor.u32 %v1913_v57, %v1912_v41  ;;  %v1917_v15 = vshll.u32 %v1916_v49, 23  ;;  %v1928_v22 = vsel %vm8579_vm1, 0, %v1926_v5 }
 0x35c   : > { %v1962_v9 = vmul.f32 %v8487_v43, %v1946_v46  ;;  %v1594_v40 = vsub.s32 %v1590_v20, %v1593_v26  ;;  %v1932_v11 = vand.u32 3, %v1928_v22 }
 0x35d   : > { %v1918_v54 = vor.u32 4788187, %v1917_v15  ;;  %v1921_v53 = vcvt.s32.f32 %v1914_v3 }
 0x35e   : > { %v1968_v13 = vadd.f32 %v1962_v9, %v8072_v36  ;;  %v1596_v16 = vsub.s32 0, %v1594_v40  ;;  %vm1937_vm4 = vcmp.eq.s32.totalorder %v1932_v11, 2  ;;  %vm1934_vm0 = vcmp.eq.s32.totalorder %v1932_v11, 0 }
 0x35f   : > { %v1919_v10 = vand.u32 2147483647, %v1918_v54  ;;  %vm1933_vm6 = vcmp.lt.s32.totalorder %v1932_v11, 2 }
 0x360   : > { %v8570_v24 = vmul.f32 %v7905_v21, %v1968_v13  ;;  %v6220_v38 = vmin.u32 %v1596_v16, %v1594_v40  ;;  %v1616_v13 = vsub.s32 4, %v8564_v55 }
 0x361   : > { %v1922_v62 = vmul.f32 %v1921_v53, %v1919_v10 }
 0x362   : > { %2026 = vrot.lane.b32.xlu0 %v8570_v24, %s7232_s14  ;;  %v6546_v23 = vpack.c.bf16 %v8570_v24, %v8485_v30  ;;  %v1598_v27 = vclz %v6220_v38  ;;  %v1617_v53 = vsel %vm1532_vm7, %v1616_v13, %v8564_v55 }
 0x363   : > { %v1923_v45 = vxor.u32 2147483648, %v1922_v62 }
 0x364   : > { %v6221_v32 = vadd.s32 4294967294, %v1598_v27 }
 0x365   : > { %v1924_v44 = vsel %vm1841_vm12, %v1923_v45, %v1922_v62  ;;  %v1619_v62 = vsel %vm1531_vm15, 0, %v1617_v53  ;;  %vm1622_vm12 = vweird.f32 %v8402_v19 }
 0x366   : > { %v1927_v33 = vsel %vm8579_vm1, %v8313_v25, %v1924_v44  ;;  %vm6222_vm2 = vcmp.lt.s32.totalorder %v6221_v32, 0  ;;  %v1623_v38 = vand.u32 3, %v1619_v62  ;;  %vm11286_vm1 = vcmask 7168  }
 0x367   : > { %6959 = vcosq.f32 %v1927_v33  ;;  %v1601_v51 = vsel %vm6222_vm2, 0, %v6221_v32  ;;  %vm11287_vm2 = vcmask 195768  }
 0x368   : > { %6961 = vsinq.f32 %v1927_v33  ;;  %v1602_v34 = vsub.s32 32, %v1601_v51  ;;  %v1606_v37 = vsub.s32 4294967266, %v1601_v51  ;;  %v1603_v6 = vshll.u32 %v1594_v40, %v1601_v51 }
 0x369   : > { %vm1628_vm13 = vcmp.eq.s32.totalorder %v1623_v38, 2  ;;  %vm1625_vm14 = vcmp.eq.s32.totalorder %v1623_v38, 0  ;;  %vm1624_vm8 = vcmp.lt.s32.totalorder %v1623_v38, 2 }
 0x36a   : > { %v1604_v20 = vshrl.u32 %v1586_v12, %v1602_v34  ;;  %v1607_v47 = vadd.s32 127, %v1606_v37 }
 0x36c   : > { %v1605_v42 = vor.u32 %v1604_v20, %v1603_v6  ;;  %v1608_v59 = vshll.u32 %v1607_v47, 23  ;;  %v357_v20 = vld [vmem:[%s11218_s4] sm:$0xff]  ;;  %v354_v47 = vld [vmem:[%s11219_s5 + $0x8] sm:$0xff] }
 0x36d   : > { %6455 = vmatprep.mubr.msk.f32.mxu1 %vm1141_vm9, %v357_v20 }
 0x36e   : > { %v1609_v50 = vor.u32 4788187, %v1608_v59  ;;  %v1612_v57 = vcvt.s32.f32 %v1605_v42 }
 0x370   : > { %v1610_v29 = vand.u32 2147483647, %v1609_v50 }
 0x371   : > { %v6960_v2 = vpop.eup %6959 }
 0x372   : > { %v6962_v0 = vpop.eup %6961  ;;  %v1938_v41 = vxor.u32 2147483648, %v6960_v2  ;;  %v1613_v28 = vmul.f32 %v1612_v57, %v1610_v29 }
 0x373   : > { %v1935_v49 = vxor.u32 2147483648, %v6962_v0 }
 0x374   : > { %v1939_v52 = vsel %vm1937_vm4, %v1938_v41, %v6962_v0  ;;  %v1614_v15 = vxor.u32 2147483648, %v1613_v28  ;;  %vm11288_vm4 = vmmov %vm11286_vm1 }
 0x375   : > { %v1936_v46 = vsel %vm1934_vm0, %v6960_v2, %v1935_v49  ;;  %vm11289_vm0 = vmmov %vm11286_vm1 }
 0x376   : > { %v1940_v3 = vsel %vm1933_vm6, %v1936_v46, %v1939_v52  ;;  %v1615_v54 = vsel %vm1532_vm7, %v1614_v15, %v1613_v28  ;;  %vm11290_vm6 = vcmask 1039360  }
 0x377   : > { %v1941_v9 = vsel %vm1931_vm3, nan, %v1940_v3  ;;  %v1618_v40 = vsel %vm1531_vm15, %v8402_v19, %v1615_v54  ;;  %v353_v19 = vld [vmem:[%s11219_s5] sm:$0xff]  ;;  %vm11291_vm3 = vmmov %vm11287_vm2 }
 0x378   : > { %v1947_v26 = vsub.f32 1.0, %v1941_v9  ;;  %6963 = vcosq.f32 %v1618_v40  ;;  %vm11292_vm7 = vmmov %vm11290_vm6 }
 0x379   : > { %6965 = vsinq.f32 %v1618_v40  ;;  %vm11293_vm15 = vmmov %vm11290_vm6 }
 0x37a   : > { %v1963_v10 = vmul.f32 %v8487_v43, %v1947_v26  ;;  %v6239_v43 = vld [vmem:[%s11217_s3 + $0x10] sm:$0xff] }
 0x37b   : > { %v2258_v33 = vadd.f32 1e-09, %v6239_v43 }
 0x37c   : > { %v1969_v25 = vadd.f32 %v1963_v10, %v8274_v31 }
 0x37d   : > { %6967 = vrcp.f32 %v2258_v33 }
 0x37e   : > { %v1975_v16 = vmul.f32 %v7938_v39, %v1969_v25  ;;  %v6548_v25 = vpack.c.bf16 %v8545_v17, %v8392_v35  ;;  %v358_v35 = vld [vmem:[%s11218_s4 + $0x8] sm:$0xff] }
 0x380   : > { %1981 = vst.msk [vmem:[#allocation2 + $0x58] sm:$0xff] %vm1037_vm5, %v1975_v16 }
 0x382   : > { %v6964_v4 = vpop.eup %6963 }
 0x383   : > { %v6966_v45 = vpop.eup %6965  ;;  %v1629_v27 = vxor.u32 2147483648, %v6964_v4 }
 0x384   : > { %v1626_v36 = vxor.u32 2147483648, %v6966_v45 }
 0x385   : > { %v1630_v44 = vsel %vm1628_vm13, %v1629_v27, %v6966_v45  ;;  %vm11294_vm13 = vmmov %vm11290_vm6 }
 0x386   : > { %v1627_v31 = vsel %vm1625_vm14, %v6964_v4, %v1626_v36  ;;  %vm11295_vm14 = vmmov %vm11289_vm0 }
 0x387   : > { %v1631_v55 = vsel %vm1624_vm8, %v1627_v31, %v1630_v44  ;;  %v6968_v34 = vpop.eup %6967  ;;  %v2059_v30 = vld [vmem:[#allocation2 + $0x58] sm:$0xff] }
 0x388   : > { %v1632_v48 = vsel %vm1622_vm12, nan, %v1631_v55  ;;  %v2261_v6 = vmul.f32 0.5, %v6968_v34  ;;  %v7085_v34 = vld [vmem:[%s7412_s20 + $0x8] sm:$0xff] }
 0x389   : > { %v1944_v32 = vsub.f32 1.0, %v1632_v48 }
 0x38b   : > { %v1960_v5 = vmul.f32 %v8357_v60, %v1944_v32  ;;  %v2264_v60 = vadd.f32 %v6239_v43, %v6239_v43 }
 0x38d   : > { %v1966_v51 = vadd.f32 %v1960_v5, %v8283_v14  ;;  %v6240_v14 = vld [vmem:[%s11217_s3 + $0x18] sm:$0xff] }
 0x38e   : > { %v2259_v37 = vadd.f32 1e-09, %v6240_v14  ;;  %v2265_v42 = vadd.f32 %v6240_v14, %v6240_v14 }
 0x38f   : > { %v1972_v12 = vmul.f32 %v7938_v39, %v1966_v51 }
 0x390   : > { %6969 = vrcp.f32 %v2259_v37 }
 0x391   : > { %1978 = vst.msk [vmem:[#allocation2 + $0x40] sm:$0xff] %vm1037_vm5, %v1972_v12  ;;  %2022 = vrot.lane.b32.xlu1 %v1972_v12, %s7232_s14  ;;  %1994 = vrot.lane.b32.xlu0 %v1972_v12, %s7231_s10 }
 0x395   : > { %1998 = vrot.lane.b32.xlu1 %v8570_v24, %s7231_s10  ;;  %2068 = vperm.xlu0 %6909, %v353_v19   ;;  %v7084_v19 = vld [vmem:[%s7412_s20] sm:$0xff] }
 0x399   : > { %2028 = vrot.lane.b32.xlu1 %v1975_v16, %s7232_s14  ;;  %2268 = vperm.xlu0 %6909, %v2264_v60  }
 0x39a   : > { %v1991_v22 = vpop.permute.xlu0 %1990  ;;  %v6970_v59 = vpop.eup %6969 }
 0x39b   : > { %2012 = vst.msk [vmem:[#allocation2] sm:$0xff] %vm1073_vm10, %v1991_v22  ;;  %v2263_v11 = vmul.f32 0.5, %v6970_v59 }
 0x39d   : > { %2024 = vrot.lane.b32.xlu1 %v8545_v17, %s7232_s14  ;;  %2908 = vperm.xlu0 %6909, %v2261_v6  }
 0x3a1   : > { %2000 = vrot.lane.b32.xlu1 %v1975_v16, %s7231_s10 }
 0x3a2   : > { %v2048_v26 = vld [vmem:[#allocation2] sm:$0xff] }
 0x3a5   : > { %2073 = vperm.xlu1 %6910, %v354_v47  }
 0x3a9   : > { %2273 = vperm.xlu1 %6910, %v2265_v42  }
 0x3ad   : > { %2913 = vperm.xlu1 %6910, %v2263_v11  }
 0x3b4   : > { %v2021_v50 = vpop.permute.xlu0 %2020  ;;  %v1993_v29 = vpop.permute.xlu1 %1992 }
 0x3b5   : > { %v2002_v3 = vsel %vm11288_vm4, %v1991_v22, %v1993_v29 }
 0x3c1   : > { %v1997_v2 = vpop.permute.xlu0 %1996 }
 0x3c2   : > { %2015 = vst.msk [vmem:[#allocation2 + $0x18] sm:$0xff] %vm1073_vm10, %v1997_v2 }
 0x3c5   : > { %v2019_v0 = vpop.permute.xlu0 %2018 }
 0x3c6   : > { %v2030_v62 = vsel %vm11293_vm15, %v2019_v0, %v2021_v50 }
 0x3c9   : > { %v2051_v46 = vld [vmem:[#allocation2 + $0x18] sm:$0xff] }
 0x3ca   : > { %v6544_v54 = vpack.c.bf16 %v2051_v46, %v2048_v26 }
 0x3d4   : > { %v2027_v41 = vpop.permute.xlu0 %2026 }
 0x403   : > { %v2023_v57 = vpop.permute.xlu1 %2022  ;;  %v1995_v49 = vpop.permute.xlu0 %1994 }
 0x404   : > { %2042 = vst.msk [vmem:[#allocation2 + $0x70] sm:$0xff] %vm1105_vm11, %v2023_v57  ;;  %v2003_v52 = vsel %vm11286_vm1, %v1993_v29, %v1995_v49  ;;  %v2031_v10 = vsel %vm11292_vm7, %v2021_v50, %v2023_v57  ;;  %v7087_v49 = vld [vmem:[%s7412_s20 + $0x20] sm:$0xff] }
 0x405   : > { %2046 = vst.msk [vmem:[#allocation2 + $0x70] sm:$0xff] %vm11287_vm2, %v11232_v18 }
 0x406   : > { %2014 = vst.msk [vmem:[#allocation2 + $0x10] sm:$0xff] %vm1037_vm5, %v2003_v52 }
 0x407   : > { %v1999_v28 = vpop.permute.xlu1 %1998 }
 0x408   : > { %v2004_v15 = vsel %vm11289_vm0, %v1997_v2, %v1999_v28  ;;  %v7086_v2 = vld [vmem:[%s7412_s20 + $0x18] sm:$0xff] }
 0x409   : > { %v6542_v9 = vpack.c.bf16 %v2004_v15, %v2002_v3 }
 0x40b   : > { %v2029_v13 = vpop.permute.xlu1 %2028  ;;  %6543 = vmatprep.subr.bf16.mxu0 %v6542_v9 }
 0x40c   : > { %v2033_v40 = vsel %vm11290_vm6, %v2027_v41, %v2029_v13  ;;  %2045 = vst.msk [vmem:[#allocation2 + $0x88] sm:$0xff] %vm1105_vm11, %v2029_v13  ;;  %6545 = vmatpush1.bf16.msra.mxu0 %v6544_v54  ;;  %v2062_v44 = vld [vmem:[#allocation2 + $0x70] sm:$0xff] }
 0x40d   : > { %2047 = vst.msk [vmem:[#allocation2 + $0x88] sm:$0xff] %vm11291_vm3, %v11232_v18  ;;  %6547 = vmatprep.subr.bf16.mxu0 %v6546_v23  ;;  %v6550_v16 = vpack.c.bf16 %v2033_v40, %v2031_v10  ;;  %v2050_v17 = vld [vmem:[#allocation2 + $0x10] sm:$0xff]  ;;  %v2056_v23 = vld [vmem:[#allocation2 + $0x40] sm:$0xff] }
 0x40e   : > { %v6558_v31 = vpack.c.bf16 %v2059_v30, %v2056_v23 }
 0x40f   : > { %v2025_v53 = vpop.permute.xlu1 %2024 }
 0x410   : > { %v2032_v38 = vsel %vm11294_vm13, %v2025_v53, %v2027_v41  ;;  %6549 = vmatpush1.bf16.msra.mxu0 %v6548_v25 }
 0x411   : > { %6551 = vmatprep.subr.bf16.mxu0 %v6550_v16  ;;  %v6552_v4 = vpack.c.bf16 %v2032_v38, %v2030_v62 }
 0x413   : > { %v2001_v45 = vpop.permute.xlu1 %2000 }
 0x414   : > { %v2005_v27 = vsel %vm11295_vm14, %v1999_v28, %v2001_v45  ;;  %6553 = vmatpush1.bf16.msra.mxu0 %v6552_v4  ;;  %v2065_v43 = vld [vmem:[#allocation2 + $0x88] sm:$0xff]  ;;  %v8663_v48 = vpop.permute.xlu0 %2068 }
 0x415   : > { %2017 = vst.msk [vmem:[#allocation2 + $0x28] sm:$0xff] %vm1037_vm5, %v2005_v27  ;;  %v6562_v55 = vpack.c.bf16 %v2065_v43, %v2062_v44 }
 0x417   : > { %6235 = vmatmul.mubr.msk.f32.vlgmr.msra.gmra.mrb[4].mxu0 %vm1141_vm9, %v357_v20 }
 0x418   : > { %2152 = vmatprep.mubr.f32.mxu0 %v11232_v18  ;;  %v8672_v14 = vpop.permute.xlu0 %2268 }
 0x41b   : > { %6236 = vmatmul.mubr.msk.f32.gmra.mrb[6].mxu0 %vm1141_vm9, %v358_v35 }
 0x41c   : > { %v2053_v24 = vld [vmem:[#allocation2 + $0x28] sm:$0xff]  ;;  %3109 = vmatprep.mubr.f32.mxu0 %v11232_v18 }
 0x41d   : > { %v6554_v36 = vpack.c.bf16 %v2053_v24, %v2050_v17 }
 0x41f   : > { %6555 = vmatprep.subr.bf16.mxu1 %v6554_v36 }
 0x420   : > { %6557 = vmatpush3.bf16.msra.mxu1 %v6554_v36 }
 0x421   : > { %6559 = vmatprep.subr.bf16.mxu1 %v6558_v31 }
 0x424   : > { %6561 = vmatpush3.bf16.msra.mxu1 %v6558_v31  ;;  %v8666_v51 = vpop.permute.xlu1 %2073 }
 0x425   : > { %6563 = vmatprep.subr.bf16.mxu1 %v6562_v55 }
 0x428   : > { %6565 = vmatpush3.bf16.msra.mxu1 %v6562_v55  ;;  %v8692_v41 = vpop.permute.xlu1 %2273 }
 0x42b   : > { %6456 = vmatmul.mubr.msk.f32.vlgmr.msra.gmra.mrb[2].mxu1 %vm1141_vm9, %v358_v35 }
 0x4ea   : > { %v2148_v33 = vpop.f32.mrb[4].mxu0 }
 0x4eb   : > { %v2149_v32 = vadd.f32 %v2148_v33, %v8663_v48  ;;  %v2150_v5 = vpop.f32.mrb[5].mxu0 }
 0x4ec   : > { %v2151_v12 = vadd.f32 %v2150_v5, %v8663_v48 }
 0x4ed   : > { %v8670_v60 = vadd.f32 %v7084_v19, %v2149_v32 }
 0x4ee   : > { %v8675_v37 = vadd.f32 %v7085_v34, %v2151_v12  ;;  %v2154_v22 = vpop.f32.mrb[6].mxu0 }
 0x4ef   : > { %v8679_v6 = vmul.f32 %v8672_v14, %v8670_v60  ;;  %v2155_v20 = vadd.f32 %v2154_v22, %v8666_v51  ;;  %v2156_v47 = vpop.f32.mrb[7].mxu0 }
 0x4f0   : > { %v8684_v42 = vmul.f32 %v8672_v14, %v8675_v37  ;;  %v2157_v59 = vadd.f32 %v2156_v47, %v8666_v51 }
 0x4f1   : > { %v2282_v11 = vand.u32 2147483647, %v8679_v6  ;;  %v2285_v50 = vand.u32 2139095040, %v8679_v6  ;;  %v8690_v0 = vadd.f32 %v7086_v2, %v2155_v20 }
 0x4f2   : > { %v2385_v29 = vand.u32 2147483647, %v8684_v42  ;;  %v2388_v57 = vand.u32 2139095040, %v8684_v42  ;;  %v8697_v52 = vadd.f32 %v7087_v49, %v2157_v59 }
 0x4f3   : > { %v2286_v28 = vshrl.u32 %v2285_v50, 23  ;;  %v2289_v46 = vand.u32 8388607, %v2282_v11  ;;  %v8703_v3 = vmul.f32 %v8692_v41, %v8690_v0 }
 0x4f4   : > { %v2389_v15 = vshrl.u32 %v2388_v57, 23  ;;  %v2392_v9 = vand.u32 8388607, %v2385_v29  ;;  %v8710_v13 = vmul.f32 %v8692_v41, %v8697_v52 }
 0x4f5   : > { %v6251_v26 = vadd.s32 4294967169, %v2286_v28  ;;  %v2591_v54 = vand.u32 2147483647, %v8703_v3  ;;  %v2290_v40 = vor.u32 8388608, %v2289_v46  ;;  %v2594_v25 = vand.u32 2139095040, %v8703_v3 }
 0x4f6   : > { %v6255_v10 = vadd.s32 4294967169, %v2389_v15  ;;  %v2393_v16 = vor.u32 8388608, %v2392_v9  ;;  %v11235_v45 = vand.u32 2147483647, %v8710_v13  ;;  %v2697_v55 = vand.u32 2139095040, %v8710_v13 }
 0x4f7   : > { %v2292_v53 = vadd.s32 1, %v6251_v26  ;;  %v2595_v38 = vshrl.u32 %v2594_v25, 23  ;;  %v8715_v4 = vand.u32 8388607, %v2591_v54  ;;  %v8718_v35 = vshll.u32 %v2290_v40, 8 }
 0x4f8   : > { %v2395_v62 = vadd.s32 1, %v6255_v10  ;;  %v8720_v36 = vshll.u32 %v2393_v16, 8 }
 0x4f9   : > { %vm2293_vm8 = vcmp.gt.s32.totalorder %v2292_v53, 0  ;;  %v6263_v30 = vadd.s32 4294967169, %v2595_v38  ;;  %v2599_v31 = vor.u32 8388608, %v8715_v4 }
 0x4fa   : > { %v2294_v27 = vsel %vm2293_vm8, %v2292_v53, 0  ;;  %vm2396_vm12 = vcmp.gt.s32.totalorder %v2395_v62, 0 }
 0x4fb   : > { %v2295_v17 = vshrl.u32 %v2294_v27, 5  ;;  %v2296_v24 = vand.u32 31, %v2294_v27  ;;  %v2397_v23 = vsel %vm2396_vm12, %v2395_v62, 0  ;;  %v8728_v12 = vadd.s32 1, %v6263_v30 }
 0x4fc   : > { %v8722_v44 = vshrl.u32 %v2397_v23, 5  ;;  %v2399_v43 = vand.u32 31, %v2397_v23 }
 0x4fd   : > { %v2297_v33 = vsub.s32 32, %v2296_v24  ;;  %v2299_v32 = vshll.u32 %v7224_v56, %v2296_v24  ;;  %v2302_v5 = vshll.u32 %v11251_v58, %v2296_v24  ;;  %v2305_v19 = vshll.u32 %v11238_v61, %v2296_v24 }
 0x4fe   : > { %v2308_v34 = vshll.u32 %v11249_v63, %v2296_v24  ;;  %v2311_v22 = vshll.u32 %v11247_v1, %v2296_v24  ;;  %vm2314_vm1 = vcmp.lt.s32.totalorder %v2295_v17, 1  ;;  %v8733_v20 = vpop.f32.mrb[2].mxu1  ;;  %vm2315_vm2 = vcmp.lt.s32.totalorder %v2295_v17, 2 }
 0x4ff   : > { %v2300_v47 = vshrl.u32 %v11251_v58, %v2297_v33  ;;  %v2303_v59 = vshrl.u32 %v11238_v61, %v2297_v33  ;;  %v2306_v50 = vshrl.u32 %v11249_v63, %v2297_v33  ;;  %v8738_v2 = vpop.f32.mrb[3].mxu1  ;;  %v2298_v57 = vshrl.u32 %v7224_v56, %v2297_v33 }
 0x500   : > { %v2309_v49 = vshrl.u32 %v11247_v1, %v2297_v33  ;;  %v2312_v28 = vshrl.u32 %v11245_v8, %v2297_v33  ;;  %vm2316_vm4 = vcmp.lt.s32.totalorder %v2295_v17, 3  ;;  %v2400_v26 = vsub.s32 32, %v2399_v43 }
 0x501   : > { %v2301_v46 = vor.u32 %v2300_v47, %v2299_v32  ;;  %v2304_v15 = vor.u32 %v2303_v59, %v2302_v5  ;;  %v2307_v9 = vor.u32 %v2306_v50, %v2305_v19  ;;  %vm2317_vm0 = vcmp.lt.s32.totalorder %v2295_v17, 4 }
 0x502   : > { %v2310_v40 = vor.u32 %v2309_v49, %v2308_v34  ;;  %v2313_v10 = vor.u32 %v2312_v28, %v2311_v22  ;;  %v2402_v25 = vshll.u32 %v7224_v56, %v2399_v43  ;;  %v2405_v23 = vshll.u32 %v11251_v58, %v2399_v43 }
 0x503   : > { %v2318_v53 = vsel %vm2314_vm1, %v2298_v57, %v2301_v46  ;;  %v2319_v16 = vsel %vm2317_vm0, %v2307_v9, 2102212464  ;;  %v2322_v62 = vsel %vm2314_vm1, %v2301_v46, %v2304_v15  ;;  %v2326_v38 = vsel %vm2314_vm1, %v2304_v15, %v2307_v9 }
 0x504   : > { %v2320_v27 = vsel %vm2316_vm4, %v2304_v15, %v2319_v16  ;;  %v2323_v30 = vsel %vm2317_vm0, %v2310_v40, 920167782  ;;  %v2327_v24 = vsel %vm2317_vm0, %v2313_v10, 1326507024  ;;  %v2401_v5 = vshrl.u32 %v7224_v56, %v2400_v26 }
 0x505   : > { %v2324_v33 = vsel %vm2316_vm4, %v2307_v9, %v2323_v30  ;;  %v2328_v32 = vsel %vm2316_vm4, %v2310_v40, %v2327_v24  ;;  %v2403_v19 = vshrl.u32 %v11251_v58, %v2400_v26  ;;  %v2321_v34 = vsel %vm2315_vm2, %v2318_v53, %v2320_v27 }
 0x506   : > { %v2325_v22 = vsel %vm2315_vm2, %v2322_v62, %v2324_v33  ;;  %v2329_v47 = vsel %vm2315_vm2, %v2326_v38, %v2328_v32  ;;  %v2406_v59 = vshrl.u32 %v11238_v61, %v2400_v26  ;;  %v2408_v9 = vshll.u32 %v11238_v61, %v2399_v43 }
 0x507   : > { %v8758_v50 = vmul.u32.u64.low %v8718_v35, %v2329_v47  ;;  %v8759_v57 = vmul.u32.u64.high %v8718_v35, %v2329_v47, %v8758_v50  ;;  %v8762_v49 = vmul.u32.u64.low %v8718_v35, %v2325_v22  ;;  %v8763_v28 = vmul.u32.u64.high %v8718_v35, %v2325_v22, %v8762_v49 }
 0x508   : > { %v2404_v46 = vor.u32 %v2403_v19, %v2402_v25  ;;  %v2407_v15 = vor.u32 %v2406_v59, %v2405_v23  ;;  %v2409_v40 = vshrl.u32 %v11249_v63, %v2400_v26  ;;  %v2337_v10 = vmul.u32 %v8718_v35, %v2321_v34 }
 0x509   : > { %v2411_v17 = vshll.u32 %v11249_v63, %v2399_v43  ;;  %v2412_v53 = vshrl.u32 %v11247_v1, %v2400_v26  ;;  %v2415_v16 = vshrl.u32 %v11245_v8, %v2400_v26  ;;  %v2414_v38 = vshll.u32 %v11247_v1, %v2399_v43 }
 0x50a   : > { %v2410_v62 = vor.u32 %v2409_v40, %v2408_v9  ;;  %vm2417_vm6 = vcmp.lt.s32.totalorder %v8722_v44, 1  ;;  %vm2418_vm3 = vcmp.lt.s32.totalorder %v8722_v44, 2  ;;  %vm2339_vm7 = vc.u32 %v8759_v57, %v8762_v49 }
 0x50b   : > { %v2340_v25 = vadd.s32 1, %v8763_v28  ;;  %v2413_v27 = vor.u32 %v2412_v53, %v2411_v17  ;;  %vm2419_vm15 = vcmp.lt.s32.totalorder %v8722_v44, 3  ;;  %v2416_v35 = vor.u32 %v2415_v16, %v2414_v38 }
 0x50c   : > { %vm2420_vm13 = vcmp.lt.s32.totalorder %v8722_v44, 4  ;;  %v2421_v30 = vsel %vm2417_vm6, %v2401_v5, %v2404_v46  ;;  %v2425_v24 = vsel %vm2417_vm6, %v2404_v46, %v2407_v15  ;;  %v2429_v33 = vsel %vm2417_vm6, %v2407_v15, %v2410_v62 }
 0x50d   : > { %v2341_v26 = vsel %vm2339_vm7, %v2340_v25, %v8763_v28  ;;  %v2422_v23 = vsel %vm2420_vm13, %v2410_v62, 2102212464  ;;  %v2426_v43 = vsel %vm2420_vm13, %v2413_v27, 920167782  ;;  %v2430_v22 = vsel %vm2420_vm13, %v2416_v35, 1326507024 }
 0x50e   : > { %v2342_v32 = vadd.s32 %v2341_v26, %v2337_v10  ;;  %v2423_v19 = vsel %vm2419_vm15, %v2407_v15, %v2422_v23  ;;  %v2427_v34 = vsel %vm2419_vm15, %v2410_v62, %v2426_v43  ;;  %v2431_v59 = vsel %vm2419_vm15, %v2413_v27, %v2430_v22 }
 0x50f   : > { %v2428_v47 = vsel %vm2418_vm3, %v2425_v24, %v2427_v34  ;;  %vm2602_vm14 = vcmp.gt.s32.totalorder %v8728_v12, 0  ;;  %v2698_v50 = vshrl.u32 %v2697_v55, 23  ;;  %v2432_v28 = vsel %vm2418_vm3, %v2429_v33, %v2431_v59 }
 0x510   : > { %v2343_v5 = vadd.s32 536870912, %v2342_v32  ;;  %v8787_v46 = vmul.u32.u64.low %v8720_v36, %v2428_v47  ;;  %v8788_v9 = vmul.u32.u64.high %v8720_v36, %v2428_v47, %v8787_v46  ;;  %v2424_v15 = vsel %vm2418_vm3, %v2421_v30, %v2423_v19 }
 0x511   : > { %v8794_v40 = vmul.u32.u64.low %v8720_v36, %v2432_v28  ;;  %v8795_v10 = vmul.u32.u64.high %v8720_v36, %v2432_v28, %v8794_v40  ;;  %v2603_v17 = vsel %vm2602_vm14, %v8728_v12, 0  ;;  %v8801_v16 = vadd.s32 %v8762_v49, %v8759_v57 }
 0x512   : > { %v8798_v53 = vshrl.u32 %v2343_v5, 30  ;;  %v2605_v55 = vand.u32 31, %v2603_v17  ;;  %v8805_v62 = vshll.u32 %v2599_v31, 8  ;;  %v6267_v38 = vadd.s32 4294967169, %v2698_v50 }
 0x513   : > { %v8809_v44 = vand.u32 8388607, %v11235_v45  ;;  %v2440_v27 = vmul.u32 %v8720_v36, %v2424_v15  ;;  %v2443_v12 = vadd.s32 1, %v8788_v9  ;;  %vm2442_vm8 = vc.u32 %v8795_v10, %v8787_v46 }
 0x514   : > { %v2345_v25 = vshll.u32 %v8798_v53, 30  ;;  %v2606_v35 = vsub.s32 32, %v2605_v55  ;;  %v2604_v57 = vshrl.u32 %v2603_v17, 5  ;;  %v2608_v4 = vshll.u32 %v7224_v56, %v2605_v55 }
 0x515   : > { %v2611_v31 = vshll.u32 %v11251_v58, %v2605_v55  ;;  %v2444_v30 = vsel %vm2442_vm8, %v2443_v12, %v8788_v9  ;;  %v2614_v26 = vshll.u32 %v11238_v61, %v2605_v55  ;;  %v2617_v33 = vshll.u32 %v11249_v63, %v2605_v55 }
 0x516   : > { %v8818_v49 = vsub.s32 %v2342_v32, %v2345_v25  ;;  %v2609_v24 = vshrl.u32 %v11251_v58, %v2606_v35  ;;  %v2445_v36 = vadd.s32 %v2444_v30, %v2440_v27  ;;  %v2612_v23 = vshrl.u32 %v11238_v61, %v2606_v35 }
 0x517   : > { %v2615_v43 = vshrl.u32 %v11249_v63, %v2606_v35  ;;  %v2618_v22 = vshrl.u32 %v11247_v1, %v2606_v35  ;;  %v2620_v32 = vshll.u32 %v11247_v1, %v2605_v55  ;;  %v2621_v5 = vshrl.u32 %v11245_v8, %v2606_v35 }
 0x518   : > { %v2348_v19 = vsub.s32 0, %v8818_v49  ;;  %v2610_v34 = vor.u32 %v2609_v24, %v2608_v4  ;;  %v2446_v47 = vadd.s32 536870912, %v2445_v36  ;;  %v2613_v59 = vor.u32 %v2612_v23, %v2611_v31 }
 0x519   : > { %v2616_v50 = vor.u32 %v2615_v43, %v2614_v26  ;;  %v2607_v9 = vshrl.u32 %v7224_v56, %v2606_v35  ;;  %v2619_v15 = vor.u32 %v2618_v22, %v2617_v33  ;;  %v2704_v40 = vadd.s32 1, %v6267_v38 }
 0x51a   : > { %v6252_v28 = vmin.u32 %v2348_v19, %v8818_v49  ;;  %v8832_v17 = vshrl.u32 %v2446_v47, 30  ;;  %v2622_v25 = vor.u32 %v2621_v5, %v2620_v32  ;;  %vm2623_vm12 = vcmp.lt.s32.totalorder %v2604_v57, 1 }
 0x51b   : > { %vm2626_vm1 = vcmp.lt.s32.totalorder %v2604_v57, 4  ;;  %vm2624_vm2 = vcmp.lt.s32.totalorder %v2604_v57, 2  ;;  %v2631_v55 = vsel %vm2623_vm12, %v2610_v34, %v2613_v59  ;;  %vm2625_vm4 = vcmp.lt.s32.totalorder %v2604_v57, 3 }
 0x51c   : > { %v2350_v27 = vclz %v6252_v28  ;;  %v2628_v12 = vsel %vm2626_vm1, %v2616_v50, 2102212464  ;;  %v2448_v4 = vshll.u32 %v8832_v17, 30  ;;  %v2632_v31 = vsel %vm2626_vm1, %v2619_v15, 920167782 }
 0x51d   : > { %v2635_v30 = vsel %vm2623_vm12, %v2613_v59, %v2616_v50  ;;  %v2627_v26 = vsel %vm2623_vm12, %v2607_v9, %v2610_v34  ;;  %v2633_v23 = vsel %vm2625_vm4, %v2616_v50, %v2632_v31  ;;  %v2636_v35 = vsel %vm2626_vm1, %v2622_v25, 1326507024 }
 0x51e   : > { %v6253_v24 = vadd.s32 4294967294, %v2350_v27  ;;  %v8835_v43 = vsub.s32 %v2445_v36, %v2448_v4  ;;  %v2629_v38 = vsel %vm2625_vm4, %v2613_v59, %v2628_v12  ;;  %v2634_v33 = vsel %vm2624_vm2, %v2631_v55, %v2633_v23 }
 0x51f   : > { %v2637_v19 = vsel %vm2625_vm4, %v2619_v15, %v2636_v35  ;;  %v8840_v32 = vmul.u32.u64.low %v8805_v62, %v2634_v33  ;;  %v8841_v47 = vmul.u32.u64.high %v8805_v62, %v2634_v33, %v8840_v32  ;;  %v2630_v9 = vsel %vm2624_vm2, %v2627_v26, %v2629_v38 }
 0x520   : > { %vm6254_vm0 = vcmp.lt.s32.totalorder %v6253_v24, 0  ;;  %v2638_v22 = vsel %vm2624_vm2, %v2635_v30, %v2637_v19  ;;  %v2451_v28 = vsub.s32 0, %v8835_v43  ;;  %vm2705_vm6 = vcmp.gt.s32.totalorder %v2704_v40, 0 }
 0x521   : > { %v2353_v5 = vsel %vm6254_vm0, 0, %v6253_v24  ;;  %v8846_v34 = vmul.u32.u64.low %v8805_v62, %v2638_v22  ;;  %v8847_v50 = vmul.u32.u64.high %v8805_v62, %v2638_v22, %v8846_v34  ;;  %v2702_v25 = vor.u32 8388608, %v8809_v44 }
 0x522   : > { %v2354_v36 = vsub.s32 32, %v2353_v5  ;;  %v2358_v59 = vsub.s32 4294967266, %v2353_v5  ;;  %v6256_v15 = vmin.u32 %v2451_v28, %v8835_v43  ;;  %v2706_v27 = vsel %vm2705_vm6, %v2704_v40, 0 }
 0x523   : > { %v2649_v4 = vadd.s32 1, %v8841_v47  ;;  %v2231_v31 = vadd.f32 %v8733_v20, %v8666_v51  ;;  %v2646_v24 = vmul.u32 %v8805_v62, %v2630_v9  ;;  %vm2648_vm3 = vc.u32 %v8847_v50, %v8840_v32 }
 0x524   : > { %v2356_v12 = vshrl.u32 %v8801_v16, %v2354_v36  ;;  %v2359_v55 = vadd.s32 127, %v2358_v59  ;;  %v2453_v30 = vclz %v6256_v15  ;;  %v2708_v57 = vand.u32 31, %v2706_v27  ;;  %v7088_v15 = vld [vmem:[%s7412_s20 + $0x28] sm:$0xff] }
 0x525   : > { %v2355_v26 = vshll.u32 %v8818_v49, %v2353_v5  ;;  %v2650_v44 = vsel %vm2648_vm3, %v2649_v4, %v8841_v47  ;;  %v8863_v16 = vadd.f32 %v8738_v2, %v8663_v48  ;;  %v2441_v40 = vadd.s32 %v8787_v46, %v8795_v10 }
 0x526   : > { %v2360_v23 = vshll.u32 %v2359_v55, 23  ;;  %v6257_v51 = vadd.s32 4294967294, %v2453_v30  ;;  %v2651_v20 = vadd.s32 %v2650_v44, %v2646_v24  ;;  %v2709_v35 = vsub.s32 32, %v2708_v57 }
 0x527   : > { %v2357_v62 = vor.u32 %v2356_v12, %v2355_v26  ;;  %v8867_v33 = vshrl.u32 %v2706_v27, 5  ;;  %v8869_v19 = vshll.u32 %v2702_v25, 8  ;;  %v2711_v22 = vshll.u32 %v7224_v56, %v2708_v57 }
 0x528   : > { %v2361_v38 = vor.u32 4788187, %v2360_v23  ;;  %vm6258_vm7 = vcmp.lt.s32.totalorder %v6257_v51, 0  ;;  %v2652_v49 = vadd.s32 536870912, %v2651_v20  ;;  %v2712_v48 = vshrl.u32 %v11251_v58, %v2709_v35 }
 0x529   : > { %v2456_v2 = vsel %vm6258_vm7, 0, %v6257_v51  ;;  %v2714_v47 = vshll.u32 %v11251_v58, %v2708_v57  ;;  %v2715_v46 = vshrl.u32 %v11238_v61, %v2709_v35  ;;  %v2718_v10 = vshrl.u32 %v11249_v63, %v2709_v35 }
 0x52a   : > { %v2457_v5 = vsub.s32 32, %v2456_v2  ;;  %v2461_v28 = vsub.s32 4294967266, %v2456_v2  ;;  %v8876_v34 = vshrl.u32 %v2652_v49, 30  ;;  %v2717_v36 = vshll.u32 %v11238_v61, %v2708_v57 }
 0x52b   : > { %v2362_v59 = vand.u32 2147483647, %v2361_v38  ;;  %v2713_v9 = vor.u32 %v2712_v48, %v2711_v22  ;;  %vm2726_vm15 = vcmp.lt.s32.totalorder %v8867_v33, 1  ;;  %v8881_v25 = vadd.f32 %v7088_v15, %v2231_v31 }
 0x52c   : > { %v2462_v27 = vadd.s32 127, %v2461_v28  ;;  %v2654_v12 = vshll.u32 %v8876_v34, 30  ;;  %v2716_v55 = vor.u32 %v2715_v46, %v2714_v47  ;;  %v2719_v4 = vor.u32 %v2718_v10, %v2717_v36 }
 0x52d   : > { %v2720_v30 = vshll.u32 %v11249_v63, %v2708_v57  ;;  %v2721_v24 = vshrl.u32 %v11247_v1, %v2709_v35  ;;  %v2723_v26 = vshll.u32 %v11247_v1, %v2708_v57  ;;  %v2724_v23 = vshrl.u32 %v11245_v8, %v2709_v35 }
 0x52e   : > { %v2364_v44 = vcvt.s32.f32 %v2357_v62  ;;  %v2459_v51 = vshrl.u32 %v2441_v40, %v2457_v5  ;;  %v2463_v38 = vshll.u32 %v2462_v27, 23  ;;  %v8888_v49 = vsub.s32 %v2651_v20, %v2654_v12 }
 0x52f   : > { %v2458_v31 = vshll.u32 %v8835_v43, %v2456_v2  ;;  %v2710_v22 = vshrl.u32 %v7224_v56, %v2709_v35  ;;  %v2722_v48 = vor.u32 %v2721_v24, %v2720_v30  ;;  %v2725_v47 = vor.u32 %v2724_v23, %v2723_v26 }
 0x530   : > { %v2365_v46 = vmul.f32 %v2364_v44, %v2362_v59  ;;  %v2464_v10 = vor.u32 4788187, %v2463_v38  ;;  %v2657_v28 = vsub.s32 0, %v8888_v49  ;;  %vm2729_vm13 = vcmp.lt.s32.totalorder %v8867_v33, 4 }
 0x531   : > { %vm2728_vm14 = vcmp.lt.s32.totalorder %v8867_v33, 3  ;;  %v2731_v57 = vsel %vm2729_vm13, %v2719_v4, 2102212464  ;;  %v2734_v40 = vsel %vm2726_vm15, %v2713_v9, %v2716_v55  ;;  %v2735_v20 = vsel %vm2729_vm13, %v2722_v48, 920167782 }
 0x532   : > { %v2460_v62 = vor.u32 %v2459_v51, %v2458_v31  ;;  %v6264_v43 = vmin.u32 %v2657_v28, %v8888_v49  ;;  %vm2727_vm8 = vcmp.lt.s32.totalorder %v8867_v33, 2  ;;  %v2736_v35 = vsel %vm2728_vm14, %v2719_v4, %v2735_v20 }
 0x533   : > { %v2730_v2 = vsel %vm2726_vm15, %v2710_v22, %v2713_v9  ;;  %v2737_v5 = vsel %vm2727_vm8, %v2734_v40, %v2736_v35  ;;  %v2738_v36 = vsel %vm2726_vm15, %v2716_v55, %v2719_v4  ;;  %v2739_v59 = vsel %vm2729_vm13, %v2725_v47, 1326507024 }
 0x534   : > { %vm2284_vm12 = vcmp.lt.s32.totalorder %v8679_v6, 0  ;;  %v2465_v15 = vand.u32 2147483647, %v2464_v10  ;;  %v2659_v27 = vclz %v6264_v43  ;;  %v2732_v12 = vsel %vm2728_vm14, %v2716_v55, %v2731_v57 }
 0x535   : > { %v2740_v30 = vsel %vm2728_vm14, %v2722_v48, %v2739_v59  ;;  %v8915_v24 = vmul.u32.u64.low %v8869_v19, %v2737_v5  ;;  %v8916_v26 = vmul.u32.u64.high %v8869_v19, %v2737_v5, %v8915_v24  ;;  %v8920_v4 = vmul.f32 %v8692_v41, %v8881_v25  ;;  %v7089_v48 = vld [vmem:[%s7412_s20 + $0x10] sm:$0xff]  ;;  %s7233_s20 = smov 3  }
 0x536   : > { %v2741_v9 = vsel %vm2727_vm8, %v2738_v36, %v2740_v30  ;;  %v2467_v23 = vcvt.s32.f32 %v2460_v62  ;;  %v6265_v44 = vadd.s32 4294967294, %v2659_v27  ;;  %v2733_v55 = vsel %vm2727_vm8, %v2730_v2, %v2732_v12 }
 0x537   : > { %v8923_v51 = vmul.u32.u64.low %v8869_v19, %v2741_v9  ;;  %v8924_v38 = vmul.u32.u64.high %v8869_v19, %v2741_v9, %v8923_v51  ;;  %v11234_v31 = vand.u32 2147483647, %v8920_v4  ;;  %v2800_v22 = vand.u32 2139095040, %v8920_v4 }
 0x538   : > { %v8932_v47 = vadd.f32 %v7089_v48, %v8863_v16  ;;  %vm2387_vm1 = vcmp.lt.s32.totalorder %v8684_v42, 0  ;;  %v2468_v41 = vmul.f32 %v2467_v23, %v2465_v15  ;;  %v2647_v10 = vadd.s32 %v8840_v32, %v8847_v50 }
 0x539   : > { %vm6266_vm2 = vcmp.lt.s32.totalorder %v6265_v44, 0  ;;  %v2366_v28 = vxor.u32 2147483648, %v2365_v46  ;;  %v2752_v33 = vadd.s32 1, %v8916_v26  ;;  %v2801_v40 = vshrl.u32 %v2800_v22, 23 }
 0x53a   : > { %v2662_v57 = vsel %vm6266_vm2, 0, %v6265_v44  ;;  %v2749_v43 = vmul.u32 %v8869_v19, %v2733_v55  ;;  %v2804_v16 = vand.u32 8388607, %v11234_v31  ;;  %vm2751_vm4 = vc.u32 %v8924_v38, %v8915_v24 }
 0x53b   : > { %v2663_v20 = vsub.s32 32, %v2662_v57  ;;  %v2667_v62 = vsub.s32 4294967266, %v2662_v57  ;;  %v6271_v35 = vadd.s32 4294967169, %v2801_v40  ;;  %v8944_v2 = vmul.f32 %v8672_v14, %v8932_v47 }
 0x53c   : > { %v2368_v32 = vsub.s32 4, %v8798_v53  ;;  %v2469_v50 = vxor.u32 2147483648, %v2468_v41  ;;  %v2753_v59 = vsel %vm2751_vm4, %v2752_v33, %v8916_v26  ;;  %v2367_v19 = vsel %vm2284_vm12, %v2366_v28, %v2365_v46 }
 0x53d   : > { %v2665_v5 = vshrl.u32 %v2647_v10, %v2663_v20  ;;  %v2668_v36 = vadd.s32 127, %v2667_v62  ;;  %v2664_v15 = vshll.u32 %v8888_v49, %v2662_v57  ;;  %v2754_v27 = vadd.s32 %v2753_v59, %v2749_v43 }
 0x53e   : > { %v2807_v12 = vadd.s32 1, %v6271_v35  ;;  %v2805_v9 = vor.u32 8388608, %v2804_v16  ;;  %v11231_v23 = vand.u32 2147483647, %v8944_v2  ;;  %v2491_v14 = vand.u32 2139095040, %v8944_v2 }
 0x53f   : > { %v2669_v30 = vshll.u32 %v2668_v36, 23  ;;  %v8953_v44 = vor.u32 %v2665_v5, %v2664_v15  ;;  %v2755_v51 = vadd.s32 536870912, %v2754_v27  ;;  %v8958_v26 = vsel %vm2284_vm12, %v2368_v32, %v8798_v53 }
 0x540   : > { %vm2808_vm0 = vcmp.gt.s32.totalorder %v2807_v12, 0  ;;  %v8962_v49 = vsel %vm2387_vm1, %v2469_v50, %v2468_v41  ;;  %v2492_v55 = vshrl.u32 %v2491_v14, 23  ;;  %vm8966_vm6 = vcmp.le.f32.partialorder %v2282_v11, 0.7853982 }
 0x541   : > { %v2809_v46 = vsel %vm2808_vm0, %v2807_v12, 0  ;;  %v8971_v48 = vadd.s32 %v8915_v24, %v8924_v38  ;;  %v8973_v10 = vshrl.u32 %v2755_v51, 30  ;;  %v8978_v53 = vsel %vm8966_vm6, %v8679_v6, %v2367_v19 }
 0x542   : > { %v2811_v28 = vand.u32 31, %v2809_v46  ;;  %v2670_v41 = vor.u32 4788187, %v2669_v30  ;;  %v8980_v57 = vshll.u32 %v2805_v9, 8  ;;  %v8984_v11 = vand.u32 8388607, %v11231_v23 }
 0x543   : > { %v2371_v24 = vsel %vm8966_vm6, 0, %v8958_v26  ;;  %v2673_v38 = vcvt.s32.f32 %v8953_v44  ;;  %v2757_v33 = vshll.u32 %v8973_v10, 30  ;;  %v2810_v40 = vshrl.u32 %v2809_v46, 5 }
 0x544   : > { %v2812_v20 = vsub.s32 32, %v2811_v28  ;;  %v2814_v62 = vshll.u32 %v7224_v56, %v2811_v28  ;;  %v2817_v43 = vshll.u32 %v11251_v58, %v2811_v28  ;;  %v2820_v16 = vshll.u32 %v11238_v61, %v2811_v28 }
 0x545   : > { %v6259_v35 = vadd.s32 4294967169, %v2492_v55  ;;  %v8994_v32 = vsub.s32 %v2754_v27, %v2757_v33  ;;  %v2823_v36 = vshll.u32 %v11249_v63, %v2811_v28  ;;  %v2826_v15 = vshll.u32 %v11247_v1, %v2811_v28 }
 0x546   : > { %v2815_v50 = vshrl.u32 %v11251_v58, %v2812_v20  ;;  %v2818_v5 = vshrl.u32 %v11238_v61, %v2812_v20  ;;  %v2821_v59 = vshrl.u32 %v11249_v63, %v2812_v20  ;;  %v2824_v19 = vshrl.u32 %v11247_v1, %v2812_v20 }
 0x547   : > { %v2827_v12 = vshrl.u32 %v11245_v8, %v2812_v20  ;;  %v2760_v30 = vsub.s32 0, %v8994_v32  ;;  %v2813_v9 = vshrl.u32 %v7224_v56, %v2812_v20  ;;  %vm2829_vm3 = vcmp.lt.s32.totalorder %v2810_v40, 1 }
 0x548   : > { %v2816_v27 = vor.u32 %v2815_v50, %v2814_v62  ;;  %v2819_v14 = vor.u32 %v2818_v5, %v2817_v43  ;;  %v2822_v44 = vor.u32 %v2821_v59, %v2820_v16  ;;  %v2825_v51 = vor.u32 %v2824_v19, %v2823_v36 }
 0x549   : > { %v2828_v26 = vor.u32 %v2827_v12, %v2826_v15  ;;  %v6268_v46 = vmin.u32 %v2760_v30, %v8994_v32  ;;  %vm2830_vm7 = vcmp.lt.s32.totalorder %v2810_v40, 2  ;;  %vm2831_vm15 = vcmp.lt.s32.totalorder %v2810_v40, 3 }
 0x54a   : > { %vm2832_vm13 = vcmp.lt.s32.totalorder %v2810_v40, 4  ;;  %v2833_v55 = vsel %vm2829_vm3, %v2813_v9, %v2816_v27  ;;  %v2837_v28 = vsel %vm2829_vm3, %v2816_v27, %v2819_v14  ;;  %v2841_v45 = vsel %vm2829_vm3, %v2819_v14, %v2822_v44 }
 0x54b   : > { %v2834_v22 = vsel %vm2832_vm13, %v2822_v44, 2102212464  ;;  %v2838_v33 = vsel %vm2832_vm13, %v2825_v51, 920167782  ;;  %v2762_v23 = vclz %v6268_v46  ;;  %v2671_v20 = vand.u32 2147483647, %v2670_v41 }
 0x54c   : > { %v2835_v18 = vsel %vm2831_vm15, %v2819_v14, %v2834_v22  ;;  %v2839_v31 = vsel %vm2831_vm15, %v2822_v44, %v2838_v33  ;;  %v2842_v43 = vsel %vm2832_vm13, %v2828_v26, 1326507024  ;;  %v2498_v16 = vadd.s32 1, %v6259_v35 }
 0x54d   : > { %v2840_v62 = vsel %vm2830_vm7, %v2837_v28, %v2839_v31  ;;  %v6269_v50 = vadd.s32 4294967294, %v2762_v23  ;;  %v2843_v5 = vsel %vm2831_vm15, %v2825_v51, %v2842_v43  ;;  %v2836_v19 = vsel %vm2830_vm7, %v2833_v55, %v2835_v18 }
 0x54e   : > { %v9008_v36 = vmul.u32.u64.low %v8980_v57, %v2840_v62  ;;  %v9009_v59 = vmul.u32.u64.high %v8980_v57, %v2840_v62, %v9008_v36  ;;  %v2844_v15 = vsel %vm2830_vm7, %v2841_v45, %v2843_v5  ;;  %v2496_v12 = vor.u32 8388608, %v8984_v11 }
 0x54f   : > { %vm2499_vm14 = vcmp.gt.s32.totalorder %v2498_v16, 0  ;;  %vm6270_vm8 = vcmp.lt.s32.totalorder %v6269_v50, 0  ;;  %v9016_v41 = vmul.u32.u64.low %v8980_v57, %v2844_v15  ;;  %v9017_v31 = vmul.u32.u64.high %v8980_v57, %v2844_v15, %v9016_v41 }
 0x550   : > { %v2500_v35 = vsel %vm2499_vm14, %v2498_v16, 0  ;;  %v2765_v23 = vsel %vm6270_vm8, 0, %v6269_v50  ;;  %6971 = vcosq.f32 %v8978_v53  ;;  %v9020_v9 = vand.u32 3, %v2371_v24 }
 0x551   : > { %v2502_v30 = vand.u32 31, %v2500_v35  ;;  %v2674_v27 = vmul.f32 %v2673_v38, %v2671_v20  ;;  %v2766_v14 = vsub.s32 32, %v2765_v23  ;;  %v2770_v18 = vsub.s32 4294967266, %v2765_v23 }
 0x552   : > { %v2855_v45 = vadd.s32 1, %v9009_v59  ;;  %v2852_v11 = vmul.u32 %v8980_v57, %v2836_v19  ;;  %v2501_v40 = vshrl.u32 %v2500_v35, 5  ;;  %6973 = vsinq.f32 %v8978_v53 }
 0x553   : > { %v2503_v44 = vsub.s32 32, %v2502_v30  ;;  %v2771_v51 = vadd.s32 127, %v2770_v18  ;;  %vm2854_vm12 = vc.u32 %v9017_v31, %v9008_v36  ;;  %v2505_v26 = vshll.u32 %v7224_v56, %v2502_v30 }
 0x554   : > { %v2508_v24 = vshll.u32 %v11251_v58, %v2502_v30  ;;  %v2856_v38 = vsel %vm2854_vm12, %v2855_v45, %v9009_v59  ;;  %v2511_v57 = vshll.u32 %v11238_v61, %v2502_v30  ;;  %vm2593_vm2 = vcmp.lt.s32.totalorder %v8703_v3, 0 }
 0x555   : > { %v2506_v46 = vshrl.u32 %v11251_v58, %v2503_v44  ;;  %v2509_v55 = vshrl.u32 %v11238_v61, %v2503_v44  ;;  %v2768_v53 = vshrl.u32 %v8971_v48, %v2766_v14  ;;  %v2772_v22 = vshll.u32 %v2771_v51, 23 }
 0x556   : > { %v2857_v28 = vadd.s32 %v2856_v38, %v2852_v11  ;;  %v2512_v33 = vshrl.u32 %v11249_v63, %v2503_v44  ;;  %v2514_v43 = vshll.u32 %v11249_v63, %v2502_v30  ;;  %v2515_v16 = vshrl.u32 %v11247_v1, %v2503_v44 }
 0x557   : > { %v2507_v20 = vor.u32 %v2506_v46, %v2505_v26  ;;  %v2510_v62 = vor.u32 %v2509_v55, %v2508_v24  ;;  %v2675_v50 = vxor.u32 2147483648, %v2674_v27  ;;  %v2767_v5 = vshll.u32 %v8994_v32, %v2765_v23 }
 0x558   : > { %v2858_v59 = vadd.s32 536870912, %v2857_v28  ;;  %v2513_v19 = vor.u32 %v2512_v33, %v2511_v57  ;;  %v2516_v15 = vor.u32 %v2515_v16, %v2514_v43  ;;  %v2517_v41 = vshll.u32 %v11247_v1, %v2502_v30 }
 0x559   : > { %v2518_v48 = vshrl.u32 %v11245_v8, %v2503_v44  ;;  %v2536_v35 = vshll.u32 %v2496_v12, 8  ;;  %v2769_v14 = vor.u32 %v2768_v53, %v2767_v5  ;;  %v2504_v45 = vshrl.u32 %v7224_v56, %v2503_v44 }
 0x55a   : > { %v9041_v18 = vshrl.u32 %v2858_v59, 30  ;;  %vm2520_vm4 = vcmp.lt.s32.totalorder %v2501_v40, 1  ;;  %vm9046_vm0 = vcmp.le.f32.partialorder %v2385_v29, 0.7853982  ;;  %v6972_v32 = vpop.eup %6971  ;;  %v2773_v23 = vor.u32 4788187, %v2772_v22 }
 0x55b   : > { %v2519_v51 = vor.u32 %v2518_v48, %v2517_v41  ;;  %vm2523_vm6 = vcmp.lt.s32.totalorder %v2501_v40, 4  ;;  %v2528_v30 = vsel %vm2520_vm4, %v2507_v20, %v2510_v62  ;;  %vm2522_vm3 = vcmp.lt.s32.totalorder %v2501_v40, 3 }
 0x55c   : > { %v2860_v12 = vshll.u32 %v9041_v18, 30  ;;  %v2525_v26 = vsel %vm2523_vm6, %v2513_v19, 2102212464  ;;  %v2529_v24 = vsel %vm2523_vm6, %v2516_v15, 920167782  ;;  %v6974_v38 = vpop.eup %6973  ;;  %vm2521_vm7 = vcmp.lt.s32.totalorder %v2501_v40, 2 }
 0x55d   : > { %v2530_v44 = vsel %vm2522_vm3, %v2513_v19, %v2529_v24  ;;  %v2532_v46 = vsel %vm2520_vm4, %v2510_v62, %v2513_v19  ;;  %v2533_v29 = vsel %vm2523_vm6, %v2519_v51, 1326507024  ;;  %vm2374_vm15 = vweird.f32 %v8679_v6 }
 0x55e   : > { %v9054_v55 = vsub.s32 %v2857_v28, %v2860_v12  ;;  %v2524_v57 = vsel %vm2520_vm4, %v2504_v45, %v2507_v20  ;;  %v2526_v53 = vsel %vm2522_vm3, %v2510_v62, %v2525_v26  ;;  %v2531_v22 = vsel %vm2521_vm7, %v2528_v30, %v2530_v44 }
 0x55f   : > { %v2676_v33 = vsel %vm2593_vm2, %v2675_v50, %v2674_v27  ;;  %v2534_v43 = vsel %vm2522_vm3, %v2516_v15, %v2533_v29  ;;  %v9060_v16 = vmul.u32.u64.low %v2536_v35, %v2531_v22  ;;  %v9061_v5 = vmul.u32.u64.high %v2536_v35, %v2531_v22, %v9060_v16  ;;  %v9088_v29 = vpop.permute.xlu0 %2908 }
 0x560   : > { %v2774_v59 = vand.u32 2147483647, %v2773_v23  ;;  %v2776_v19 = vcvt.s32.f32 %v2769_v14  ;;  %v2863_v41 = vsub.s32 0, %v9054_v55  ;;  %v2535_v28 = vsel %vm2521_vm7, %v2532_v46, %v2534_v43 }
 0x561   : > { %v2527_v48 = vsel %vm2521_vm7, %v2524_v57, %v2526_v53  ;;  %v9067_v20 = vmul.u32.u64.low %v2536_v35, %v2535_v28  ;;  %v9068_v62 = vmul.u32.u64.high %v2536_v35, %v2535_v28, %v9067_v20  ;;  %v2378_v45 = vxor.u32 2147483648, %v6974_v38 }
 0x562   : > { %v6272_v51 = vmin.u32 %v2863_v41, %v9054_v55  ;;  %vm2377_vm13 = vcmp.eq.s32.totalorder %v9020_v9, 0  ;;  %v2381_v27 = vxor.u32 2147483648, %v6972_v32  ;;  %v2471_v50 = vsub.s32 4, %v8832_v17 }
 0x563   : > { %v2546_v15 = vadd.s32 1, %v9061_v5  ;;  %v2379_v14 = vsel %vm2377_vm13, %v6972_v32, %v2378_v45  ;;  %vm2380_vm14 = vcmp.eq.s32.totalorder %v9020_v9, 2  ;;  %v2473_v40 = vsel %vm9046_vm0, %v8684_v42, %v8962_v49 }
 0x564   : > { %v2865_v23 = vclz %v6272_v51  ;;  %vm2376_vm8 = vcmp.lt.s32.totalorder %v9020_v9, 2  ;;  %v2382_v30 = vsel %vm2380_vm14, %v2381_v27, %v6974_v38  ;;  %6975 = vcosq.f32 %v2473_v40 }
 0x565   : > { %v2543_v12 = vmul.u32 %v2536_v35, %v2527_v48  ;;  %vm2545_vm12 = vc.u32 %v9068_v62, %v9060_v16  ;;  %v2383_v26 = vsel %vm2376_vm8, %v2379_v14, %v2382_v30  ;;  %v2472_v32 = vsel %vm2387_vm1, %v2471_v50, %v8832_v17 }
 0x566   : > { %v6273_v24 = vadd.s32 4294967294, %v2865_v23  ;;  %v2547_v44 = vsel %vm2545_vm12, %v2546_v15, %v9061_v5  ;;  %v2384_v49 = vsel %vm2374_vm15, nan, %v2383_v26  ;;  %6977 = vsinq.f32 %v2473_v40 }
 0x567   : > { %v2777_v46 = vmul.f32 %v2776_v19, %v2774_v59  ;;  %v2548_v9 = vadd.s32 %v2547_v44, %v2543_v12  ;;  %v2900_v38 = vsub.f32 1.0, %v2384_v49  ;;  %v2474_v35 = vsel %vm9046_vm0, 0, %v2472_v32 }
 0x568   : > { %vm6274_vm4 = vcmp.lt.s32.totalorder %v6273_v24, 0  ;;  %vm9094_vm6 = vcmp.le.f32.partialorder %v2591_v54, 0.7853982  ;;  %v2677_v57 = vsub.s32 4, %v8876_v34  ;;  %v2853_v11 = vadd.s32 %v9008_v36, %v9017_v31 }
 0x569   : > { %v2868_v6 = vsel %vm6274_vm4, 0, %v6273_v24  ;;  %v2549_v53 = vadd.s32 536870912, %v2548_v9  ;;  %v2916_v22 = vmul.f32 %v9088_v29, %v2900_v38  ;;  %v2679_v43 = vsel %vm9094_vm6, %v8703_v3, %v2676_v33 }
 0x56a   : > { %v2869_v5 = vsub.s32 32, %v2868_v6  ;;  %v2873_v59 = vsub.s32 4294967266, %v2868_v6  ;;  %v2778_v19 = vxor.u32 2147483648, %v2777_v46  ;;  %v2478_v28 = vand.u32 3, %v2474_v35 }
 0x56b   : > { %v9105_v54 = vshrl.u32 %v2549_v53, 30  ;;  %v2922_v41 = vadd.f32 %v2916_v22, %v8670_v60  ;;  %v2870_v48 = vshll.u32 %v9054_v55, %v2868_v6  ;;  %6979 = vcosq.f32 %v2679_v43 }
 0x56c   : > { %v2871_v20 = vshrl.u32 %v2853_v11, %v2869_v5  ;;  %v2874_v45 = vadd.s32 127, %v2873_v59  ;;  %v2678_v36 = vsel %vm2593_vm2, %v2677_v57, %v8876_v34  ;;  %6981 = vsinq.f32 %v2679_v43 }
 0x56d   : > { %v2551_v51 = vshll.u32 %v9105_v54, 30  ;;  %v9111_v33 = vmul.f32 %v7914_v7, %v2922_v41  ;;  %vm2696_vm1 = vcmp.lt.s32.totalorder %v8710_v13, 0  ;;  %vm2479_vm0 = vcmp.lt.s32.totalorder %v2478_v28, 2 }
 0x56e   : > { %v6976_v31 = vpop.eup %6975  ;;  %v2872_v27 = vor.u32 %v2871_v20, %v2870_v48  ;;  %v2875_v50 = vshll.u32 %v2874_v45, 23  ;;  %v2779_v55 = vsel %vm2696_vm1, %v2778_v19, %v2777_v46  ;;  %vm2483_vm2 = vcmp.eq.s32.totalorder %v2478_v28, 2 }
 0x56f   : > { %v9119_v15 = vsub.s32 %v2548_v9, %v2551_v51  ;;  %2949 = vrot.lane.b32.xlu0 %v9111_v33, %s7233_s20  ;;  %v2484_v14 = vxor.u32 2147483648, %v6976_v31  ;;  %v2680_v34 = vsel %vm9094_vm6, 0, %v2678_v36  ;;  %vm2480_vm3 = vcmp.eq.s32.totalorder %v2478_v28, 0 }
 0x570   : > { %v6978_v40 = vpop.eup %6977  ;;  %v2876_v23 = vor.u32 4788187, %v2875_v50  ;;  %v2879_v24 = vcvt.s32.f32 %v2872_v27  ;;  %v11302_v44 = vand.u32 2147483647, %v8710_v13  ;;  %v2780_v46 = vsub.s32 4, %v8973_v10 }
 0x571   : > { %v2554_v30 = vsub.s32 0, %v9119_v15  ;;  %v2481_v12 = vxor.u32 2147483648, %v6978_v40  ;;  %v2485_v26 = vsel %vm2483_vm2, %v2484_v14, %v6978_v40  ;;  %v2684_v35 = vand.u32 3, %v2680_v34 }
 0x572   : > { %v2877_v32 = vand.u32 2147483647, %v2876_v23  ;;  %vm9128_vm7 = vcmp.le.f32.partialorder %v11302_v44, 0.7853982  ;;  %vm2799_vm15 = vcmp.lt.s32.totalorder %v8920_v4, 0  ;;  %vm2477_vm13 = vweird.f32 %v8684_v42 }
 0x573   : > { %v6260_v9 = vmin.u32 %v2554_v30, %v9119_v15  ;;  %v2482_v38 = vsel %vm2480_vm3, %v6976_v31, %v2481_v12  ;;  %v2782_v17 = vsel %vm9128_vm7, %v8710_v13, %v2779_v55  ;;  %v2544_v53 = vadd.s32 %v9060_v16, %v9068_v62 }
 0x574   : > { %v2880_v57 = vmul.f32 %v2879_v24, %v2877_v32  ;;  %v2486_v6 = vsel %vm2479_vm0, %v2482_v38, %v2485_v26  ;;  %vm2683_vm14 = vweird.f32 %v8703_v3  ;;  %v2781_v19 = vsel %vm2696_vm1, %v2780_v46, %v8973_v10 }
 0x575   : > { %v2556_v22 = vclz %v6260_v9  ;;  %v2487_v43 = vsel %vm2477_vm13, nan, %v2486_v6  ;;  %v6980_v11 = vpop.eup %6979  ;;  %6983 = vcosq.f32 %v2782_v17  ;;  %vm2685_vm8 = vcmp.lt.s32.totalorder %v2684_v35, 2 }
 0x576   : > { %v2881_v5 = vxor.u32 2147483648, %v2880_v57  ;;  %v2901_v59 = vsub.f32 1.0, %v2487_v43  ;;  %v6982_v41 = vpop.eup %6981  ;;  %v2690_v42 = vxor.u32 2147483648, %v6980_v11  ;;  %6985 = vsinq.f32 %v2782_v17 }
 0x577   : > { %v6261_v48 = vadd.s32 4294967294, %v2556_v22  ;;  %vm2686_vm12 = vcmp.eq.s32.totalorder %v2684_v35, 0  ;;  %v2687_v16 = vxor.u32 2147483648, %v6982_v41  ;;  %vm2689_vm4 = vcmp.eq.s32.totalorder %v2684_v35, 2 }
 0x578   : > { %v2917_v28 = vmul.f32 %v9088_v29, %v2901_v59  ;;  %v2882_v62 = vsel %vm2799_vm15, %v2881_v5, %v2880_v57  ;;  %v2691_v20 = vsel %vm2689_vm4, %v2690_v42, %v6982_v41  ;;  %v2783_v45 = vsel %vm9128_vm7, 0, %v2781_v19 }
 0x579   : > { %vm6262_vm6 = vcmp.lt.s32.totalorder %v6261_v48, 0  ;;  %v2688_v36 = vsel %vm2686_vm12, %v6980_v11, %v2687_v16  ;;  %v11305_v31 = vand.u32 2147483647, %v8920_v4  ;;  %v2883_v30 = vsub.s32 4, %v9041_v18 }
 0x57a   : > { %v2559_v10 = vsel %vm6262_vm6, 0, %v6261_v48  ;;  %v2923_v51 = vadd.f32 %v2917_v28, %v8675_v37  ;;  %v2692_v40 = vsel %vm2685_vm8, %v2688_v36, %v2691_v20  ;;  %v2787_v3 = vand.u32 3, %v2783_v45 }
 0x57b   : > { %vm9154_vm1 = vcmp.le.f32.partialorder %v11305_v31, 0.7853982  ;;  %v2560_v50 = vsub.s32 32, %v2559_v10  ;;  %v2561_v55 = vshll.u32 %v9119_v15, %v2559_v10  ;;  %v2564_v14 = vsub.s32 4294967266, %v2559_v10  ;;  %v9169_v15 = vpop.permute.xlu1 %2913 }
 0x57c   : > { %v9161_v23 = vmul.f32 %v7905_v21, %v2923_v51  ;;  %v2693_v34 = vsel %vm2683_vm14, nan, %v2692_v40  ;;  %v2885_v12 = vsel %vm9154_vm1, %v8920_v4, %v2882_v62  ;;  %v2884_v9 = vsel %vm2799_vm15, %v2883_v30, %v9041_v18 }
 0x57d   : > { %v2562_v26 = vshrl.u32 %v2544_v53, %v2560_v50  ;;  %v2565_v32 = vadd.s32 127, %v2564_v14  ;;  %v2903_v24 = vsub.f32 1.0, %v2693_v34  ;;  %6987 = vcosq.f32 %v2885_v12 }
 0x57e   : > { %2951 = vrot.lane.b32.xlu1 %v9161_v23, %s7233_s20  ;;  %2980 = vrot.lane.b32.xlu0 %v9161_v23, %s7234_s23  ;;  %6989 = vsinq.f32 %v2885_v12  ;;  %vm2789_vm0 = vcmp.eq.s32.totalorder %v2787_v3, 0  ;;  %vm2792_vm2 = vcmp.eq.s32.totalorder %v2787_v3, 2  ;;  %v2886_v22 = vsel %vm9154_vm1, 0, %v2884_v9 }
 0x57f   : > { %v2563_v44 = vor.u32 %v2562_v26, %v2561_v55  ;;  %v2566_v49 = vshll.u32 %v2565_v32, 23  ;;  %v2919_v46 = vmul.f32 %v9169_v15, %v2903_v24  ;;  %v6984_v38 = vpop.eup %6983  ;;  %vm2788_vm3 = vcmp.lt.s32.totalorder %v2787_v3, 2 }
 0x580   : > { %v6986_v35 = vpop.eup %6985  ;;  %v2793_v6 = vxor.u32 2147483648, %v6984_v38  ;;  %vm2940_vm7 = vcmask 23552   ;;  %vm2786_vm15 = vweird.f32 %v8710_v13  ;;  %v2890_v48 = vand.u32 3, %v2886_v22 }
 0x581   : > { %v2567_v17 = vor.u32 4788187, %v2566_v49  ;;  %v2925_v57 = vadd.f32 %v2919_v46, %v8690_v0  ;;  %v2790_v53 = vxor.u32 2147483648, %v6986_v35  ;;  %v2570_v11 = vcvt.s32.f32 %v2563_v44 }
 0x582   : > { %v2794_v59 = vsel %vm2792_vm2, %v2793_v6, %v6986_v35  ;;  %v11308_v42 = vmov 0.0   ;;  %vm2490_vm13 = vcmp.lt.s32.totalorder %v8944_v2, 0  ;;  %v11309_v13 = vand.u32 2147483647, %v8944_v2 }
 0x583   : > { %v2568_v43 = vand.u32 2147483647, %v2567_v17  ;;  %v9183_v5 = vmul.f32 %v7914_v7, %v2925_v57  ;;  %v2791_v18 = vsel %vm2789_vm0, %v6984_v38, %v2790_v53  ;;  %2941 = vst.msk [vmem:[#allocation2] sm:$0xff] %vm2940_vm7, %v11308_v42  ;;  %2942 = vst.msk [vmem:[#allocation2 + $0x18] sm:$0xff] %vm2940_vm7, %v11308_v42  ;;  %v2574_v36 = vsub.s32 4, %v9105_v54  ;;  %v6241_v53 = vld [vmem:[%s11220_s6 + $0x10] sm:$0xff] }
 0x584   : > { %v2795_v41 = vsel %vm2788_vm3, %v2791_v18, %v2794_v59  ;;  %vm9197_vm14 = vcmp.le.f32.partialorder %v11309_v13, 0.7853982  ;;  %vm2895_vm8 = vcmp.eq.s32.totalorder %v2890_v48, 2  ;;  %vm2892_vm12 = vcmp.eq.s32.totalorder %v2890_v48, 0 }
 0x585   : > { %v2571_v19 = vmul.f32 %v2570_v11, %v2568_v43  ;;  %2955 = vrot.lane.b32.xlu0 %v9183_v5, %s7233_s20  ;;  %v2796_v28 = vsel %vm2786_vm15, nan, %v2795_v41  ;;  %v6572_v16 = vpack.c.bf16 %v9183_v5, %v9111_v33  ;;  %vm2891_vm4 = vcmp.lt.s32.totalorder %v2890_v48, 2  ;;  %v6242_v48 = vld [vmem:[%s11220_s6 + $0x18] sm:$0xff] }
 0x586   : > { %v2904_v45 = vsub.f32 1.0, %v2796_v28  ;;  %vm2889_vm6 = vweird.f32 %v8920_v4  ;;  %v2575_v26 = vsel %vm2490_vm13, %v2574_v36, %v9105_v54  ;;  %vm2580_vm3 = vweird.f32 %v8944_v2 }
 0x587   : > { %v6988_v62 = vpop.eup %6987  ;;  %v2572_v20 = vxor.u32 2147483648, %v2571_v19  ;;  %v2577_v49 = vsel %vm9197_vm14, 0, %v2575_v26  ;;  %v3197_v11 = vadd.f32 1e-09, %v6241_v53  ;;  %v3204_v13 = vadd.f32 %v6242_v48, %v6242_v48 }
 0x588   : > { %v6990_v10 = vpop.eup %6989  ;;  %v2896_v31 = vxor.u32 2147483648, %v6988_v62  ;;  %v2920_v50 = vmul.f32 %v9169_v15, %v2904_v45  ;;  %v2581_v9 = vand.u32 3, %v2577_v49  ;;  %v6247_v45 = vld [vmem:[%s11215_s1 + $0x10] sm:$0xff]  ;;  %vm2971_vm15 = vcmask 1047576  }
 0x589   : > { %v2573_v27 = vsel %vm2490_vm13, %v2572_v20, %v2571_v19  ;;  %2978 = vrot.lane.b32.xlu0 %v9111_v33, %s7234_s23  ;;  %v2893_v55 = vxor.u32 2147483648, %v6990_v10  ;;  %6470 = vmatprep.mubr.msk.f32.mxu1 %vm1141_vm9, %v6247_v45  ;;  %vm11312_vm13 = vcmask 7168  }
 0x58a   : > { %v2576_v14 = vsel %vm9197_vm14, %v8944_v2, %v2573_v27  ;;  %v2897_v40 = vsel %vm2895_vm8, %v2896_v31, %v6990_v10  ;;  %v2926_v34 = vadd.f32 %v2920_v50, %v8697_v52  ;;  %vm2586_vm1 = vcmp.eq.s32.totalorder %v2581_v9, 2  ;;  %v6243_v2 = vld [vmem:[%s11216_s2 + $0x10] sm:$0xff]  ;;  %v6244_v10 = vld [vmem:[%s11216_s2 + $0x18] sm:$0xff]  ;;  %vm11313_vm14 = vmmov %vm11312_vm13 }
 0x58b   : > { %6991 = vcosq.f32 %v2576_v14  ;;  %v2894_v30 = vsel %vm2892_vm12, %v6988_v62, %v2893_v55  ;;  %vm2583_vm0 = vcmp.eq.s32.totalorder %v2581_v9, 0  ;;  %vm2582_vm2 = vcmp.lt.s32.totalorder %v2581_v9, 2 }
 0x58c   : > { %6993 = vsinq.f32 %v2576_v14  ;;  %v2898_v12 = vsel %vm2891_vm4, %v2894_v30, %v2897_v40  ;;  %v9216_v32 = vmul.f32 %v7905_v21, %v2926_v34  ;;  %v3198_v62 = vadd.f32 1e-09, %v6242_v48 }
 0x58d   : > { %v2899_v24 = vsel %vm2889_vm6, nan, %v2898_v12  ;;  %6995 = vrcp.f32 %v3197_v11  ;;  %vm3003_vm8 = vcmask 171008   ;;  %vm3008_vm12 = vcmask 195752  }
 0x58e   : > { %v2905_v3 = vsub.f32 1.0, %v2899_v24  ;;  %2986 = vrot.lane.b32.xlu0 %v9216_v32, %s7234_s23  ;;  %v6570_v44 = vpack.c.bf16 %v9216_v32, %v9161_v23  ;;  %6997 = vrcp.f32 %v3198_v62  ;;  %vm2990_vm4 = vcmask 1022976   ;;  %v6248_v23 = vld [vmem:[%s11215_s1 + $0x18] sm:$0xff] }
 0x590   : > { %v2921_v4 = vmul.f32 %v9169_v15, %v2905_v3 }
 0x592   : > { %v2927_v46 = vadd.f32 %v2921_v4, %v8881_v25 }
 0x594   : > { %v2933_v54 = vmul.f32 %v7938_v39, %v2927_v46 }
 0x595   : > { %v6992_v38 = vpop.eup %6991 }
 0x596   : > { %v6994_v35 = vpop.eup %6993  ;;  %v2587_v17 = vxor.u32 2147483648, %v6992_v38  ;;  %2939 = vst.msk [vmem:[#allocation2 + $0x58] sm:$0xff] %vm1037_vm5, %v2933_v54 }
 0x597   : > { %v2584_v57 = vxor.u32 2147483648, %v6994_v35  ;;  %v6996_v28 = vpop.eup %6995 }
 0x598   : > { %v2588_v6 = vsel %vm2586_vm1, %v2587_v17, %v6994_v35  ;;  %v3200_v20 = vmul.f32 0.5, %v6996_v28  ;;  %v6998_v51 = vpop.eup %6997 }
 0x599   : > { %v2585_v15 = vsel %vm2583_vm0, %v6992_v38, %v2584_v57  ;;  %v3202_v36 = vmul.f32 0.5, %v6998_v51 }
 0x59a   : > { %v2589_v22 = vsel %vm2582_vm2, %v2585_v15, %v2588_v6 }
 0x59b   : > { %v2590_v43 = vsel %vm2580_vm3, nan, %v2589_v22 }
 0x59c   : > { %v2902_v59 = vsub.f32 1.0, %v2590_v43 }
 0x59e   : > { %v2918_v18 = vmul.f32 %v9088_v29, %v2902_v59  ;;  %v3203_v29 = vadd.f32 %v6241_v53, %v6241_v53 }
 0x5a0   : > { %v2924_v19 = vadd.f32 %v2918_v18, %v8932_v47 }
 0x5a2   : > { %v2930_v41 = vmul.f32 %v7938_v39, %v2924_v19 }
 0x5a4   : > { %2936 = vst.msk [vmem:[#allocation2 + $0x40] sm:$0xff] %vm1037_vm5, %v2930_v41  ;;  %2982 = vrot.lane.b32.xlu1 %v2930_v41, %s7234_s23  ;;  %2953 = vrot.lane.b32.xlu0 %v2930_v41, %s7233_s20 }
 0x5a8   : > { %2957 = vrot.lane.b32.xlu1 %v9216_v32, %s7233_s20  ;;  %3031 = vperm.xlu0 %6909, %v6243_v2   ;;  %v3022_v32 = vld [vmem:[#allocation2 + $0x58] sm:$0xff] }
 0x5ac   : > { %2988 = vrot.lane.b32.xlu1 %v2933_v54, %s7234_s23  ;;  %3207 = vperm.xlu0 %6909, %v3203_v29  }
 0x5b0   : > { %2984 = vrot.lane.b32.xlu1 %v9183_v5, %s7234_s23  ;;  %3847 = vperm.xlu0 %6909, %v3200_v20   ;;  %s6376_s23 = sshll.u32 %s7202_s27, 1 }
 0x5b4   : > { %2959 = vrot.lane.b32.xlu1 %v2933_v54, %s7233_s20  ;;  %s6810_s20 = smul.u32 12, %s7206_s28 }
 0x5b6   : > { %s6078_s12 = sadd.s32 %s6810_s20, %s6376_s23 }
 0x5b8   : > { %3036 = vperm.xlu1 %6910, %v6244_v10  }
 0x5bc   : > { %3212 = vperm.xlu1 %6910, %v3204_v13  }
 0x5c0   : > { %3852 = vperm.xlu1 %6910, %v3202_v36  }
 0x5e1   : > { %v2950_v31 = vpop.permute.xlu0 %2949 }
 0x5e2   : > { %2972 = vst.msk [vmem:[#allocation2] sm:$0xff] %vm2971_vm15, %v2950_v31 }
 0x5e9   : > { %v3011_v27 = vld [vmem:[#allocation2] sm:$0xff] }
 0x5ea   : > { %3879 = vst.msk [vmem:[#allocation2] sm:$0xff] %vm11312_vm13, %v11308_v42 }
 0x5f0   : > { %v2981_v50 = vpop.permute.xlu0 %2980  ;;  %v2952_v30 = vpop.permute.xlu1 %2951 }
 0x5f1   : > { %v2961_v49 = vsel %vm2940_vm7, %v2950_v31, %v2952_v30 }
 0x5f7   : > { %v2956_v55 = vpop.permute.xlu0 %2955 }
 0x5f8   : > { %2975 = vst.msk [vmem:[#allocation2 + $0x18] sm:$0xff] %vm2971_vm15, %v2956_v55 }
 0x5fb   : > { %v2979_v40 = vpop.permute.xlu0 %2978 }
 0x5fc   : > { %v2991_v6 = vsel %vm2990_vm4, %v2979_v40, %v2981_v50 }
 0x5ff   : > { %v3014_v14 = vld [vmem:[#allocation2 + $0x18] sm:$0xff] }
 0x600   : > { %3880 = vst.msk [vmem:[#allocation2 + $0x18] sm:$0xff] %vm11313_vm14, %v11308_v42  ;;  %v2987_v34 = vpop.permute.xlu0 %2986  ;;  %v6568_v9 = vpack.c.bf16 %v3014_v14, %v3011_v27 }
 0x616   : > { %v2983_v12 = vpop.permute.xlu1 %2982  ;;  %v2954_v26 = vpop.permute.xlu0 %2953 }
 0x617   : > { %3004 = vst.msk [vmem:[#allocation2 + $0x70] sm:$0xff] %vm3003_vm8, %v2983_v12  ;;  %v2962_v24 = vsel %vm2940_vm7, %v2952_v30, %v2954_v26  ;;  %v2992_v35 = vsel %vm2990_vm4, %v2981_v50, %v2983_v12 }
 0x618   : > { %3009 = vst.msk [vmem:[#allocation2 + $0x70] sm:$0xff] %vm3008_vm12, %v11308_v42 }
 0x619   : > { %2974 = vst.msk [vmem:[#allocation2 + $0x10] sm:$0xff] %vm1037_vm5, %v2962_v24 }
 0x61a   : > { %v2958_v3 = vpop.permute.xlu1 %2957 }
 0x61b   : > { %v2963_v4 = vsel %vm2940_vm7, %v2956_v55, %v2958_v3 }
 0x61c   : > { %v6566_v46 = vpack.c.bf16 %v2963_v4, %v2961_v49 }
 0x61e   : > { %v2989_v54 = vpop.permute.xlu1 %2988  ;;  %6567 = vmatprep.subr.bf16.mxu0 %v6566_v46 }
 0x61f   : > { %v2994_v38 = vsel %vm2990_vm4, %v2987_v34, %v2989_v54  ;;  %3007 = vst.msk [vmem:[#allocation2 + $0x88] sm:$0xff] %vm3003_vm8, %v2989_v54  ;;  %6569 = vmatpush1.bf16.msra.mxu0 %v6568_v9  ;;  %v3025_v11 = vld [vmem:[#allocation2 + $0x70] sm:$0xff] }
 0x620   : > { %3010 = vst.msk [vmem:[#allocation2 + $0x88] sm:$0xff] %vm3008_vm12, %v11308_v42  ;;  %6571 = vmatprep.subr.bf16.mxu0 %v6570_v44  ;;  %v6574_v57 = vpack.c.bf16 %v2994_v38, %v2992_v35  ;;  %v3013_v33 = vld [vmem:[#allocation2 + $0x10] sm:$0xff] }
 0x622   : > { %v2985_v17 = vpop.permute.xlu1 %2984 }
 0x623   : > { %v2993_v53 = vsel %vm2990_vm4, %v2985_v17, %v2987_v34  ;;  %6573 = vmatpush1.bf16.msra.mxu0 %v6572_v16  ;;  %v3019_v16 = vld [vmem:[#allocation2 + $0x40] sm:$0xff] }
 0x624   : > { %6575 = vmatprep.subr.bf16.mxu0 %v6574_v57  ;;  %v6576_v15 = vpack.c.bf16 %v2993_v53, %v2991_v6  ;;  %v6582_v18 = vpack.c.bf16 %v3022_v32, %v3019_v16 }
 0x626   : > { %v2960_v22 = vpop.permute.xlu1 %2959 }
 0x627   : > { %v2964_v43 = vsel %vm2940_vm7, %v2958_v3, %v2960_v22  ;;  %6577 = vmatpush1.bf16.msra.mxu0 %v6576_v15  ;;  %v3028_v59 = vld [vmem:[#allocation2 + $0x88] sm:$0xff]  ;;  %v9287_v41 = vpop.permute.xlu0 %3031 }
 0x628   : > { %2977 = vst.msk [vmem:[#allocation2 + $0x28] sm:$0xff] %vm1037_vm5, %v2964_v43  ;;  %v6586_v19 = vpack.c.bf16 %v3028_v59, %v3025_v11 }
 0x62a   : > { %6275 = vmatmul.mubr.msk.f32.vlgmr.msra.gmra.mrb[8].mxu0 %vm1141_vm9, %v6247_v45 }
 0x62b   : > { %3115 = vmatprep.mubr.f32.mxu0 %v11308_v42  ;;  %v9292_v28 = vpop.permute.xlu0 %3207 }
 0x62e   : > { %6276 = vmatmul.mubr.msk.f32.gmra.mrb[10].mxu0 %vm1141_vm9, %v6248_v23 }
 0x62f   : > { %v3016_v5 = vld [vmem:[#allocation2 + $0x28] sm:$0xff]  ;;  %4043 = vmatprep.mubr.f32.mxu0 %v11308_v42 }
 0x630   : > { %v6578_v44 = vpack.c.bf16 %v3016_v5, %v3013_v33 }
 0x632   : > { %6579 = vmatprep.subr.bf16.mxu1 %v6578_v44 }
 0x633   : > { %6581 = vmatpush3.bf16.msra.mxu1 %v6578_v44 }
 0x634   : > { %6583 = vmatprep.subr.bf16.mxu1 %v6582_v18 }
 0x637   : > { %6585 = vmatpush3.bf16.msra.mxu1 %v6582_v18  ;;  %v9294_v62 = vpop.permute.xlu1 %3036 }
 0x638   : > { %6587 = vmatprep.subr.bf16.mxu1 %v6586_v19 }
 0x63b   : > { %6589 = vmatpush3.bf16.msra.mxu1 %v6586_v19  ;;  %v9316_v34 = vpop.permute.xlu1 %3212 }
 0x63e   : > { %6471 = vmatmul.mubr.msk.f32.vlgmr.msra.gmra.mrb[4].mxu1 %vm1141_vm9, %v6248_v23 }
 0x6fd   : > { %v3111_v2 = vpop.f32.mrb[8].mxu0 }
 0x6fe   : > { %v9290_v29 = vadd.f32 %v3111_v2, %v9287_v41  ;;  %v3113_v48 = vpop.f32.mrb[9].mxu0 }
 0x6ff   : > { %v9297_v20 = vadd.f32 %v3113_v48, %v9287_v41 }
 0x700   : > { %v9301_v45 = vmul.f32 %v9292_v28, %v9290_v29 }
 0x701   : > { %v9305_v10 = vmul.f32 %v9292_v28, %v9297_v20  ;;  %v3117_v13 = vpop.f32.mrb[10].mxu0 }
 0x702   : > { %v3221_v51 = vand.u32 2147483647, %v9301_v45  ;;  %v3224_v36 = vand.u32 2139095040, %v9301_v45  ;;  %v3119_v31 = vpop.f32.mrb[11].mxu0  ;;  %v9314_v40 = vadd.f32 %v3117_v13, %v9294_v62 }
 0x703   : > { %v11240_v27 = vand.u32 2147483647, %v9305_v10  ;;  %v3327_v50 = vand.u32 2139095040, %v9305_v10  ;;  %v9327_v15 = vadd.f32 %v3119_v31, %v9294_v62 }
 0x704   : > { %v3225_v55 = vshrl.u32 %v3224_v36, 23  ;;  %v3228_v14 = vand.u32 8388607, %v3221_v51  ;;  %v9322_v24 = vmul.f32 %v9316_v34, %v9314_v40 }
 0x705   : > { %v3328_v30 = vshrl.u32 %v3327_v50, 23  ;;  %v3331_v12 = vand.u32 8388607, %v11240_v27 }
 0x706   : > { %v6279_v26 = vadd.s32 4294967169, %v3225_v55  ;;  %v3229_v49 = vor.u32 8388608, %v3228_v14  ;;  %v11237_v54 = vand.u32 2147483647, %v9322_v24  ;;  %v3533_v38 = vand.u32 2139095040, %v9322_v24 }
 0x707   : > { %v6283_v3 = vadd.s32 4294967169, %v3328_v30  ;;  %v3332_v46 = vor.u32 8388608, %v3331_v12 }
 0x708   : > { %v3231_v4 = vadd.s32 1, %v6279_v26  ;;  %v3534_v17 = vshrl.u32 %v3533_v38, 23  ;;  %v9329_v22 = vshll.u32 %v3229_v49, 8  ;;  %v9337_v32 = vand.u32 8388607, %v11237_v54 }
 0x709   : > { %v3334_v9 = vadd.s32 1, %v6283_v3  ;;  %v9333_v23 = vshll.u32 %v3332_v46, 8 }
 0x70a   : > { %vm3232_vm7 = vcmp.gt.s32.totalorder %v3231_v4, 0  ;;  %v9340_v44 = vadd.s32 4294967169, %v3534_v17 }
 0x70b   : > { %v3233_v35 = vsel %vm3232_vm7, %v3231_v4, 0  ;;  %vm3335_vm6 = vcmp.gt.s32.totalorder %v3334_v9, 0 }
 0x70c   : > { %v3234_v57 = vshrl.u32 %v3233_v35, 5  ;;  %v3235_v6 = vand.u32 31, %v3233_v35  ;;  %v3336_v53 = vsel %vm3335_vm6, %v3334_v9, 0 }
 0x70d   : > { %v9331_v43 = vshrl.u32 %v3336_v53, 5  ;;  %v3338_v16 = vand.u32 31, %v3336_v53 }
 0x70e   : > { %v3236_v33 = vsub.s32 32, %v3235_v6  ;;  %v3238_v5 = vshll.u32 %v7224_v56, %v3235_v6  ;;  %v3241_v11 = vshll.u32 %v11251_v58, %v3235_v6  ;;  %v3244_v59 = vshll.u32 %v11238_v61, %v3235_v6 }
 0x70f   : > { %v3247_v18 = vshll.u32 %v11249_v63, %v3235_v6  ;;  %v3250_v19 = vshll.u32 %v11247_v1, %v3235_v6  ;;  %vm3253_vm1 = vcmp.lt.s32.totalorder %v3234_v57, 1  ;;  %vm3254_vm0 = vcmp.lt.s32.totalorder %v3234_v57, 2 }
 0x710   : > { %v3239_v2 = vshrl.u32 %v11251_v58, %v3236_v33  ;;  %v3242_v48 = vshrl.u32 %v11238_v61, %v3236_v33  ;;  %v3245_v13 = vshrl.u32 %v11249_v63, %v3236_v33  ;;  %v3237_v36 = vshrl.u32 %v7224_v56, %v3236_v33 }
 0x711   : > { %v3248_v31 = vshrl.u32 %v11247_v1, %v3236_v33  ;;  %v3251_v50 = vshrl.u32 %v11245_v8, %v3236_v33  ;;  %v9352_v55 = vpop.f32.mrb[4].mxu1  ;;  %v3339_v26 = vsub.s32 32, %v3338_v16  ;;  %vm3255_vm2 = vcmp.lt.s32.totalorder %v3234_v57, 3 }
 0x712   : > { %v3240_v14 = vor.u32 %v3239_v2, %v3238_v5  ;;  %v3243_v30 = vor.u32 %v3242_v48, %v3241_v11  ;;  %v3246_v12 = vor.u32 %v3245_v13, %v3244_v59  ;;  %v9354_v3 = vpop.f32.mrb[5].mxu1  ;;  %vm3256_vm3 = vcmp.lt.s32.totalorder %v3234_v57, 4 }
 0x713   : > { %v3249_v49 = vor.u32 %v3248_v31, %v3247_v18  ;;  %v3252_v4 = vor.u32 %v3251_v50, %v3250_v19  ;;  %v3341_v33 = vshll.u32 %v7224_v56, %v3338_v16  ;;  %v3342_v59 = vshrl.u32 %v11251_v58, %v3339_v26 }
 0x714   : > { %v3257_v46 = vsel %vm3253_vm1, %v3237_v36, %v3240_v14  ;;  %v3258_v9 = vsel %vm3256_vm3, %v3246_v12, 2102212464  ;;  %v3261_v38 = vsel %vm3253_vm1, %v3240_v14, %v3243_v30  ;;  %v3265_v35 = vsel %vm3253_vm1, %v3243_v30, %v3246_v12 }
 0x715   : > { %v3259_v17 = vsel %vm3255_vm2, %v3243_v30, %v3258_v9  ;;  %v3262_v6 = vsel %vm3256_vm3, %v3249_v49, 920167782  ;;  %v3266_v53 = vsel %vm3256_vm3, %v3252_v4, 1326507024  ;;  %v3344_v18 = vshll.u32 %v11251_v58, %v3338_v16 }
 0x716   : > { %v3263_v5 = vsel %vm3255_vm2, %v3246_v12, %v3262_v6  ;;  %v3267_v11 = vsel %vm3255_vm2, %v3249_v49, %v3266_v53  ;;  %v3260_v19 = vsel %vm3254_vm0, %v3257_v46, %v3259_v17  ;;  %v3345_v13 = vshrl.u32 %v11238_v61, %v3339_v26 }
 0x717   : > { %v3264_v2 = vsel %vm3254_vm0, %v3261_v38, %v3263_v5  ;;  %v3268_v48 = vsel %vm3254_vm0, %v3265_v35, %v3267_v11  ;;  %v3343_v30 = vor.u32 %v3342_v59, %v3341_v33  ;;  %v3347_v49 = vshll.u32 %v11238_v61, %v3338_v16 }
 0x718   : > { %v9367_v36 = vmul.u32.u64.low %v9329_v22, %v3268_v48  ;;  %v9368_v31 = vmul.u32.u64.high %v9329_v22, %v3268_v48, %v9367_v36  ;;  %v9371_v50 = vmul.u32.u64.low %v9329_v22, %v3264_v2  ;;  %v9372_v14 = vmul.u32.u64.high %v9329_v22, %v3264_v2, %v9371_v50 }
 0x719   : > { %v3346_v12 = vor.u32 %v3345_v13, %v3344_v18  ;;  %v3348_v4 = vshrl.u32 %v11249_v63, %v3339_v26  ;;  %v3340_v46 = vshrl.u32 %v7224_v56, %v3339_v26  ;;  %v3350_v57 = vshll.u32 %v11249_v63, %v3338_v16 }
 0x71a   : > { %v3351_v9 = vshrl.u32 %v11247_v1, %v3339_v26  ;;  %v3354_v38 = vshrl.u32 %v11245_v8, %v3339_v26  ;;  %v3276_v35 = vmul.u32 %v9329_v22, %v3260_v19  ;;  %v3353_v6 = vshll.u32 %v11247_v1, %v3338_v16 }
 0x71b   : > { %v3349_v17 = vor.u32 %v3348_v4, %v3347_v49  ;;  %vm3356_vm15 = vcmp.lt.s32.totalorder %v9331_v43, 1  ;;  %vm3278_vm13 = vc.u32 %v9368_v31, %v9371_v50  ;;  %v3279_v53 = vadd.s32 1, %v9372_v14 }
 0x71c   : > { %v3352_v33 = vor.u32 %v3351_v9, %v3350_v57  ;;  %vm3357_vm14 = vcmp.lt.s32.totalorder %v9331_v43, 2  ;;  %v3355_v5 = vor.u32 %v3354_v38, %v3353_v6  ;;  %vm3358_vm8 = vcmp.lt.s32.totalorder %v9331_v43, 3 }
 0x71d   : > { %vm3359_vm12 = vcmp.lt.s32.totalorder %v9331_v43, 4  ;;  %v3364_v26 = vsel %vm3356_vm15, %v3343_v30, %v3346_v12  ;;  %v3280_v22 = vsel %vm3278_vm13, %v3279_v53, %v9372_v14  ;;  %v3368_v16 = vsel %vm3356_vm15, %v3346_v12, %v3349_v17 }
 0x71e   : > { %v3361_v11 = vsel %vm3359_vm12, %v3349_v17, 2102212464  ;;  %v3365_v59 = vsel %vm3359_vm12, %v3352_v33, 920167782  ;;  %v3281_v18 = vadd.s32 %v3280_v22, %v3276_v35  ;;  %v3360_v19 = vsel %vm3356_vm15, %v3340_v46, %v3343_v30 }
 0x71f   : > { %v3366_v2 = vsel %vm3358_vm8, %v3349_v17, %v3365_v59  ;;  %v3369_v48 = vsel %vm3359_vm12, %v3355_v5, 1326507024  ;;  %v3362_v13 = vsel %vm3358_vm8, %v3346_v12, %v3361_v11  ;;  %v3540_v4 = vadd.s32 1, %v9340_v44 }
 0x720   : > { %v3367_v36 = vsel %vm3357_vm14, %v3364_v26, %v3366_v2  ;;  %v3370_v49 = vsel %vm3358_vm8, %v3352_v33, %v3369_v48  ;;  %v3282_v57 = vadd.s32 536870912, %v3281_v18  ;;  %v3363_v35 = vsel %vm3357_vm14, %v3360_v19, %v3362_v13 }
 0x721   : > { %v3371_v9 = vsel %vm3357_vm14, %v3368_v16, %v3370_v49  ;;  %v9395_v14 = vmul.u32.u64.low %v9333_v23, %v3367_v36  ;;  %v9396_v38 = vmul.u32.u64.high %v9333_v23, %v3367_v36, %v9395_v14  ;;  %vm3541_vm4 = vcmp.gt.s32.totalorder %v3540_v4, 0 }
 0x722   : > { %v9400_v30 = vmul.u32.u64.low %v9333_v23, %v3371_v9  ;;  %v9401_v46 = vmul.u32.u64.high %v9333_v23, %v3371_v9, %v9400_v30  ;;  %v9403_v12 = vshrl.u32 %v3282_v57, 30  ;;  %v3542_v44 = vsel %vm3541_vm4, %v3540_v4, 0 }
 0x723   : > { %v9409_v17 = vmul.f32 %v9316_v34, %v9327_v15  ;;  %v3544_v6 = vand.u32 31, %v3542_v44  ;;  %v3382_v33 = vadd.s32 1, %v9396_v38  ;;  %v3538_v5 = vor.u32 8388608, %v9337_v32 }
 0x724   : > { %v3284_v53 = vshll.u32 %v9403_v12, 30  ;;  %v3379_v26 = vmul.u32 %v9333_v23, %v3363_v35  ;;  %vm3381_vm7 = vc.u32 %v9401_v46, %v9395_v14  ;;  %v3277_v19 = vadd.s32 %v9371_v50, %v9368_v31 }
 0x725   : > { %v3545_v22 = vsub.s32 32, %v3544_v6  ;;  %v3383_v11 = vsel %vm3381_vm7, %v3382_v33, %v9396_v38  ;;  %v11236_v59 = vand.u32 2147483647, %v9409_v17  ;;  %v9423_v48 = vshll.u32 %v3538_v5, 8 }
 0x726   : > { %v9417_v43 = vsub.s32 %v3281_v18, %v3284_v53  ;;  %v3384_v16 = vadd.s32 %v3383_v11, %v3379_v26  ;;  %v9425_v13 = vshrl.u32 %v3542_v44, 5  ;;  %v3636_v36 = vand.u32 2139095040, %v9409_v17 }
 0x727   : > { %v3554_v23 = vshrl.u32 %v11249_v63, %v3545_v22  ;;  %v3548_v49 = vshrl.u32 %v11251_v58, %v3545_v22  ;;  %v3551_v4 = vshrl.u32 %v11238_v61, %v3545_v22  ;;  %v9434_v31 = vand.u32 8388607, %v11236_v59 }
 0x728   : > { %v3287_v2 = vsub.s32 0, %v9417_v43  ;;  %v3385_v32 = vadd.s32 536870912, %v3384_v16  ;;  %v3307_v50 = vsub.s32 4, %v9403_v12  ;;  %v3553_v9 = vshll.u32 %v11238_v61, %v3544_v6 }
 0x729   : > { %v3557_v38 = vshrl.u32 %v11247_v1, %v3545_v22  ;;  %v3547_v35 = vshll.u32 %v7224_v56, %v3544_v6  ;;  %v3550_v44 = vshll.u32 %v11251_v58, %v3544_v6  ;;  %v3556_v53 = vshll.u32 %v11249_v63, %v3544_v6 }
 0x72a   : > { %v6280_v18 = vmin.u32 %v3287_v2, %v9417_v43  ;;  %v9437_v57 = vshrl.u32 %v3385_v32, 30  ;;  %v3555_v5 = vor.u32 %v3554_v23, %v3553_v9  ;;  %v3560_v26 = vshrl.u32 %v11245_v8, %v3545_v22 }
 0x72b   : > { %v3637_v11 = vshrl.u32 %v3636_v36, 23  ;;  %v3549_v32 = vor.u32 %v3548_v49, %v3547_v35  ;;  %v3552_v59 = vor.u32 %v3551_v4, %v3550_v44  ;;  %v3558_v54 = vor.u32 %v3557_v38, %v3556_v53 }
 0x72c   : > { %v3289_v30 = vclz %v6280_v18  ;;  %v3387_v33 = vshll.u32 %v9437_v57, 30  ;;  %v3546_v18 = vshrl.u32 %v7224_v56, %v3545_v22  ;;  %v3559_v27 = vshll.u32 %v11247_v1, %v3544_v6 }
 0x72d   : > { %vm3562_vm6 = vcmp.lt.s32.totalorder %v9425_v13, 1  ;;  %vm3223_vm1 = vcmp.lt.s32.totalorder %v9301_v45, 0  ;;  %v3410_v23 = vsub.s32 4, %v9437_v57  ;;  %vm3563_vm2 = vcmp.lt.s32.totalorder %v9425_v13, 2 }
 0x72e   : > { %v6281_v2 = vadd.s32 4294967294, %v3289_v30  ;;  %v9446_v61 = vsub.s32 %v3384_v16, %v3387_v33  ;;  %vm3565_vm3 = vcmp.lt.s32.totalorder %v9425_v13, 4  ;;  %vm3326_vm15 = vcmp.lt.s32.totalorder %v9305_v10, 0 }
 0x72f   : > { %v3561_v49 = vor.u32 %v3560_v26, %v3559_v27  ;;  %v3567_v6 = vsel %vm3565_vm3, %v3555_v5, 2102212464  ;;  %v3570_v9 = vsel %vm3562_vm6, %v3549_v32, %v3552_v59  ;;  %v3571_v38 = vsel %vm3565_vm3, %v3558_v54, 920167782 }
 0x730   : > { %vm6282_vm0 = vcmp.lt.s32.totalorder %v6281_v2, 0  ;;  %v3390_v16 = vsub.s32 0, %v9446_v61  ;;  %vm3564_vm13 = vcmp.lt.s32.totalorder %v9425_v13, 3  ;;  %v3566_v27 = vsel %vm3562_vm6, %v3546_v18, %v3549_v32 }
 0x731   : > { %v3292_v36 = vsel %vm6282_vm0, 0, %v6281_v2  ;;  %v3572_v33 = vsel %vm3564_vm13, %v3555_v5, %v3571_v38  ;;  %v3574_v26 = vsel %vm3562_vm6, %v3552_v59, %v3555_v5  ;;  %vm9472_vm14 = vcmp.le.f32.partialorder %v3221_v51, 0.7853982 }
 0x732   : > { %v3293_v22 = vsub.s32 32, %v3292_v36  ;;  %v3297_v4 = vsub.s32 4294967266, %v3292_v36  ;;  %v3294_v30 = vshll.u32 %v9417_v43, %v3292_v36  ;;  %v6284_v35 = vmin.u32 %v3390_v16, %v9446_v61 }
 0x733   : > { %v3568_v36 = vsel %vm3564_vm13, %v3552_v59, %v3567_v6  ;;  %v3573_v16 = vsel %vm3563_vm2, %v3570_v9, %v3572_v33  ;;  %v3575_v32 = vsel %vm3565_vm3, %v3561_v49, 1326507024  ;;  %v3411_v13 = vsel %vm3326_vm15, %v3410_v23, %v9437_v57 }
 0x734   : > { %v3295_v44 = vshrl.u32 %v3277_v19, %v3293_v22  ;;  %v3298_v53 = vadd.s32 127, %v3297_v4  ;;  %v3392_v43 = vclz %v6284_v35  ;;  %v11316_v22 = vand.u32 2147483647, %v9305_v10 }
 0x735   : > { %v3576_v51 = vsel %vm3564_vm13, %v3558_v54, %v3575_v32  ;;  %v6295_v4 = vadd.s32 4294967169, %v3637_v11  ;;  %v9489_v6 = vmul.u32.u64.low %v9423_v48, %v3573_v16  ;;  %v9490_v9 = vmul.u32.u64.high %v9423_v48, %v3573_v16, %v9489_v6 }
 0x736   : > { %v3296_v19 = vor.u32 %v3295_v44, %v3294_v30  ;;  %v3299_v18 = vshll.u32 %v3298_v53, 23  ;;  %vm9482_vm8 = vcmp.le.f32.partialorder %v11316_v22, 0.7853982  ;;  %v6285_v38 = vadd.s32 4294967294, %v3392_v43 }
 0x737   : > { %v3577_v59 = vsel %vm3563_vm2, %v3574_v26, %v3576_v51  ;;  %v3569_v49 = vsel %vm3563_vm2, %v3566_v27, %v3568_v36  ;;  %v3308_v54 = vsel %vm3223_vm1, %v3307_v50, %v9403_v12  ;;  %v3380_v11 = vadd.s32 %v9395_v14, %v9401_v46 }
 0x738   : > { %v3300_v35 = vor.u32 4788187, %v3299_v18  ;;  %v9495_v30 = vmul.u32.u64.low %v9423_v48, %v3577_v59  ;;  %v9496_v44 = vmul.u32.u64.high %v9423_v48, %v3577_v59, %v9495_v30  ;;  %vm6286_vm12 = vcmp.lt.s32.totalorder %v6285_v38, 0 }
 0x739   : > { %v3643_v53 = vadd.s32 1, %v6295_v4  ;;  %v3303_v26 = vcvt.s32.f32 %v3296_v19  ;;  %v3395_v43 = vsel %vm6286_vm12, 0, %v6285_v38  ;;  %v3585_v16 = vmul.u32 %v9423_v48, %v3569_v49 }
 0x73a   : > { %v3301_v33 = vand.u32 2147483647, %v3300_v35  ;;  %v3396_v27 = vsub.s32 32, %v3395_v43  ;;  %v3400_v36 = vsub.s32 4294967266, %v3395_v43  ;;  %v3588_v32 = vadd.s32 1, %v9490_v9 }
 0x73b   : > { %v3397_v12 = vshll.u32 %v9446_v61, %v3395_v43  ;;  %vm3587_vm4 = vc.u32 %v9496_v44, %v9489_v6  ;;  %vm3644_vm7 = vcmp.gt.s32.totalorder %v3643_v53, 0  ;;  %v3310_v57 = vsel %vm9472_vm14, 0, %v3308_v54 }
 0x73c   : > { %v3304_v18 = vmul.f32 %v3303_v26, %v3301_v33  ;;  %v3398_v14 = vshrl.u32 %v3380_v11, %v3396_v27  ;;  %v3401_v46 = vadd.s32 127, %v3400_v36  ;;  %v3589_v50 = vsel %vm3587_vm4, %v3588_v32, %v9490_v9 }
 0x73d   : > { %v3645_v19 = vsel %vm3644_vm7, %v3643_v53, 0  ;;  %v3590_v23 = vadd.s32 %v3589_v50, %v3585_v16  ;;  %v3413_v38 = vsel %vm9482_vm8, 0, %v3411_v13  ;;  %v9520_v49 = vand.u32 3, %v3310_v57 }
 0x73e   : > { %v3305_v22 = vxor.u32 2147483648, %v3304_v18  ;;  %v3647_v51 = vand.u32 31, %v3645_v19  ;;  %v3399_v48 = vor.u32 %v3398_v14, %v3397_v12  ;;  %v3402_v4 = vshll.u32 %v3401_v46, 23 }
 0x73f   : > { %v3591_v59 = vadd.s32 536870912, %v3590_v23  ;;  %v9522_v54 = vand.u32 3, %v3413_v38  ;;  %v3641_v53 = vor.u32 8388608, %v9434_v31  ;;  %v9529_v43 = vadd.f32 %v9352_v55, %v9294_v62 }
 0x740   : > { %v3306_v61 = vsel %vm3223_vm1, %v3305_v22, %v3304_v18  ;;  %v3648_v35 = vsub.s32 32, %v3647_v51  ;;  %v3403_v30 = vor.u32 4788187, %v3402_v4  ;;  %v3406_v26 = vcvt.s32.f32 %v3399_v48 }
 0x741   : > { %v3309_v9 = vsel %vm9472_vm14, %v9301_v45, %v3306_v61  ;;  %v9524_v11 = vshrl.u32 %v3591_v59, 30  ;;  %v9532_v2 = vadd.s32 %v9489_v6, %v9496_v44  ;;  %v9538_v36 = vadd.f32 %v9354_v3, %v9287_v41 }
 0x742   : > { %6999 = vcosq.f32 %v3309_v9  ;;  %v3404_v33 = vand.u32 2147483647, %v3403_v30  ;;  %v3651_v27 = vshrl.u32 %v11251_v58, %v3648_v35  ;;  %v11319_v31 = vmov 2131351028  }
 0x743   : > { %7001 = vsinq.f32 %v3309_v9  ;;  %v3593_v13 = vshll.u32 %v9524_v11, 30  ;;  %v3654_v32 = vshrl.u32 %v11319_v31, %v3648_v35  ;;  %v3657_v18 = vshrl.u32 %v11249_v63, %v3648_v35 }
 0x744   : > { %v3407_v16 = vmul.f32 %v3406_v26, %v3404_v33  ;;  %v3660_v12 = vshrl.u32 %v11247_v1, %v3648_v35  ;;  %vm3319_vm6 = vcmp.eq.s32.totalorder %v9520_v49, 2  ;;  %v9546_v55 = vshrl.u32 %v3645_v19, 5 }
 0x745   : > { %v9544_v62 = vsub.s32 %v3590_v23, %v3593_v13  ;;  %v3650_v6 = vshll.u32 %v7224_v56, %v3647_v51  ;;  %v3653_v44 = vshll.u32 %v11251_v58, %v3647_v51  ;;  %vm3316_vm1 = vcmp.eq.s32.totalorder %v9520_v49, 0 }
 0x746   : > { %v3408_v41 = vxor.u32 2147483648, %v3407_v16  ;;  %v3656_v3 = vshll.u32 %v11319_v31, %v3647_v51  ;;  %v3659_v14 = vshll.u32 %v11249_v63, %v3647_v51  ;;  %v3663_v46 = vshrl.u32 %v11245_v8, %v3648_v35 }
 0x747   : > { %vm3315_vm0 = vcmp.lt.s32.totalorder %v9520_v49, 2  ;;  %v3596_v50 = vsub.s32 0, %v9544_v62  ;;  %v3652_v22 = vor.u32 %v3651_v27, %v3650_v6  ;;  %v3662_v19 = vshll.u32 %v11247_v1, %v3647_v51 }
 0x748   : > { %v9557_v57 = vshll.u32 %v3641_v53, 8  ;;  %vm3313_vm2 = vweird.f32 %v9301_v45  ;;  %v3409_v23 = vsel %vm3326_vm15, %v3408_v41, %v3407_v16  ;;  %v3655_v48 = vor.u32 %v3654_v32, %v3653_v44 }
 0x749   : > { %v3658_v4 = vor.u32 %v3657_v18, %v3656_v3  ;;  %v3661_v38 = vor.u32 %v3660_v12, %v3659_v14  ;;  %v3412_v61 = vsel %vm9482_vm8, %v9305_v10, %v3409_v23  ;;  %v6292_v59 = vmin.u32 %v3596_v50, %v9544_v62 }
 0x74a   : > { %v3664_v9 = vor.u32 %v3663_v46, %v3662_v19  ;;  %v9568_v51 = vmul.f32 %v9316_v34, %v9529_v43  ;;  %7003 = vcosq.f32 %v3412_v61  ;;  %v3649_v30 = vshrl.u32 %v7224_v56, %v3648_v35 }
 0x74b   : > { %vm3665_vm3 = vcmp.lt.s32.totalorder %v9546_v55, 1  ;;  %vm3666_vm15 = vcmp.lt.s32.totalorder %v9546_v55, 2  ;;  %7005 = vsinq.f32 %v3412_v61  ;;  %v3598_v33 = vclz %v6292_v59 }
 0x74c   : > { %v7000_v53 = vpop.eup %6999  ;;  %vm3667_vm13 = vcmp.lt.s32.totalorder %v9546_v55, 3  ;;  %vm3668_vm14 = vcmp.lt.s32.totalorder %v9546_v55, 4  ;;  %v3673_v34 = vsel %vm3665_vm3, %v3652_v22, %v3655_v48  ;;  %v3677_v35 = vsel %vm3665_vm3, %v3655_v48, %v3658_v4 }
 0x74d   : > { %v7002_v5 = vpop.eup %7001  ;;  %v3320_v26 = vxor.u32 2147483648, %v7000_v53  ;;  %v3674_v13 = vsel %vm3668_vm14, %v3661_v38, 920167782  ;;  %vm3532_vm8 = vcmp.lt.s32.totalorder %v9322_v24, 0  ;;  %v6293_v16 = vadd.s32 4294967294, %v3598_v33  ;;  %v9612_v33 = vpop.permute.xlu0 %3847 }
 0x74e   : > { %v3317_v27 = vxor.u32 2147483648, %v7002_v5  ;;  %v3675_v32 = vsel %vm3667_vm13, %v3658_v4, %v3674_v13  ;;  %v3678_v18 = vsel %vm3668_vm14, %v3664_v9, 1326507024  ;;  %vm3422_vm12 = vcmp.eq.s32.totalorder %v9522_v54, 2 }
 0x74f   : > { %v3321_v12 = vsel %vm3319_vm6, %v3320_v26, %v7002_v5  ;;  %v3669_v6 = vsel %vm3665_vm3, %v3649_v30, %v3652_v22  ;;  %v3670_v44 = vsel %vm3668_vm14, %v3658_v4, 2102212464  ;;  %v3679_v41 = vsel %vm3667_vm13, %v3661_v38, %v3678_v18 }
 0x750   : > { %v3318_v3 = vsel %vm3316_vm1, %v7000_v53, %v3317_v27  ;;  %vm3419_vm4 = vcmp.eq.s32.totalorder %v9522_v54, 0  ;;  %vm6294_vm7 = vcmp.lt.s32.totalorder %v6293_v16, 0  ;;  %v3676_v14 = vsel %vm3666_vm15, %v3673_v34, %v3675_v32 }
 0x751   : > { %v3680_v46 = vsel %vm3666_vm15, %v3677_v35, %v3679_v41  ;;  %v3322_v50 = vsel %vm3315_vm0, %v3318_v3, %v3321_v12  ;;  %vm3418_vm6 = vcmp.lt.s32.totalorder %v9522_v54, 2  ;;  %v3601_v22 = vsel %vm6294_vm7, 0, %v6293_v16 }
 0x752   : > { %v9600_v19 = vmul.u32.u64.low %v9557_v57, %v3680_v46  ;;  %v9601_v23 = vmul.u32.u64.high %v9557_v57, %v3680_v46, %v9600_v19  ;;  %v3323_v4 = vsel %vm3313_vm2, nan, %v3322_v50  ;;  %v3602_v38 = vsub.s32 32, %v3601_v22 }
 0x753   : > { %v3606_v61 = vsub.s32 4294967266, %v3601_v22  ;;  %v3671_v59 = vsel %vm3667_vm13, %v3655_v48, %v3670_v44  ;;  %v3839_v9 = vsub.f32 1.0, %v3323_v4  ;;  %v3616_v30 = vsub.s32 4, %v9524_v11 }
 0x754   : > { %v9609_v49 = vmul.u32.u64.low %v9557_v57, %v3676_v14  ;;  %v9610_v53 = vmul.u32.u64.high %v9557_v57, %v3676_v14, %v9609_v49  ;;  %v3603_v5 = vshll.u32 %v9544_v62, %v3601_v22  ;;  %v3604_v26 = vshrl.u32 %v9532_v2, %v3602_v38  ;;  %v7004_v13 = vpop.eup %7003 }
 0x755   : > { %v3607_v45 = vadd.s32 127, %v3606_v61  ;;  %v3739_v34 = vand.u32 2139095040, %v9568_v51  ;;  %v3855_v35 = vmul.f32 %v9612_v33, %v3839_v9  ;;  %v3672_v48 = vsel %vm3666_vm15, %v3669_v6, %v3671_v59  ;;  %v7006_v16 = vpop.eup %7005 }
 0x756   : > { %vm3690_vm1 = vc.u32 %v9601_v23, %v9609_v49  ;;  %v3736_v27 = vand.u32 2147483647, %v9568_v51  ;;  %v3423_v32 = vxor.u32 2147483648, %v7004_v13  ;;  %v3605_v18 = vor.u32 %v3604_v26, %v3603_v5 }
 0x757   : > { %v3608_v12 = vshll.u32 %v3607_v45, 23  ;;  %v3740_v62 = vshrl.u32 %v3739_v34, 23  ;;  %v3861_v2 = vadd.f32 %v3855_v35, %v9290_v29  ;;  %v3420_v44 = vxor.u32 2147483648, %v7006_v16 }
 0x758   : > { %v3617_v41 = vsel %vm3532_vm8, %v3616_v30, %v9524_v11  ;;  %v3691_v3 = vadd.s32 1, %v9610_v53  ;;  %v3424_v55 = vsel %vm3422_vm12, %v3423_v32, %v7006_v16  ;;  %v3688_v14 = vmul.u32 %v9557_v57, %v3672_v48 }
 0x759   : > { %v3609_v6 = vor.u32 4788187, %v3608_v12  ;;  %v6299_v46 = vadd.s32 4294967169, %v3740_v62  ;;  %v3421_v50 = vsel %vm3419_vm4, %v7004_v13, %v3420_v44  ;;  %v3612_v22 = vcvt.s32.f32 %v3605_v18 }
 0x75a   : > { %v3692_v29 = vsel %vm3690_vm1, %v3691_v3, %v9610_v53  ;;  %v3743_v11 = vand.u32 8388607, %v3736_v27  ;;  %v3425_v19 = vsel %vm3418_vm6, %v3421_v50, %v3424_v55  ;;  %vm3416_vm0 = vweird.f32 %v9305_v10 }
 0x75b   : > { %v3610_v4 = vand.u32 2147483647, %v3609_v6  ;;  %v3693_v38 = vadd.s32 %v3692_v29, %v3688_v14  ;;  %v3746_v61 = vadd.s32 1, %v6299_v46  ;;  %v11320_v57 = vand.u32 2147483647, %v9322_v24 }
 0x75c   : > { %v9647_v9 = vmul.f32 %v7914_v7, %v3861_v2  ;;  %v3426_v30 = vsel %vm3416_vm0, nan, %v3425_v19  ;;  %v3744_v26 = vor.u32 8388608, %v3743_v11  ;;  %v9657_v13 = vmul.f32 %v9292_v28, %v9538_v36 }
 0x75d   : > { %vm9642_vm2 = vcmp.le.f32.partialorder %v11320_v57, 0.7853982  ;;  %v3613_v53 = vmul.f32 %v3612_v22, %v3610_v4  ;;  %v3694_v5 = vadd.s32 536870912, %v3693_v38  ;;  %vm3747_vm3 = vcmp.gt.s32.totalorder %v3746_v61, 0 }
 0x75e   : > { %v3619_v54 = vsel %vm9642_vm2, 0, %v3617_v41  ;;  %v3748_v45 = vsel %vm3747_vm3, %v3746_v61, 0  ;;  %3887 = vrot.lane.b32.xlu0 %v9647_v9, %s7231_s10  ;;  %v3840_v35 = vsub.f32 1.0, %v3426_v30  ;;  %v9668_v62 = vadd.s32 %v9609_v49, %v9601_v23 }
 0x75f   : > { %v3614_v10 = vxor.u32 2147483648, %v3613_v53  ;;  %v9653_v34 = vshrl.u32 %v3694_v5, 30  ;;  %v3750_v48 = vand.u32 31, %v3748_v45  ;;  %v9661_v32 = vand.u32 3, %v3619_v54 }
 0x760   : > { %v9670_v44 = vshll.u32 %v3744_v26, 8  ;;  %v3427_v41 = vand.u32 2147483647, %v9657_v13  ;;  %v3430_v3 = vand.u32 2139095040, %v9657_v13  ;;  %v3856_v55 = vmul.f32 %v9612_v33, %v3840_v35 }
 0x761   : > { %v3615_v16 = vsel %vm3532_vm8, %v3614_v10, %v3613_v53  ;;  %v3696_v18 = vshll.u32 %v9653_v34, 30  ;;  %v3751_v2 = vsub.s32 32, %v3750_v48  ;;  %v3749_v6 = vshrl.u32 %v3748_v45, 5 }
 0x762   : > { %v3618_v12 = vsel %vm9642_vm2, %v9322_v24, %v3615_v16  ;;  %v3753_v23 = vshll.u32 %v7224_v56, %v3750_v48  ;;  %v3756_v22 = vshll.u32 %v11251_v58, %v3750_v48  ;;  %v3759_v29 = vshll.u32 %v11319_v31, %v3750_v48 }
 0x763   : > { %7007 = vcosq.f32 %v3618_v12  ;;  %v9672_v28 = vsub.s32 %v3693_v38, %v3696_v18  ;;  %v3754_v14 = vshrl.u32 %v11251_v58, %v3751_v2  ;;  %v3757_v49 = vshrl.u32 %v11319_v31, %v3751_v2 }
 0x764   : > { %7009 = vsinq.f32 %v3618_v12  ;;  %v3760_v50 = vshrl.u32 %v11249_v63, %v3751_v2  ;;  %v3762_v11 = vshll.u32 %v11249_v63, %v3750_v48  ;;  %v3763_v19 = vshrl.u32 %v11247_v1, %v3751_v2 }
 0x765   : > { %v3699_v46 = vsub.s32 0, %v9672_v28  ;;  %vm3628_vm15 = vcmp.eq.s32.totalorder %v9661_v32, 2  ;;  %v3755_v38 = vor.u32 %v3754_v14, %v3753_v23  ;;  %v3765_v61 = vshll.u32 %v11247_v1, %v3750_v48 }
 0x766   : > { %v3431_v57 = vshrl.u32 %v3430_v3, 23  ;;  %vm3625_vm13 = vcmp.eq.s32.totalorder %v9661_v32, 0  ;;  %v3758_v59 = vor.u32 %v3757_v49, %v3756_v22  ;;  %v3761_v30 = vor.u32 %v3760_v50, %v3759_v29 }
 0x767   : > { %v6296_v4 = vmin.u32 %v3699_v46, %v9672_v28  ;;  %v3764_v53 = vor.u32 %v3763_v19, %v3762_v11  ;;  %v3766_v5 = vshrl.u32 %v11245_v8, %v3751_v2  ;;  %v3862_v54 = vadd.f32 %v3856_v55, %v9297_v20 }
 0x768   : > { %vm3624_vm14 = vcmp.lt.s32.totalorder %v9661_v32, 2  ;;  %v3719_v45 = vsub.s32 4, %v9653_v34  ;;  %v3752_v10 = vshrl.u32 %v7224_v56, %v3751_v2  ;;  %vm3622_vm8 = vweird.f32 %v9322_v24 }
 0x769   : > { %v3701_v26 = vclz %v6296_v4  ;;  %v3767_v35 = vor.u32 %v3766_v5, %v3765_v61  ;;  %vm3768_vm12 = vcmp.lt.s32.totalorder %v3749_v6, 1  ;;  %vm3770_vm4 = vcmp.lt.s32.totalorder %v3749_v6, 3 }
 0x76a   : > { %vm3771_vm7 = vcmp.lt.s32.totalorder %v3749_v6, 4  ;;  %v3780_v12 = vsel %vm3768_vm12, %v3758_v59, %v3761_v30  ;;  %vm3769_vm6 = vcmp.lt.s32.totalorder %v3749_v6, 2  ;;  %v3776_v3 = vsel %vm3768_vm12, %v3755_v38, %v3758_v59 }
 0x76b   : > { %v6297_v48 = vadd.s32 4294967294, %v3701_v26  ;;  %v3773_v16 = vsel %vm3771_vm7, %v3761_v30, 2102212464  ;;  %v3777_v18 = vsel %vm3771_vm7, %v3764_v53, 920167782  ;;  %v3772_v46 = vsel %vm3768_vm12, %v3752_v10, %v3755_v38 }
 0x76c   : > { %v3778_v20 = vsel %vm3770_vm4, %v3761_v30, %v3777_v18  ;;  %v3781_v55 = vsel %vm3771_vm7, %v3767_v35, 1326507024  ;;  %v6287_v23 = vadd.s32 4294967169, %v3431_v57  ;;  %v3774_v29 = vsel %vm3770_vm4, %v3758_v59, %v3773_v16 }
 0x76d   : > { %v7008_v14 = vpop.eup %7007  ;;  %vm6298_vm1 = vcmp.lt.s32.totalorder %v6297_v48, 0  ;;  %v3782_v2 = vsel %vm3770_vm4, %v3764_v53, %v3781_v55  ;;  %v3779_v5 = vsel %vm3769_vm6, %v3776_v3, %v3778_v20  ;;  %v3775_v16 = vsel %vm3769_vm6, %v3772_v46, %v3774_v29 }
 0x76e   : > { %v7010_v49 = vpop.eup %7009  ;;  %v3629_v50 = vxor.u32 2147483648, %v7008_v14  ;;  %v3704_v22 = vsel %vm6298_vm1, 0, %v6297_v48  ;;  %v3783_v11 = vsel %vm3769_vm6, %v3780_v12, %v3782_v2  ;;  %v3437_v35 = vadd.s32 1, %v6287_v23 }
 0x76f   : > { %v3626_v19 = vxor.u32 2147483648, %v7010_v49  ;;  %v3705_v4 = vsub.s32 32, %v3704_v22  ;;  %v3709_v61 = vsub.s32 4294967266, %v3704_v22  ;;  %v3706_v38 = vshll.u32 %v9672_v28, %v3704_v22  ;;  %v9742_v22 = vpop.permute.xlu1 %3852 }
 0x770   : > { %v3630_v30 = vsel %vm3628_vm15, %v3629_v50, %v7010_v49  ;;  %v9705_v53 = vmul.u32.u64.low %v9670_v44, %v3783_v11  ;;  %v9706_v57 = vmul.u32.u64.high %v9670_v44, %v3783_v11, %v9705_v53  ;;  %vm3438_vm0 = vcmp.gt.s32.totalorder %v3437_v35, 0 }
 0x771   : > { %v3627_v26 = vsel %vm3625_vm13, %v7008_v14, %v3626_v19  ;;  %v3707_v59 = vshrl.u32 %v9668_v62, %v3705_v4  ;;  %v3710_v10 = vadd.s32 127, %v3709_v61  ;;  %v11323_v62 = vand.u32 2147483647, %v9409_v17 }
 0x772   : > { %v3631_v48 = vsel %vm3624_vm14, %v3627_v26, %v3630_v30  ;;  %v9715_v18 = vmul.u32.u64.low %v9670_v44, %v3779_v5  ;;  %v9716_v12 = vmul.u32.u64.high %v9670_v44, %v3779_v5, %v9715_v18  ;;  %vm3635_vm3 = vcmp.lt.s32.totalorder %v9409_v17, 0 }
 0x773   : > { %v3632_v28 = vsel %vm3622_vm8, nan, %v3631_v48  ;;  %v3708_v3 = vor.u32 %v3707_v59, %v3706_v38  ;;  %v3711_v20 = vshll.u32 %v3710_v10, 23  ;;  %vm9723_vm2 = vcmp.le.f32.partialorder %v11323_v62, 0.7853982 }
 0x774   : > { %v3842_v55 = vsub.f32 1.0, %v3632_v28  ;;  %v3439_v32 = vsel %vm3438_vm0, %v3437_v35, 0  ;;  %vm3793_vm15 = vc.u32 %v9706_v57, %v9715_v18  ;;  %v3434_v24 = vand.u32 8388607, %v3427_v41 }
 0x775   : > { %v3712_v6 = vor.u32 4788187, %v3711_v20  ;;  %v3441_v46 = vand.u32 31, %v3439_v32  ;;  %v9735_v2 = vsel %vm3635_vm3, %v3719_v45, %v9653_v34  ;;  %v3791_v23 = vmul.u32 %v9670_v44, %v3775_v16 }
 0x776   : > { %v3794_v49 = vadd.s32 1, %v9716_v12  ;;  %v9740_v50 = vmul.f32 %v7905_v21, %v3862_v54  ;;  %v3715_v11 = vcvt.s32.f32 %v3708_v3  ;;  %v9744_v19 = vshrl.u32 %v3439_v32, 5 }
 0x777   : > { %v3713_v29 = vand.u32 2147483647, %v3712_v6  ;;  %v3442_v4 = vsub.s32 32, %v3441_v46  ;;  %v3858_v61 = vmul.f32 %v9742_v22, %v3842_v55  ;;  %v3444_v34 = vshll.u32 %v7224_v56, %v3441_v46 }
 0x778   : > { %v3795_v5 = vsel %vm3793_vm15, %v3794_v49, %v9716_v12  ;;  %v3447_v44 = vshll.u32 %v11251_v58, %v3441_v46  ;;  %3889 = vrot.lane.b32.xlu1 %v9740_v50, %s7231_s10  ;;  %v3450_v38 = vshll.u32 %v11319_v31, %v3441_v46  ;;  %3917 = vrot.lane.b32.xlu0 %v9740_v50, %s7232_s14  ;;  %v3722_v32 = vsel %vm9723_vm2, 0, %v9735_v2 }
 0x779   : > { %v3716_v54 = vmul.f32 %v3715_v11, %v3713_v29  ;;  %v3796_v45 = vadd.s32 %v3795_v5, %v3791_v23  ;;  %v3445_v30 = vshrl.u32 %v11251_v58, %v3442_v4  ;;  %v3448_v53 = vshrl.u32 %v11319_v31, %v3442_v4 }
 0x77a   : > { %v3451_v26 = vshrl.u32 %v11249_v63, %v3442_v4  ;;  %v3453_v59 = vshll.u32 %v11249_v63, %v3441_v46  ;;  %v3454_v10 = vshrl.u32 %v11247_v1, %v3442_v4  ;;  %v3456_v16 = vshll.u32 %v11247_v1, %v3441_v46 }
 0x77b   : > { %v3717_v35 = vxor.u32 2147483648, %v3716_v54  ;;  %v3797_v48 = vadd.s32 536870912, %v3796_v45  ;;  %v3457_v12 = vshrl.u32 %v11245_v8, %v3442_v4  ;;  %v3446_v28 = vor.u32 %v3445_v30, %v3444_v34 }
 0x77c   : > { %v3449_v3 = vor.u32 %v3448_v53, %v3447_v44  ;;  %v3452_v20 = vor.u32 %v3451_v26, %v3450_v38  ;;  %v3455_v55 = vor.u32 %v3454_v10, %v3453_v59  ;;  %v3435_v23 = vor.u32 8388608, %v3434_v24 }
 0x77d   : > { %v3718_v62 = vsel %vm3635_vm3, %v3717_v35, %v3716_v54  ;;  %v9767_v6 = vshrl.u32 %v3797_v48, 30  ;;  %v3864_v49 = vadd.f32 %v3858_v61, %v9314_v40  ;;  %v3458_v29 = vor.u32 %v3457_v12, %v3456_v16 }
 0x77e   : > { %v3721_v46 = vsel %vm9723_vm2, %v9409_v17, %v3718_v62  ;;  %vm3459_vm13 = vcmp.lt.s32.totalorder %v9744_v19, 1  ;;  %vm3461_vm14 = vcmp.lt.s32.totalorder %v9744_v19, 3  ;;  %vm3462_vm8 = vcmp.lt.s32.totalorder %v9744_v19, 4 }
 0x77f   : > { %7011 = vcosq.f32 %v3721_v46  ;;  %v3799_v11 = vshll.u32 %v9767_v6, 30  ;;  %v3464_v2 = vsel %vm3462_vm8, %v3452_v20, 2102212464  ;;  %v3467_v24 = vsel %vm3459_vm13, %v3446_v28, %v3449_v3 }
 0x780   : > { %7013 = vsinq.f32 %v3721_v46  ;;  %v3468_v40 = vsel %vm3462_vm8, %v3455_v55, 920167782  ;;  %v3443_v14 = vshrl.u32 %v7224_v56, %v3442_v4  ;;  %vm3460_vm12 = vcmp.lt.s32.totalorder %v9744_v19, 2 }
 0x781   : > { %v3800_v61 = vsub.s32 %v3796_v45, %v3799_v11  ;;  %v3469_v5 = vsel %vm3461_vm14, %v3452_v20, %v3468_v40  ;;  %v3471_v44 = vsel %vm3459_vm13, %v3449_v3, %v3452_v20  ;;  %v3472_v54 = vsel %vm3462_vm8, %v3458_v29, 1326507024 }
 0x782   : > { %v3470_v34 = vsel %vm3460_vm12, %v3467_v24, %v3469_v5  ;;  %v3475_v30 = vshll.u32 %v3435_v23, 8  ;;  %v3463_v53 = vsel %vm3459_vm13, %v3443_v14, %v3446_v28  ;;  %v3465_v4 = vsel %vm3461_vm14, %v3449_v3, %v3464_v2 }
 0x783   : > { %v3802_v38 = vsub.s32 0, %v3800_v61  ;;  %v3473_v45 = vsel %vm3461_vm14, %v3455_v55, %v3472_v54  ;;  %v9800_v35 = vmul.f32 %v7914_v7, %v3864_v49  ;;  %v3726_v16 = vand.u32 3, %v3722_v32 }
 0x784   : > { %v3474_v26 = vsel %vm3460_vm12, %v3471_v44, %v3473_v45  ;;  %v9795_v59 = vmul.u32.u64.low %v3475_v30, %v3470_v34  ;;  %v9796_v10 = vmul.u32.u64.high %v3475_v30, %v3470_v34, %v9795_v59  ;;  %v3466_v20 = vsel %vm3460_vm12, %v3463_v53, %v3465_v4 }
 0x785   : > { %v6300_v48 = vmin.u32 %v3802_v38, %v3800_v61  ;;  %v9802_v12 = vmul.u32.u64.low %v3475_v30, %v3474_v26  ;;  %v9803_v28 = vmul.u32.u64.high %v3475_v30, %v3474_v26, %v9802_v12  ;;  %3893 = vrot.lane.b32.xlu0 %v9800_v35, %s7231_s10  ;;  %vm3727_vm4 = vcmp.lt.s32.totalorder %v3726_v16, 2 }
 0x786   : > { %v3485_v55 = vadd.s32 1, %v9796_v10  ;;  %v3482_v29 = vmul.u32 %v3475_v30, %v3466_v20  ;;  %vm3731_vm6 = vcmp.eq.s32.totalorder %v3726_v16, 2  ;;  %vm3728_vm0 = vcmp.eq.s32.totalorder %v3726_v16, 0 }
 0x787   : > { %v3804_v3 = vclz %v6300_v48  ;;  %vm3484_vm7 = vc.u32 %v9803_v28, %v9795_v59  ;;  %v3792_v14 = vadd.s32 %v9715_v18, %v9706_v57  ;;  %vm3725_vm2 = vweird.f32 %v9409_v17 }
 0x788   : > { %v3486_v19 = vsel %vm3484_vm7, %v3485_v55, %v9796_v10  ;;  %vm3738_vm3 = vcmp.lt.s32.totalorder %v9568_v51, 0  ;;  %vm9834_vm15 = vcmp.le.f32.partialorder %v3736_v27, 0.7853982  ;;  %v3483_v27 = vadd.s32 %v9795_v59, %v9803_v28 }
 0x789   : > { %v7012_v62 = vpop.eup %7011  ;;  %v6301_v23 = vadd.s32 4294967294, %v3804_v3  ;;  %3915 = vrot.lane.b32.xlu0 %v9647_v9, %s7232_s14  ;;  %v3487_v24 = vadd.s32 %v3486_v19, %v3482_v29  ;;  %v3822_v19 = vsub.s32 4, %v9767_v6  ;;  %vm3429_vm7 = vcmp.lt.s32.totalorder %v9657_v13, 0 }
 0x78a   : > { %v7014_v46 = vpop.eup %7013  ;;  %v3732_v49 = vxor.u32 2147483648, %v7012_v62 }
 0x78b   : > { %v3729_v32 = vxor.u32 2147483648, %v7014_v46  ;;  %vm6302_vm1 = vcmp.lt.s32.totalorder %v6301_v23, 0  ;;  %v3488_v54 = vadd.s32 536870912, %v3487_v24 }
 0x78c   : > { %v3733_v11 = vsel %vm3731_vm6, %v3732_v49, %v7014_v46  ;;  %v3807_v2 = vsel %vm6302_vm1, 0, %v6301_v23  ;;  %vm3428_vm6 = vcmp.le.f32.partialorder %v3427_v41, 0.7853982 }
 0x78d   : > { %v3730_v40 = vsel %vm3728_vm0, %v7012_v62, %v3729_v32  ;;  %v3808_v5 = vsub.s32 32, %v3807_v2  ;;  %v3812_v34 = vsub.s32 4294967266, %v3807_v2  ;;  %v3809_v38 = vshll.u32 %v3800_v61, %v3807_v2 }
 0x78e   : > { %v3734_v44 = vsel %vm3727_vm4, %v3730_v40, %v3733_v11  ;;  %v9819_v26 = vshrl.u32 %v3488_v54, 30  ;;  %vm3828_vm4 = vweird.f32 %v9568_v51 }
 0x78f   : > { %v3735_v30 = vsel %vm3725_vm2, nan, %v3734_v44  ;;  %v3810_v53 = vshrl.u32 %v3792_v14, %v3808_v5  ;;  %v3813_v4 = vadd.s32 127, %v3812_v34 }
 0x790   : > { %v3843_v45 = vsub.f32 1.0, %v3735_v30  ;;  %v3490_v57 = vshll.u32 %v9819_v26, 30 }
 0x791   : > { %v3811_v10 = vor.u32 %v3810_v53, %v3809_v38  ;;  %v3814_v48 = vshll.u32 %v3813_v4, 23 }
 0x792   : > { %v3859_v12 = vmul.f32 %v9742_v22, %v3843_v45  ;;  %v3491_v17 = vsub.s32 %v3487_v24, %v3490_v57  ;;  %v3823_v24 = vsel %vm3738_vm3, %v3822_v19, %v9767_v6 }
 0x793   : > { %v3815_v18 = vor.u32 4788187, %v3814_v48  ;;  %v3818_v20 = vcvt.s32.f32 %v3811_v10  ;;  %v3825_v34 = vsel %vm9834_vm15, 0, %v3823_v24 }
 0x794   : > { %v3865_v3 = vadd.f32 %v3859_v12, %v9327_v15  ;;  %v3493_v55 = vsub.s32 0, %v3491_v17  ;;  %v3829_v4 = vand.u32 3, %v3825_v34 }
 0x795   : > { %v3816_v16 = vand.u32 2147483647, %v3815_v18 }
 0x796   : > { %v9825_v61 = vmul.f32 %v7905_v21, %v3865_v3  ;;  %v6288_v23 = vmin.u32 %v3493_v55, %v3491_v17  ;;  %vm3834_vm14 = vcmp.eq.s32.totalorder %v3829_v4, 2  ;;  %vm3831_vm8 = vcmp.eq.s32.totalorder %v3829_v4, 0 }
 0x797   : > { %v3819_v62 = vmul.f32 %v3818_v20, %v3816_v16  ;;  %vm3830_vm12 = vcmp.lt.s32.totalorder %v3829_v4, 2 }
 0x798   : > { %3923 = vrot.lane.b32.xlu0 %v9825_v61, %s7232_s14  ;;  %v6594_v49 = vpack.c.bf16 %v9825_v61, %v9740_v50  ;;  %v3495_v29 = vclz %v6288_v23  ;;  %v3513_v23 = vsub.s32 4, %v9819_v26 }
 0x799   : > { %v3820_v46 = vxor.u32 2147483648, %v3819_v62 }
 0x79a   : > { %v6289_v2 = vadd.s32 4294967294, %v3495_v29  ;;  %v3514_v15 = vsel %vm3429_vm7, %v3513_v23, %v9819_v26 }
 0x79b   : > { %v3821_v32 = vsel %vm3738_vm3, %v3820_v46, %v3819_v62  ;;  %v3516_v19 = vsel %vm3428_vm6, 0, %v3514_v15  ;;  %vm3519_vm3 = vweird.f32 %v9657_v13 }
 0x79c   : > { %v3824_v11 = vsel %vm9834_vm15, %v9568_v51, %v3821_v32  ;;  %vm6290_vm13 = vcmp.lt.s32.totalorder %v6289_v2, 0  ;;  %vm11328_vm15 = vcmask 7168  }
 0x79d   : > { %7015 = vcosq.f32 %v3824_v11  ;;  %v3498_v40 = vsel %vm6290_vm13, 0, %v6289_v2  ;;  %vm11329_vm13 = vcmask 195768  }
 0x79e   : > { %7017 = vsinq.f32 %v3824_v11  ;;  %v3499_v14 = vsub.s32 32, %v3498_v40  ;;  %v3503_v5 = vsub.s32 4294967266, %v3498_v40  ;;  %v3500_v44 = vshll.u32 %v3491_v17, %v3498_v40 }
 0x79f   : > { %v3520_v11 = vand.u32 3, %v3516_v19 }
 0x7a0   : > { %v3501_v54 = vshrl.u32 %v3483_v27, %v3499_v14  ;;  %v3504_v30 = vadd.s32 127, %v3503_v5 }
 0x7a1   : > { %vm3525_vm1 = vcmp.eq.s32.totalorder %v3520_v11, 2  ;;  %vm3522_vm0 = vcmp.eq.s32.totalorder %v3520_v11, 0  ;;  %vm3521_vm2 = vcmp.lt.s32.totalorder %v3520_v11, 2 }
 0x7a2   : > { %v3502_v38 = vor.u32 %v3501_v54, %v3500_v44  ;;  %v3505_v53 = vshll.u32 %v3504_v30, 23 }
 0x7a4   : > { %v3506_v45 = vor.u32 4788187, %v3505_v53  ;;  %v3509_v57 = vcvt.s32.f32 %v3502_v38 }
 0x7a6   : > { %v3507_v6 = vand.u32 2147483647, %v3506_v45 }
 0x7a7   : > { %v7016_v10 = vpop.eup %7015 }
 0x7a8   : > { %v7018_v48 = vpop.eup %7017  ;;  %v3835_v12 = vxor.u32 2147483648, %v7016_v10  ;;  %v3510_v28 = vmul.f32 %v3509_v57, %v3507_v6 }
 0x7a9   : > { %v3832_v18 = vxor.u32 2147483648, %v7018_v48 }
 0x7aa   : > { %v3836_v59 = vsel %vm3834_vm14, %v3835_v12, %v7018_v48  ;;  %v3511_v16 = vxor.u32 2147483648, %v3510_v28  ;;  %v6246_v48 = vld [vmem:[%s11219_s5 + $0x18] sm:$0xff]  ;;  %vm11330_vm14 = vmmov %vm11328_vm15 }
 0x7ab   : > { %v3833_v3 = vsel %vm3831_vm8, %v7016_v10, %v3832_v18  ;;  %v6249_v10 = vld [vmem:[%s11218_s4 + $0x10] sm:$0xff]  ;;  %vm11331_vm8 = vmmov %vm11330_vm14 }
 0x7ac   : > { %v3837_v17 = vsel %vm3830_vm12, %v3833_v3, %v3836_v59  ;;  %v3512_v62 = vsel %vm3429_vm7, %v3511_v16, %v3510_v28  ;;  %6485 = vmatprep.mubr.msk.f32.mxu1 %vm1141_vm9, %v6249_v10  ;;  %vm11332_vm12 = vcmask 1039360  }
 0x7ad   : > { %v3838_v20 = vsel %vm3828_vm4, nan, %v3837_v17  ;;  %v3515_v46 = vsel %vm3428_vm6, %v9657_v13, %v3512_v62  ;;  %v6245_v13 = vld [vmem:[%s11219_s5 + $0x10] sm:$0xff]  ;;  %vm11333_vm4 = vmmov %vm11329_vm13 }
 0x7ae   : > { %v3844_v55 = vsub.f32 1.0, %v3838_v20  ;;  %7019 = vcosq.f32 %v3515_v46  ;;  %vm11334_vm7 = vmmov %vm11332_vm12 }
 0x7af   : > { %7021 = vsinq.f32 %v3515_v46  ;;  %vm11335_vm6 = vmmov %vm11334_vm7 }
 0x7b0   : > { %v3860_v29 = vmul.f32 %v9742_v22, %v3844_v55  ;;  %v6307_v22 = vld [vmem:[%s11217_s3 + $0x20] sm:$0xff] }
 0x7b1   : > { %v4155_v5 = vadd.f32 1e-09, %v6307_v22 }
 0x7b2   : > { %v3866_v51 = vadd.f32 %v3860_v29, %v9529_v43 }
 0x7b3   : > { %7023 = vrcp.f32 %v4155_v5 }
 0x7b4   : > { %v3872_v32 = vmul.f32 %v7938_v39, %v3866_v51 }
 0x7b6   : > { %3878 = vst.msk [vmem:[#allocation2 + $0x58] sm:$0xff] %vm1037_vm5, %v3872_v32 }
 0x7b8   : > { %v7020_v41 = vpop.eup %7019 }
 0x7b9   : > { %v7022_v2 = vpop.eup %7021  ;;  %v3526_v24 = vxor.u32 2147483648, %v7020_v41 }
 0x7ba   : > { %v3523_v40 = vxor.u32 2147483648, %v7022_v2 }
 0x7bb   : > { %v3527_v27 = vsel %vm3525_vm1, %v3526_v24, %v7022_v2  ;;  %v6596_v2 = vpack.c.bf16 %v9800_v35, %v9647_v9  ;;  %vm11336_vm1 = vmmov %vm11335_vm6  ;;  %v6250_v9 = vld [vmem:[%s11218_s4 + $0x18] sm:$0xff] }
 0x7bc   : > { %v3524_v43 = vsel %vm3522_vm0, %v7020_v41, %v3523_v40  ;;  %vm11337_vm0 = vmmov %vm11331_vm8 }
 0x7bd   : > { %v3528_v26 = vsel %vm3521_vm2, %v3524_v43, %v3527_v27  ;;  %v7024_v38 = vpop.eup %7023  ;;  %v3956_v50 = vld [vmem:[#allocation2 + $0x58] sm:$0xff] }
 0x7be   : > { %v3529_v14 = vsel %vm3519_vm3, nan, %v3528_v26  ;;  %v4158_v45 = vmul.f32 0.5, %v7024_v38 }
 0x7bf   : > { %v3841_v34 = vsub.f32 1.0, %v3529_v14 }
 0x7c1   : > { %v3857_v44 = vmul.f32 %v9612_v33, %v3841_v34  ;;  %v4161_v33 = vadd.f32 %v6307_v22, %v6307_v22 }
 0x7c3   : > { %v3863_v54 = vadd.f32 %v3857_v44, %v9538_v36  ;;  %v6308_v36 = vld [vmem:[%s11217_s3 + $0x28] sm:$0xff] }
 0x7c4   : > { %v4156_v53 = vadd.f32 1e-09, %v6308_v36  ;;  %v4162_v12 = vadd.f32 %v6308_v36, %v6308_v36 }
 0x7c5   : > { %v3869_v30 = vmul.f32 %v7938_v39, %v3863_v54 }
 0x7c6   : > { %7025 = vrcp.f32 %v4156_v53 }
 0x7c7   : > { %3875 = vst.msk [vmem:[#allocation2 + $0x40] sm:$0xff] %vm1037_vm5, %v3869_v30  ;;  %3919 = vrot.lane.b32.xlu1 %v3869_v30, %s7232_s14  ;;  %3891 = vrot.lane.b32.xlu0 %v3869_v30, %s7231_s10 }
 0x7cb   : > { %3895 = vrot.lane.b32.xlu1 %v9825_v61, %s7231_s10  ;;  %3965 = vperm.xlu0 %6909, %v6245_v13  }
 0x7cf   : > { %3925 = vrot.lane.b32.xlu1 %v3872_v32, %s7232_s14  ;;  %4165 = vperm.xlu0 %6909, %v4161_v33  }
 0x7d0   : > { %v3888_v4 = vpop.permute.xlu0 %3887  ;;  %v7026_v6 = vpop.eup %7025 }
 0x7d1   : > { %3909 = vst.msk [vmem:[#allocation2] sm:$0xff] %vm1073_vm10, %v3888_v4  ;;  %v4160_v57 = vmul.f32 0.5, %v7026_v6 }
 0x7d3   : > { %3921 = vrot.lane.b32.xlu1 %v9800_v35, %s7232_s14  ;;  %4805 = vperm.xlu0 %6909, %v4158_v45  }
 0x7d7   : > { %3897 = vrot.lane.b32.xlu1 %v3872_v32, %s7231_s10 }
 0x7d8   : > { %v3945_v15 = vld [vmem:[#allocation2] sm:$0xff] }
 0x7db   : > { %3970 = vperm.xlu1 %6910, %v6246_v48  }
 0x7df   : > { %4170 = vperm.xlu1 %6910, %v4162_v12  }
 0x7e3   : > { %4810 = vperm.xlu1 %6910, %v4160_v57  }
 0x7ea   : > { %v3918_v18 = vpop.permute.xlu0 %3917  ;;  %v3890_v17 = vpop.permute.xlu1 %3889 }
 0x7eb   : > { %v3899_v46 = vsel %vm11330_vm14, %v3888_v4, %v3890_v17 }
 0x7f7   : > { %v3894_v59 = vpop.permute.xlu0 %3893 }
 0x7f8   : > { %3912 = vst.msk [vmem:[#allocation2 + $0x18] sm:$0xff] %vm1073_vm10, %v3894_v59 }
 0x7fb   : > { %v3916_v28 = vpop.permute.xlu0 %3915 }
 0x7fc   : > { %v3927_v27 = vsel %vm11335_vm6, %v3916_v28, %v3918_v18 }
 0x7ff   : > { %v3948_v23 = vld [vmem:[#allocation2 + $0x18] sm:$0xff] }
 0x800   : > { %v6592_v32 = vpack.c.bf16 %v3948_v23, %v3945_v15 }
 0x80a   : > { %v3924_v3 = vpop.permute.xlu0 %3923 }
 0x839   : > { %v3920_v16 = vpop.permute.xlu1 %3919  ;;  %v3892_v20 = vpop.permute.xlu0 %3891 }
 0x83a   : > { %3939 = vst.msk [vmem:[#allocation2 + $0x70] sm:$0xff] %vm1105_vm11, %v3920_v16  ;;  %v3900_v55 = vsel %vm11328_vm15, %v3890_v17, %v3892_v20  ;;  %v3928_v41 = vsel %vm11334_vm7, %v3918_v18, %v3920_v16 }
 0x83b   : > { %3943 = vst.msk [vmem:[#allocation2 + $0x70] sm:$0xff] %vm11329_vm13, %v11308_v42 }
 0x83c   : > { %3911 = vst.msk [vmem:[#allocation2 + $0x10] sm:$0xff] %vm1037_vm5, %v3900_v55 }
 0x83d   : > { %v3896_v62 = vpop.permute.xlu1 %3895 }
 0x83e   : > { %v3901_v29 = vsel %vm11331_vm8, %v3894_v59, %v3896_v62 }
 0x83f   : > { %v6590_v51 = vpack.c.bf16 %v3901_v29, %v3899_v46 }
 0x841   : > { %v3926_v19 = vpop.permute.xlu1 %3925  ;;  %6591 = vmatprep.subr.bf16.mxu0 %v6590_v51 }
 0x842   : > { %v3930_v11 = vsel %vm11332_vm12, %v3924_v3, %v3926_v19  ;;  %3942 = vst.msk [vmem:[#allocation2 + $0x88] sm:$0xff] %vm1105_vm11, %v3926_v19  ;;  %6593 = vmatpush1.bf16.msra.mxu0 %v6592_v32  ;;  %v3959_v34 = vld [vmem:[#allocation2 + $0x70] sm:$0xff] }
 0x843   : > { %3944 = vst.msk [vmem:[#allocation2 + $0x88] sm:$0xff] %vm11333_vm4, %v11308_v42  ;;  %6595 = vmatprep.subr.bf16.mxu0 %v6594_v49  ;;  %v6598_v40 = vpack.c.bf16 %v3930_v11, %v3928_v41  ;;  %v3947_v35 = vld [vmem:[#allocation2 + $0x10] sm:$0xff]  ;;  %v3953_v49 = vld [vmem:[#allocation2 + $0x40] sm:$0xff] }
 0x844   : > { %v6606_v54 = vpack.c.bf16 %v3956_v50, %v3953_v49 }
 0x845   : > { %v3922_v24 = vpop.permute.xlu1 %3921 }
 0x846   : > { %v3929_v22 = vsel %vm11336_vm1, %v3922_v24, %v3924_v3  ;;  %6597 = vmatpush1.bf16.msra.mxu0 %v6596_v2 }
 0x847   : > { %6599 = vmatprep.subr.bf16.mxu0 %v6598_v40  ;;  %v6600_v43 = vpack.c.bf16 %v3929_v22, %v3927_v27 }
 0x849   : > { %v3898_v26 = vpop.permute.xlu1 %3897 }
 0x84a   : > { %v3902_v14 = vsel %vm11337_vm0, %v3896_v62, %v3898_v26  ;;  %6601 = vmatpush1.bf16.msra.mxu0 %v6600_v43  ;;  %v3962_v44 = vld [vmem:[#allocation2 + $0x88] sm:$0xff]  ;;  %v9918_v13 = vpop.permute.xlu0 %3965 }
 0x84b   : > { %3914 = vst.msk [vmem:[#allocation2 + $0x28] sm:$0xff] %vm1037_vm5, %v3902_v14  ;;  %v6610_v30 = vpack.c.bf16 %v3962_v44, %v3959_v34 }
 0x84d   : > { %6303 = vmatmul.mubr.msk.f32.vlgmr.msra.gmra.mrb[12].mxu0 %vm1141_vm9, %v6249_v10 }
 0x84e   : > { %4049 = vmatprep.mubr.f32.mxu0 %v11308_v42  ;;  %v9927_v10 = vpop.permute.xlu0 %4165 }
 0x851   : > { %6304 = vmatmul.mubr.msk.f32.gmra.mrb[14].mxu0 %vm1141_vm9, %v6250_v9 }
 0x852   : > { %v3950_v61 = vld [vmem:[#allocation2 + $0x28] sm:$0xff]  ;;  %5006 = vmatprep.mubr.f32.mxu0 %v11308_v42 }
 0x853   : > { %v6602_v5 = vpack.c.bf16 %v3950_v61, %v3947_v35 }
 0x855   : > { %6603 = vmatprep.subr.bf16.mxu1 %v6602_v5 }
 0x856   : > { %6605 = vmatpush3.bf16.msra.mxu1 %v6602_v5 }
 0x857   : > { %6607 = vmatprep.subr.bf16.mxu1 %v6606_v54 }
 0x85a   : > { %6609 = vmatpush3.bf16.msra.mxu1 %v6606_v54  ;;  %v9921_v53 = vpop.permute.xlu1 %3970 }
 0x85b   : > { %6611 = vmatprep.subr.bf16.mxu1 %v6610_v30 }
 0x85e   : > { %6613 = vmatpush3.bf16.msra.mxu1 %v6610_v30  ;;  %v9947_v17 = vpop.permute.xlu1 %4170 }
 0x861   : > { %6486 = vmatmul.mubr.msk.f32.vlgmr.msra.gmra.mrb[6].mxu1 %vm1141_vm9, %v6250_v9 }
 0x920   : > { %v4045_v33 = vpop.f32.mrb[12].mxu0 }
 0x921   : > { %v4046_v36 = vadd.f32 %v4045_v33, %v9918_v13  ;;  %v4047_v38 = vpop.f32.mrb[13].mxu0 }
 0x922   : > { %v4048_v4 = vadd.f32 %v4047_v38, %v9918_v13 }
 0x923   : > { %v9925_v45 = vadd.f32 %v4046_v36, %v8670_v60 }
 0x924   : > { %v9930_v48 = vadd.f32 %v4048_v4, %v8675_v37  ;;  %v4051_v12 = vpop.f32.mrb[14].mxu0 }
 0x925   : > { %v9934_v6 = vmul.f32 %v9927_v10, %v9925_v45  ;;  %v4052_v57 = vadd.f32 %v4051_v12, %v9921_v53  ;;  %v4053_v18 = vpop.f32.mrb[15].mxu0 }
 0x926   : > { %v9939_v59 = vmul.f32 %v9927_v10, %v9930_v48  ;;  %v4054_v60 = vadd.f32 %v4053_v18, %v9921_v53 }
 0x927   : > { %v4179_v28 = vand.u32 2147483647, %v9934_v6  ;;  %v4182_v3 = vand.u32 2139095040, %v9934_v6  ;;  %v9945_v37 = vadd.f32 %v4052_v57, %v8690_v0 }
 0x928   : > { %v11244_v16 = vand.u32 2147483647, %v9939_v59  ;;  %v4285_v20 = vand.u32 2139095040, %v9939_v59  ;;  %v9960_v0 = vadd.f32 %v4054_v60, %v8697_v52 }
 0x929   : > { %v4183_v55 = vshrl.u32 %v4182_v3, 23  ;;  %v4186_v62 = vand.u32 8388607, %v4179_v28  ;;  %v9955_v23 = vmul.f32 %v9947_v17, %v9945_v37 }
 0x92a   : > { %v4286_v46 = vshrl.u32 %v4285_v20, 23  ;;  %v4289_v29 = vand.u32 8388607, %v11244_v16  ;;  %v9970_v22 = vmul.f32 %v9947_v17, %v9960_v0 }
 0x92b   : > { %v6319_v51 = vadd.s32 4294967169, %v4183_v55  ;;  %v11241_v15 = vand.u32 2147483647, %v9955_v23  ;;  %v4187_v32 = vor.u32 8388608, %v4186_v62  ;;  %v4491_v11 = vand.u32 2139095040, %v9955_v23 }
 0x92c   : > { %v6323_v19 = vadd.s32 4294967169, %v4286_v46  ;;  %v4290_v2 = vor.u32 8388608, %v4289_v29  ;;  %v4594_v34 = vand.u32 2139095040, %v9970_v22 }
 0x92d   : > { %v4189_v41 = vadd.s32 1, %v6319_v51  ;;  %v4492_v40 = vshrl.u32 %v4491_v11, 23  ;;  %v9966_v27 = vand.u32 8388607, %v11241_v15  ;;  %v9972_v43 = vshll.u32 %v4187_v32, 8 }
 0x92e   : > { %v4292_v24 = vadd.s32 1, %v6323_v19  ;;  %v9974_v35 = vshll.u32 %v4290_v2, 8 }
 0x92f   : > { %vm4190_vm2 = vcmp.gt.s32.totalorder %v4189_v41, 0  ;;  %v6331_v26 = vadd.s32 4294967169, %v4492_v40  ;;  %v4496_v5 = vor.u32 8388608, %v9966_v27 }
 0x930   : > { %v4191_v52 = vsel %vm4190_vm2, %v4189_v41, 0  ;;  %vm4293_vm3 = vcmp.gt.s32.totalorder %v4292_v24, 0 }
 0x931   : > { %v4192_v14 = vshrl.u32 %v4191_v52, 5  ;;  %v4193_v9 = vand.u32 31, %v4191_v52  ;;  %v4294_v50 = vsel %vm4293_vm3, %v4292_v24, 0  ;;  %v9982_v33 = vadd.s32 1, %v6331_v26 }
 0x932   : > { %v9976_v61 = vshrl.u32 %v4294_v50, 5  ;;  %v4296_v49 = vand.u32 31, %v4294_v50 }
 0x933   : > { %v4194_v44 = vsub.s32 32, %v4193_v9  ;;  %v4196_v54 = vshll.u32 %v7224_v56, %v4193_v9  ;;  %v4199_v30 = vshll.u32 %v11251_v58, %v4193_v9  ;;  %v4202_v36 = vshll.u32 %v11319_v31, %v4193_v9 }
 0x934   : > { %v4205_v38 = vshll.u32 %v11249_v63, %v4193_v9  ;;  %v4208_v4 = vshll.u32 %v11247_v1, %v4193_v9  ;;  %vm4211_vm15 = vcmp.lt.s32.totalorder %v4192_v14, 1  ;;  %v9987_v12 = vpop.f32.mrb[6].mxu1  ;;  %vm4212_vm13 = vcmp.lt.s32.totalorder %v4192_v14, 2 }
 0x935   : > { %v4197_v57 = vshrl.u32 %v11251_v58, %v4194_v44  ;;  %v4200_v18 = vshrl.u32 %v11319_v31, %v4194_v44  ;;  %v4203_v60 = vshrl.u32 %v11249_v63, %v4194_v44  ;;  %v9992_v3 = vpop.f32.mrb[7].mxu1  ;;  %v4195_v20 = vshrl.u32 %v7224_v56, %v4194_v44 }
 0x936   : > { %v4206_v55 = vshrl.u32 %v11247_v1, %v4194_v44  ;;  %v4209_v62 = vshrl.u32 %v11245_v8, %v4194_v44  ;;  %vm4213_vm14 = vcmp.lt.s32.totalorder %v4192_v14, 3  ;;  %v4297_v32 = vsub.s32 32, %v4296_v49 }
 0x937   : > { %v4198_v46 = vor.u32 %v4197_v57, %v4196_v54  ;;  %v4201_v29 = vor.u32 %v4200_v18, %v4199_v30  ;;  %v4204_v51 = vor.u32 %v4203_v60, %v4202_v36  ;;  %vm4214_vm8 = vcmp.lt.s32.totalorder %v4192_v14, 4 }
 0x938   : > { %v4207_v19 = vor.u32 %v4206_v55, %v4205_v38  ;;  %v4210_v11 = vor.u32 %v4209_v62, %v4208_v4  ;;  %v4299_v41 = vshll.u32 %v7224_v56, %v4296_v49  ;;  %v4302_v44 = vshll.u32 %v11251_v58, %v4296_v49 }
 0x939   : > { %v4215_v2 = vsel %vm4211_vm15, %v4195_v20, %v4198_v46  ;;  %v4216_v24 = vsel %vm4214_vm8, %v4204_v51, 2102212464  ;;  %v4219_v40 = vsel %vm4211_vm15, %v4198_v46, %v4201_v29  ;;  %v4223_v52 = vsel %vm4211_vm15, %v4201_v29, %v4204_v51 }
 0x93a   : > { %v4217_v26 = vsel %vm4213_vm14, %v4201_v29, %v4216_v24  ;;  %v4220_v9 = vsel %vm4214_vm8, %v4207_v19, 920167782  ;;  %v4224_v50 = vsel %vm4214_vm8, %v4210_v11, 1326507024  ;;  %v4298_v36 = vshrl.u32 %v7224_v56, %v4297_v32 }
 0x93b   : > { %v4221_v54 = vsel %vm4213_vm14, %v4204_v51, %v4220_v9  ;;  %v4225_v30 = vsel %vm4213_vm14, %v4207_v19, %v4224_v50  ;;  %v4300_v38 = vshrl.u32 %v11251_v58, %v4297_v32  ;;  %v4218_v4 = vsel %vm4212_vm13, %v4215_v2, %v4217_v26 }
 0x93c   : > { %v4222_v57 = vsel %vm4212_vm13, %v4219_v40, %v4221_v54  ;;  %v4226_v18 = vsel %vm4212_vm13, %v4223_v52, %v4225_v30  ;;  %v4303_v60 = vshrl.u32 %v11319_v31, %v4297_v32  ;;  %v4305_v19 = vshll.u32 %v11319_v31, %v4296_v49 }
 0x93d   : > { %v10012_v20 = vmul.u32.u64.low %v9972_v43, %v4226_v18  ;;  %v10013_v55 = vmul.u32.u64.high %v9972_v43, %v4226_v18, %v10012_v20  ;;  %v10016_v62 = vmul.u32.u64.low %v9972_v43, %v4222_v57  ;;  %v10017_v46 = vmul.u32.u64.high %v9972_v43, %v4222_v57, %v10016_v62 }
 0x93e   : > { %v4301_v29 = vor.u32 %v4300_v38, %v4299_v41  ;;  %v4304_v51 = vor.u32 %v4303_v60, %v4302_v44  ;;  %v4306_v11 = vshrl.u32 %v11249_v63, %v4297_v32  ;;  %v4234_v14 = vmul.u32 %v9972_v43, %v4218_v4 }
 0x93f   : > { %v4308_v2 = vshll.u32 %v11249_v63, %v4296_v49  ;;  %v4309_v24 = vshrl.u32 %v11247_v1, %v4297_v32  ;;  %v4312_v40 = vshrl.u32 %v11245_v8, %v4297_v32  ;;  %v4311_v26 = vshll.u32 %v11247_v1, %v4296_v49 }
 0x940   : > { %v4307_v52 = vor.u32 %v4306_v11, %v4305_v19  ;;  %vm4314_vm12 = vcmp.lt.s32.totalorder %v9976_v61, 1  ;;  %vm4315_vm4 = vcmp.lt.s32.totalorder %v9976_v61, 2  ;;  %vm4236_vm7 = vc.u32 %v10013_v55, %v10016_v62 }
 0x941   : > { %v4237_v41 = vadd.s32 1, %v10017_v46  ;;  %v4310_v9 = vor.u32 %v4309_v24, %v4308_v2  ;;  %vm4316_vm6 = vcmp.lt.s32.totalorder %v9976_v61, 3  ;;  %v4313_v43 = vor.u32 %v4312_v40, %v4311_v26 }
 0x942   : > { %vm4317_vm1 = vcmp.lt.s32.totalorder %v9976_v61, 4  ;;  %v4318_v50 = vsel %vm4314_vm12, %v4298_v36, %v4301_v29  ;;  %v4322_v32 = vsel %vm4314_vm12, %v4301_v29, %v4304_v51  ;;  %v4326_v30 = vsel %vm4314_vm12, %v4304_v51, %v4307_v52 }
 0x943   : > { %v4238_v44 = vsel %vm4236_vm7, %v4237_v41, %v10017_v46  ;;  %v4319_v49 = vsel %vm4317_vm1, %v4307_v52, 2102212464  ;;  %v4323_v54 = vsel %vm4317_vm1, %v4310_v9, 920167782  ;;  %v4327_v18 = vsel %vm4317_vm1, %v4313_v43, 1326507024 }
 0x944   : > { %v4239_v38 = vadd.s32 %v4238_v44, %v4234_v14  ;;  %v4320_v4 = vsel %vm4316_vm6, %v4304_v51, %v4319_v49  ;;  %v4324_v57 = vsel %vm4316_vm6, %v4307_v52, %v4323_v54  ;;  %v4328_v20 = vsel %vm4316_vm6, %v4310_v9, %v4327_v18 }
 0x945   : > { %v4325_v60 = vsel %vm4315_vm4, %v4322_v32, %v4324_v57  ;;  %vm4499_vm0 = vcmp.gt.s32.totalorder %v9982_v33, 0  ;;  %v4595_v19 = vshrl.u32 %v4594_v34, 23  ;;  %v4329_v46 = vsel %vm4315_vm4, %v4326_v30, %v4328_v20 }
 0x946   : > { %v4240_v36 = vadd.s32 536870912, %v4239_v38  ;;  %v10043_v29 = vmul.u32.u64.low %v9974_v35, %v4325_v60  ;;  %v10044_v11 = vmul.u32.u64.high %v9974_v35, %v4325_v60, %v10043_v29  ;;  %v4321_v51 = vsel %vm4315_vm4, %v4318_v50, %v4320_v4 }
 0x947   : > { %v10050_v14 = vmul.u32.u64.low %v9974_v35, %v4329_v46  ;;  %v10051_v2 = vmul.u32.u64.high %v9974_v35, %v4329_v46, %v10050_v14  ;;  %v4500_v24 = vsel %vm4499_vm0, %v9982_v33, 0  ;;  %v10058_v52 = vshll.u32 %v4496_v5, 8 }
 0x948   : > { %v10054_v40 = vshrl.u32 %v4240_v36, 30  ;;  %v4502_v34 = vand.u32 31, %v4500_v24  ;;  %v11242_v26 = vand.u32 2147483647, %v9970_v22  ;;  %v6335_v41 = vadd.s32 4294967169, %v4595_v19 }
 0x949   : > { %v4337_v61 = vmul.u32 %v9974_v35, %v4321_v51  ;;  %v4340_v43 = vadd.s32 1, %v10044_v11  ;;  %vm4339_vm2 = vc.u32 %v10051_v2, %v10043_v29  ;;  %v4501_v33 = vshrl.u32 %v4500_v24, 5 }
 0x94a   : > { %v4242_v9 = vshll.u32 %v10054_v40, 30  ;;  %v4503_v50 = vsub.s32 32, %v4502_v34  ;;  %v4505_v32 = vshll.u32 %v7224_v56, %v4502_v34  ;;  %v4508_v27 = vshll.u32 %v11251_v58, %v4502_v34 }
 0x94b   : > { %v4341_v44 = vsel %vm4339_vm2, %v4340_v43, %v10044_v11  ;;  %v4511_v54 = vshll.u32 %v11319_v31, %v4502_v34  ;;  %v4514_v57 = vshll.u32 %v11249_v63, %v4502_v34  ;;  %vm4520_vm3 = vcmp.lt.s32.totalorder %v4501_v33, 1 }
 0x94c   : > { %v10068_v5 = vsub.s32 %v4239_v38, %v4242_v9  ;;  %v4506_v49 = vshrl.u32 %v11251_v58, %v4503_v50  ;;  %v4342_v35 = vadd.s32 %v4341_v44, %v4337_v61  ;;  %v4509_v30 = vshrl.u32 %v11319_v31, %v4503_v50 }
 0x94d   : > { %v4512_v4 = vshrl.u32 %v11249_v63, %v4503_v50  ;;  %v4515_v20 = vshrl.u32 %v11247_v1, %v4503_v50  ;;  %v4517_v38 = vshll.u32 %v11247_v1, %v4502_v34  ;;  %v4518_v11 = vshrl.u32 %v11245_v8, %v4503_v50 }
 0x94e   : > { %v4245_v18 = vsub.s32 0, %v10068_v5  ;;  %v4507_v60 = vor.u32 %v4506_v49, %v4505_v32  ;;  %v4343_v19 = vadd.s32 536870912, %v4342_v35  ;;  %v4510_v36 = vor.u32 %v4509_v30, %v4508_v27 }
 0x94f   : > { %v4513_v46 = vor.u32 %v4512_v4, %v4511_v54  ;;  %v4504_v14 = vshrl.u32 %v7224_v56, %v4503_v50  ;;  %v4516_v24 = vor.u32 %v4515_v20, %v4514_v57  ;;  %v4601_v9 = vadd.s32 1, %v6335_v41 }
 0x950   : > { %v6320_v51 = vmin.u32 %v4245_v18, %v10068_v5  ;;  %v10082_v61 = vshrl.u32 %v4343_v19, 30  ;;  %v4519_v43 = vor.u32 %v4518_v11, %v4517_v38  ;;  %vm4523_vm15 = vcmp.lt.s32.totalorder %v4501_v33, 4 }
 0x951   : > { %vm4521_vm13 = vcmp.lt.s32.totalorder %v4501_v33, 2  ;;  %v4525_v44 = vsel %vm4523_vm15, %v4513_v46, 2102212464  ;;  %v4528_v34 = vsel %vm4520_vm3, %v4507_v60, %v4510_v36  ;;  %vm4522_vm14 = vcmp.lt.s32.totalorder %v4501_v33, 3 }
 0x952   : > { %v4247_v32 = vclz %v6320_v51  ;;  %v4345_v27 = vshll.u32 %v10082_v61, 30  ;;  %v4529_v49 = vsel %vm4523_vm15, %v4516_v24, 920167782  ;;  %v4532_v54 = vsel %vm4520_vm3, %v4510_v36, %v4513_v46 }
 0x953   : > { %v4524_v4 = vsel %vm4520_vm3, %v4504_v14, %v4507_v60  ;;  %v4530_v18 = vsel %vm4522_vm14, %v4513_v46, %v4529_v49  ;;  %v4533_v50 = vsel %vm4523_vm15, %v4519_v43, 1326507024  ;;  %v4526_v41 = vsel %vm4522_vm14, %v4510_v36, %v4525_v44 }
 0x954   : > { %v6321_v30 = vadd.s32 4294967294, %v4247_v32  ;;  %v10085_v57 = vsub.s32 %v4342_v35, %v4345_v27  ;;  %v4531_v20 = vsel %vm4521_vm13, %v4528_v34, %v4530_v18  ;;  %v4534_v38 = vsel %vm4522_vm14, %v4516_v24, %v4533_v50 }
 0x955   : > { %v4535_v19 = vsel %vm4521_vm13, %v4532_v54, %v4534_v38  ;;  %v10090_v11 = vmul.u32.u64.low %v10058_v52, %v4531_v20  ;;  %v10091_v51 = vmul.u32.u64.high %v10058_v52, %v4531_v20, %v10090_v11  ;;  %v4527_v36 = vsel %vm4521_vm13, %v4524_v4, %v4526_v41 }
 0x956   : > { %vm6322_vm8 = vcmp.lt.s32.totalorder %v6321_v30, 0  ;;  %v4348_v32 = vsub.s32 0, %v10085_v57  ;;  %v10096_v60 = vmul.u32.u64.low %v10058_v52, %v4535_v19  ;;  %v10097_v46 = vmul.u32.u64.high %v10058_v52, %v4535_v19, %v10096_v60 }
 0x957   : > { %v4250_v15 = vsel %vm6322_vm8, 0, %v6321_v30  ;;  %v4598_v14 = vand.u32 8388607, %v11242_v26  ;;  %vm4602_vm12 = vcmp.gt.s32.totalorder %v4601_v9, 0  ;;  %v4546_v27 = vadd.s32 1, %v10091_v51 }
 0x958   : > { %v4255_v35 = vsub.s32 4294967266, %v4250_v15  ;;  %v6324_v24 = vmin.u32 %v4348_v32, %v10085_v57  ;;  %v4603_v43 = vsel %vm4602_vm12, %v4601_v9, 0  ;;  %v4251_v44 = vsub.s32 32, %v4250_v15 }
 0x959   : > { %v4543_v54 = vmul.u32 %v10058_v52, %v4527_v36  ;;  %vm4545_vm4 = vc.u32 %v10097_v46, %v10090_v11  ;;  %v4605_v30 = vand.u32 31, %v4603_v43  ;;  %v4235_v33 = vadd.s32 %v10016_v62, %v10013_v55 }
 0x95a   : > { %v4256_v34 = vadd.s32 127, %v4255_v35  ;;  %v4350_v49 = vclz %v6324_v24  ;;  %v4547_v4 = vsel %vm4545_vm4, %v4546_v27, %v10091_v51  ;;  %v4599_v18 = vor.u32 8388608, %v4598_v14 }
 0x95b   : > { %v4548_v9 = vadd.s32 %v4547_v4, %v4543_v54  ;;  %v4606_v20 = vsub.s32 32, %v4605_v30  ;;  %v4252_v38 = vshll.u32 %v10068_v5, %v4250_v15  ;;  %v4253_v19 = vshrl.u32 %v4235_v33, %v4251_v44 }
 0x95c   : > { %v4257_v50 = vshll.u32 %v4256_v34, 23  ;;  %v6325_v41 = vadd.s32 4294967294, %v4350_v49  ;;  %v4128_v52 = vadd.f32 %v9987_v12, %v9921_v53  ;;  %v10115_v32 = vadd.f32 %v9992_v3, %v9918_v13 }
 0x95d   : > { %v4549_v60 = vadd.s32 536870912, %v4548_v9  ;;  %v4604_v55 = vshrl.u32 %v4603_v43, 5  ;;  %v4609_v62 = vshrl.u32 %v11251_v58, %v4606_v20  ;;  %v4608_v35 = vshll.u32 %v7224_v56, %v4605_v30 }
 0x95e   : > { %vm6326_vm7 = vcmp.lt.s32.totalorder %v6325_v41, 0  ;;  %v4612_v36 = vshrl.u32 %v11319_v31, %v4606_v20  ;;  %v4615_v15 = vshrl.u32 %v11249_v63, %v4606_v20  ;;  %v4258_v5 = vor.u32 4788187, %v4257_v50 }
 0x95f   : > { %v10118_v51 = vsel %vm6326_vm7, 0, %v6325_v41  ;;  %v10123_v14 = vshrl.u32 %v4549_v60, 30  ;;  %v4611_v53 = vshll.u32 %v11251_v58, %v4605_v30  ;;  %v4614_v13 = vshll.u32 %v11319_v31, %v4605_v30 }
 0x960   : > { %v4254_v12 = vor.u32 %v4253_v19, %v4252_v38  ;;  %v4338_v3 = vadd.s32 %v10043_v29, %v10051_v2  ;;  %v4358_v24 = vsub.s32 4294967266, %v10118_v51  ;;  %v10130_v43 = vshll.u32 %v4599_v18, 8 }
 0x961   : > { %v4551_v44 = vshll.u32 %v10123_v14, 30  ;;  %v4610_v34 = vor.u32 %v4609_v62, %v4608_v35  ;;  %v4613_v27 = vor.u32 %v4612_v36, %v4611_v53  ;;  %v4616_v49 = vor.u32 %v4615_v15, %v4614_v13 }
 0x962   : > { %v4617_v54 = vshll.u32 %v11249_v63, %v4605_v30  ;;  %v4618_v33 = vshrl.u32 %v11247_v1, %v4606_v20  ;;  %v4620_v4 = vshll.u32 %v11247_v1, %v4605_v30  ;;  %v4621_v50 = vshrl.u32 %v11245_v8, %v4606_v20 }
 0x963   : > { %v4259_v41 = vand.u32 2147483647, %v4258_v5  ;;  %v10137_v38 = vsub.s32 %v4548_v9, %v4551_v44  ;;  %vm4623_vm6 = vcmp.lt.s32.totalorder %v4604_v55, 1  ;;  %v10140_v29 = vadd.f32 %v4128_v52, %v8881_v25 }
 0x964   : > { %v4261_v2 = vcvt.s32.f32 %v4254_v12  ;;  %v4359_v18 = vadd.s32 127, %v4358_v24  ;;  %v4619_v19 = vor.u32 %v4618_v33, %v4617_v54  ;;  %v4622_v60 = vor.u32 %v4621_v50, %v4620_v4 }
 0x965   : > { %v4354_v62 = vsub.s32 32, %v10118_v51  ;;  %v4554_v35 = vsub.s32 0, %v10137_v38  ;;  %v4607_v36 = vshrl.u32 %v7224_v56, %v4606_v20  ;;  %vm4626_vm1 = vcmp.lt.s32.totalorder %v4604_v55, 4 }
 0x966   : > { %vm4625_vm0 = vcmp.lt.s32.totalorder %v4604_v55, 3  ;;  %v4628_v30 = vsel %vm4626_vm1, %v4616_v49, 2102212464  ;;  %v4631_v9 = vsel %vm4623_vm6, %v4610_v34, %v4613_v27  ;;  %v4632_v15 = vsel %vm4626_vm1, %v4619_v19, 920167782 }
 0x967   : > { %v4262_v5 = vmul.f32 %v4261_v2, %v4259_v41  ;;  %v6332_v25 = vmin.u32 %v4554_v35, %v10137_v38  ;;  %vm4624_vm2 = vcmp.lt.s32.totalorder %v4604_v55, 2  ;;  %v4633_v52 = vsel %vm4625_vm0, %v4616_v49, %v4632_v15 }
 0x968   : > { %v4360_v53 = vshll.u32 %v4359_v18, 23  ;;  %v4634_v13 = vsel %vm4624_vm2, %v4631_v9, %v4633_v52  ;;  %v4635_v12 = vsel %vm4623_vm6, %v4613_v27, %v4616_v49  ;;  %v4636_v24 = vsel %vm4626_vm1, %v4622_v60, 1326507024 }
 0x969   : > { %v4556_v44 = vclz %v6332_v25  ;;  %v4627_v20 = vsel %vm4623_vm6, %v4607_v36, %v4610_v34  ;;  %v4629_v54 = vsel %vm4625_vm0, %v4613_v27, %v4628_v30  ;;  %v4637_v33 = vsel %vm4625_vm0, %v4619_v19, %v4636_v24 }
 0x96a   : > { %v4638_v4 = vsel %vm4624_vm2, %v4635_v12, %v4637_v33  ;;  %v10152_v50 = vmul.u32.u64.low %v10130_v43, %v4634_v13  ;;  %v10153_v41 = vmul.u32.u64.high %v10130_v43, %v4634_v13, %v10152_v50  ;;  %v10158_v2 = vmul.f32 %v9947_v17, %v10140_v29 }
 0x96b   : > { %v4356_v18 = vshrl.u32 %v4338_v3, %v4354_v62  ;;  %v6333_v35 = vadd.s32 4294967294, %v4556_v44  ;;  %v10161_v49 = vmul.u32.u64.low %v10130_v43, %v4638_v4  ;;  %v10162_v60 = vmul.u32.u64.high %v10130_v43, %v4638_v4, %v10161_v49 }
 0x96c   : > { %v4630_v34 = vsel %vm4624_vm2, %v4627_v20, %v4629_v54  ;;  %v11243_v27 = vand.u32 2147483647, %v10158_v2  ;;  %v4697_v19 = vand.u32 2139095040, %v10158_v2  ;;  %v10169_v36 = vadd.f32 %v10115_v32, %v8932_v47 }
 0x96d   : > { %v4355_v17 = vshll.u32 %v10085_v57, %v10118_v51  ;;  %v4361_v30 = vor.u32 4788187, %v4360_v53  ;;  %vm6334_vm3 = vcmp.lt.s32.totalorder %v6333_v35, 0  ;;  %v4263_v3 = vxor.u32 2147483648, %v4262_v5 }
 0x96e   : > { %v4649_v62 = vadd.s32 1, %v10153_v41  ;;  %v4698_v9 = vshrl.u32 %v4697_v19, 23  ;;  %v4646_v55 = vmul.u32 %v10130_v43, %v4630_v34  ;;  %v4701_v25 = vand.u32 8388607, %v11243_v27 }
 0x96f   : > { %v4357_v15 = vor.u32 %v4356_v18, %v4355_v17  ;;  %v10177_v52 = vsel %vm6334_vm3, 0, %v6333_v35  ;;  %vm4648_vm15 = vc.u32 %v10162_v60, %v10152_v50  ;;  %v10183_v57 = vmul.f32 %v9927_v10, %v10169_v36 }
 0x970   : > { %v6339_v47 = vadd.s32 4294967169, %v4698_v9  ;;  %vm4181_vm13 = vcmp.lt.s32.totalorder %v9934_v6, 0  ;;  %v4362_v32 = vand.u32 2147483647, %v4361_v30  ;;  %v4650_v51 = vsel %vm4648_vm15, %v4649_v62, %v10153_v41 }
 0x971   : > { %v4264_v43 = vsel %vm4181_vm13, %v4263_v3, %v4262_v5  ;;  %v4651_v53 = vadd.s32 %v4650_v51, %v4646_v55  ;;  %v4364_v12 = vcvt.s32.f32 %v4357_v15  ;;  %v4560_v24 = vsub.s32 32, %v10177_v52 }
 0x972   : > { %v4704_v13 = vadd.s32 1, %v6339_v47  ;;  %v4702_v44 = vor.u32 8388608, %v4701_v25  ;;  %v4388_v20 = vand.u32 2139095040, %v10183_v57  ;;  %vm10193_vm8 = vcmp.le.f32.partialorder %v4179_v28, 0.7853982 }
 0x973   : > { %v4652_v54 = vadd.s32 536870912, %v4651_v53  ;;  %v10197_v33 = vmul.f32 %v4364_v12, %v4362_v32  ;;  %v4544_v5 = vadd.s32 %v10090_v11, %v10097_v46  ;;  %v4265_v49 = vsub.s32 4, %v10054_v40 }
 0x974   : > { %vm4705_vm14 = vcmp.gt.s32.totalorder %v4704_v13, 0  ;;  %v4389_v41 = vshrl.u32 %v4388_v20, 23  ;;  %v10207_v34 = vsel %vm10193_vm8, %v9934_v6, %v4264_v43  ;;  %v4561_v28 = vshll.u32 %v10137_v38, %v10177_v52 }
 0x975   : > { %v4706_v4 = vsel %vm4705_vm14, %v4704_v13, 0  ;;  %v10201_v18 = vshrl.u32 %v4652_v54, 30  ;;  %v4562_v19 = vshrl.u32 %v4544_v5, %v4560_v24  ;;  %v4564_v17 = vsub.s32 4294967266, %v10177_v52 }
 0x976   : > { %v4708_v35 = vand.u32 31, %v4706_v4  ;;  %v10212_v30 = vshll.u32 %v4702_v44, 8  ;;  %v4707_v46 = vshrl.u32 %v4706_v4, 5  ;;  %v4385_v62 = vand.u32 2147483647, %v10183_v57 }
 0x977   : > { %v4654_v11 = vshll.u32 %v10201_v18, 30  ;;  %v6327_v25 = vadd.s32 4294967169, %v4389_v41  ;;  %7027 = vcosq.f32 %v10207_v34  ;;  %vm4284_vm14 = vcmp.lt.s32.totalorder %v9939_v59, 0 }
 0x978   : > { %v4709_v3 = vsub.s32 32, %v4708_v35  ;;  %v4711_v9 = vshll.u32 %v7224_v56, %v4708_v35  ;;  %v4714_v15 = vshll.u32 %v11251_v58, %v4708_v35  ;;  %v4717_v55 = vshll.u32 %v11319_v31, %v4708_v35 }
 0x979   : > { %v10219_v47 = vsub.s32 %v4651_v53, %v4654_v11  ;;  %v4720_v32 = vshll.u32 %v11249_v63, %v4708_v35  ;;  %v4723_v13 = vshll.u32 %v11247_v1, %v4708_v35  ;;  %vm4726_vm12 = vcmp.lt.s32.totalorder %v4707_v46, 1 }
 0x97a   : > { %v4712_v38 = vshrl.u32 %v11251_v58, %v4709_v3  ;;  %v4715_v52 = vshrl.u32 %v11319_v31, %v4709_v3  ;;  %v4718_v51 = vshrl.u32 %v11249_v63, %v4709_v3  ;;  %v4721_v43 = vshrl.u32 %v11247_v1, %v4709_v3 }
 0x97b   : > { %v4724_v12 = vshrl.u32 %v11245_v8, %v4709_v3  ;;  %v4657_v24 = vsub.s32 0, %v10219_v47  ;;  %v4710_v44 = vshrl.u32 %v7224_v56, %v4709_v3  ;;  %vm4727_vm4 = vcmp.lt.s32.totalorder %v4707_v46, 2 }
 0x97c   : > { %v4713_v53 = vor.u32 %v4712_v38, %v4711_v9  ;;  %v4716_v20 = vor.u32 %v4715_v52, %v4714_v15  ;;  %v4719_v54 = vor.u32 %v4718_v51, %v4717_v55  ;;  %v4722_v5 = vor.u32 %v4721_v43, %v4720_v32 }
 0x97d   : > { %v4725_v4 = vor.u32 %v4724_v12, %v4723_v13  ;;  %v6336_v41 = vmin.u32 %v4657_v24, %v10219_v47  ;;  %vm4728_vm7 = vcmp.lt.s32.totalorder %v4707_v46, 3  ;;  %vm4729_vm6 = vcmp.lt.s32.totalorder %v4707_v46, 4 }
 0x97e   : > { %v4730_v11 = vsel %vm4726_vm12, %v4710_v44, %v4713_v53  ;;  %v4731_v26 = vsel %vm4729_vm6, %v4719_v54, 2102212464  ;;  %v4734_v35 = vsel %vm4726_vm12, %v4713_v53, %v4716_v20  ;;  %v4735_v27 = vsel %vm4729_vm6, %v4722_v5, 920167782 }
 0x97f   : > { %v4659_v16 = vclz %v6336_v41  ;;  %v4732_v8 = vsel %vm4728_vm7, %v4716_v20, %v4731_v26  ;;  %v4736_v1 = vsel %vm4728_vm7, %v4719_v54, %v4735_v27  ;;  %v4738_v63 = vsel %vm4726_vm12, %v4716_v20, %v4719_v54 }
 0x980   : > { %v4737_v3 = vsel %vm4727_vm4, %v4734_v35, %v4736_v1  ;;  %v4739_v9 = vsel %vm4729_vm6, %v4725_v4, 1326507024  ;;  %v4392_v15 = vand.u32 8388607, %v4385_v62  ;;  %v4395_v55 = vadd.s32 1, %v6327_v25 }
 0x981   : > { %v6337_v38 = vadd.s32 4294967294, %v4659_v16  ;;  %v4740_v52 = vsel %vm4728_vm7, %v4722_v5, %v4739_v9  ;;  %v10235_v32 = vmul.u32.u64.low %v10212_v30, %v4737_v3  ;;  %v10236_v51 = vmul.u32.u64.high %v10212_v30, %v4737_v3, %v10235_v32 }
 0x982   : > { %v4733_v43 = vsel %vm4727_vm4, %v4730_v11, %v4732_v8  ;;  %v4741_v26 = vsel %vm4727_vm4, %v4738_v63, %v4740_v52  ;;  %vm4396_vm1 = vcmp.gt.s32.totalorder %v4395_v55, 0  ;;  %v4266_v1 = vsel %vm4181_vm13, %v4265_v49, %v10054_v40 }
 0x983   : > { %vm6338_vm0 = vcmp.lt.s32.totalorder %v6337_v38, 0  ;;  %v10245_v27 = vmul.u32.u64.low %v10212_v30, %v4741_v26  ;;  %v10246_v25 = vmul.u32.u64.high %v10212_v30, %v4741_v26, %v10245_v27  ;;  %v4397_v16 = vsel %vm4396_vm1, %v4395_v55, 0 }
 0x984   : > { %v4366_v13 = vxor.u32 2147483648, %v10197_v33  ;;  %v10249_v12 = vadd.s32 127, %v4564_v17  ;;  %v10253_v8 = vadd.s32 %v10152_v50, %v10162_v60  ;;  %v4399_v63 = vand.u32 31, %v4397_v16 }
 0x985   : > { %v10255_v46 = vor.u32 %v4562_v19, %v4561_v28  ;;  %v4752_v24 = vadd.s32 1, %v10236_v51  ;;  %v4393_v40 = vor.u32 8388608, %v4392_v15  ;;  %v4268_v49 = vsel %vm10193_vm8, 0, %v4266_v1 }
 0x986   : > { %v10260_v44 = vsel %vm6338_vm0, 0, %v6337_v38  ;;  %v4749_v53 = vmul.u32 %v10212_v30, %v4733_v43  ;;  %v4400_v20 = vsub.s32 32, %v4399_v63  ;;  %vm4751_vm2 = vc.u32 %v10246_v25, %v10235_v32 }
 0x987   : > { %v4398_v50 = vshrl.u32 %v4397_v16, 5  ;;  %v4402_v60 = vshll.u32 %v7224_v56, %v4399_v63  ;;  %7029 = vsinq.f32 %v10207_v34  ;;  %v4753_v28 = vsel %vm4751_vm2, %v4752_v24, %v10236_v51 }
 0x988   : > { %v4403_v10 = vshrl.u32 %v11251_v58, %v4400_v20  ;;  %v4405_v19 = vshll.u32 %v11251_v58, %v4399_v63  ;;  %v4406_v17 = vshrl.u32 %v11319_v31, %v4400_v20  ;;  %v4667_v30 = vsub.s32 4294967266, %v10260_v44 }
 0x989   : > { %v4754_v54 = vadd.s32 %v4753_v28, %v4749_v53  ;;  %v4408_v5 = vshll.u32 %v11319_v31, %v4399_v63  ;;  %v11340_v4 = vmov 2102212464   ;;  %v11341_v34 = vmov 920167782  }
 0x98a   : > { %v4409_v41 = vshrl.u32 %v11340_v4, %v4400_v20  ;;  %v4404_v11 = vor.u32 %v4403_v10, %v4402_v60  ;;  %v4407_v35 = vor.u32 %v4406_v17, %v4405_v19  ;;  %v4411_v3 = vshll.u32 %v11340_v4, %v4399_v63  ;;  %v7028_v19 = vpop.eup %7027 }
 0x98b   : > { %v4412_v9 = vshrl.u32 %v11341_v34, %v4400_v20  ;;  %v4566_v15 = vshll.u32 %v10249_v12, 23  ;;  %v4755_v55 = vadd.s32 536870912, %v4754_v54  ;;  %v4272_v52 = vand.u32 3, %v4268_v49 }
 0x98c   : > { %v4410_v38 = vor.u32 %v4409_v41, %v4408_v5  ;;  %v4414_v43 = vshll.u32 %v11341_v34, %v4399_v63  ;;  %v11342_v26 = vmov 1326507024   ;;  %v4433_v27 = vshll.u32 %v4393_v40, 8 }
 0x98d   : > { %v4413_v51 = vor.u32 %v4412_v9, %v4411_v3  ;;  %v4415_v1 = vshrl.u32 %v11342_v26, %v4400_v20  ;;  %v4663_v16 = vsub.s32 32, %v10260_v44  ;;  %v4668_v24 = vadd.s32 127, %v4667_v30 }
 0x98e   : > { %v10281_v53 = vshrl.u32 %v4755_v55, 30  ;;  %vm4417_vm3 = vcmp.lt.s32.totalorder %v4398_v50, 1  ;;  %v4401_v60 = vshrl.u32 %v7224_v56, %v4400_v20  ;;  %vm4420_vm15 = vcmp.lt.s32.totalorder %v4398_v50, 4 }
 0x98f   : > { %v4416_v28 = vor.u32 %v4415_v1, %v4414_v43  ;;  %v4425_v12 = vsel %vm4417_vm3, %v4404_v11, %v4407_v35  ;;  %vm4419_vm13 = vcmp.lt.s32.totalorder %v4398_v50, 3  ;;  %v4422_v10 = vsel %vm4420_vm15, %v4410_v38, 2102212464 }
 0x990   : > { %v4757_v49 = vshll.u32 %v10281_v53, 30  ;;  %v4426_v63 = vsel %vm4420_vm15, %v4413_v51, 920167782  ;;  %vm4418_vm8 = vcmp.lt.s32.totalorder %v4398_v50, 2  ;;  %v4429_v17 = vsel %vm4417_vm3, %v4407_v35, %v4410_v38 }
 0x991   : > { %v4427_v40 = vsel %vm4419_vm13, %v4410_v38, %v4426_v63  ;;  %v4430_v30 = vsel %vm4420_vm15, %v4416_v28, 1326507024  ;;  %vm4271_vm12 = vweird.f32 %v9934_v6  ;;  %v7030_v20 = vpop.eup %7029  ;;  %v4669_v5 = vshll.u32 %v4668_v24, 23 }
 0x992   : > { %v10290_v41 = vsub.s32 %v4754_v54, %v4757_v49  ;;  %v4421_v3 = vsel %vm4417_vm3, %v4401_v60, %v4404_v11  ;;  %v4428_v9 = vsel %vm4418_vm8, %v4425_v12, %v4427_v40  ;;  %v4423_v55 = vsel %vm4419_vm13, %v4407_v35, %v4422_v10 }
 0x993   : > { %v4431_v43 = vsel %vm4419_vm13, %v4413_v51, %v4430_v30  ;;  %v10296_v1 = vmul.u32.u64.low %v4433_v27, %v4428_v9  ;;  %v10297_v58 = vmul.u32.u64.high %v4433_v27, %v4428_v9, %v10296_v1  ;;  %v4567_v38 = vor.u32 4788187, %v4566_v15 }
 0x994   : > { %v4665_v28 = vshrl.u32 %v10253_v8, %v4663_v16  ;;  %v4760_v63 = vsub.s32 0, %v10290_v41  ;;  %v4432_v54 = vsel %vm4418_vm8, %v4429_v17, %v4431_v43  ;;  %v4664_v11 = vshll.u32 %v10219_v47, %v10260_v44  ;;  %v10327_v43 = vpop.permute.xlu0 %4805 }
 0x995   : > { %v10305_v24 = vmul.u32.u64.low %v4433_v27, %v4432_v54  ;;  %v10306_v60 = vmul.u32.u64.high %v4433_v27, %v4432_v54, %v10305_v24  ;;  %v4275_v35 = vxor.u32 2147483648, %v7030_v20  ;;  %v4424_v12 = vsel %vm4418_vm8, %v4421_v3, %v4423_v55 }
 0x996   : > { %v6340_v51 = vmin.u32 %v4760_v63, %v10290_v41  ;;  %vm4274_vm4 = vcmp.eq.s32.totalorder %v4272_v52, 0  ;;  %v4278_v49 = vxor.u32 2147483648, %v7028_v19  ;;  %v4670_v15 = vor.u32 4788187, %v4669_v5 }
 0x997   : > { %v4443_v8 = vadd.s32 1, %v10297_v58  ;;  %v4276_v16 = vsel %vm4274_vm4, %v7028_v19, %v4275_v35  ;;  %vm4277_vm7 = vcmp.eq.s32.totalorder %v4272_v52, 2  ;;  %v4666_v10 = vor.u32 %v4665_v28, %v4664_v11 }
 0x998   : > { %v4762_v40 = vclz %v6340_v51  ;;  %vm4273_vm6 = vcmp.lt.s32.totalorder %v4272_v52, 2  ;;  %v4279_v17 = vsel %vm4277_vm7, %v4278_v49, %v7030_v20  ;;  %v4440_v47 = vmul.u32 %v4433_v27, %v4424_v12 }
 0x999   : > { %vm4442_vm1 = vc.u32 %v10306_v60, %v10296_v1  ;;  %v4280_v44 = vsel %vm4273_vm6, %v4276_v16, %v4279_v17  ;;  %v11343_v30 = vand.u32 2147483647, %v9939_v59  ;;  %v4367_v19 = vsel %vm4284_vm14, %v4366_v13, %v10197_v33 }
 0x99a   : > { %v6341_v5 = vadd.s32 4294967294, %v4762_v40  ;;  %v4444_v52 = vsel %vm4442_vm1, %v4443_v8, %v10297_v58  ;;  %v4281_v27 = vsel %vm4271_vm12, nan, %v4280_v44  ;;  %v4568_v20 = vand.u32 2147483647, %v4567_v38 }
 0x99b   : > { %vm10315_vm0 = vcmp.le.f32.partialorder %v11343_v30, 0.7853982  ;;  %v4671_v3 = vand.u32 2147483647, %v4670_v15  ;;  %v4445_v9 = vadd.s32 %v4444_v52, %v4440_v47  ;;  %v4797_v55 = vsub.f32 1.0, %v4281_v27 }
 0x99c   : > { %v4570_v28 = vcvt.s32.f32 %v10255_v46  ;;  %v4673_v63 = vcvt.s32.f32 %v4666_v10  ;;  %vm6342_vm2 = vcmp.lt.s32.totalorder %v6341_v5, 0  ;;  %v4368_v54 = vsub.s32 4, %v10082_v61 }
 0x99d   : > { %v4765_v11 = vsel %vm6342_vm2, 0, %v6341_v5  ;;  %v4446_v33 = vadd.s32 536870912, %v4445_v9  ;;  %v4813_v13 = vmul.f32 %v10327_v43, %v4797_v55  ;;  %v4370_v58 = vsel %vm10315_vm0, %v9939_v59, %v4367_v19 }
 0x99e   : > { %v4750_v6 = vadd.s32 %v10235_v32, %v10246_v25  ;;  %v4766_v38 = vsub.s32 32, %v4765_v11  ;;  %v4770_v24 = vsub.s32 4294967266, %v4765_v11  ;;  %v4571_v35 = vmul.f32 %v4570_v28, %v4568_v20 }
 0x99f   : > { %v4674_v51 = vmul.f32 %v4673_v63, %v4671_v3  ;;  %v10337_v46 = vshrl.u32 %v4446_v33, 30  ;;  %v4819_v12 = vadd.f32 %v4813_v13, %v9925_v45  ;;  %v4767_v49 = vshll.u32 %v10290_v41, %v4765_v11 }
 0x9a0   : > { %v4768_v15 = vshrl.u32 %v4750_v6, %v4766_v38  ;;  %v4771_v8 = vadd.s32 127, %v4770_v24  ;;  %7031 = vcosq.f32 %v4370_v58  ;;  %v4369_v32 = vsel %vm4284_vm14, %v4368_v54, %v10082_v61 }
 0x9a1   : > { %v4448_v16 = vshll.u32 %v10337_v46, 30  ;;  %v10343_v10 = vmul.f32 %v7914_v7, %v4819_v12  ;;  %7033 = vsinq.f32 %v4370_v58  ;;  %v4675_v17 = vxor.u32 2147483648, %v4674_v51 }
 0x9a2   : > { %v4769_v25 = vor.u32 %v4768_v15, %v4767_v49  ;;  %v4772_v40 = vshll.u32 %v4771_v8, 23  ;;  %v4572_v41 = vxor.u32 2147483648, %v4571_v35  ;;  %v4371_v30 = vsel %vm10315_vm0, 0, %v4369_v32 }
 0x9a3   : > { %v4449_v47 = vsub.s32 %v4445_v9, %v4448_v16  ;;  %4846 = vrot.lane.b32.xlu0 %v10343_v10, %s7235_s24  ;;  %vm4593_vm3 = vcmp.lt.s32.totalorder %v9970_v22, 0  ;;  %v4780_v61 = vsub.s32 4, %v10281_v53  ;;  %vm4490_vm15 = vcmp.lt.s32.totalorder %v9955_v23, 0 }
 0x9a4   : > { %v4773_v44 = vor.u32 4788187, %v4772_v40  ;;  %v4776_v52 = vcvt.s32.f32 %v4769_v25  ;;  %v4676_v27 = vsel %vm4593_vm3, %v4675_v17, %v4674_v51  ;;  %v4375_v3 = vand.u32 3, %v4371_v30 }
 0x9a5   : > { %v4451_v19 = vsub.s32 0, %v4449_v47  ;;  %v4573_v9 = vsel %vm4490_vm15, %v4572_v41, %v4571_v35  ;;  %vm4696_vm13 = vcmp.lt.s32.totalorder %v10158_v2, 0  ;;  %v11346_v55 = vand.u32 2147483647, %v10158_v2 }
 0x9a6   : > { %v4774_v5 = vand.u32 2147483647, %v4773_v44  ;;  %v4441_v63 = vadd.s32 %v10296_v1, %v10306_v60  ;;  %v11349_v11 = vand.u32 2147483647, %v9970_v22  ;;  %v4677_v13 = vsub.s32 4, %v10201_v18 }
 0x9a7   : > { %v6328_v20 = vmin.u32 %v4451_v19, %v4449_v47  ;;  %vm10362_vm14 = vcmp.le.f32.partialorder %v11346_v55, 0.7853982  ;;  %v4781_v38 = vsel %vm4696_vm13, %v4780_v61, %v10281_v53  ;;  %v11352_v24 = vand.u32 2147483647, %v9955_v23 }
 0x9a8   : > { %v4777_v50 = vmul.f32 %v4776_v52, %v4774_v5  ;;  %vm10370_vm8 = vcmp.le.f32.partialorder %v11349_v11, 0.7853982  ;;  %vm4377_vm4 = vcmp.eq.s32.totalorder %v4375_v3, 0  ;;  %vm4380_vm7 = vcmp.eq.s32.totalorder %v4375_v3, 2 }
 0x9a9   : > { %v4453_v54 = vclz %v6328_v20  ;;  %vm10380_vm12 = vcmp.le.f32.partialorder %v11352_v24, 0.7853982  ;;  %v4679_v1 = vsel %vm10370_vm8, %v9970_v22, %v4676_v27  ;;  %v4678_v16 = vsel %vm4593_vm3, %v4677_v13, %v10201_v18 }
 0x9aa   : > { %v7032_v58 = vpop.eup %7031  ;;  %v4778_v6 = vxor.u32 2147483648, %v4777_v50  ;;  %7035 = vcosq.f32 %v4679_v1  ;;  %v4576_v40 = vsel %vm10380_vm12, %v9955_v23, %v4573_v9  ;;  %vm4376_vm1 = vcmp.lt.s32.totalorder %v4375_v3, 2 }
 0x9ab   : > { %v7034_v60 = vpop.eup %7033  ;;  %v6329_v51 = vadd.s32 4294967294, %v4453_v54  ;;  %v4381_v12 = vxor.u32 2147483648, %v7032_v58  ;;  %7037 = vsinq.f32 %v4679_v1  ;;  %v4680_v30 = vsel %vm10370_vm8, 0, %v4678_v16 }
 0x9ac   : > { %v4779_v49 = vsel %vm4696_vm13, %v4778_v6, %v4777_v50  ;;  %v4378_v15 = vxor.u32 2147483648, %v7034_v60  ;;  %v4783_v18 = vsel %vm10362_vm14, 0, %v4781_v38  ;;  %vm4374_vm0 = vweird.f32 %v9939_v59 }
 0x9ad   : > { %vm6330_vm6 = vcmp.lt.s32.totalorder %v6329_v51, 0  ;;  %v4782_v53 = vsel %vm10362_vm14, %v10158_v2, %v4779_v49  ;;  %v4382_v8 = vsel %vm4380_vm7, %v4381_v12, %v7034_v60  ;;  %v4684_v9 = vand.u32 3, %v4680_v30 }
 0x9ae   : > { %v4456_v32 = vsel %vm6330_vm6, 0, %v6329_v51  ;;  %7039 = vcosq.f32 %v4782_v53  ;;  %v4379_v25 = vsel %vm4377_vm4, %v7032_v58, %v4378_v15  ;;  %v4787_v50 = vand.u32 3, %v4783_v18 }
 0x9af   : > { %v4457_v17 = vsub.s32 32, %v4456_v32  ;;  %v4461_v41 = vsub.s32 4294967266, %v4456_v32  ;;  %7041 = vsinq.f32 %v4782_v53  ;;  %v4383_v44 = vsel %vm4376_vm1, %v4379_v25, %v4382_v8 }
 0x9b0   : > { %v4458_v19 = vshll.u32 %v4449_v47, %v4456_v32  ;;  %7043 = vcosq.f32 %v4576_v40  ;;  %v4384_v20 = vsel %vm4374_vm0, nan, %v4383_v44  ;;  %v4574_v3 = vsub.s32 4, %v10123_v14  ;;  %v6309_v32 = vld [vmem:[%s11220_s6 + $0x20] sm:$0xff] }
 0x9b1   : > { %v4459_v5 = vshrl.u32 %v4441_v63, %v4457_v17  ;;  %v4462_v52 = vadd.s32 127, %v4461_v41  ;;  %7045 = vsinq.f32 %v4576_v40  ;;  %vm4837_vm2 = vcmask 39936   ;;  %v4811_v40 = vpop.permute.xlu1 %4810 }
 0x9b2   : > { %4838 = vst.msk [vmem:[#allocation2] sm:$0xff] %vm4837_vm2, %v11308_v42  ;;  %4839 = vst.msk [vmem:[#allocation2 + $0x18] sm:$0xff] %vm4837_vm2, %v11308_v42  ;;  %vm4387_vm3 = vcmp.lt.s32.totalorder %v10183_v57, 0  ;;  %vm4786_vm13 = vweird.f32 %v10158_v2  ;;  %v4798_v59 = vsub.f32 1.0, %v4384_v20  ;;  %vm4689_vm14 = vcmp.eq.s32.totalorder %v4684_v9, 2 }
 0x9b3   : > { %v4460_v61 = vor.u32 %v4459_v5, %v4458_v19  ;;  %v4463_v27 = vshll.u32 %v4462_v52, 23  ;;  %vm4792_vm8 = vcmp.eq.s32.totalorder %v4787_v50, 2  ;;  %v4575_v58 = vsel %vm4490_vm15, %v4574_v3, %v10123_v14 }
 0x9b4   : > { %v7036_v55 = vpop.eup %7035  ;;  %vm4686_vm4 = vcmp.eq.s32.totalorder %v4684_v9, 0  ;;  %vm4685_vm7 = vcmp.lt.s32.totalorder %v4684_v9, 2  ;;  %v4814_v12 = vmul.f32 %v10327_v43, %v4798_v59  ;;  %vm4683_vm6 = vweird.f32 %v9970_v22 }
 0x9b5   : > { %v4464_v54 = vor.u32 4788187, %v4463_v27  ;;  %v7038_v47 = vpop.eup %7037  ;;  %v4690_v28 = vxor.u32 2147483648, %v7036_v55  ;;  %v4467_v11 = vcvt.s32.f32 %v4460_v61  ;;  %vm4789_vm1 = vcmp.eq.s32.totalorder %v4787_v50, 0 }
 0x9b6   : > { %v4687_v33 = vxor.u32 2147483648, %v7038_v47  ;;  %vm4788_vm0 = vcmp.lt.s32.totalorder %v4787_v50, 2  ;;  %vm10417_vm15 = vcmp.le.f32.partialorder %v4385_v62, 0.7853982  ;;  %v4471_v41 = vsub.s32 4, %v10337_v46 }
 0x9b7   : > { %v4465_v63 = vand.u32 2147483647, %v4464_v54  ;;  %v4691_v6 = vsel %vm4689_vm14, %v4690_v28, %v7038_v47  ;;  %v4577_v44 = vsel %vm10380_vm12, 0, %v4575_v58  ;;  %v4820_v5 = vadd.f32 %v4814_v12, %v9930_v48 }
 0x9b8   : > { %v7040_v13 = vpop.eup %7039  ;;  %v4688_v60 = vsel %vm4686_vm4, %v7036_v55, %v4687_v33  ;;  %v4581_v61 = vand.u32 3, %v4577_v44  ;;  %v4472_v35 = vsel %vm4387_vm3, %v4471_v41, %v10337_v46  ;;  %vm4580_vm14 = vweird.f32 %v9955_v23 }
 0x9b9   : > { %v7042_v38 = vpop.eup %7041  ;;  %v4468_v24 = vmul.f32 %v4467_v11, %v4465_v63  ;;  %v4793_v1 = vxor.u32 2147483648, %v7040_v13  ;;  %v4692_v49 = vsel %vm4685_vm7, %v4688_v60, %v4691_v6  ;;  %v10437_v50 = vmul.f32 %v7905_v21, %v4820_v5 }
 0x9ba   : > { %v4790_v51 = vxor.u32 2147483648, %v7042_v38  ;;  %v4693_v8 = vsel %vm4683_vm6, nan, %v4692_v49  ;;  %v7044_v16 = vpop.eup %7043  ;;  %v4474_v54 = vsel %vm10417_vm15, 0, %v4472_v35  ;;  %vm4583_vm12 = vcmp.eq.s32.totalorder %v4581_v61, 0 }
 0x9bb   : > { %v4469_v15 = vxor.u32 2147483648, %v4468_v24  ;;  %v4794_v53 = vsel %vm4792_vm8, %v4793_v1, %v7042_v38  ;;  %v4801_v25 = vsub.f32 1.0, %v4693_v8  ;;  %v7046_v30 = vpop.eup %7045  ;;  %v4587_v9 = vxor.u32 2147483648, %v7044_v16  ;;  %v6310_v8 = vld [vmem:[%s11220_s6 + $0x28] sm:$0xff] }
 0x9bc   : > { %v4791_v14 = vsel %vm4789_vm1, %v7040_v13, %v4790_v51  ;;  %v4584_v2 = vxor.u32 2147483648, %v7046_v30  ;;  %v4478_v63 = vand.u32 3, %v4474_v54  ;;  %vm4477_vm6 = vweird.f32 %v10183_v57 }
 0x9bd   : > { %v4470_v17 = vsel %vm4387_vm3, %v4469_v15, %v4468_v24  ;;  %v4795_v22 = vsel %vm4788_vm0, %v4791_v14, %v4794_v53  ;;  %v4817_v52 = vmul.f32 %v4811_v40, %v4801_v25  ;;  %vm4582_vm3 = vcmp.lt.s32.totalorder %v4581_v61, 2 }
 0x9be   : > { %v4796_v19 = vsel %vm4786_vm13, nan, %v4795_v22  ;;  %v4473_v62 = vsel %vm10417_vm15, %v10183_v57, %v4470_v17  ;;  %vm4586_vm13 = vcmp.eq.s32.totalorder %v4581_v61, 2  ;;  %v4585_v59 = vsel %vm4583_vm12, %v7044_v16, %v4584_v2  ;;  %v6312_v17 = vld [vmem:[%s11216_s2 + $0x28] sm:$0xff] }
 0x9bf   : > { %v4802_v18 = vsub.f32 1.0, %v4796_v19  ;;  %7047 = vcosq.f32 %v4473_v62  ;;  %v4823_v27 = vadd.f32 %v4817_v52, %v9960_v0  ;;  %v4588_v28 = vsel %vm4586_vm13, %v4587_v9, %v7046_v30  ;;  %v6311_v30 = vld [vmem:[%s11216_s2 + $0x20] sm:$0xff] }
 0x9c0   : > { %7049 = vsinq.f32 %v4473_v62  ;;  %v4589_v11 = vsel %vm4582_vm3, %v4585_v59, %v4588_v28  ;;  %vm4483_vm8 = vcmp.eq.s32.totalorder %v4478_v63, 2  ;;  %vm4480_vm4 = vcmp.eq.s32.totalorder %v4478_v63, 0 }
 0x9c1   : > { %v4818_v20 = vmul.f32 %v4811_v40, %v4802_v18  ;;  %v10440_v3 = vmul.f32 %v7905_v21, %v4823_v27  ;;  %v4590_v38 = vsel %vm4580_vm14, nan, %v4589_v11  ;;  %vm4479_vm7 = vcmp.lt.s32.totalorder %v4478_v63, 2 }
 0x9c2   : > { %v4800_v51 = vsub.f32 1.0, %v4590_v38  ;;  %v5095_v14 = vadd.f32 1e-09, %v6310_v8  ;;  %v5094_v25 = vadd.f32 1e-09, %v6309_v32  ;;  %v5101_v22 = vadd.f32 %v6310_v8, %v6310_v8 }
 0x9c3   : > { %v4824_v55 = vadd.f32 %v4818_v20, %v10140_v29  ;;  %v6618_v47 = vpack.c.bf16 %v10440_v3, %v10437_v50  ;;  %v5100_v19 = vadd.f32 %v6309_v32, %v6309_v32  ;;  %vm4868_vm1 = vcmask 1047592  }
 0x9c4   : > { %v4816_v15 = vmul.f32 %v4811_v40, %v4800_v51  ;;  %7051 = vrcp.f32 %v5095_v14  ;;  %v10478_v40 = vld [vmem:[%s11215_s1 + $0x20] sm:$0xff]  ;;  %vm11357_vm0 = vcmask 7168   ;;  %vm4900_vm15 = vcmask 154624  }
 0x9c5   : > { %v4830_v46 = vmul.f32 %v7938_v39, %v4824_v55  ;;  %6500 = vmatprep.mubr.msk.f32.mxu1 %vm1141_vm9, %v10478_v40  ;;  %7053 = vrcp.f32 %v5094_v25  ;;  %vm4905_vm12 = vcmask 195736   ;;  %vm4887_vm13 = vcmask 1006592  }
 0x9c6   : > { %v4822_v57 = vadd.f32 %v4816_v15, %v9945_v37 }
 0x9c7   : > { %4856 = vrot.lane.b32.xlu1 %v4830_v46, %s7235_s24  ;;  %4836 = vst.msk [vmem:[#allocation2 + $0x58] sm:$0xff] %vm1037_vm5, %v4830_v46 }
 0x9c9   : > { %v7048_v33 = vpop.eup %7047 }
 0x9ca   : > { %v7050_v13 = vpop.eup %7049  ;;  %v4484_v58 = vxor.u32 2147483648, %v7048_v33 }
 0x9cb   : > { %v4481_v6 = vxor.u32 2147483648, %v7050_v13  ;;  %4848 = vrot.lane.b32.xlu1 %v10437_v50, %s7235_s24 }
 0x9cc   : > { %v4485_v24 = vsel %vm4483_vm8, %v4484_v58, %v7050_v13 }
 0x9cd   : > { %v4482_v1 = vsel %vm4480_vm4, %v7048_v33, %v4481_v6 }
 0x9ce   : > { %v4486_v60 = vsel %vm4479_vm7, %v4482_v1, %v4485_v24  ;;  %v7052_v41 = vpop.eup %7051  ;;  %v4919_v6 = vld [vmem:[#allocation2 + $0x58] sm:$0xff] }
 0x9cf   : > { %v4487_v12 = vsel %vm4477_vm6, nan, %v4486_v60  ;;  %4854 = vrot.lane.b32.xlu1 %v10440_v3, %s7235_s24  ;;  %v5099_v44 = vmul.f32 0.5, %v7052_v41  ;;  %v7054_v62 = vpop.eup %7053 }
 0x9d0   : > { %v4799_v49 = vsub.f32 1.0, %v4487_v12  ;;  %v5097_v5 = vmul.f32 0.5, %v7054_v62 }
 0x9d2   : > { %v4815_v23 = vmul.f32 %v10327_v43, %v4799_v49  ;;  %v10466_v43 = vmul.f32 %v7914_v7, %v4822_v57 }
 0x9d4   : > { %v4821_v53 = vadd.f32 %v4815_v23, %v10169_v36  ;;  %v6620_v32 = vpack.c.bf16 %v10466_v43, %v10343_v10 }
 0x9d6   : > { %v4827_v16 = vmul.f32 %v7938_v39, %v4821_v53 }
 0x9d8   : > { %4833 = vst.msk [vmem:[#allocation2 + $0x40] sm:$0xff] %vm1037_vm5, %v4827_v16  ;;  %4850 = vrot.lane.b32.xlu0 %v4827_v16, %s7235_s24  ;;  %4879 = vrot.lane.b32.xlu1 %v4827_v16, %s7236_s18 }
 0x9dc   : > { %4852 = vrot.lane.b32.xlu0 %v10466_v43, %s7235_s24  ;;  %4885 = vrot.lane.b32.xlu1 %v4830_v46, %s7236_s18  ;;  %s314_s24 = scalar_lea.vmem [#allocation6], %s6177_s29 }
 0x9dd   : > { %s6081_s11 = sshll.u32 %s314_s24, 4  ;;  %s11153_s11 = int_to_ptr.vmem [resolvable:$true] %s6081_s11 }
 0x9de   : > { %s7120_s15 = scalar_lea.vmem %s11153_s11, 512 }
 0x9df   : > { %v4916_v58 = vld [vmem:[#allocation2 + $0x40] sm:$0xff]  ;;  %p7121_p8 = scmp.ne.s32.totalorder %s11153_s11, %s7120_s15 }
 0x9e0   : > { %4877 = vrot.lane.b32.xlu0 %v10437_v50, %s7236_s18  ;;  %4881 = vrot.lane.b32.xlu1 %v10466_v43, %s7236_s18  ;;  %v6630_v51 = vpack.c.bf16 %v4919_v6, %v4916_v58 }
 0x9e1   : > { %p7122_p12 = pnand %p7121_p8, %p11381_p9 }
 0x9e3   : > { %p7123_p0 = pneg %p7122_p12 }
 0x9e4   : > { %4883 = vrot.lane.b32.xlu0 %v10440_v3, %s7236_s18  ;;  %4933 = vperm.xlu1 %6910, %v6312_v17  }
 0x9e8   : > { %4875 = vrot.lane.b32.xlu0 %v10343_v10, %s7236_s18  ;;  %5109 = vperm.xlu1 %6910, %v5101_v22   ;;  %v6316_v22 = vld [vmem:[%s11215_s1 + $0x28] sm:$0xff]  ;;  %s6377_s18 = sshll.u32 %s6078_s12, 7 }
 0x9e9   : > { %s11158_s13 = scalar_lea.hbm %s11221_s7, %s6377_s18 }
 0x9ec   : > { %4928 = vperm.xlu0 %6909, %v6311_v30   ;;  %5749 = vperm.xlu1 %6910, %v5099_v44  }
 0x9f0   : > { %5104 = vperm.xlu0 %6909, %v5100_v19  }
 0x9f4   : > { %5744 = vperm.xlu0 %6909, %v5097_v5  }
 0xa15   : > { %v4847_v52 = vpop.permute.xlu0 %4846 }
 0xa16   : > { %4869 = vst.msk [vmem:[#allocation2] sm:$0xff] %vm4868_vm1, %v4847_v52 }
 0xa1d   : > { %v4908_v18 = vld [vmem:[#allocation2] sm:$0xff] }
 0xa1e   : > { %5776 = vst.msk [vmem:[#allocation2] sm:$0xff] %vm11357_vm0, %v11308_v42 }
 0xa39   : > { %v4857_v61 = vpop.permute.xlu1 %4856 }
 0xa3d   : > { %v4849_v27 = vpop.permute.xlu1 %4848 }
 0xa3e   : > { %v4858_v59 = vsel %vm4837_vm2, %v4847_v52, %v4849_v27 }
 0xa41   : > { %v4855_v20 = vpop.permute.xlu1 %4854 }
 0xa42   : > { %v4861_v35 = vsel %vm4837_vm2, %v4855_v20, %v4857_v61 }
 0xa43   : > { %4874 = vst.msk [vmem:[#allocation2 + $0x28] sm:$0xff] %vm1037_vm5, %v4861_v35 }
 0xa4a   : > { %v4851_v2 = vpop.permute.xlu0 %4850  ;;  %v4880_v9 = vpop.permute.xlu1 %4879  ;;  %v4913_v11 = vld [vmem:[#allocation2 + $0x28] sm:$0xff] }
 0xa4b   : > { %v4859_v55 = vsel %vm4837_vm2, %v4849_v27, %v4851_v2  ;;  %4901 = vst.msk [vmem:[#allocation2 + $0x70] sm:$0xff] %vm4900_vm15, %v4880_v9 }
 0xa4c   : > { %4871 = vst.msk [vmem:[#allocation2 + $0x10] sm:$0xff] %vm1037_vm5, %v4859_v55 }
 0xa4d   : > { %4906 = vst.msk [vmem:[#allocation2 + $0x70] sm:$0xff] %vm4905_vm12, %v11308_v42 }
 0xa4e   : > { %v4853_v54 = vpop.permute.xlu0 %4852  ;;  %v4886_v46 = vpop.permute.xlu1 %4885 }
 0xa4f   : > { %4872 = vst.msk [vmem:[#allocation2 + $0x18] sm:$0xff] %vm4868_vm1, %v4853_v54  ;;  %v4860_v28 = vsel %vm4837_vm2, %v4853_v54, %v4855_v20  ;;  %vm11358_vm2 = vmmov %vm11357_vm0 }
 0xa50   : > { %4904 = vst.msk [vmem:[#allocation2 + $0x88] sm:$0xff] %vm4900_vm15, %v4886_v46  ;;  %v6614_v63 = vpack.c.bf16 %v4860_v28, %v4858_v59 }
 0xa51   : > { %4907 = vst.msk [vmem:[#allocation2 + $0x88] sm:$0xff] %vm4905_vm12, %v11308_v42 }
 0xa52   : > { %v4878_v33 = vpop.permute.xlu0 %4877  ;;  %6615 = vmatprep.subr.bf16.mxu0 %v6614_v63  ;;  %v4882_v49 = vpop.permute.xlu1 %4881 }
 0xa53   : > { %v4910_v13 = vld [vmem:[#allocation2 + $0x10] sm:$0xff]  ;;  %v4889_v8 = vsel %vm4887_vm13, %v4878_v33, %v4880_v9 }
 0xa54   : > { %v6626_v38 = vpack.c.bf16 %v4913_v11, %v4910_v13  ;;  %v4922_v24 = vld [vmem:[#allocation2 + $0x70] sm:$0xff] }
 0xa56   : > { %v4884_v1 = vpop.permute.xlu0 %4883  ;;  %6627 = vmatprep.subr.bf16.mxu1 %v6626_v38  ;;  %v4911_v60 = vld [vmem:[#allocation2 + $0x18] sm:$0xff] }
 0xa57   : > { %v4891_v12 = vsel %vm4887_vm13, %v4884_v1, %v4886_v46  ;;  %v6616_v23 = vpack.c.bf16 %v4911_v60, %v4908_v18  ;;  %5777 = vst.msk [vmem:[#allocation2 + $0x18] sm:$0xff] %vm11358_vm2, %v11308_v42  ;;  %6629 = vmatpush3.bf16.msra.mxu1 %v6626_v38  ;;  %v4890_v57 = vsel %vm4887_vm13, %v4882_v49, %v4884_v1 }
 0xa58   : > { %v4925_v15 = vld [vmem:[#allocation2 + $0x88] sm:$0xff]  ;;  %6631 = vmatprep.subr.bf16.mxu1 %v6630_v51  ;;  %v6622_v14 = vpack.c.bf16 %v4891_v12, %v4889_v8 }
 0xa59   : > { %v6634_v53 = vpack.c.bf16 %v4925_v15, %v4922_v24  ;;  %6617 = vmatpush1.bf16.msra.mxu0 %v6616_v23 }
 0xa5a   : > { %v4876_v16 = vpop.permute.xlu0 %4875  ;;  %6619 = vmatprep.subr.bf16.mxu0 %v6618_v47 }
 0xa5b   : > { %6633 = vmatpush3.bf16.msra.mxu1 %v6630_v51  ;;  %v4888_v25 = vsel %vm4887_vm13, %v4876_v16, %v4878_v33 }
 0xa5c   : > { %6635 = vmatprep.subr.bf16.mxu1 %v6634_v53  ;;  %v6624_v17 = vpack.c.bf16 %v4890_v57, %v4888_v25 }
 0xa5d   : > { %6621 = vmatpush1.bf16.msra.mxu0 %v6620_v32 }
 0xa5e   : > { %6623 = vmatprep.subr.bf16.mxu0 %v6622_v14 }
 0xa5f   : > { %6637 = vmatpush3.bf16.msra.mxu1 %v6634_v53 }
 0xa61   : > { %6625 = vmatpush1.bf16.msra.mxu0 %v6624_v17 }
 0xa62   : > { %6501 = vmatmul.mubr.msk.f32.vlgmr.msra.gmra.mrb[8].mxu1 %vm1141_vm9, %v6316_v22 }
 0xa63   : > { %v10522_v10 = vpop.permute.xlu1 %4933 }
 0xa64   : > { %6343 = vmatmul.mubr.msk.f32.vlgmr.msra.gmra.mrb[16].mxu0 %vm1141_vm9, %v10478_v40 }
 0xa65   : > { %5012 = vmatprep.mubr.f32.mxu0 %v11308_v42 }
 0xa67   : > { %v10527_v41 = vpop.permute.xlu1 %5109 }
 0xa68   : > { %6344 = vmatmul.mubr.msk.f32.gmra.mrb[18].mxu0 %vm1141_vm9, %v6316_v22  ;;  %v11359_v22 = vmov 2475754826  }
 0xa69   : > { %5940 = vmatprep.mubr.f32.mxu0 %v11308_v42 }
 0xa6b   : > { %v4929_v50 = vpop.permute.xlu0 %4928 }
 0xa6f   : > { %v5105_v40 = vpop.permute.xlu0 %5104 }
 0xb35   : > { %v6502_v3 = vpop.f32.mrb[8].mxu1 }
 0xb36   : > { %v10525_v47 = vadd.f32 %v6502_v3, %v10522_v10  ;;  %v5085_v43 = vpop.f32.mrb[9].mxu1 }
 0xb37   : > { %v10529_v44 = vadd.f32 %v5085_v43, %v4929_v50  ;;  %v5008_v30 = vpop.f32.mrb[16].mxu0 }
 0xb38   : > { %v10533_v19 = vmul.f32 %v10527_v41, %v10525_v47  ;;  %v10535_v62 = vadd.f32 %v5008_v30, %v4929_v50  ;;  %v5010_v5 = vpop.f32.mrb[17].mxu0 }
 0xb39   : > { %v10538_v52 = vmul.f32 %v5105_v40, %v10529_v44  ;;  %v10556_v58 = vadd.f32 %v5010_v5, %v4929_v50 }
 0xb3a   : > { %v5633_v18 = vand.u32 2147483647, %v10533_v19  ;;  %v5636_v61 = vand.u32 2139095040, %v10533_v19  ;;  %v10549_v55 = vmul.f32 %v5105_v40, %v10535_v62 }
 0xb3b   : > { %v5324_v27 = vand.u32 2147483647, %v10538_v52  ;;  %v5327_v20 = vand.u32 2139095040, %v10538_v52  ;;  %v10544_v35 = vpop.f32.mrb[18].mxu0  ;;  %v10560_v15 = vmul.f32 %v5105_v40, %v10556_v58 }
 0xb3c   : > { %v5637_v2 = vshrl.u32 %v5636_v61, 23  ;;  %v5640_v9 = vand.u32 8388607, %v5633_v18  ;;  %v10551_v54 = vpop.f32.mrb[19].mxu0  ;;  %v5121_v11 = vand.u32 2139095040, %v10549_v55 }
 0xb3d   : > { %v5328_v46 = vshrl.u32 %v5327_v20, 23  ;;  %v5331_v59 = vand.u32 8388607, %v5324_v27  ;;  %v5118_v24 = vand.u32 2147483647, %v10549_v55 }
 0xb3e   : > { %v6367_v28 = vadd.s32 4294967169, %v5637_v2  ;;  %v5641_v33 = vor.u32 8388608, %v5640_v9  ;;  %v5122_v1 = vshrl.u32 %v5121_v11, 23 }
 0xb3f   : > { %v6355_v63 = vadd.s32 4294967169, %v5328_v46  ;;  %v5332_v6 = vor.u32 8388608, %v5331_v59  ;;  %v10570_v57 = vand.u32 8388607, %v5118_v24 }
 0xb40   : > { %v5643_v13 = vadd.s32 1, %v6367_v28  ;;  %v6347_v51 = vadd.s32 4294967169, %v5122_v1  ;;  %v10562_v53 = vshll.u32 %v5641_v33, 8 }
 0xb41   : > { %v5334_v38 = vadd.s32 1, %v6355_v63  ;;  %v10566_v16 = vshll.u32 %v5332_v6, 8 }
 0xb42   : > { %vm5644_vm3 = vcmp.gt.s32.totalorder %v5643_v13, 0  ;;  %v10573_v17 = vadd.s32 1, %v6347_v51 }
 0xb43   : > { %v5645_v60 = vsel %vm5644_vm3, %v5643_v13, 0  ;;  %vm5335_vm14 = vcmp.gt.s32.totalorder %v5334_v38, 0 }
 0xb44   : > { %v5646_v12 = vshrl.u32 %v5645_v60, 5  ;;  %v5647_v49 = vand.u32 31, %v5645_v60  ;;  %v5336_v23 = vsel %vm5335_vm14, %v5334_v38, 0  ;;  %vm5129_vm2 = vcmp.gt.s32.totalorder %v10573_v17, 0 }
 0xb45   : > { %v10564_v8 = vshrl.u32 %v5336_v23, 5  ;;  %v5338_v25 = vand.u32 31, %v5336_v23  ;;  %vm5635_vm14 = vcmp.lt.s32.totalorder %v10533_v19, 0 }
 0xb46   : > { %v5648_v14 = vsub.s32 32, %v5647_v49  ;;  %v5650_v32 = vshll.u32 %v7224_v56, %v5647_v49  ;;  %v5653_v50 = vshll.u32 %v11359_v22, %v5647_v49  ;;  %v5656_v3 = vshll.u32 %v11319_v31, %v5647_v49 }
 0xb47   : > { %v5659_v43 = vshll.u32 %v11340_v4, %v5647_v49  ;;  %v5662_v30 = vshll.u32 %v11341_v34, %v5647_v49  ;;  %vm5665_vm8 = vcmp.lt.s32.totalorder %v5646_v12, 1  ;;  %vm5666_vm4 = vcmp.lt.s32.totalorder %v5646_v12, 2 }
 0xb48   : > { %v5651_v40 = vshrl.u32 %v11359_v22, %v5648_v14  ;;  %v5654_v5 = vshrl.u32 %v11319_v31, %v5648_v14  ;;  %v5657_v61 = vshrl.u32 %v11340_v4, %v5648_v14  ;;  %v5649_v20 = vshrl.u32 %v7224_v56, %v5648_v14 }
 0xb49   : > { %v5660_v2 = vshrl.u32 %v11341_v34, %v5648_v14  ;;  %v5663_v9 = vshrl.u32 %v11342_v26, %v5648_v14  ;;  %v5339_v63 = vsub.s32 32, %v5338_v25  ;;  %vm5667_vm7 = vcmp.lt.s32.totalorder %v5646_v12, 3 }
 0xb4a   : > { %v5652_v46 = vor.u32 %v5651_v40, %v5650_v32  ;;  %v5655_v59 = vor.u32 %v5654_v5, %v5653_v50  ;;  %v5658_v28 = vor.u32 %v5657_v61, %v5656_v3  ;;  %vm5668_vm6 = vcmp.lt.s32.totalorder %v5646_v12, 4 }
 0xb4b   : > { %v5661_v11 = vor.u32 %v5660_v2, %v5659_v43  ;;  %v5664_v33 = vor.u32 %v5663_v9, %v5662_v30  ;;  %v5341_v23 = vshll.u32 %v7224_v56, %v5338_v25  ;;  %v5342_v50 = vshrl.u32 %v11359_v22, %v5339_v63 }
 0xb4c   : > { %v5669_v13 = vsel %vm5665_vm8, %v5649_v20, %v5652_v46  ;;  %v5670_v6 = vsel %vm5668_vm6, %v5658_v28, 2102212464  ;;  %v5673_v38 = vsel %vm5665_vm8, %v5652_v46, %v5655_v59  ;;  %v5677_v1 = vsel %vm5665_vm8, %v5655_v59, %v5658_v28 }
 0xb4d   : > { %v5671_v60 = vsel %vm5667_vm7, %v5655_v59, %v5670_v6  ;;  %v5674_v51 = vsel %vm5668_vm6, %v5661_v11, 920167782  ;;  %v5678_v49 = vsel %vm5668_vm6, %v5664_v33, 1326507024  ;;  %v5344_v3 = vshll.u32 %v11359_v22, %v5338_v25 }
 0xb4e   : > { %v5675_v14 = vsel %vm5667_vm7, %v5658_v28, %v5674_v51  ;;  %v5679_v32 = vsel %vm5667_vm7, %v5661_v11, %v5678_v49  ;;  %v5672_v43 = vsel %vm5666_vm4, %v5669_v13, %v5671_v60  ;;  %v5345_v5 = vshrl.u32 %v11319_v31, %v5339_v63 }
 0xb4f   : > { %v5676_v30 = vsel %vm5666_vm4, %v5673_v38, %v5675_v14  ;;  %v5680_v40 = vsel %vm5666_vm4, %v5677_v1, %v5679_v32  ;;  %v5343_v46 = vor.u32 %v5342_v50, %v5341_v23  ;;  %v5347_v28 = vshll.u32 %v11319_v31, %v5338_v25 }
 0xb50   : > { %v10596_v61 = vmul.u32.u64.low %v10562_v53, %v5680_v40  ;;  %v10597_v20 = vmul.u32.u64.high %v10562_v53, %v5680_v40, %v10596_v61  ;;  %v10600_v2 = vmul.u32.u64.low %v10562_v53, %v5676_v30  ;;  %v10601_v9 = vmul.u32.u64.high %v10562_v53, %v5676_v30, %v10600_v2 }
 0xb51   : > { %v5346_v59 = vor.u32 %v5345_v5, %v5344_v3  ;;  %v5348_v11 = vshrl.u32 %v11340_v4, %v5339_v63  ;;  %v5340_v33 = vshrl.u32 %v7224_v56, %v5339_v63  ;;  %v5350_v12 = vshll.u32 %v11340_v4, %v5338_v25 }
 0xb52   : > { %v5351_v13 = vshrl.u32 %v11341_v34, %v5339_v63  ;;  %v5354_v6 = vshrl.u32 %v11342_v26, %v5339_v63  ;;  %v5688_v38 = vmul.u32 %v10562_v53, %v5672_v43  ;;  %v5353_v60 = vshll.u32 %v11341_v34, %v5338_v25 }
 0xb53   : > { %v5349_v1 = vor.u32 %v5348_v11, %v5347_v28  ;;  %vm5356_vm1 = vcmp.lt.s32.totalorder %v10564_v8, 1  ;;  %vm5690_vm0 = vc.u32 %v10597_v20, %v10600_v2  ;;  %v5691_v51 = vadd.s32 1, %v10601_v9 }
 0xb54   : > { %v5352_v49 = vor.u32 %v5351_v13, %v5350_v12  ;;  %vm5357_vm15 = vcmp.lt.s32.totalorder %v10564_v8, 2  ;;  %v5355_v23 = vor.u32 %v5354_v6, %v5353_v60  ;;  %vm5358_vm12 = vcmp.lt.s32.totalorder %v10564_v8, 3 }
 0xb55   : > { %vm5359_vm13 = vcmp.lt.s32.totalorder %v10564_v8, 4  ;;  %v5364_v63 = vsel %vm5356_vm1, %v5343_v46, %v5346_v59  ;;  %v5692_v53 = vsel %vm5690_vm0, %v5691_v51, %v10601_v9  ;;  %v5368_v25 = vsel %vm5356_vm1, %v5346_v59, %v5349_v1 }
 0xb56   : > { %v5361_v14 = vsel %vm5359_vm13, %v5349_v1, 2102212464  ;;  %v5365_v32 = vsel %vm5359_vm13, %v5352_v49, 920167782  ;;  %v5693_v50 = vadd.s32 %v5692_v53, %v5688_v38  ;;  %v5360_v3 = vsel %vm5356_vm1, %v5340_v33, %v5343_v46 }
 0xb57   : > { %v5366_v43 = vsel %vm5358_vm12, %v5349_v1, %v5365_v32  ;;  %v5369_v30 = vsel %vm5359_vm13, %v5355_v23, 1326507024  ;;  %v5362_v40 = vsel %vm5358_vm12, %v5346_v59, %v5361_v14  ;;  %v5130_v59 = vsel %vm5129_vm2, %v10573_v17, 0 }
 0xb58   : > { %v5367_v5 = vsel %vm5357_vm15, %v5364_v63, %v5366_v43  ;;  %v5370_v61 = vsel %vm5358_vm12, %v5352_v49, %v5369_v30  ;;  %v5694_v28 = vadd.s32 536870912, %v5693_v50  ;;  %v5224_v33 = vand.u32 2139095040, %v10560_v15 }
 0xb59   : > { %v5371_v11 = vsel %vm5357_vm15, %v5368_v25, %v5370_v61  ;;  %v10624_v9 = vmul.u32.u64.low %v10566_v16, %v5367_v5  ;;  %v10625_v12 = vmul.u32.u64.high %v10566_v16, %v5367_v5, %v10624_v9  ;;  %v5363_v38 = vsel %vm5357_vm15, %v5360_v3, %v5362_v40 }
 0xb5a   : > { %v10628_v13 = vmul.u32.u64.low %v10566_v16, %v5371_v11  ;;  %v10629_v46 = vmul.u32.u64.high %v10566_v16, %v5371_v11, %v10628_v13  ;;  %v10633_v6 = vshrl.u32 %v5694_v28, 30  ;;  %v5132_v1 = vand.u32 31, %v5130_v59 }
 0xb5b   : > { %v5382_v51 = vadd.s32 1, %v10625_v12  ;;  %v5126_v49 = vor.u32 8388608, %v10570_v57  ;;  %v5379_v63 = vmul.u32 %v10566_v16, %v5363_v38  ;;  %v5225_v17 = vshrl.u32 %v5224_v33, 23 }
 0xb5c   : > { %v5696_v60 = vshll.u32 %v10633_v6, 30  ;;  %v5133_v23 = vsub.s32 32, %v5132_v1  ;;  %vm5381_vm3 = vc.u32 %v10629_v46, %v10624_v9  ;;  %v11253_v8 = vand.u32 2147483647, %v10560_v15 }
 0xb5d   : > { %v5383_v14 = vsel %vm5381_vm3, %v5382_v51, %v10625_v12  ;;  %v5689_v25 = vadd.s32 %v10600_v2, %v10597_v20  ;;  %v10649_v57 = vshll.u32 %v5126_v49, 8  ;;  %v10651_v16 = vshrl.u32 %v5130_v59, 5 }
 0xb5e   : > { %v10642_v53 = vsub.s32 %v5693_v50, %v5696_v60  ;;  %v5384_v32 = vadd.s32 %v5383_v14, %v5379_v63  ;;  %v5136_v43 = vshrl.u32 %v11359_v22, %v5133_v23  ;;  %v5139_v40 = vshrl.u32 %v11319_v31, %v5133_v23 }
 0xb5f   : > { %v6351_v50 = vadd.s32 4294967169, %v5225_v17  ;;  %v5135_v61 = vshll.u32 %v7224_v56, %v5132_v1  ;;  %v5142_v28 = vshrl.u32 %v11340_v4, %v5133_v23  ;;  %v10659_v20 = vand.u32 8388607, %v11253_v8 }
 0xb60   : > { %v5699_v3 = vsub.s32 0, %v10642_v53  ;;  %v5385_v30 = vadd.s32 536870912, %v5384_v32  ;;  %v5138_v11 = vshll.u32 %v11359_v22, %v5132_v1  ;;  %v5144_v12 = vshll.u32 %v11340_v4, %v5132_v1 }
 0xb61   : > { %v5145_v13 = vshrl.u32 %v11341_v34, %v5133_v23  ;;  %v5137_v33 = vor.u32 %v5136_v43, %v5135_v61  ;;  %v5141_v38 = vshll.u32 %v11319_v31, %v5132_v1  ;;  %v10669_v60 = vadd.f32 %v10544_v35, %v10522_v10 }
 0xb62   : > { %v6368_v5 = vmin.u32 %v5699_v3, %v10642_v53  ;;  %v10661_v2 = vshrl.u32 %v5385_v30, 30  ;;  %v5140_v49 = vor.u32 %v5139_v40, %v5138_v11  ;;  %v5148_v17 = vshrl.u32 %v11342_v26, %v5133_v23 }
 0xb63   : > { %v5146_v63 = vor.u32 %v5145_v13, %v5144_v12  ;;  %v5719_v3 = vsub.s32 4, %v10633_v6  ;;  %v10675_v30 = vadd.s32 %v10624_v9, %v10629_v46  ;;  %v5134_v35 = vshrl.u32 %v7224_v56, %v5133_v23 }
 0xb64   : > { %v5701_v59 = vclz %v6368_v5  ;;  %v5387_v51 = vshll.u32 %v10661_v2, 30  ;;  %v5143_v5 = vor.u32 %v5142_v28, %v5141_v38  ;;  %v5147_v61 = vshll.u32 %v11341_v34, %v5132_v1 }
 0xb65   : > { %vm5153_vm8 = vcmp.lt.s32.totalorder %v10651_v16, 4  ;;  %vm5150_vm7 = vcmp.lt.s32.totalorder %v10651_v16, 1  ;;  %vm5152_vm6 = vcmp.lt.s32.totalorder %v10651_v16, 3  ;;  %vm10692_vm1 = vcmp.le.f32.partialorder %v5633_v18, 0.7853982 }
 0xb66   : > { %v6369_v14 = vadd.s32 4294967294, %v5701_v59  ;;  %v10678_v43 = vsub.s32 %v5384_v32, %v5387_v51  ;;  %v5159_v9 = vsel %vm5153_vm8, %v5146_v63, 920167782  ;;  %v5149_v28 = vor.u32 %v5148_v17, %v5147_v61 }
 0xb67   : > { %v5158_v32 = vsel %vm5150_vm7, %v5137_v33, %v5140_v49  ;;  %vm5326_vm0 = vcmp.lt.s32.totalorder %v10538_v52, 0  ;;  %vm5151_vm15 = vcmp.lt.s32.totalorder %v10651_v16, 2  ;;  %v5160_v12 = vsel %vm5152_vm6, %v5143_v5, %v5159_v9 }
 0xb68   : > { %vm6370_vm4 = vcmp.lt.s32.totalorder %v6369_v14, 0  ;;  %v5390_v40 = vsub.s32 0, %v10678_v43  ;;  %v5154_v38 = vsel %vm5150_vm7, %v5134_v35, %v5137_v33  ;;  %v5155_v18 = vsel %vm5153_vm8, %v5143_v5, 2102212464 }
 0xb69   : > { %v5704_v46 = vsel %vm6370_vm4, 0, %v6369_v14  ;;  %v5161_v14 = vsel %vm5151_vm15, %v5158_v32, %v5160_v12  ;;  %v5162_v61 = vsel %vm5150_vm7, %v5140_v49, %v5143_v5  ;;  %vm10719_vm12 = vcmp.le.f32.partialorder %v5324_v27, 0.7853982 }
 0xb6a   : > { %v5705_v23 = vsub.s32 32, %v5704_v46  ;;  %v5709_v11 = vsub.s32 4294967266, %v5704_v46  ;;  %v5706_v13 = vshll.u32 %v10642_v53, %v5704_v46  ;;  %v6356_v59 = vmin.u32 %v5390_v40, %v10678_v43 }
 0xb6b   : > { %v5163_v53 = vsel %vm5153_vm8, %v5149_v28, 1326507024  ;;  %v10713_v9 = vmul.u32.u64.low %v10649_v57, %v5161_v14  ;;  %v10714_v46 = vmul.u32.u64.high %v10649_v57, %v5161_v14, %v10713_v9  ;;  %v5156_v5 = vsel %vm5152_vm6, %v5140_v49, %v5155_v18 }
 0xb6c   : > { %v5707_v51 = vshrl.u32 %v5689_v25, %v5705_v23  ;;  %v5710_v17 = vadd.s32 127, %v5709_v11  ;;  %v5392_v8 = vclz %v6356_v59  ;;  %v5164_v40 = vsel %vm5152_vm6, %v5146_v63, %v5163_v53 }
 0xb6d   : > { %v5410_v32 = vsub.s32 4, %v10661_v2  ;;  %v5165_v23 = vsel %vm5151_vm15, %v5162_v61, %v5164_v40  ;;  %v5231_v11 = vadd.s32 1, %v6351_v50  ;;  %v5720_v27 = vsel %vm5635_vm14, %v5719_v3, %v10633_v6 }
 0xb6e   : > { %v5708_v33 = vor.u32 %v5707_v51, %v5706_v13  ;;  %v5711_v35 = vshll.u32 %v5710_v17, 23  ;;  %v6357_v28 = vadd.s32 4294967294, %v5392_v8  ;;  %v5157_v49 = vsel %vm5151_vm15, %v5154_v38, %v5156_v5 }
 0xb6f   : > { %v10734_v13 = vmul.u32.u64.low %v10649_v57, %v5165_v23  ;;  %v10735_v59 = vmul.u32.u64.high %v10649_v57, %v5165_v23, %v10734_v13  ;;  %v5176_v8 = vadd.s32 1, %v10714_v46  ;;  %vm5232_vm2 = vcmp.gt.s32.totalorder %v5231_v11, 0 }
 0xb70   : > { %v5712_v12 = vor.u32 4788187, %v5711_v35  ;;  %vm6358_vm13 = vcmp.lt.s32.totalorder %v6357_v28, 0  ;;  %v5715_v18 = vcvt.s32.f32 %v5708_v33  ;;  %v5233_v50 = vsel %vm5232_vm2, %v5231_v11, 0 }
 0xb71   : > { %v5395_v51 = vsel %vm6358_vm13, 0, %v6357_v28  ;;  %v5722_v17 = vsel %vm10692_vm1, 0, %v5720_v27  ;;  %v5411_v3 = vsel %vm5326_vm0, %v5410_v32, %v10661_v2  ;;  %v5173_v16 = vmul.u32 %v10649_v57, %v5157_v49 }
 0xb72   : > { %v5713_v63 = vand.u32 2147483647, %v5712_v12  ;;  %v5396_v14 = vsub.s32 32, %v5395_v51  ;;  %v5400_v6 = vsub.s32 4294967266, %v5395_v51  ;;  %vm5175_vm3 = vc.u32 %v10735_v59, %v10713_v9 }
 0xb73   : > { %v5235_v38 = vand.u32 31, %v5233_v50  ;;  %v5397_v53 = vshll.u32 %v10678_v43, %v5395_v51  ;;  %v5177_v5 = vsel %vm5175_vm3, %v5176_v8, %v10714_v46  ;;  %v10751_v28 = vand.u32 3, %v5722_v17 }
 0xb74   : > { %v5716_v61 = vmul.f32 %v5715_v18, %v5713_v63  ;;  %v5398_v33 = vshrl.u32 %v10675_v30, %v5396_v14  ;;  %v5401_v35 = vadd.s32 127, %v5400_v6  ;;  %v5178_v23 = vadd.s32 %v5177_v5, %v5173_v16 }
 0xb75   : > { %v5236_v11 = vsub.s32 32, %v5235_v38  ;;  %v5413_v57 = vsel %vm10719_vm12, 0, %v5411_v3  ;;  %v5229_v12 = vor.u32 8388608, %v10659_v20  ;;  %v10758_v30 = vshrl.u32 %v5233_v50, 5 }
 0xb76   : > { %v5717_v40 = vxor.u32 2147483648, %v5716_v61  ;;  %v5399_v2 = vor.u32 %v5398_v33, %v5397_v53  ;;  %v5402_v32 = vshll.u32 %v5401_v35, 23  ;;  %v5179_v27 = vadd.s32 536870912, %v5178_v23 }
 0xb77   : > { %v5238_v46 = vshll.u32 %v7224_v56, %v5235_v38  ;;  %v5239_v8 = vshrl.u32 %v11359_v22, %v5236_v11  ;;  %v5242_v63 = vshrl.u32 %v11319_v31, %v5236_v11  ;;  %v5244_v20 = vshll.u32 %v11319_v31, %v5235_v38 }
 0xb78   : > { %v5718_v43 = vsel %vm5635_vm14, %v5717_v40, %v5716_v61  ;;  %v5403_v49 = vor.u32 4788187, %v5402_v32  ;;  %v10766_v18 = vshrl.u32 %v5179_v27, 30  ;;  %v5245_v51 = vshrl.u32 %v11340_v4, %v5236_v11 }
 0xb79   : > { %v5721_v13 = vsel %vm10692_vm1, %v10533_v19, %v5718_v43  ;;  %v5406_v17 = vcvt.s32.f32 %v5399_v2  ;;  %v5241_v14 = vshll.u32 %v11359_v22, %v5235_v38  ;;  %v5247_v3 = vshll.u32 %v11340_v4, %v5235_v38 }
 0xb7a   : > { %7055 = vcosq.f32 %v5721_v13  ;;  %v5404_v50 = vand.u32 2147483647, %v5403_v49  ;;  %v5181_v1 = vshll.u32 %v10766_v18, 30  ;;  %v5246_v6 = vor.u32 %v5245_v51, %v5244_v20 }
 0xb7b   : > { %7057 = vsinq.f32 %v5721_v13  ;;  %v5248_v61 = vshrl.u32 %v11341_v34, %v5236_v11  ;;  %v5240_v53 = vor.u32 %v5239_v8, %v5238_v46  ;;  %v5243_v33 = vor.u32 %v5242_v63, %v5241_v14 }
 0xb7c   : > { %v5407_v16 = vmul.f32 %v5406_v17, %v5404_v50  ;;  %v5251_v35 = vshrl.u32 %v11342_v26, %v5236_v11  ;;  %v10775_v5 = vand.u32 3, %v5413_v57  ;;  %v10777_v40 = vsub.s32 %v5178_v23, %v5181_v1 }
 0xb7d   : > { %v5249_v32 = vor.u32 %v5248_v61, %v5247_v3  ;;  %v10781_v2 = vadd.f32 %v10551_v54, %v10522_v10  ;;  %vm5728_vm14 = vcmp.eq.s32.totalorder %v10751_v28, 0  ;;  %v5250_v27 = vshll.u32 %v11341_v34, %v5235_v38 }
 0xb7e   : > { %v5408_v43 = vxor.u32 2147483648, %v5407_v16  ;;  %vm5256_vm8 = vcmp.lt.s32.totalorder %v10758_v30, 4  ;;  %v10786_v46 = vshll.u32 %v5229_v12, 8  ;;  %vm5727_vm4 = vcmp.lt.s32.totalorder %v10751_v28, 2 }
 0xb7f   : > { %v5184_v57 = vsub.s32 0, %v10777_v40  ;;  %v5237_v23 = vshrl.u32 %v7224_v56, %v5236_v11  ;;  %vm5253_vm7 = vcmp.lt.s32.totalorder %v10758_v30, 1  ;;  %v5258_v10 = vsel %vm5256_vm8, %v5246_v6, 2102212464 }
 0xb80   : > { %vm5725_vm6 = vweird.f32 %v10533_v19  ;;  %v5409_v54 = vsel %vm5326_vm0, %v5408_v43, %v5407_v16  ;;  %v5252_v38 = vor.u32 %v5251_v35, %v5250_v27  ;;  %v5261_v12 = vsel %vm5253_vm7, %v5240_v53, %v5243_v33 }
 0xb81   : > { %v5262_v13 = vsel %vm5256_vm8, %v5249_v32, 920167782  ;;  %v5412_v11 = vsel %vm10719_vm12, %v10538_v52, %v5409_v54  ;;  %v6348_v49 = vmin.u32 %v5184_v57, %v10777_v40  ;;  %vm5254_vm1 = vcmp.lt.s32.totalorder %v10758_v30, 2 }
 0xb82   : > { %vm5255_vm15 = vcmp.lt.s32.totalorder %v10758_v30, 3  ;;  %7059 = vcosq.f32 %v5412_v11  ;;  %v5257_v8 = vsel %vm5253_vm7, %v5237_v23, %v5240_v53  ;;  %v5265_v17 = vsel %vm5253_vm7, %v5243_v33, %v5246_v6 }
 0xb83   : > { %v5259_v63 = vsel %vm5255_vm15, %v5243_v33, %v5258_v10  ;;  %v5263_v20 = vsel %vm5255_vm15, %v5246_v6, %v5262_v13  ;;  %7061 = vsinq.f32 %v5412_v11  ;;  %v5186_v25 = vclz %v6348_v49 }
 0xb84   : > { %v7056_v51 = vpop.eup %7055  ;;  %v5264_v50 = vsel %vm5254_vm1, %v5261_v12, %v5263_v20  ;;  %v5266_v3 = vsel %vm5256_vm8, %v5252_v38, 1326507024  ;;  %vm5731_vm0 = vcmp.eq.s32.totalorder %v10751_v28, 2  ;;  %vm5120_vm12 = vcmp.lt.s32.totalorder %v10549_v55, 0 }
 0xb85   : > { %v7058_v14 = vpop.eup %7057  ;;  %v5732_v1 = vxor.u32 2147483648, %v7056_v51  ;;  %v10820_v61 = vmul.u32.u64.low %v10786_v46, %v5264_v50  ;;  %v10821_v16 = vmul.u32.u64.high %v10786_v46, %v5264_v50, %v10820_v61  ;;  %v6349_v35 = vadd.s32 4294967294, %v5186_v25 }
 0xb86   : > { %v5729_v53 = vxor.u32 2147483648, %v7058_v14  ;;  %v5267_v43 = vsel %vm5255_vm15, %v5249_v32, %v5266_v3  ;;  %v5260_v33 = vsel %vm5254_vm1, %v5257_v8, %v5259_v63  ;;  %v10834_v57 = vmul.f32 %v10527_v41, %v10669_v60 }
 0xb87   : > { %v5733_v6 = vsel %vm5731_vm0, %v5732_v1, %v7058_v14  ;;  %v5268_v27 = vsel %vm5254_vm1, %v5265_v17, %v5267_v43  ;;  %vm5419_vm13 = vcmp.eq.s32.totalorder %v10775_v5, 0  ;;  %vm6350_vm2 = vcmp.lt.s32.totalorder %v6349_v35, 0 }
 0xb88   : > { %v5730_v23 = vsel %vm5728_vm14, %v7056_v51, %v5729_v53  ;;  %v10840_v10 = vmul.u32.u64.low %v10786_v46, %v5268_v27  ;;  %v10841_v32 = vmul.u32.u64.high %v10786_v46, %v5268_v27, %v10840_v10  ;;  %vm5418_vm3 = vcmp.lt.s32.totalorder %v10775_v5, 2 }
 0xb89   : > { %v5734_v54 = vsel %vm5727_vm4, %v5730_v23, %v5733_v6  ;;  %v5174_v30 = vadd.s32 %v10713_v9, %v10735_v59  ;;  %v5189_v38 = vsel %vm6350_vm2, 0, %v6349_v35  ;;  %v5279_v12 = vadd.s32 1, %v10821_v16  ;;  %v10856_v9 = vpop.permute.xlu1 %5749 }
 0xb8a   : > { %v5735_v13 = vsel %vm5725_vm6, nan, %v5734_v54  ;;  %vm5416_vm14 = vweird.f32 %v10538_v52  ;;  %v5190_v11 = vsub.s32 32, %v5189_v38  ;;  %v5194_v49 = vsub.s32 4294967266, %v5189_v38 }
 0xb8b   : > { %v5204_v8 = vsub.s32 4, %v10766_v18  ;;  %v5741_v63 = vsub.f32 1.0, %v5735_v13  ;;  %v5276_v28 = vmul.u32 %v10786_v46, %v5260_v33  ;;  %v5427_v20 = vand.u32 2147483647, %v10834_v57 }
 0xb8c   : > { %v5430_v51 = vand.u32 2139095040, %v10834_v57  ;;  %v5191_v59 = vshll.u32 %v10777_v40, %v5189_v38  ;;  %v5192_v25 = vshrl.u32 %v5174_v30, %v5190_v11  ;;  %v5195_v19 = vadd.s32 127, %v5194_v49  ;;  %v7060_v50 = vpop.eup %7059 }
 0xb8d   : > { %vm5278_vm8 = vc.u32 %v10841_v32, %v10820_v61  ;;  %v5757_v17 = vmul.f32 %v10856_v9, %v5741_v63  ;;  %vm5422_vm4 = vcmp.eq.s32.totalorder %v10775_v5, 2  ;;  %v7062_v1 = vpop.eup %7061  ;;  %v5423_v3 = vxor.u32 2147483648, %v7060_v50 }
 0xb8e   : > { %v5280_v46 = vsel %vm5278_vm8, %v5279_v12, %v10821_v16  ;;  %v5431_v14 = vshrl.u32 %v5430_v51, 23  ;;  %v5193_v53 = vor.u32 %v5192_v25, %v5191_v59  ;;  %v5196_v35 = vshll.u32 %v5195_v19, 23 }
 0xb8f   : > { %v5281_v43 = vadd.s32 %v5280_v46, %v5276_v28  ;;  %v5763_v40 = vadd.f32 %v5757_v17, %v10525_v47  ;;  %v5420_v6 = vxor.u32 2147483648, %v7062_v1  ;;  %v5205_v33 = vsel %vm5120_vm12, %v5204_v8, %v10766_v18  ;;  %v10903_v46 = vpop.permute.xlu0 %5744 }
 0xb90   : > { %v6359_v27 = vadd.s32 4294967169, %v5431_v14  ;;  %v5424_v23 = vsel %vm5422_vm4, %v5423_v3, %v7062_v1  ;;  %v5197_v10 = vor.u32 4788187, %v5196_v35  ;;  %v5434_v16 = vand.u32 8388607, %v5427_v20 }
 0xb91   : > { %v5282_v54 = vadd.s32 536870912, %v5281_v43  ;;  %v5421_v30 = vsel %vm5419_vm13, %v7060_v50, %v5420_v6  ;;  %v5200_v38 = vcvt.s32.f32 %v5193_v53  ;;  %v10873_v13 = vmul.f32 %v7938_v39, %v5763_v40 }
 0xb92   : > { %v5437_v12 = vadd.s32 1, %v6359_v27  ;;  %v5425_v47 = vsel %vm5418_vm3, %v5421_v30, %v5424_v23  ;;  %v5198_v11 = vand.u32 2147483647, %v5197_v10  ;;  %v10881_v49 = vmul.f32 %v10527_v41, %v10781_v2 }
 0xb93   : > { %v10877_v18 = vshrl.u32 %v5282_v54, 30  ;;  %v5426_v8 = vsel %vm5416_vm14, nan, %v5425_v47  ;;  %vm10887_vm7 = vcmp.le.f32.partialorder %v5118_v24, 0.7853982  ;;  %5794 = vrot.lane.b32.xlu1 %v10873_v13, %s7231_s10  ;;  %5775 = vst.msk [vmem:[#allocation2 + $0x58] sm:$0xff] %vm1037_vm5, %v10873_v13  ;;  %v5435_v28 = vor.u32 8388608, %v5434_v16 }
 0xb94   : > { %vm5438_vm6 = vcmp.gt.s32.totalorder %v5437_v12, 0  ;;  %v5201_v5 = vmul.f32 %v5200_v38, %v5198_v11  ;;  %v5207_v41 = vsel %vm10887_vm7, 0, %v5205_v33  ;;  %v5738_v51 = vsub.f32 1.0, %v5426_v8 }
 0xb95   : > { %v5284_v52 = vshll.u32 %v10877_v18, 30  ;;  %v5439_v59 = vsel %vm5438_vm6, %v5437_v12, 0  ;;  %v5533_v19 = vand.u32 2139095040, %v10881_v49  ;;  %v10901_v50 = vand.u32 3, %v5207_v41 }
 0xb96   : > { %v5202_v24 = vxor.u32 2147483648, %v5201_v5  ;;  %v5441_v17 = vand.u32 31, %v5439_v59  ;;  %v5277_v1 = vadd.s32 %v10820_v61, %v10841_v32  ;;  %v10910_v53 = vshll.u32 %v5435_v28, 8 }
 0xb97   : > { %v10898_v25 = vsub.s32 %v5281_v43, %v5284_v52  ;;  %v5754_v35 = vmul.f32 %v10903_v46, %v5738_v51  ;;  %v5307_v40 = vsub.s32 4, %v10877_v18  ;;  %v10918_v27 = vshrl.u32 %v5439_v59, 5 }
 0xb98   : > { %v5203_v14 = vsel %vm5120_vm12, %v5202_v24, %v5201_v5  ;;  %v5442_v6 = vsub.s32 32, %v5441_v17  ;;  %v5534_v23 = vshrl.u32 %v5533_v19, 23  ;;  %v5444_v61 = vshll.u32 %v7224_v56, %v5441_v17 }
 0xb99   : > { %v5287_v3 = vsub.s32 0, %v10898_v25  ;;  %v5206_v43 = vsel %vm10887_vm7, %v10549_v55, %v5203_v14  ;;  %v5447_v10 = vshll.u32 %v11359_v22, %v5441_v17  ;;  %v5450_v30 = vshll.u32 %v11319_v31, %v5441_v17 }
 0xb9a   : > { %7063 = vcosq.f32 %v5206_v43  ;;  %v5445_v32 = vshrl.u32 %v11359_v22, %v5442_v6  ;;  %v5448_v16 = vshrl.u32 %v11319_v31, %v5442_v6  ;;  %v5451_v38 = vshrl.u32 %v11340_v4, %v5442_v6 }
 0xb9b   : > { %v6352_v33 = vmin.u32 %v5287_v3, %v10898_v25  ;;  %7065 = vsinq.f32 %v5206_v43  ;;  %v5453_v47 = vshll.u32 %v11340_v4, %v5441_v17  ;;  %v5454_v11 = vshrl.u32 %v11341_v34, %v5442_v6 }
 0xb9c   : > { %v5446_v12 = vor.u32 %v5445_v32, %v5444_v61  ;;  %v5456_v8 = vshll.u32 %v11341_v34, %v5441_v17  ;;  %vm5216_vm1 = vcmp.eq.s32.totalorder %v10901_v50, 2  ;;  %v5449_v5 = vor.u32 %v5448_v16, %v5447_v10 }
 0xb9d   : > { %v5289_v54 = vclz %v6352_v33  ;;  %v5452_v41 = vor.u32 %v5451_v38, %v5450_v30  ;;  %v5457_v52 = vshrl.u32 %v11342_v26, %v5442_v6  ;;  %vm5213_vm15 = vcmp.eq.s32.totalorder %v10901_v50, 0 }
 0xb9e   : > { %v5443_v28 = vshrl.u32 %v7224_v56, %v5442_v6  ;;  %v5455_v51 = vor.u32 %v5454_v11, %v5453_v47  ;;  %vm5459_vm0 = vcmp.lt.s32.totalorder %v10918_v27, 1  ;;  %vm5460_vm12 = vcmp.lt.s32.totalorder %v10918_v27, 2 }
 0xb9f   : > { %v6353_v63 = vadd.s32 4294967294, %v5289_v54  ;;  %v5458_v59 = vor.u32 %v5457_v52, %v5456_v8  ;;  %vm5461_vm2 = vcmp.lt.s32.totalorder %v10918_v27, 3  ;;  %vm5462_vm3 = vcmp.lt.s32.totalorder %v10918_v27, 4 }
 0xba0   : > { %vm5210_vm14 = vweird.f32 %v10549_v55  ;;  %v5464_v19 = vsel %vm5462_vm3, %v5452_v41, 2102212464  ;;  %v5467_v17 = vsel %vm5459_vm0, %v5446_v12, %v5449_v5  ;;  %v5468_v14 = vsel %vm5462_vm3, %v5455_v51, 920167782 }
 0xba1   : > { %vm6354_vm13 = vcmp.lt.s32.totalorder %v6353_v63, 0  ;;  %vm5223_vm8 = vcmp.lt.s32.totalorder %v10560_v15, 0  ;;  %v5463_v33 = vsel %vm5459_vm0, %v5443_v28, %v5446_v12  ;;  %v5465_v61 = vsel %vm5461_vm2, %v5449_v5, %v5464_v19 }
 0xba2   : > { %v5292_v24 = vsel %vm6354_vm13, 0, %v6353_v63  ;;  %v5469_v32 = vsel %vm5461_vm2, %v5452_v41, %v5468_v14  ;;  %v5471_v10 = vsel %vm5459_vm0, %v5449_v5, %v5452_v41  ;;  %v5472_v54 = vsel %vm5462_vm3, %v5458_v59, 1326507024 }
 0xba3   : > { %v5293_v3 = vsub.s32 32, %v5292_v24  ;;  %v5294_v43 = vshll.u32 %v10898_v25, %v5292_v24  ;;  %v5297_v6 = vsub.s32 4294967266, %v5292_v24  ;;  %v5470_v25 = vsel %vm5460_vm12, %v5467_v17, %v5469_v32 }
 0xba4   : > { %v7064_v16 = vpop.eup %7063  ;;  %v5473_v47 = vsel %vm5461_vm2, %v5455_v51, %v5472_v54  ;;  %v10957_v63 = vmul.u32.u64.low %v10910_v53, %v5470_v25  ;;  %v10958_v52 = vmul.u32.u64.high %v10910_v53, %v5470_v25, %v10957_v63  ;;  %v5760_v5 = vadd.f32 %v5754_v35, %v10529_v44 }
 0xba5   : > { %v5295_v30 = vshrl.u32 %v5277_v1, %v5293_v3  ;;  %v5298_v38 = vadd.s32 127, %v5297_v6  ;;  %v7066_v12 = vpop.eup %7065  ;;  %v5217_v11 = vxor.u32 2147483648, %v7064_v16  ;;  %v5474_v8 = vsel %vm5460_vm12, %v5471_v10, %v5473_v47 }
 0xba6   : > { %v5214_v1 = vxor.u32 2147483648, %v7066_v12  ;;  %v10965_v51 = vmul.u32.u64.low %v10910_v53, %v5474_v8  ;;  %v10966_v24 = vmul.u32.u64.high %v10910_v53, %v5474_v8, %v10965_v51  ;;  %v6363_v19 = vadd.s32 4294967169, %v5534_v23 }
 0xba7   : > { %v5296_v41 = vor.u32 %v5295_v30, %v5294_v43  ;;  %v5299_v28 = vshll.u32 %v5298_v38, 23  ;;  %v5218_v59 = vsel %vm5216_vm1, %v5217_v11, %v7066_v12  ;;  %vm5212_vm4 = vcmp.lt.s32.totalorder %v10901_v50, 2 }
 0xba8   : > { %v5215_v17 = vsel %vm5213_vm15, %v7064_v16, %v5214_v1  ;;  %v5466_v44 = vsel %vm5460_vm12, %v5463_v33, %v5465_v61  ;;  %v5485_v3 = vadd.s32 1, %v10958_v52  ;;  %v5530_v43 = vand.u32 2147483647, %v10881_v49 }
 0xba9   : > { %v5300_v14 = vor.u32 4788187, %v5299_v28  ;;  %v5219_v35 = vsel %vm5212_vm4, %v5215_v17, %v5218_v59  ;;  %v5540_v6 = vadd.s32 1, %v6363_v19  ;;  %v5303_v23 = vcvt.s32.f32 %v5296_v41 }
 0xbaa   : > { %v5220_v32 = vsel %vm5210_vm14, nan, %v5219_v35  ;;  %v10978_v54 = vmul.f32 %v7938_v39, %v5760_v5  ;;  %v5308_v50 = vsel %vm5223_vm8, %v5307_v40, %v10877_v18  ;;  %v5482_v27 = vmul.u32 %v10910_v53, %v5466_v44 }
 0xbab   : > { %v5301_v10 = vand.u32 2147483647, %v5300_v14  ;;  %vm5484_vm7 = vc.u32 %v10966_v24, %v10957_v63  ;;  %vm5541_vm6 = vcmp.gt.s32.totalorder %v5540_v6, 0  ;;  %v5736_v33 = vsub.f32 1.0, %v5220_v32 }
 0xbac   : > { %v5486_v61 = vsel %vm5484_vm7, %v5485_v3, %v10958_v52  ;;  %v5542_v16 = vsel %vm5541_vm6, %v5540_v6, 0  ;;  %5772 = vst.msk [vmem:[#allocation2 + $0x40] sm:$0xff] %vm1037_vm5, %v10978_v54  ;;  %v11366_v38 = vand.u32 2147483647, %v10560_v15  ;;  %v5537_v47 = vand.u32 8388607, %v5530_v43 }
 0xbad   : > { %v5304_v55 = vmul.f32 %v5303_v23, %v5301_v10  ;;  %v5487_v39 = vadd.s32 %v5486_v61, %v5482_v27  ;;  %v5544_v30 = vand.u32 31, %v5542_v16  ;;  %v5752_v11 = vmul.f32 %v10903_v46, %v5736_v33 }
 0xbae   : > { %vm10993_vm1 = vcmp.le.f32.partialorder %v11366_v38, 0.7853982  ;;  %v5543_v44 = vshrl.u32 %v5542_v16, 5  ;;  %v5538_v3 = vor.u32 8388608, %v5537_v47  ;;  %vm5313_vm2 = vweird.f32 %v10560_v15 }
 0xbaf   : > { %v5305_v53 = vxor.u32 2147483648, %v5304_v55  ;;  %v5310_v40 = vsel %vm10993_vm1, 0, %v5308_v50  ;;  %v5488_v25 = vadd.s32 536870912, %v5487_v39  ;;  %v5545_v12 = vsub.s32 32, %v5544_v30 }
 0xbb0   : > { %v5547_v52 = vshll.u32 %v7224_v56, %v5544_v30  ;;  %v5550_v5 = vshll.u32 %v11359_v22, %v5544_v30  ;;  %v5556_v59 = vshll.u32 %v11340_v4, %v5544_v30  ;;  %v5553_v35 = vshll.u32 %v11319_v31, %v5544_v30 }
 0xbb1   : > { %v5306_v8 = vsel %vm5223_vm8, %v5305_v53, %v5304_v55  ;;  %v11009_v41 = vshrl.u32 %v5488_v25, 30  ;;  %v5548_v28 = vshrl.u32 %v11359_v22, %v5545_v12  ;;  %v5551_v51 = vshrl.u32 %v11319_v31, %v5545_v12 }
 0xbb2   : > { %v5309_v1 = vsel %vm10993_vm1, %v10560_v15, %v5306_v8  ;;  %v5554_v19 = vshrl.u32 %v11340_v4, %v5545_v12  ;;  %v5557_v17 = vshrl.u32 %v11341_v34, %v5545_v12  ;;  %v5559_v50 = vshll.u32 %v11341_v34, %v5544_v30 }
 0xbb3   : > { %7067 = vcosq.f32 %v5309_v1  ;;  %v5490_v14 = vshll.u32 %v11009_v41, 30  ;;  %v5549_v6 = vor.u32 %v5548_v28, %v5547_v52  ;;  %v5552_v32 = vor.u32 %v5551_v51, %v5550_v5 }
 0xbb4   : > { %7069 = vsinq.f32 %v5309_v1  ;;  %v5558_v10 = vor.u32 %v5557_v17, %v5556_v59  ;;  %v5555_v23 = vor.u32 %v5554_v19, %v5553_v35  ;;  %v5560_v27 = vshrl.u32 %v11342_v26, %v5545_v12 }
 0xbb5   : > { %v11018_v22 = vsub.s32 %v5487_v39, %v5490_v14  ;;  %v5758_v4 = vadd.f32 %v5752_v11, %v10535_v62  ;;  %v5314_v33 = vand.u32 3, %v5310_v40  ;;  %vm5562_vm15 = vcmp.lt.s32.totalorder %v5543_v44, 1 }
 0xbb6   : > { %v5561_v61 = vor.u32 %v5560_v27, %v5559_v50  ;;  %vm5565_vm0 = vcmp.lt.s32.totalorder %v5543_v44, 4  ;;  %v5546_v31 = vshrl.u32 %v7224_v56, %v5545_v12  ;;  %v5570_v16 = vsel %vm5562_vm15, %v5549_v6, %v5552_v32 }
 0xbb7   : > { %v5493_v55 = vsub.s32 0, %v11018_v22  ;;  %v5571_v38 = vsel %vm5565_vm0, %v5558_v10, 920167782  ;;  %v5578_v18 = vshll.u32 %v5538_v3, 8  ;;  %vm5564_vm12 = vcmp.lt.s32.totalorder %v5543_v44, 3 }
 0xbb8   : > { %v5567_v53 = vsel %vm5565_vm0, %v5555_v23, 2102212464  ;;  %v5574_v34 = vsel %vm5562_vm15, %v5552_v32, %v5555_v23  ;;  %vm5563_vm13 = vcmp.lt.s32.totalorder %v5543_v44, 2  ;;  %v5572_v26 = vsel %vm5564_vm12, %v5555_v23, %v5571_v38 }
 0xbb9   : > { %v6360_v39 = vmin.u32 %v5493_v55, %v11018_v22  ;;  %v5575_v30 = vsel %vm5565_vm0, %v5561_v61, 1326507024  ;;  %v11027_v62 = vmul.f32 %v7914_v7, %v5758_v4  ;;  %v5566_v25 = vsel %vm5562_vm15, %v5546_v31, %v5549_v6 }
 0xbba   : > { %v5573_v47 = vsel %vm5563_vm13, %v5570_v16, %v5572_v26  ;;  %v5576_v11 = vsel %vm5564_vm12, %v5558_v10, %v5575_v30  ;;  %v5568_v12 = vsel %vm5564_vm12, %v5552_v32, %v5567_v53  ;;  %vm5319_vm3 = vcmp.eq.s32.totalorder %v5314_v33, 2 }
 0xbbb   : > { %v5495_v40 = vclz %v6360_v39  ;;  %v5577_v8 = vsel %vm5563_vm13, %v5574_v34, %v5576_v11  ;;  %v11031_v52 = vmul.u32.u64.low %v5578_v18, %v5573_v47  ;;  %v11032_v5 = vmul.u32.u64.high %v5578_v18, %v5573_v47, %v11031_v52  ;;  %5784 = vrot.lane.b32.xlu0 %v11027_v62, %s7231_s10 }
 0xbbc   : > { %v11037_v51 = vmul.u32.u64.low %v5578_v18, %v5577_v8  ;;  %v11038_v19 = vmul.u32.u64.high %v5578_v18, %v5577_v8, %v11037_v51  ;;  %vm5316_vm14 = vcmp.eq.s32.totalorder %v5314_v33, 0  ;;  %v5569_v35 = vsel %vm5563_vm13, %v5566_v25, %v5568_v12 }
 0xbbd   : > { %v7068_v56 = vpop.eup %7067  ;;  %v6361_v59 = vadd.s32 4294967294, %v5495_v40  ;;  %vm5315_vm4 = vcmp.lt.s32.totalorder %v5314_v33, 2  ;;  %v5588_v32 = vadd.s32 1, %v11032_v5  ;;  %v5483_v23 = vadd.s32 %v10957_v63, %v10966_v24 }
 0xbbe   : > { %v7070_v1 = vpop.eup %7069  ;;  %v5320_v28 = vxor.u32 2147483648, %v7068_v56  ;;  %v5585_v55 = vmul.u32 %v5578_v18, %v5569_v35  ;;  %vm5587_vm7 = vc.u32 %v11038_v19, %v11031_v52  ;;  %vm5429_vm6 = vcmp.lt.s32.totalorder %v10834_v57, 0 }
 0xbbf   : > { %v5317_v17 = vxor.u32 2147483648, %v7070_v1  ;;  %vm6362_vm8 = vcmp.lt.s32.totalorder %v6361_v59, 0  ;;  %5788 = vrot.lane.b32.xlu0 %v10978_v54, %s7231_s10  ;;  %v5589_v16 = vsel %vm5587_vm7, %v5588_v32, %v11032_v5  ;;  %vm11063_vm1 = vcmp.le.f32.partialorder %v5427_v20, 0.7853982 }
 0xbc0   : > { %v5321_v14 = vsel %vm5319_vm3, %v5320_v28, %v7070_v1  ;;  %v5498_v6 = vsel %vm6362_vm8, 0, %v6361_v59  ;;  %v5590_v38 = vadd.s32 %v5589_v16, %v5585_v55  ;;  %v5513_v12 = vsub.s32 4, %v11009_v41 }
 0xbc1   : > { %v5318_v3 = vsel %vm5316_vm14, %v7068_v56, %v5317_v17  ;;  %v5499_v50 = vsub.s32 32, %v5498_v6  ;;  %v5503_v27 = vsub.s32 4294967266, %v5498_v6  ;;  %v5500_v44 = vshll.u32 %v11018_v22, %v5498_v6 }
 0xbc2   : > { %v5322_v10 = vsel %vm5315_vm4, %v5318_v3, %v5321_v14  ;;  %v5591_v53 = vadd.s32 536870912, %v5590_v38  ;;  %v5514_v28 = vsel %vm5429_vm6, %v5513_v12, %v11009_v41  ;;  %v5586_v17 = vadd.s32 %v11031_v52, %v11038_v19 }
 0xbc3   : > { %v5323_v4 = vsel %vm5313_vm2, nan, %v5322_v10  ;;  %v5501_v61 = vshrl.u32 %v5483_v23, %v5499_v50  ;;  %v5504_v31 = vadd.s32 127, %v5503_v27  ;;  %v5516_v20 = vsel %vm11063_vm1, 0, %v5514_v28 }
 0xbc4   : > { %v5737_v33 = vsub.f32 1.0, %v5323_v4  ;;  %v5592_v26 = vshrl.u32 %v5591_v53, 30  ;;  %v5520_v3 = vand.u32 3, %v5516_v20  ;;  %vm5519_vm2 = vweird.f32 %v10834_v57 }
 0xbc5   : > { %v5502_v63 = vor.u32 %v5501_v61, %v5500_v44  ;;  %v5505_v24 = vshll.u32 %v5504_v31, 23  ;;  %vm5532_vm3 = vcmp.lt.s32.totalorder %v10881_v49, 0  ;;  %vm5531_vm14 = vcmp.le.f32.partialorder %v5530_v43, 0.7853982 }
 0xbc6   : > { %v5753_v39 = vmul.f32 %v10903_v46, %v5737_v33  ;;  %v5593_v40 = vshll.u32 %v5592_v26, 30  ;;  %vm5525_vm0 = vcmp.eq.s32.totalorder %v5520_v3, 2  ;;  %vm5522_vm12 = vcmp.eq.s32.totalorder %v5520_v3, 0 }
 0xbc7   : > { %v5506_v34 = vor.u32 4788187, %v5505_v24  ;;  %v5509_v18 = vcvt.s32.f32 %v5502_v63  ;;  %vm5521_vm13 = vcmp.lt.s32.totalorder %v5520_v3, 2 }
 0xbc8   : > { %v5759_v15 = vadd.f32 %v5753_v39, %v10556_v58  ;;  %v5594_v47 = vsub.s32 %v5590_v38, %v5593_v40 }
 0xbc9   : > { %v5507_v22 = vand.u32 2147483647, %v5506_v34  ;;  %v5616_v34 = vsub.s32 4, %v5592_v26 }
 0xbca   : > { %v11056_v30 = vmul.f32 %v7905_v21, %v5759_v15  ;;  %v5596_v46 = vsub.s32 0, %v5594_v47 }
 0xbcb   : > { %v5510_v25 = vmul.f32 %v5509_v18, %v5507_v22  ;;  %v5617_v18 = vsel %vm5532_vm3, %v5616_v34, %v5592_v26 }
 0xbcc   : > { %5786 = vrot.lane.b32.xlu1 %v11056_v30, %s7231_s10  ;;  %v6364_v5 = vmin.u32 %v5596_v46, %v5594_v47  ;;  %v5619_v40 = vsel %vm5531_vm14, 0, %v5617_v18 }
 0xbcd   : > { %v5511_v11 = vxor.u32 2147483648, %v5510_v25 }
 0xbce   : > { %v5598_v1 = vclz %v6364_v5 }
 0xbcf   : > { %v5512_v56 = vsel %vm5429_vm6, %v5511_v11, %v5510_v25  ;;  %vm5622_vm6 = vweird.f32 %v10881_v49 }
 0xbd0   : > { %v5515_v8 = vsel %vm11063_vm1, %v10834_v57, %v5512_v56  ;;  %v6365_v59 = vadd.s32 4294967294, %v5598_v1  ;;  %vm11371_vm1 = vcmask 7168  }
 0xbd1   : > { %7071 = vcosq.f32 %v5515_v8 }
 0xbd2   : > { %7073 = vsinq.f32 %v5515_v8  ;;  %vm6366_vm15 = vcmp.lt.s32.totalorder %v6365_v59, 0 }
 0xbd3   : > { %v5601_v51 = vsel %vm6366_vm15, 0, %v6365_v59  ;;  %vm11372_vm15 = vmmov %vm11371_vm1 }
 0xbd4   : > { %v5602_v14 = vsub.s32 32, %v5601_v51  ;;  %v5606_v35 = vsub.s32 4294967266, %v5601_v51  ;;  %v5603_v6 = vshll.u32 %v5594_v47, %v5601_v51 }
 0xbd6   : > { %v5604_v32 = vshrl.u32 %v5586_v17, %v5602_v14  ;;  %v5607_v10 = vadd.s32 127, %v5606_v35 }
 0xbd8   : > { %v5605_v4 = vor.u32 %v5604_v32, %v5603_v6  ;;  %v5608_v41 = vshll.u32 %v5607_v10, 23 }
 0xbda   : > { %v5609_v33 = vor.u32 4788187, %v5608_v41  ;;  %v5612_v31 = vcvt.s32.f32 %v5605_v4 }
 0xbdb   : > { %v7072_v23 = vpop.eup %7071 }
 0xbdc   : > { %v7074_v50 = vpop.eup %7073  ;;  %v5526_v27 = vxor.u32 2147483648, %v7072_v23  ;;  %v5610_v19 = vand.u32 2147483647, %v5609_v33  ;;  %v5853_v33 = vld [vmem:[#allocation2 + $0x58] sm:$0xff] }
 0xbdd   : > { %v5523_v44 = vxor.u32 2147483648, %v7074_v50 }
 0xbde   : > { %v5527_v55 = vsel %vm5525_vm0, %v5526_v27, %v7074_v50  ;;  %v5613_v39 = vmul.f32 %v5612_v31, %v5610_v19  ;;  %vm11373_vm0 = vmmov %vm11371_vm1  ;;  %v5850_v31 = vld [vmem:[#allocation2 + $0x40] sm:$0xff] }
 0xbdf   : > { %v5524_v61 = vsel %vm5522_vm12, %v7072_v23, %v5523_v44  ;;  %vm11374_vm12 = vmmov %vm11373_vm0 }
 0xbe0   : > { %v5528_v52 = vsel %vm5521_vm13, %v5524_v61, %v5527_v55  ;;  %v5614_v24 = vxor.u32 2147483648, %v5613_v39  ;;  %vm11375_vm13 = vcmask 1039360  }
 0xbe1   : > { %v5529_v16 = vsel %vm5519_vm2, nan, %v5528_v52  ;;  %vm11377_vm2 = vcmask 195768  }
 0xbe2   : > { %v5739_v38 = vsub.f32 1.0, %v5529_v16  ;;  %v5615_v15 = vsel %vm5532_vm3, %v5614_v24, %v5613_v39  ;;  %vm11379_vm3 = vmmov %vm11377_vm2 }
 0xbe3   : > { %v5618_v57 = vsel %vm5531_vm14, %v10881_v49, %v5615_v15 }
 0xbe4   : > { %v5755_v63 = vmul.f32 %v10856_v9, %v5739_v38  ;;  %7075 = vcosq.f32 %v5618_v57 }
 0xbe5   : > { %7077 = vsinq.f32 %v5618_v57  ;;  %v6318_v57 = vld [vmem:[%s11218_s4 + $0x28] sm:$0xff] }
 0xbe6   : > { %v5761_v53 = vadd.f32 %v5755_v63, %v10669_v60  ;;  %v5623_v60 = vand.u32 3, %v5619_v40  ;;  %v6654_v63 = vpack.c.bf16 %v5853_v33, %v5850_v31 }
 0xbe8   : > { %v11084_v22 = vmul.f32 %v7914_v7, %v5761_v53  ;;  %vm5628_vm8 = vcmp.eq.s32.totalorder %v5623_v60, 2  ;;  %vm5625_vm4 = vcmp.eq.s32.totalorder %v5623_v60, 0  ;;  %vm5624_vm7 = vcmp.lt.s32.totalorder %v5623_v60, 2 }
 0xbea   : > { %5790 = vrot.lane.b32.xlu0 %v11084_v22, %s7231_s10  ;;  %v6644_v44 = vpack.c.bf16 %v11084_v22, %v11027_v62 }
 0xbee   : > { %5814 = vrot.lane.b32.xlu0 %v11056_v30, %s7232_s14  ;;  %v7076_v25 = vpop.eup %7075 }
 0xbef   : > { %v7078_v43 = vpop.eup %7077  ;;  %v5629_v47 = vxor.u32 2147483648, %v7076_v25 }
 0xbf0   : > { %v5626_v11 = vxor.u32 2147483648, %v7078_v43 }
 0xbf1   : > { %v5630_v46 = vsel %vm5628_vm8, %v5629_v47, %v7078_v43 }
 0xbf2   : > { %v5627_v7 = vsel %vm5625_vm4, %v7076_v25, %v5626_v11 }
 0xbf3   : > { %v5631_v26 = vsel %vm5624_vm7, %v5627_v7, %v5630_v46 }
 0xbf4   : > { %v5632_v58 = vsel %vm5622_vm6, nan, %v5631_v26 }
 0xbf5   : > { %v5740_v56 = vsub.f32 1.0, %v5632_v58 }
 0xbf7   : > { %v5756_v12 = vmul.f32 %v10856_v9, %v5740_v56  ;;  %v6313_v9 = vld [vmem:[%s11219_s5 + $0x20] sm:$0xff] }
 0xbf9   : > { %v5762_v8 = vadd.f32 %v5756_v12, %v10781_v2  ;;  %v6314_v2 = vld [vmem:[%s11219_s5 + $0x28] sm:$0xff] }
 0xbfb   : > { %v5768_v5 = vmul.f32 %v7905_v21, %v5762_v8  ;;  %v6317_v21 = vld [vmem:[%s11218_s4 + $0x20] sm:$0xff] }
 0xbfc   : > { %6515 = vmatprep.mubr.msk.f32.mxu1 %vm1141_vm9, %v6317_v21 }
 0xbfd   : > { %5792 = vrot.lane.b32.xlu1 %v5768_v5, %s7231_s10  ;;  %5820 = vrot.lane.b32.xlu0 %v5768_v5, %s7232_s14  ;;  %v6642_v1 = vpack.c.bf16 %v5768_v5, %v11056_v30  ;;  %s6066_s10 = scalar_lea.sflag [#allocation5], %s7408_s9 }
 0xc01   : > { %5816 = vrot.lane.b32.xlu1 %v10978_v54, %s7232_s14  ;;  %5812 = vrot.lane.b32.xlu0 %v11027_v62, %s7232_s14 }
 0xc05   : > { %5822 = vrot.lane.b32.xlu1 %v10873_v13, %s7232_s14  ;;  %5862 = vperm.xlu0 %6909, %v6313_v9   ;;  %v5795_v54 = vpop.permute.xlu1 %5794 }
 0xc09   : > { %5818 = vrot.lane.b32.xlu1 %v11084_v22, %s7232_s14  ;;  %s7124_s14 = sshll.u32 %s7238_s16, 4  ;;  %s7125_s14 = int_to_ptr.vmem [resolvable:$false] %s7124_s14 }
 0xc0a   : > { %s7126_s21 = scalar_lea.vmem %s7125_s14, 1024  ;;  %p7127_p11 = scmp.lt.s32.totalorder %s11153_s11, %s7125_s14 }
 0xc0b   : > { %p7128_p13 = scmp.lt.s32.totalorder %s7126_s21, %s7120_s15 }
 0xc0d   : > { %5867 = vperm.xlu1 %6910, %v6314_v2   ;;  %p7129_p1 = por %p7128_p13, %p7127_p11 }
 0xc0f   : > { %p7130_p3 = pnand %p7129_p1, %p7123_p0 }
 0xc2d   : > { %v5785_v49 = vpop.permute.xlu0 %5784 }
 0xc2e   : > { %5806 = vst.msk [vmem:[#allocation2] sm:$0xff] %vm1073_vm10, %v5785_v49 }
 0xc31   : > { %v5789_v30 = vpop.permute.xlu0 %5788 }
 0xc35   : > { %v5842_v3 = vld [vmem:[#allocation2] sm:$0xff] }
 0xc3e   : > { %v5787_v13 = vpop.permute.xlu1 %5786 }
 0xc3f   : > { %v5796_v28 = vsel %vm11371_vm1, %v5785_v49, %v5787_v13  ;;  %v5797_v59 = vsel %vm11372_vm15, %v5787_v13, %v5789_v30 }
 0xc40   : > { %5808 = vst.msk [vmem:[#allocation2 + $0x10] sm:$0xff] %vm1037_vm5, %v5797_v59 }
 0xc47   : > { %v5844_v52 = vld [vmem:[#allocation2 + $0x10] sm:$0xff] }
 0xc5c   : > { %v5791_v20 = vpop.permute.xlu0 %5790 }
 0xc5d   : > { %5809 = vst.msk [vmem:[#allocation2 + $0x18] sm:$0xff] %vm1073_vm10, %v5791_v20  ;;  %vm11376_vm10 = vmmov %vm11375_vm13 }
 0xc60   : > { %v5815_v51 = vpop.permute.xlu0 %5814 }
 0xc64   : > { %v5845_v17 = vld [vmem:[#allocation2 + $0x18] sm:$0xff] }
 0xc65   : > { %v6640_v10 = vpack.c.bf16 %v5845_v17, %v5842_v3 }
 0xc6f   : > { %v5793_v14 = vpop.permute.xlu1 %5792  ;;  %v5821_v35 = vpop.permute.xlu0 %5820 }
 0xc70   : > { %v5799_v6 = vsel %vm11373_vm0, %v5793_v14, %v5795_v54  ;;  %v5798_v32 = vsel %vm11374_vm12, %v5791_v20, %v5793_v14 }
 0xc71   : > { %5811 = vst.msk [vmem:[#allocation2 + $0x28] sm:$0xff] %vm1037_vm5, %v5799_v6  ;;  %v6638_v23 = vpack.c.bf16 %v5798_v32, %v5796_v28  ;;  %vm11378_vm5 = vmmov %vm11376_vm10 }
 0xc72   : > { %vm11380_vm14 = vmmov %vm11378_vm5 }
 0xc73   : > { %v5817_v50 = vpop.permute.xlu1 %5816  ;;  %6639 = vmatprep.subr.bf16.mxu0 %v6638_v23  ;;  %v5813_v27 = vpop.permute.xlu0 %5812 }
 0xc74   : > { %5836 = vst.msk [vmem:[#allocation2 + $0x70] sm:$0xff] %vm1105_vm11, %v5817_v50  ;;  %v5825_v4 = vsel %vm11375_vm13, %v5815_v51, %v5817_v50  ;;  %v5824_v41 = vsel %vm11376_vm10, %v5813_v27, %v5815_v51  ;;  %6641 = vmatpush1.bf16.msra.mxu0 %v6640_v10 }
 0xc75   : > { %5840 = vst.msk [vmem:[#allocation2 + $0x70] sm:$0xff] %vm11377_vm2, %v11308_v42  ;;  %6643 = vmatprep.subr.bf16.mxu0 %v6642_v1 }
 0xc77   : > { %v5823_v55 = vpop.permute.xlu1 %5822 }
 0xc78   : > { %5839 = vst.msk [vmem:[#allocation2 + $0x88] sm:$0xff] %vm1105_vm11, %v5823_v55  ;;  %v5827_v61 = vsel %vm11378_vm5, %v5821_v35, %v5823_v55  ;;  %v5847_v19 = vld [vmem:[#allocation2 + $0x28] sm:$0xff]  ;;  %6645 = vmatpush1.bf16.msra.mxu0 %v6644_v44 }
 0xc79   : > { %5841 = vst.msk [vmem:[#allocation2 + $0x88] sm:$0xff] %vm11379_vm3, %v11308_v42  ;;  %v6650_v16 = vpack.c.bf16 %v5847_v19, %v5844_v52  ;;  %v6646_v38 = vpack.c.bf16 %v5827_v61, %v5825_v4 }
 0xc7b   : > { %v5819_v39 = vpop.permute.xlu1 %5818  ;;  %6651 = vmatprep.subr.bf16.mxu1 %v6650_v16  ;;  %6647 = vmatprep.subr.bf16.mxu0 %v6646_v38 }
 0xc7c   : > { %v5826_v62 = vsel %vm11380_vm14, %v5819_v39, %v5821_v35  ;;  %6653 = vmatpush3.bf16.msra.mxu1 %v6650_v16  ;;  %v5856_v53 = vld [vmem:[#allocation2 + $0x70] sm:$0xff] }
 0xc7d   : > { %6655 = vmatprep.subr.bf16.mxu1 %v6654_v63  ;;  %v6648_v24 = vpack.c.bf16 %v5826_v62, %v5824_v41 }
 0xc7f   : > { %6649 = vmatpush1.bf16.msra.mxu0 %v6648_v24 }
 0xc80   : > { %6657 = vmatpush3.bf16.msra.mxu1 %v6654_v63  ;;  %v5859_v15 = vld [vmem:[#allocation2 + $0x88] sm:$0xff] }
 0xc81   : > { %v6658_v34 = vpack.c.bf16 %v5859_v15, %v5856_v53 }
 0xc82   : > { %6371 = vmatmul.mubr.msk.f32.vlgmr.msra.gmra.mrb[20].mxu0 %vm1141_vm9, %v6317_v21 }
 0xc83   : > { %6659 = vmatprep.subr.bf16.mxu1 %v6658_v34  ;;  %5946 = vmatprep.mubr.f32.mxu0 %v11308_v42 }
 0xc84   : > { %6661 = vmatpush3.bf16.msra.mxu1 %v6658_v34  ;;  %v5863_v22 = vpop.permute.xlu0 %5862 }
 0xc86   : > { %6372 = vmatmul.mubr.msk.f32.gmra.mrb[22].mxu0 %vm1141_vm9, %v6318_v57 }
 0xc87   : > { %6516 = vmatmul.mubr.msk.f32.vlgmr.msra.gmra.mrb[10].mxu1 %vm1141_vm9, %v6318_v57  ;;  %vm6052_vm9 = vcmask 949248  }
 0xc8c   : > { %v5868_v47 = vpop.permute.xlu1 %5867 }
 0xd55   : > { %v5942_v18 = vpop.f32.mrb[20].mxu0 }
 0xd56   : > { %v5943_v40 = vadd.f32 %v5942_v18, %v5863_v22  ;;  %v5944_v60 = vpop.f32.mrb[21].mxu0 }
 0xd57   : > { %v5945_v25 = vadd.f32 %v5944_v60, %v5863_v22 }
 0xd58   : > { %v6028_v43 = vadd.f32 %v5943_v40, %v9925_v45 }
 0xd59   : > { %v6029_v11 = vadd.f32 %v5945_v25, %v9930_v48  ;;  %v5948_v46 = vpop.f32.mrb[22].mxu0 }
 0xd5a   : > { %v6517_v7 = vpop.f32.mrb[10].mxu1  ;;  %v5949_v26 = vadd.f32 %v5948_v46, %v5868_v47  ;;  %v5950_v58 = vpop.f32.mrb[23].mxu0  ;;  %6040 = vrot.lane.b32.xlu0 %v6028_v43, %s7237_s19 }
 0xd5b   : > { %v6019_v42 = vpop.f32.mrb[11].mxu1  ;;  %6042 = vrot.lane.b32.xlu1 %v6029_v11, %s7237_s19  ;;  %v6025_v8 = vadd.f32 %v6517_v7, %v5868_v47  ;;  %v5951_v5 = vadd.f32 %v5950_v58, %v5868_v47 }
 0xd5c   : > { %v6020_v56 = vadd.f32 %v6019_v42, %v5863_v22  ;;  %v6031_v12 = vadd.f32 %v5949_v26, %v9945_v37 }
 0xd5d   : > { %v6033_v48 = vadd.f32 %v6025_v8, %v10140_v29  ;;  %v6032_v1 = vadd.f32 %v5951_v5, %v9960_v0 }
 0xd5e   : > { %v6030_v45 = vadd.f32 %v6020_v56, %v10169_v36 }
 0xd5f   : > { %6046 = vrot.lane.b32.xlu1 %v6031_v12, %s7237_s19 }
 0xd60   : > { %6044 = vrot.lane.b32.xlu0 %v6030_v45, %s7237_s19 }
 0xd63   : > { %6050 = vrot.lane.b32.xlu1 %v6033_v48, %s7237_s19 }
 0xd64   : > { %6048 = vrot.lane.b32.xlu0 %v6032_v1, %s7237_s19 }
 0xdcc   : > { %v6041_v9 = vpop.permute.xlu0 %6040 }
 0xdcd   : > { %v6043_v21 = vpop.permute.xlu1 %6042 }
 0xdce   : > { %v6053_v37 = vsel %vm6052_vm9, %v6041_v9, %v6043_v21 }
 0xdcf   : > { %6061 = vst [vmem:[%s314_s24] sm:$0xff] %v6053_v37 }
 0xdd1   : > { %v6047_v36 = vpop.permute.xlu1 %6046 }
 0xdd2   : > { %v6045_v29 = vpop.permute.xlu0 %6044 }
 0xdd3   : > { %v6054_v0 = vsel %vm6052_vm9, %v6043_v21, %v6045_v29 }
 0xdd4   : > { %6062 = vst [vmem:[%s314_s24 + $0x8] sm:$0xff] %v6054_v0 }
 0xdd5   : > { %v6051_v2 = vpop.permute.xlu1 %6050 }
 0xdd6   : > { %v6049_v49 = vpop.permute.xlu0 %6048 }
 0xdd7   : > { %v6055_v54 = vsel %vm6052_vm9, %v6047_v36, %v6049_v49  ;;  %v6056_v13 = vsel %vm6052_vm9, %v6049_v49, %v6051_v2 }
 0xdd8   : > { %6063 = vst [vmem:[%s314_s24 + $0x10] sm:$0xff] %v6055_v54  ;;  %6064 = vst [vmem:[%s314_s24 + $0x18] sm:$0xff] %v6056_v13 }
 0xdd9   : > { %7133 = shalt.err (!%p7130_p3)
}
 0xdda   : > { %s7134_s19 = scalar_lea.hbm %s11158_s13, 512  ;;  %s7138_s23 = scalar_lea.hbm %s11221_s7, 3072 }
 0xddb   : > { %p7135_p5 = scmp.ne.s32.totalorder %s11158_s13, %s7134_s19  ;;  %p7139_p2 = scmp.lt.u32.totalorder %s11158_s13, %s11221_s7 }
 0xddc   : > { %p7140_p4 = scmp.lt.u32.totalorder %s7138_s23, %s7134_s19  ;;  %p7142_p8 = scmp.lt.u32.totalorder %s7134_s19, %s11158_s13 }
 0xddd   : > { %p7136_p6 = pnand %p7135_p5, %p11381_p9 }
 0xdde   : > { %p7141_p10 = por %p7140_p4, %p7139_p2 }
 0xddf   : > { %p7137_p7 = pneg %p7136_p6 }
 0xde0   : > { %p7143_p12 = por %p7142_p8, %p7141_p10 }
 0xde2   : > { %p7144_p0 = pnand %p7143_p12, %p7137_p7 }
 0xde4   : > { %7147 = shalt.err (!%p7144_p0)
}
 0xde5   : > { %s7239_s18 = smov 256   ;;  %s7240_s27 = smov 768  }
 0xde6   : > { %s7241_s28 = smov 16  }
 0xde7   : > { %6813 = dma.vmem_to_hbm [thread:$0]  (%p11381_p9), %s11153_s11, 512, %s11158_s13, %s6066_s10, %s7239_s18, %s7240_s27, %s7241_s28  }
 0xde8 PF: > { %s11382_s15 = sld [smem:[#allocation9_spill]]  ;;  %s11383_s16 = sld [smem:[#allocation13_spill]] }
 0xde9   : > { %p6824_p11 = scmp.ge.s32.totalorder %s7218_s8, 2 }
 0xdee   : > { %s6096_s14 = sand.u32 1, %s11382_s15   ;;  %p11384_p13 = scmp.ne.s32.totalorder %s11383_s16, 0 }
 0xdef   : > { %s6097_s21 = scalar_lea.sflag [#allocation5], %s6096_s14 }
 0xdf0   : > { %p6820_p1 = pnand %p6824_p11, %p11384_p13 }
 0xdf2   : > { %7185 = dma.done.wait (!%p6820_p1), %s6097_s21, 512  }
 0xdf3   : > { %7187 = vsyncadd (!%p6820_p1), %s6097_s21, 4294966784  ;;  %s23_s8 = sadd.s32 1, %s7218_s8   ;;  %s11385_s27 = sld [smem:[#allocation10_spill]] }
 0xdf4   : > { %p20_p3 = scmp.ge.s32.totalorder %s23_s8, 8   ;;  %s11386_s29 = sld [smem:[#allocation11_spill]] }
 0xdf5   : > { %s11387_s17 = sld [smem:[#allocation12_spill]]  ;;  %s11388_s24 = smov %s7194_s25 }
 0xdf6   : > { %s11389_s25 = smov %s7198_s26  ;;  %s11390_s26 = smov %s7360_s22 }
 0xdf7   : > { %s11391_s28 = smov %s7214_s30  ;;  %22 = sbr.rel (!%p20_p3) target bundleno = 7 (0x7), region = 105 }
 0xdfb   : > { %s11392_s30 = smov %s11387_s17 }
 0xdfe   :  { %6102 = vsyncpa [#allocation4], 1 }
 0xdff   :  { %6104 = vsyncpa [#allocation4 + $0x1], 1 }
 0xe00   :  { %6105 = vsyncpa [#allocation5], 1 }
 0xe01   :  { %6107 = vsyncpa [#allocation5 + $0x1], 1 }

</bundles_post_ra>
